<compile_context>
chip_gen: v6e
topology: v6e:2x2x1
jax: 0.10.0
libtpu: 0.0.40
codegen_flags: <defaults>
</compile_context>

<pallas_src>
import numpy as np
import jax
import jax.numpy as jnp
from jax import lax
from jax.experimental import pallas as pl
from jax.experimental.pallas import tpu as pltpu

_LANE = 128
_SUBLANE = 8


def _round_up(v, m):
    return (v + m - 1) // m * m


def _padded_vmem_bytes(shape, itemsize):
    """Bytes of a VMEM block after (8, 128) tiling of the last two dims."""
    lead = int(np.prod(shape[:-2], dtype=np.int64)) if len(shape) > 2 else 1
    return lead * _round_up(shape[-2], _SUBLANE) * _round_up(shape[-1], _LANE) * itemsize


def _make_kernel(dilations, H, W, Cinp, red, pad):
    """Build the ASPP kernel with static dilations / (padded) shapes baked in."""
    nb = len(dilations)
    nbred = nb * red
    off_taps = [(ky, kx) for ky in range(3) for kx in range(3) if (ky, kx) != (1, 1)]

    def kernel(x_ref, img_ref, wcen_ref, woff_ref, bias_ref, out_ref, zpad_ref):
        # Zero the halo border of the shifted-read scratch every step (the
        # interior is overwritten by every tap; no cross-step state, so this is
        # safe under "parallel" grid sharding).  All W offsets are 8-aligned.
        zpad_ref[0:pad, :, :] = jnp.zeros((pad, W + 2 * pad, nbred), jnp.float32)
        zpad_ref[pad + H:, :, :] = jnp.zeros((pad, W + 2 * pad, nbred), jnp.float32)
        zpad_ref[pad:pad + H, 0:pad, :] = jnp.zeros((H, pad, nbred), jnp.float32)
        zpad_ref[pad:pad + H, pad + W:, :] = jnp.zeros((H, pad, nbred), jnp.float32)

        # Centre tap + folded edge 1x1: one MXU dot over Cin+2 channels.
        # W % 8 == 0 (wrapper guarantees), so this reshape is a free view.
        x2d = x_ref[0].reshape(H * W, Cinp)
        zc = jnp.dot(x2d, wcen_ref[...], preferred_element_type=jnp.float32)
        zc = zc.reshape(H, W, nbred + red)

        # Per-branch live-value accumulators, seeded from the unshifted centre
        # tap.  They are stored exactly once, fused with bias + ReLU below.
        acc = [zc[:, :, k * red:(k + 1) * red] for k in range(nb)]
        edge_out = jnp.maximum(zc[:, :, nbred:nbred + red], 0.0)

        # 8 off-centre taps: per-tap dot (live z is only nb*red wide), one
        # aligned write into the zero-haloed scratch, then shifted full-window
        # reads accumulate into the live per-branch values (loads only, no RMW).
        for ti, (ky, kx) in enumerate(off_taps):
            zt = jnp.dot(x2d, woff_ref[ti], preferred_element_type=jnp.float32)
            zpad_ref[pad:pad + H, pad:pad + W, :] = zt.reshape(H, W, nbred)
            for k, d in enumerate(dilations):
                dy, dx = (ky - 1) * d, (kx - 1) * d
                if abs(dy) >= H or abs(dx) >= W:
                    continue  # tap entirely outside the image -> contribution is 0
                acc[k] = acc[k] + zpad_ref[pad + dy:pad + dy + H,
                                           pad + dx:pad + dx + W,
                                           k * red:(k + 1) * red]

        # Direct slab stores (no concatenate): img | edge | 4 conv branches.
        # Bilinear upsample (align_corners=True) of a 1x1 map is a broadcast.
        out_ref[0, :, :, 0:red] = jnp.broadcast_to(
            img_ref[0], (H, W, red)).astype(out_ref.dtype)
        out_ref[0, :, :, red:2 * red] = edge_out.astype(out_ref.dtype)
        for k in range(nb):
            c0 = (2 + k) * red
            out_ref[0, :, :, c0:c0 + red] = jnp.maximum(
                acc[k] + bias_ref[k], 0.0).astype(out_ref.dtype)

    return kernel


def aspp_forward_nhwc(x, edge, params, rates=(6, 12, 18),
                      compute_dtype=jnp.bfloat16):
    """ASPP forward.  x: (N,H,W,Cin), edge: (N,H,W,2) -> (N,H,W,6*red) f32."""
    dilations = (1,) + tuple(2 * r for r in rates)
    nb = len(dilations)
    N, H, W, Cin = x.shape
    red = params['w_img'].shape[1]
    nbred = nb * red
    Cout = (2 + nb) * red

    x = x.astype(jnp.float32)
    edge = edge.astype(jnp.float32)

    # Image-pooling branch (tiny (N,Cin)@(Cin,red)) stays in the wrapper so the
    # kernel never needs a whole-image reduction.
    pooled = jnp.mean(x, axis=(1, 2))
    img = jnp.maximum(pooled @ params['w_img'].astype(jnp.float32), 0.0)
    img = img.reshape(N, 1, 1, red)

    # Pad H, W up to sublane multiples; spatial zero padding commutes with the
    # convs' own zero padding, and the extra rows/cols are sliced off below.
    Hp, Wp = _round_up(H, _SUBLANE), _round_up(W, _SUBLANE)
    if (Hp, Wp) != (H, W):
        x = jnp.pad(x, ((0, 0), (0, Hp - H), (0, Wp - W), (0, 0)))
        edge = jnp.pad(edge, ((0, 0), (0, Hp - H), (0, Wp - W), (0, 0)))

    # Fold eval-mode BN scale into the conv weights; fold the edge 1x1 conv
    # into the channel axis (2 extra contraction rows used only by the centre
    # tap's RHS).  Per-tap RHS columns: block k*red:(k+1)*red = branch k.
    Cinp = Cin + 2
    w_fold = (params['w_conv'].astype(jnp.float32)
              * params['bn_scale'][:, None, None, None, :])      # (nb,3,3,Cin,red)
    wt = jnp.transpose(w_fold, (1, 2, 3, 0, 4)).reshape(3, 3, Cin, nbred)
    wt = jnp.concatenate([wt, jnp.zeros((3, 3, 2, nbred), jnp.float32)], axis=2)
    edge_cols = jnp.concatenate(
        [jnp.zeros((Cin, red), jnp.float32),
         params['w_edge'].astype(jnp.float32)], axis=0)           # (Cinp, red)
    w_cen = jnp.concatenate([wt[1, 1], edge_cols], axis=1)        # (Cinp, nbred+red)
    off_taps = [(ky, kx) for ky in range(3) for kx in range(3) if (ky, kx) != (1, 1)]
    w_off = jnp.stack([wt[ky, kx] for ky, kx in off_taps], axis=0)  # (8, Cinp, nbred)

    bias = params['bn_bias'].astype(jnp.float32).reshape(nb, 1, red)

    xe = jnp.concatenate([x, edge], axis=-1).astype(compute_dtype)  # (N,Hp,Wp,Cinp)
    w_cen = w_cen.astype(compute_dtype)
    w_off = w_off.astype(compute_dtype)

    pad = _round_up(max(dilations), _SUBLANE)   # halo of the shifted-read scratch
    kernel = _make_kernel(dilations, Hp, Wp, Cinp, red, pad)

    # VMEM budget: double-buffered blocks + resident weights + halo scratch.
    csize = jnp.dtype(compute_dtype).itemsize
    est = (2 * _padded_vmem_bytes((1, Hp, Wp, Cinp), csize)
           + 2 * _padded_vmem_bytes((1, Hp, Wp, Cout), 4)
           + 2 * _padded_vmem_bytes((Cinp, nbred + red), csize)
           + 2 * _padded_vmem_bytes((8, Cinp, nbred), csize)
           + 2 * _padded_vmem_bytes((nb, 1, red), 4)
           + 2 * _padded_vmem_bytes((1, 1, 1, red), 4)
           + _padded_vmem_bytes((Hp + 2 * pad, Wp + 2 * pad, nbred), 4))
    vmem_limit = int(min(max(2 * est + (4 << 20), 32 << 20), 100 << 20))

    out = pl.pallas_call(
        kernel,
        out_shape=jax.ShapeDtypeStruct((N, Hp, Wp, Cout), jnp.float32),
        grid_spec=pltpu.PrefetchScalarGridSpec(
            num_scalar_prefetch=0,
            grid=(N,),
            in_specs=[
                pl.BlockSpec((1, Hp, Wp, Cinp), lambda b: (b, 0, 0, 0)),
                pl.BlockSpec((1, 1, 1, red), lambda b: (b, 0, 0, 0)),
                pl.BlockSpec((Cinp, nbred + red), lambda b: (0, 0)),
                pl.BlockSpec((8, Cinp, nbred), lambda b: (0, 0, 0)),
                pl.BlockSpec((nb, 1, red), lambda b: (0, 0, 0)),
            ],
            out_specs=pl.BlockSpec((1, Hp, Wp, Cout), lambda b: (b, 0, 0, 0)),
            scratch_shapes=[
                pltpu.VMEM((Hp + 2 * pad, Wp + 2 * pad, nbred), jnp.float32)],
        ),
        compiler_params=pltpu.CompilerParams(
            dimension_semantics=("parallel",),
            vmem_limit_bytes=vmem_limit),
    )(xe, img, w_cen, w_off, bias)

    return out[:, :H, :W, :]


def aspp_forward(x_nchw, edge_nchw, params, rates=(6, 12, 18),
                 compute_dtype=jnp.bfloat16):
    """NCHW adapter matching the PyTorch module interface."""
    x = jnp.transpose(x_nchw, (0, 2, 3, 1))
    edge = jnp.transpose(edge_nchw, (0, 2, 3, 1))
    out = aspp_forward_nhwc(x, edge, params, rates, compute_dtype)
    return jnp.transpose(out, (0, 3, 1, 2))


def aspp_reference(x_nchw, edge_nchw, params, rates=(6, 12, 18)):
    """Pure-JAX f32 reference of the module forward (for correctness check)."""
    dilations = (1,) + tuple(2 * r for r in rates)
    x = jnp.transpose(x_nchw, (0, 2, 3, 1)).astype(jnp.float32)
    edge = jnp.transpose(edge_nchw, (0, 2, 3, 1)).astype(jnp.float32)
    N, H, W, Cin = x.shape
    red = params['w_img'].shape[1]

    pooled = jnp.mean(x, axis=(1, 2))                         # (N, Cin)
    img = jnp.maximum(pooled @ params['w_img'], 0.0)          # (N, red)
    img = jnp.broadcast_to(img[:, None, None, :], (N, H, W, red))
    e = jnp.maximum(jnp.einsum('nhwc,co->nhwo', edge, params['w_edge']), 0.0)
    outs = [img, e]
    for k, d in enumerate(dilations):
        w = params['w_conv'][k]                               # (3,3,Cin,red) HWIO
        y = lax.conv_general_dilated(
            x, w, window_strides=(1, 1), padding=((d, d), (d, d)),
            rhs_dilation=(d, d), dimension_numbers=('NHWC', 'HWIO', 'NHWC'))
        y = y * params['bn_scale'][k][None, None, None, :] \
              + params['bn_bias'][k][None, None, None, :]
        outs.append(jnp.maximum(y, 0.0))
    out = jnp.concatenate(outs, axis=-1)
    return jnp.transpose(out, (0, 3, 1, 2))


if __name__ == "__main__":
    key = jax.random.PRNGKey(0)
    N, Cin, H, W = 2, 4, 16, 16
    red = 8
    ks = jax.random.split(key, 9)

    x = jax.random.normal(ks[0], (N, Cin, H, W), jnp.float32)
    edge = jax.random.normal(ks[1], (N, 2, H, W), jnp.float32)

    # Deterministic synthetic parameters (shapes from the module __init__).
    w_img = 0.1 * jax.random.normal(ks[2], (Cin, red), jnp.float32)
    w_edge = 0.1 * jax.random.normal(ks[3], (2, red), jnp.float32)
    w_conv = 0.1 * jax.random.normal(ks[4], (4, 3, 3, Cin, red), jnp.float32)
    gamma = 1.0 + 0.1 * jax.random.normal(ks[5], (4, red), jnp.float32)
    beta = 0.1 * jax.random.normal(ks[6], (4, red), jnp.float32)
    r_mean = 0.1 * jax.random.normal(ks[7], (4, red), jnp.float32)
    r_var = jnp.abs(jax.random.normal(ks[8], (4, red), jnp.float32)) + 0.5
    eps = 1e-5
    bn_scale = gamma / jnp.sqrt(r_var + eps)
    bn_bias = beta - r_mean * bn_scale

    params = dict(w_img=w_img, w_edge=w_edge, w_conv=w_conv,
                  bn_scale=bn_scale, bn_bias=bn_bias)

    ref = aspp_reference(x, edge, params)

    # Exact-semantics check: f32 MXU operands.
    out_f32 = jax.block_until_ready(
        aspp_forward(x, edge, params, compute_dtype=jnp.float32))
    np.testing.assert_allclose(np.asarray(out_f32), np.asarray(ref),
                               rtol=1e-4, atol=1e-4)

    # Fast path: bf16 MXU operands, f32 accumulation / element-wise math.
    out_bf16 = jax.block_until_ready(aspp_forward(x, edge, params))
    np.testing.assert_allclose(np.asarray(out_bf16), np.asarray(ref),
                               rtol=5e-2, atol=5e-2)

    assert out_bf16.shape == (N, 6 * red, H, W)
    print("KERNEL_OK")
</pallas_src>

<mosaic_0001>
module attributes {stable_mosaic.version = 11 : i64} {
  func.func @kernel(%arg0: i32, %arg1: memref<1x16x16x6xf32, #tpu.memory_space<vmem>>, %arg2: memref<1x1x1x8xf32, #tpu.memory_space<vmem>>, %arg3: memref<6x40xf32, #tpu.memory_space<vmem>>, %arg4: memref<8x6x32xf32, #tpu.memory_space<vmem>>, %arg5: memref<4x1x8xf32, #tpu.memory_space<vmem>>, %arg6: memref<1x16x16x48xf32, #tpu.memory_space<vmem>>, %arg7: memref<96x96x32xf32, #tpu.memory_space<vmem>>) attributes {dimension_semantics = [#tpu.dimension_semantics<parallel>], iteration_bounds = array<i64: 2>, scalar_prefetch = 0 : i64, scratch_operands = 1 : i64, tpu.core_type = #tpu.core_type<tc>, window_params = [{transform_indices = @transform_0, window_bounds = array<i64: 1, 16, 16, 6>}, {transform_indices = @transform_1, window_bounds = array<i64: 1, 1, 1, 8>}, {pipeline_mode = #tpu.pipeline_mode<synchronous>, transform_indices = @transform_2, window_bounds = array<i64: 6, 40>}, {pipeline_mode = #tpu.pipeline_mode<synchronous>, transform_indices = @transform_3, window_bounds = array<i64: 8, 6, 32>}, {pipeline_mode = #tpu.pipeline_mode<synchronous>, transform_indices = @transform_4, window_bounds = array<i64: 4, 1, 8>}, {transform_indices = @transform_5, window_bounds = array<i64: 1, 16, 16, 48>}]} {
    %cst = arith.constant 0.000000e+00 : f32
    %0 = vector.broadcast %cst : f32 to vector<40x96x32xf32>
    %c0 = arith.constant 0 : index
    %c0_0 = arith.constant 0 : index
    %c0_1 = arith.constant 0 : index
    %1 = vector.load %arg7[%c0, %c0_0, %c0_1] : memref<96x96x32xf32, #tpu.memory_space<vmem>>, vector<40x96x32xf32>
    tpu.vector_store %arg7[%c0, %c0_0, %c0_1], %0 {strides = array<i32>} : memref<96x96x32xf32, #tpu.memory_space<vmem>>, vector<40x96x32xf32>,
    %cst_2 = arith.constant 0.000000e+00 : f32
    %2 = vector.broadcast %cst_2 : f32 to vector<40x96x32xf32>
    %c56 = arith.constant 56 : index
    %c0_3 = arith.constant 0 : index
    %c0_4 = arith.constant 0 : index
    %3 = vector.load %arg7[%c56, %c0_3, %c0_4] : memref<96x96x32xf32, #tpu.memory_space<vmem>>, vector<40x96x32xf32>
    tpu.vector_store %arg7[%c56, %c0_3, %c0_4], %2 {strides = array<i32>} : memref<96x96x32xf32, #tpu.memory_space<vmem>>, vector<40x96x32xf32>,
    %cst_5 = arith.constant 0.000000e+00 : f32
    %4 = vector.broadcast %cst_5 : f32 to vector<16x40x32xf32>
    %c40 = arith.constant 40 : index
    %c0_6 = arith.constant 0 : index
    %c0_7 = arith.constant 0 : index
    %5 = vector.load %arg7[%c40, %c0_6, %c0_7] : memref<96x96x32xf32, #tpu.memory_space<vmem>>, vector<16x40x32xf32>
    tpu.vector_store %arg7[%c40, %c0_6, %c0_7], %4 {strides = array<i32>} : memref<96x96x32xf32, #tpu.memory_space<vmem>>, vector<16x40x32xf32>,
    %cst_8 = arith.constant 0.000000e+00 : f32
    %6 = vector.broadcast %cst_8 : f32 to vector<16x40x32xf32>
    %c40_9 = arith.constant 40 : index
    %c56_10 = arith.constant 56 : index
    %c0_11 = arith.constant 0 : index
    %7 = vector.load %arg7[%c40_9, %c56_10, %c0_11] : memref<96x96x32xf32, #tpu.memory_space<vmem>>, vector<16x40x32xf32>
    tpu.vector_store %arg7[%c40_9, %c56_10, %c0_11], %6 {strides = array<i32>} : memref<96x96x32xf32, #tpu.memory_space<vmem>>, vector<16x40x32xf32>,
    %c0_12 = arith.constant 0 : index
    %c0_13 = arith.constant 0 : index
    %c0_14 = arith.constant 0 : index
    %c0_15 = arith.constant 0 : index
    %8 = vector.load %arg1[%c0_12, %c0_13, %c0_14, %c0_15] : memref<1x16x16x6xf32, #tpu.memory_space<vmem>>, vector<1x16x16x6xf32>
    %9 = vector.shape_cast %8 : vector<1x16x16x6xf32> to vector<16x16x6xf32>
    %10 = vector.shape_cast %9 : vector<16x16x6xf32> to vector<256x6xf32>
    %c0_16 = arith.constant 0 : index
    %c0_17 = arith.constant 0 : index
    %11 = vector.load %arg3[%c0_16, %c0_17] : memref<6x40xf32, #tpu.memory_space<vmem>>, vector<6x40xf32>
    %cst_18 = arith.constant dense<0.000000e+00> : vector<256x40xf32>
    %12 = tpu.matmul %10, %11, %cst_18 {dimension_numbers = #tpu.dot_dimension_numbers<[1], [0], [0], [1], [0, 0, 1, 1], [], []>} : vector<256x6xf32>, vector<6x40xf32>, vector<256x40xf32> -> vector<256x40xf32>
    %13 = vector.shape_cast %12 : vector<256x40xf32> to vector<16x16x40xf32>
    %14 = vector.extract_strided_slice %13 {offsets = [0, 0, 0], sizes = [16, 16, 8], strides = [1, 1, 1]} : vector<16x16x40xf32> to vector<16x16x8xf32>
    %15 = vector.extract_strided_slice %13 {offsets = [0, 0, 8], sizes = [16, 16, 8], strides = [1, 1, 1]} : vector<16x16x40xf32> to vector<16x16x8xf32>
    %16 = vector.extract_strided_slice %13 {offsets = [0, 0, 16], sizes = [16, 16, 8], strides = [1, 1, 1]} : vector<16x16x40xf32> to vector<16x16x8xf32>
    %17 = vector.extract_strided_slice %13 {offsets = [0, 0, 24], sizes = [16, 16, 8], strides = [1, 1, 1]} : vector<16x16x40xf32> to vector<16x16x8xf32>
    %18 = vector.extract_strided_slice %13 {offsets = [0, 0, 32], sizes = [16, 16, 8], strides = [1, 1, 1]} : vector<16x16x40xf32> to vector<16x16x8xf32>
    %cst_19 = arith.constant 0.000000e+00 : f32
    %19 = vector.broadcast %cst_19 : f32 to vector<16x16x8xf32>
    %20 = arith.maximumf %18, %19 : vector<16x16x8xf32>
    %c0_20 = arith.constant 0 : index
    %c0_21 = arith.constant 0 : index
    %c0_22 = arith.constant 0 : index
    %21 = vector.load %arg4[%c0_20, %c0_21, %c0_22] : memref<8x6x32xf32, #tpu.memory_space<vmem>>, vector<1x6x32xf32>
    %22 = vector.shape_cast %21 : vector<1x6x32xf32> to vector<6x32xf32>
    %cst_23 = arith.constant dense<0.000000e+00> : vector<256x32xf32>
    %23 = tpu.matmul %10, %22, %cst_23 {dimension_numbers = #tpu.dot_dimension_numbers<[1], [0], [0], [1], [0, 0, 1, 1], [], []>} : vector<256x6xf32>, vector<6x32xf32>, vector<256x32xf32> -> vector<256x32xf32>
    %24 = vector.shape_cast %23 : vector<256x32xf32> to vector<16x16x32xf32>
    %c40_24 = arith.constant 40 : index
    %c40_25 = arith.constant 40 : index
    %c0_26 = arith.constant 0 : index
    %25 = vector.load %arg7[%c40_24, %c40_25, %c0_26] : memref<96x96x32xf32, #tpu.memory_space<vmem>>, vector<16x16x32xf32>
    tpu.vector_store %arg7[%c40_24, %c40_25, %c0_26], %24 {strides = array<i32>} : memref<96x96x32xf32, #tpu.memory_space<vmem>>, vector<16x16x32xf32>,
    %c39 = arith.constant 39 : index
    %c39_27 = arith.constant 39 : index
    %c0_28 = arith.constant 0 : index
    %26 = vector.load %arg7[%c39, %c39_27, %c0_28] : memref<96x96x32xf32, #tpu.memory_space<vmem>>, vector<16x16x8xf32>
    %27 = arith.addf %14, %26 : vector<16x16x8xf32>
    %c28 = arith.constant 28 : index
    %c28_29 = arith.constant 28 : index
    %c8 = arith.constant 8 : index
    %28 = vector.load %arg7[%c28, %c28_29, %c8] : memref<96x96x32xf32, #tpu.memory_space<vmem>>, vector<16x16x8xf32>
    %29 = arith.addf %15, %28 : vector<16x16x8xf32>
    %c1 = arith.constant 1 : index
    %c0_30 = arith.constant 0 : index
    %c0_31 = arith.constant 0 : index
    %30 = vector.load %arg4[%c1, %c0_30, %c0_31] : memref<8x6x32xf32, #tpu.memory_space<vmem>>, vector<1x6x32xf32>
    %31 = vector.shape_cast %30 : vector<1x6x32xf32> to vector<6x32xf32>
    %cst_32 = arith.constant dense<0.000000e+00> : vector<256x32xf32>
    %32 = tpu.matmul %10, %31, %cst_32 {dimension_numbers = #tpu.dot_dimension_numbers<[1], [0], [0], [1], [0, 0, 1, 1], [], []>} : vector<256x6xf32>, vector<6x32xf32>, vector<256x32xf32> -> vector<256x32xf32>
    %33 = vector.shape_cast %32 : vector<256x32xf32> to vector<16x16x32xf32>
    %c40_33 = arith.constant 40 : index
    %c40_34 = arith.constant 40 : index
    %c0_35 = arith.constant 0 : index
    %34 = vector.load %arg7[%c40_33, %c40_34, %c0_35] : memref<96x96x32xf32, #tpu.memory_space<vmem>>, vector<16x16x32xf32>
    tpu.vector_store %arg7[%c40_33, %c40_34, %c0_35], %33 {strides = array<i32>} : memref<96x96x32xf32, #tpu.memory_space<vmem>>, vector<16x16x32xf32>,
    %c39_36 = arith.constant 39 : index
    %c40_37 = arith.constant 40 : index
    %c0_38 = arith.constant 0 : index
    %35 = vector.load %arg7[%c39_36, %c40_37, %c0_38] : memref<96x96x32xf32, #tpu.memory_space<vmem>>, vector<16x16x8xf32>
    %36 = arith.addf %27, %35 : vector<16x16x8xf32>
    %c28_39 = arith.constant 28 : index
    %c40_40 = arith.constant 40 : index
    %c8_41 = arith.constant 8 : index
    %37 = vector.load %arg7[%c28_39, %c40_40, %c8_41] : memref<96x96x32xf32, #tpu.memory_space<vmem>>, vector<16x16x8xf32>
    %38 = arith.addf %29, %37 : vector<16x16x8xf32>
    %c2 = arith.constant 2 : index
    %c0_42 = arith.constant 0 : index
    %c0_43 = arith.constant 0 : index
    %39 = vector.load %arg4[%c2, %c0_42, %c0_43] : memref<8x6x32xf32, #tpu.memory_space<vmem>>, vector<1x6x32xf32>
    %40 = vector.shape_cast %39 : vector<1x6x32xf32> to vector<6x32xf32>
    %cst_44 = arith.constant dense<0.000000e+00> : vector<256x32xf32>
    %41 = tpu.matmul %10, %40, %cst_44 {dimension_numbers = #tpu.dot_dimension_numbers<[1], [0], [0], [1], [0, 0, 1, 1], [], []>} : vector<256x6xf32>, vector<6x32xf32>, vector<256x32xf32> -> vector<256x32xf32>
    %42 = vector.shape_cast %41 : vector<256x32xf32> to vector<16x16x32xf32>
    %c40_45 = arith.constant 40 : index
    %c40_46 = arith.constant 40 : index
    %c0_47 = arith.constant 0 : index
    %43 = vector.load %arg7[%c40_45, %c40_46, %c0_47] : memref<96x96x32xf32, #tpu.memory_space<vmem>>, vector<16x16x32xf32>
    tpu.vector_store %arg7[%c40_45, %c40_46, %c0_47], %42 {strides = array<i32>} : memref<96x96x32xf32, #tpu.memory_space<vmem>>, vector<16x16x32xf32>,
    %c39_48 = arith.constant 39 : index
    %c41 = arith.constant 41 : index
    %c0_49 = arith.constant 0 : index
    %44 = vector.load %arg7[%c39_48, %c41, %c0_49] : memref<96x96x32xf32, #tpu.memory_space<vmem>>, vector<16x16x8xf32>
    %45 = arith.addf %36, %44 : vector<16x16x8xf32>
    %c28_50 = arith.constant 28 : index
    %c52 = arith.constant 52 : index
    %c8_51 = arith.constant 8 : index
    %46 = vector.load %arg7[%c28_50, %c52, %c8_51] : memref<96x96x32xf32, #tpu.memory_space<vmem>>, vector<16x16x8xf32>
    %47 = arith.addf %38, %46 : vector<16x16x8xf32>
    %c3 = arith.constant 3 : index
    %c0_52 = arith.constant 0 : index
    %c0_53 = arith.constant 0 : index
    %48 = vector.load %arg4[%c3, %c0_52, %c0_53] : memref<8x6x32xf32, #tpu.memory_space<vmem>>, vector<1x6x32xf32>
    %49 = vector.shape_cast %48 : vector<1x6x32xf32> to vector<6x32xf32>
    %cst_54 = arith.constant dense<0.000000e+00> : vector<256x32xf32>
    %50 = tpu.matmul %10, %49, %cst_54 {dimension_numbers = #tpu.dot_dimension_numbers<[1], [0], [0], [1], [0, 0, 1, 1], [], []>} : vector<256x6xf32>, vector<6x32xf32>, vector<256x32xf32> -> vector<256x32xf32>
    %51 = vector.shape_cast %50 : vector<256x32xf32> to vector<16x16x32xf32>
    %c40_55 = arith.constant 40 : index
    %c40_56 = arith.constant 40 : index
    %c0_57 = arith.constant 0 : index
    %52 = vector.load %arg7[%c40_55, %c40_56, %c0_57] : memref<96x96x32xf32, #tpu.memory_space<vmem>>, vector<16x16x32xf32>
    tpu.vector_store %arg7[%c40_55, %c40_56, %c0_57], %51 {strides = array<i32>} : memref<96x96x32xf32, #tpu.memory_space<vmem>>, vector<16x16x32xf32>,
    %c40_58 = arith.constant 40 : index
    %c39_59 = arith.constant 39 : index
    %c0_60 = arith.constant 0 : index
    %53 = vector.load %arg7[%c40_58, %c39_59, %c0_60] : memref<96x96x32xf32, #tpu.memory_space<vmem>>, vector<16x16x8xf32>
    %54 = arith.addf %45, %53 : vector<16x16x8xf32>
    %c40_61 = arith.constant 40 : index
    %c28_62 = arith.constant 28 : index
    %c8_63 = arith.constant 8 : index
    %55 = vector.load %arg7[%c40_61, %c28_62, %c8_63] : memref<96x96x32xf32, #tpu.memory_space<vmem>>, vector<16x16x8xf32>
    %56 = arith.addf %47, %55 : vector<16x16x8xf32>
    %c4 = arith.constant 4 : index
    %c0_64 = arith.constant 0 : index
    %c0_65 = arith.constant 0 : index
    %57 = vector.load %arg4[%c4, %c0_64, %c0_65] : memref<8x6x32xf32, #tpu.memory_space<vmem>>, vector<1x6x32xf32>
    %58 = vector.shape_cast %57 : vector<1x6x32xf32> to vector<6x32xf32>
    %cst_66 = arith.constant dense<0.000000e+00> : vector<256x32xf32>
    %59 = tpu.matmul %10, %58, %cst_66 {dimension_numbers = #tpu.dot_dimension_numbers<[1], [0], [0], [1], [0, 0, 1, 1], [], []>} : vector<256x6xf32>, vector<6x32xf32>, vector<256x32xf32> -> vector<256x32xf32>
    %60 = vector.shape_cast %59 : vector<256x32xf32> to vector<16x16x32xf32>
    %c40_67 = arith.constant 40 : index
    %c40_68 = arith.constant 40 : index
    %c0_69 = arith.constant 0 : index
    %61 = vector.load %arg7[%c40_67, %c40_68, %c0_69] : memref<96x96x32xf32, #tpu.memory_space<vmem>>, vector<16x16x32xf32>
    tpu.vector_store %arg7[%c40_67, %c40_68, %c0_69], %60 {strides = array<i32>} : memref<96x96x32xf32, #tpu.memory_space<vmem>>, vector<16x16x32xf32>,
    %c40_70 = arith.constant 40 : index
    %c41_71 = arith.constant 41 : index
    %c0_72 = arith.constant 0 : index
    %62 = vector.load %arg7[%c40_70, %c41_71, %c0_72] : memref<96x96x32xf32, #tpu.memory_space<vmem>>, vector<16x16x8xf32>
    %63 = arith.addf %54, %62 : vector<16x16x8xf32>
    %c40_73 = arith.constant 40 : index
    %c52_74 = arith.constant 52 : index
    %c8_75 = arith.constant 8 : index
    %64 = vector.load %arg7[%c40_73, %c52_74, %c8_75] : memref<96x96x32xf32, #tpu.memory_space<vmem>>, vector<16x16x8xf32>
    %65 = arith.addf %56, %64 : vector<16x16x8xf32>
    %c5 = arith.constant 5 : index
    %c0_76 = arith.constant 0 : index
    %c0_77 = arith.constant 0 : index
    %66 = vector.load %arg4[%c5, %c0_76, %c0_77] : memref<8x6x32xf32, #tpu.memory_space<vmem>>, vector<1x6x32xf32>
    %67 = vector.shape_cast %66 : vector<1x6x32xf32> to vector<6x32xf32>
    %cst_78 = arith.constant dense<0.000000e+00> : vector<256x32xf32>
    %68 = tpu.matmul %10, %67, %cst_78 {dimension_numbers = #tpu.dot_dimension_numbers<[1], [0], [0], [1], [0, 0, 1, 1], [], []>} : vector<256x6xf32>, vector<6x32xf32>, vector<256x32xf32> -> vector<256x32xf32>
    %69 = vector.shape_cast %68 : vector<256x32xf32> to vector<16x16x32xf32>
    %c40_79 = arith.constant 40 : index
    %c40_80 = arith.constant 40 : index
    %c0_81 = arith.constant 0 : index
    %70 = vector.load %arg7[%c40_79, %c40_80, %c0_81] : memref<96x96x32xf32, #tpu.memory_space<vmem>>, vector<16x16x32xf32>
    tpu.vector_store %arg7[%c40_79, %c40_80, %c0_81], %69 {strides = array<i32>} : memref<96x96x32xf32, #tpu.memory_space<vmem>>, vector<16x16x32xf32>,
    %c41_82 = arith.constant 41 : index
    %c39_83 = arith.constant 39 : index
    %c0_84 = arith.constant 0 : index
    %71 = vector.load %arg7[%c41_82, %c39_83, %c0_84] : memref<96x96x32xf32, #tpu.memory_space<vmem>>, vector<16x16x8xf32>
    %72 = arith.addf %63, %71 : vector<16x16x8xf32>
    %c52_85 = arith.constant 52 : index
    %c28_86 = arith.constant 28 : index
    %c8_87 = arith.constant 8 : index
    %73 = vector.load %arg7[%c52_85, %c28_86, %c8_87] : memref<96x96x32xf32, #tpu.memory_space<vmem>>, vector<16x16x8xf32>
    %74 = arith.addf %65, %73 : vector<16x16x8xf32>
    %c6 = arith.constant 6 : index
    %c0_88 = arith.constant 0 : index
    %c0_89 = arith.constant 0 : index
    %75 = vector.load %arg4[%c6, %c0_88, %c0_89] : memref<8x6x32xf32, #tpu.memory_space<vmem>>, vector<1x6x32xf32>
    %76 = vector.shape_cast %75 : vector<1x6x32xf32> to vector<6x32xf32>
    %cst_90 = arith.constant dense<0.000000e+00> : vector<256x32xf32>
    %77 = tpu.matmul %10, %76, %cst_90 {dimension_numbers = #tpu.dot_dimension_numbers<[1], [0], [0], [1], [0, 0, 1, 1], [], []>} : vector<256x6xf32>, vector<6x32xf32>, vector<256x32xf32> -> vector<256x32xf32>
    %78 = vector.shape_cast %77 : vector<256x32xf32> to vector<16x16x32xf32>
    %c40_91 = arith.constant 40 : index
    %c40_92 = arith.constant 40 : index
    %c0_93 = arith.constant 0 : index
    %79 = vector.load %arg7[%c40_91, %c40_92, %c0_93] : memref<96x96x32xf32, #tpu.memory_space<vmem>>, vector<16x16x32xf32>
    tpu.vector_store %arg7[%c40_91, %c40_92, %c0_93], %78 {strides = array<i32>} : memref<96x96x32xf32, #tpu.memory_space<vmem>>, vector<16x16x32xf32>,
    %c41_94 = arith.constant 41 : index
    %c40_95 = arith.constant 40 : index
    %c0_96 = arith.constant 0 : index
    %80 = vector.load %arg7[%c41_94, %c40_95, %c0_96] : memref<96x96x32xf32, #tpu.memory_space<vmem>>, vector<16x16x8xf32>
    %81 = arith.addf %72, %80 : vector<16x16x8xf32>
    %c52_97 = arith.constant 52 : index
    %c40_98 = arith.constant 40 : index
    %c8_99 = arith.constant 8 : index
    %82 = vector.load %arg7[%c52_97, %c40_98, %c8_99] : memref<96x96x32xf32, #tpu.memory_space<vmem>>, vector<16x16x8xf32>
    %83 = arith.addf %74, %82 : vector<16x16x8xf32>
    %c7 = arith.constant 7 : index
    %c0_100 = arith.constant 0 : index
    %c0_101 = arith.constant 0 : index
    %84 = vector.load %arg4[%c7, %c0_100, %c0_101] : memref<8x6x32xf32, #tpu.memory_space<vmem>>, vector<1x6x32xf32>
    %85 = vector.shape_cast %84 : vector<1x6x32xf32> to vector<6x32xf32>
    %cst_102 = arith.constant dense<0.000000e+00> : vector<256x32xf32>
    %86 = tpu.matmul %10, %85, %cst_102 {dimension_numbers = #tpu.dot_dimension_numbers<[1], [0], [0], [1], [0, 0, 1, 1], [], []>} : vector<256x6xf32>, vector<6x32xf32>, vector<256x32xf32> -> vector<256x32xf32>
    %87 = vector.shape_cast %86 : vector<256x32xf32> to vector<16x16x32xf32>
    %c40_103 = arith.constant 40 : index
    %c40_104 = arith.constant 40 : index
    %c0_105 = arith.constant 0 : index
    %88 = vector.load %arg7[%c40_103, %c40_104, %c0_105] : memref<96x96x32xf32, #tpu.memory_space<vmem>>, vector<16x16x32xf32>
    tpu.vector_store %arg7[%c40_103, %c40_104, %c0_105], %87 {strides = array<i32>} : memref<96x96x32xf32, #tpu.memory_space<vmem>>, vector<16x16x32xf32>,
    %c41_106 = arith.constant 41 : index
    %c41_107 = arith.constant 41 : index
    %c0_108 = arith.constant 0 : index
    %89 = vector.load %arg7[%c41_106, %c41_107, %c0_108] : memref<96x96x32xf32, #tpu.memory_space<vmem>>, vector<16x16x8xf32>
    %90 = arith.addf %81, %89 : vector<16x16x8xf32>
    %c52_109 = arith.constant 52 : index
    %c52_110 = arith.constant 52 : index
    %c8_111 = arith.constant 8 : index
    %91 = vector.load %arg7[%c52_109, %c52_110, %c8_111] : memref<96x96x32xf32, #tpu.memory_space<vmem>>, vector<16x16x8xf32>
    %92 = arith.addf %83, %91 : vector<16x16x8xf32>
    %c0_112 = arith.constant 0 : index
    %c0_113 = arith.constant 0 : index
    %c0_114 = arith.constant 0 : index
    %c0_115 = arith.constant 0 : index
    %93 = vector.load %arg2[%c0_112, %c0_113, %c0_114, %c0_115] : memref<1x1x1x8xf32, #tpu.memory_space<vmem>>, vector<1x1x1x8xf32>
    %94 = vector.shape_cast %93 : vector<1x1x1x8xf32> to vector<1x1x8xf32>
    %95 = vector.shape_cast %94 : vector<1x1x8xf32> to vector<1x1x8xf32>
    %96 = vector.broadcast %95 : vector<1x1x8xf32> to vector<16x16x8xf32>
    %c0_116 = arith.constant 0 : index
    %c0_117 = arith.constant 0 : index
    %c0_118 = arith.constant 0 : index
    %c0_119 = arith.constant 0 : index
    %97 = vector.load %arg6[%c0_116, %c0_117, %c0_118, %c0_119] : memref<1x16x16x48xf32, #tpu.memory_space<vmem>>, vector<1x16x16x8xf32>
    %98 = vector.shape_cast %97 : vector<1x16x16x8xf32> to vector<16x16x8xf32>
    %99 = vector.shape_cast %96 : vector<16x16x8xf32> to vector<1x16x16x8xf32>
    tpu.vector_store %arg6[%c0_116, %c0_117, %c0_118, %c0_119], %99 {strides = array<i32>} : memref<1x16x16x48xf32, #tpu.memory_space<vmem>>, vector<1x16x16x8xf32>,
    %c0_120 = arith.constant 0 : index
    %c0_121 = arith.constant 0 : index
    %c0_122 = arith.constant 0 : index
    %c8_123 = arith.constant 8 : index
    %100 = vector.load %arg6[%c0_120, %c0_121, %c0_122, %c8_123] : memref<1x16x16x48xf32, #tpu.memory_space<vmem>>, vector<1x16x16x8xf32>
    %101 = vector.shape_cast %100 : vector<1x16x16x8xf32> to vector<16x16x8xf32>
    %102 = vector.shape_cast %20 : vector<16x16x8xf32> to vector<1x16x16x8xf32>
    tpu.vector_store %arg6[%c0_120, %c0_121, %c0_122, %c8_123], %102 {strides = array<i32>} : memref<1x16x16x48xf32, #tpu.memory_space<vmem>>, vector<1x16x16x8xf32>,
    %c0_124 = arith.constant 0 : index
    %c0_125 = arith.constant 0 : index
    %c0_126 = arith.constant 0 : index
    %103 = vector.load %arg5[%c0_124, %c0_125, %c0_126] : memref<4x1x8xf32, #tpu.memory_space<vmem>>, vector<1x1x8xf32>
    %104 = vector.shape_cast %103 : vector<1x1x8xf32> to vector<1x8xf32>
    %105 = vector.shape_cast %104 : vector<1x8xf32> to vector<1x1x8xf32>
    %106 = vector.broadcast %105 : vector<1x1x8xf32> to vector<16x16x8xf32>
    %107 = arith.addf %90, %106 : vector<16x16x8xf32>
    %cst_127 = arith.constant 0.000000e+00 : f32
    %108 = vector.broadcast %cst_127 : f32 to vector<16x16x8xf32>
    %109 = arith.maximumf %107, %108 : vector<16x16x8xf32>
    %c0_128 = arith.constant 0 : index
    %c0_129 = arith.constant 0 : index
    %c0_130 = arith.constant 0 : index
    %c16 = arith.constant 16 : index
    %110 = vector.load %arg6[%c0_128, %c0_129, %c0_130, %c16] : memref<1x16x16x48xf32, #tpu.memory_space<vmem>>, vector<1x16x16x8xf32>
    %111 = vector.shape_cast %110 : vector<1x16x16x8xf32> to vector<16x16x8xf32>
    %112 = vector.shape_cast %109 : vector<16x16x8xf32> to vector<1x16x16x8xf32>
    tpu.vector_store %arg6[%c0_128, %c0_129, %c0_130, %c16], %112 {strides = array<i32>} : memref<1x16x16x48xf32, #tpu.memory_space<vmem>>, vector<1x16x16x8xf32>,
    %c1_131 = arith.constant 1 : index
    %c0_132 = arith.constant 0 : index
    %c0_133 = arith.constant 0 : index
    %113 = vector.load %arg5[%c1_131, %c0_132, %c0_133] : memref<4x1x8xf32, #tpu.memory_space<vmem>>, vector<1x1x8xf32>
    %114 = vector.shape_cast %113 : vector<1x1x8xf32> to vector<1x8xf32>
    %115 = vector.shape_cast %114 : vector<1x8xf32> to vector<1x1x8xf32>
    %116 = vector.broadcast %115 : vector<1x1x8xf32> to vector<16x16x8xf32>
    %117 = arith.addf %92, %116 : vector<16x16x8xf32>
    %cst_134 = arith.constant 0.000000e+00 : f32
    %118 = vector.broadcast %cst_134 : f32 to vector<16x16x8xf32>
    %119 = arith.maximumf %117, %118 : vector<16x16x8xf32>
    %c0_135 = arith.constant 0 : index
    %c0_136 = arith.constant 0 : index
    %c0_137 = arith.constant 0 : index
    %c24 = arith.constant 24 : index
    %120 = vector.load %arg6[%c0_135, %c0_136, %c0_137, %c24] : memref<1x16x16x48xf32, #tpu.memory_space<vmem>>, vector<1x16x16x8xf32>
    %121 = vector.shape_cast %120 : vector<1x16x16x8xf32> to vector<16x16x8xf32>
    %122 = vector.shape_cast %119 : vector<16x16x8xf32> to vector<1x16x16x8xf32>
    tpu.vector_store %arg6[%c0_135, %c0_136, %c0_137, %c24], %122 {strides = array<i32>} : memref<1x16x16x48xf32, #tpu.memory_space<vmem>>, vector<1x16x16x8xf32>,
    %c2_138 = arith.constant 2 : index
    %c0_139 = arith.constant 0 : index
    %c0_140 = arith.constant 0 : index
    %123 = vector.load %arg5[%c2_138, %c0_139, %c0_140] : memref<4x1x8xf32, #tpu.memory_space<vmem>>, vector<1x1x8xf32>
    %124 = vector.shape_cast %123 : vector<1x1x8xf32> to vector<1x8xf32>
    %125 = vector.shape_cast %124 : vector<1x8xf32> to vector<1x1x8xf32>
    %126 = vector.broadcast %125 : vector<1x1x8xf32> to vector<16x16x8xf32>
    %127 = arith.addf %16, %126 : vector<16x16x8xf32>
    %cst_141 = arith.constant 0.000000e+00 : f32
    %128 = vector.broadcast %cst_141 : f32 to vector<16x16x8xf32>
    %129 = arith.maximumf %127, %128 : vector<16x16x8xf32>
    %c0_142 = arith.constant 0 : index
    %c0_143 = arith.constant 0 : index
    %c0_144 = arith.constant 0 : index
    %c32 = arith.constant 32 : index
    %130 = vector.load %arg6[%c0_142, %c0_143, %c0_144, %c32] : memref<1x16x16x48xf32, #tpu.memory_space<vmem>>, vector<1x16x16x8xf32>
    %131 = vector.shape_cast %130 : vector<1x16x16x8xf32> to vector<16x16x8xf32>
    %132 = vector.shape_cast %129 : vector<16x16x8xf32> to vector<1x16x16x8xf32>
    tpu.vector_store %arg6[%c0_142, %c0_143, %c0_144, %c32], %132 {strides = array<i32>} : memref<1x16x16x48xf32, #tpu.memory_space<vmem>>, vector<1x16x16x8xf32>,
    %c3_145 = arith.constant 3 : index
    %c0_146 = arith.constant 0 : index
    %c0_147 = arith.constant 0 : index
    %133 = vector.load %arg5[%c3_145, %c0_146, %c0_147] : memref<4x1x8xf32, #tpu.memory_space<vmem>>, vector<1x1x8xf32>
    %134 = vector.shape_cast %133 : vector<1x1x8xf32> to vector<1x8xf32>
    %135 = vector.shape_cast %134 : vector<1x8xf32> to vector<1x1x8xf32>
    %136 = vector.broadcast %135 : vector<1x1x8xf32> to vector<16x16x8xf32>
    %137 = arith.addf %17, %136 : vector<16x16x8xf32>
    %cst_148 = arith.constant 0.000000e+00 : f32
    %138 = vector.broadcast %cst_148 : f32 to vector<16x16x8xf32>
    %139 = arith.maximumf %137, %138 : vector<16x16x8xf32>
    %c0_149 = arith.constant 0 : index
    %c0_150 = arith.constant 0 : index
    %c0_151 = arith.constant 0 : index
    %c40_152 = arith.constant 40 : index
    %140 = vector.load %arg6[%c0_149, %c0_150, %c0_151, %c40_152] : memref<1x16x16x48xf32, #tpu.memory_space<vmem>>, vector<1x16x16x8xf32>
    %141 = vector.shape_cast %140 : vector<1x16x16x8xf32> to vector<16x16x8xf32>
    %142 = vector.shape_cast %139 : vector<16x16x8xf32> to vector<1x16x16x8xf32>
    tpu.vector_store %arg6[%c0_149, %c0_150, %c0_151, %c40_152], %142 {strides = array<i32>} : memref<1x16x16x48xf32, #tpu.memory_space<vmem>>, vector<1x16x16x8xf32>,
    return
  }
  func.func @transform_0(%arg0: i32) -> (i32, i32, i32, i32) {
    %c0_i32 = arith.constant 0 : i32
    %c0_i32_0 = arith.constant 0 : i32
    %c0_i32_1 = arith.constant 0 : i32
    %c0_i32_2 = arith.constant 0 : i32
    return %arg0, %c0_i32, %c0_i32_0, %c0_i32_1 : i32, i32, i32, i32
  }
  func.func @transform_1(%arg0: i32) -> (i32, i32, i32, i32) {
    %c0_i32 = arith.constant 0 : i32
    %c0_i32_0 = arith.constant 0 : i32
    %c0_i32_1 = arith.constant 0 : i32
    %c0_i32_2 = arith.constant 0 : i32
    return %arg0, %c0_i32, %c0_i32_0, %c0_i32_1 : i32, i32, i32, i32
  }
  func.func @transform_2(%arg0: i32) -> (i32, i32) {
    %c0_i32 = arith.constant 0 : i32
    %c0_i32_0 = arith.constant 0 : i32
    %c0_i32_1 = arith.constant 0 : i32
    return %c0_i32, %c0_i32_0 : i32, i32
  }
  func.func @transform_3(%arg0: i32) -> (i32, i32, i32) {
    %c0_i32 = arith.constant 0 : i32
    %c0_i32_0 = arith.constant 0 : i32
    %c0_i32_1 = arith.constant 0 : i32
    %c0_i32_2 = arith.constant 0 : i32
    return %c0_i32, %c0_i32_0, %c0_i32_1 : i32, i32, i32
  }
  func.func @transform_4(%arg0: i32) -> (i32, i32, i32) {
    %c0_i32 = arith.constant 0 : i32
    %c0_i32_0 = arith.constant 0 : i32
    %c0_i32_1 = arith.constant 0 : i32
    %c0_i32_2 = arith.constant 0 : i32
    return %c0_i32, %c0_i32_0, %c0_i32_1 : i32, i32, i32
  }
  func.func @transform_5(%arg0: i32) -> (i32, i32, i32, i32) {
    %c0_i32 = arith.constant 0 : i32
    %c0_i32_0 = arith.constant 0 : i32
    %c0_i32_1 = arith.constant 0 : i32
    %c0_i32_2 = arith.constant 0 : i32
    return %arg0, %c0_i32, %c0_i32_0, %c0_i32_1 : i32, i32, i32, i32
  }
}

</mosaic_0001>

<bundles_post_ra>
// kernel: tpu_custom_call.1
= control target key start
LH: loop header
LB: loop body
LE: loop exit
PB: predicated region body
PF: predicated region fallthrough
CT: control target
= control target key end

     0   :  { %10 = vsyncpa [#allocation4], 0  ;;  %s11087_s0 = inlined_call_operand.vmem [shape: f32[2,16,16,6], index: 0, kind: input, shape index: {}]   ;;  %s11088_s1 = inlined_call_operand.vmem [shape: f32[2,1,1,8], index: 1, kind: input, shape index: {}]   ;;  %s11089_s2 = inlined_call_operand.vmem [shape: f32[6,40], index: 2, kind: input, shape index: {}]   ;;  %s11090_s3 = inlined_call_operand.vmem [shape: f32[8,6,32], index: 3, kind: input, shape index: {}]   ;;  %s11091_s4 = inlined_call_operand.vmem [shape: f32[4,1,8], index: 4, kind: input, shape index: {}]   ;;  %s11092_s5 = inlined_call_operand.hbm [shape: f32[2,16,16,48], index: 5, kind: output, shape index: {}]  }
   0x1   :  { %12 = vsyncpa [#allocation4 + $0x1], 0  ;;  %s7368_s18 = smov 0   ;;  %s7370_s19 = smov 0  }
   0x2   :  { %s7372_s20 = smov 0   ;;  %s7374_s21 = smov 0  }
   0x3 LB: > { %s7389_s22 = sadd.s32 4294967295, %s7329_s21   ;;  %s6097_s23 = sadd.s32 4294967294, %s7329_s21   ;;  %s7329_s21 = sphi %s7374_s21, %s11530_s21   ;;  %s7325_s20 = sphi %s7372_s20, %s11529_s20   ;;  %s7321_s19 = sphi %s7370_s19, %s11528_s19   ;;  %s7317_s18 = sphi %s7368_s18, %s11527_s18  }
   0x4   : > { %s7393_s24 = sadd.s32 1, %s7329_s21   ;;  %s140_s25 = sadd.s32 1, %s7325_s20 }
   0x5   : > { %s137_s26 = ssub.s32 %s7329_s21, %s7393_s24  ;;  %p150_p0 = scmp.ne.s32.totalorder %s7325_s20, %s7321_s19 }
   0x6   : > { %p138_p1 = scmp.eq.s32.totalorder %s137_s26, 0  ;;  %p151_p2 = scmp.eq.s32.totalorder %s7389_s22, 1 }
   0x7   : > { %p156_p3 = scmp.ne.s32.totalorder %s7321_s19, %s7317_s18  ;;  %p157_p4 = scmp.eq.s32.totalorder %s6097_s23, 1 }
   0x8   : > { %s7404_s27 = scalar_select %p138_p1, %s7325_s20, %s140_s25  }
   0x9   : > { %p7406_p5 = por %p151_p2, %p150_p0  ;;  %p7410_p6 = por %p157_p4, %p156_p3 }
   0xa   : > { %p6100_p7 = scmp.ge.s32.totalorder %s7329_s21, 1  ;;  %p198_p8 = scmp.lt.s32.totalorder %s7329_s21, 3 }
   0xc   : > { %p199_p9 = pnand %p6100_p7, %p198_p8 }
   0xe   : > { %202 = sbr.rel (%p199_p9) target bundleno = 751 (0x2ef), region = 40 }
  0x13   : > { %v1392_v0 = vld [vmem:[%s11089_s2] sm:$0x3f]  ;;  %vm1490_vm0 = vcmask 1045504   ;;  %p229_p10 = scmp.lt.s32.totalorder %s7389_s22, 1  ;;  %v6170_v2 = vld [vmem:[%s11090_s3 + $0x8] sm:$0x3f] }
  0x14   : > { %7170 = vmatprep.subr.msk.mxu1 %vm1490_vm0, %v1392_v0  ;;  %6720 = vmatprep.subr.msk.mxu0 %vm1490_vm0, %v1392_v0  ;;  %v1751_v1 = vld [vmem:[%s11090_s3] sm:$0x3f]  ;;  %vm1393_vm1 = vcmask 48128   ;;  %s7331_s15 = smov 16   ;;  %v7466_v10 = vld [vmem:[%s11090_s3 + $0x10] sm:$0x3f] }
  0x15   : > { %7171 = vmatpush3.msk.msra.mxu1 %vm1490_vm0, %v1392_v0  ;;  %6721 = vmatpush3.msk.msra.mxu0 %vm1490_vm0, %v1392_v0  ;;  %s7431_s11 = scalar_select %p229_p10, %s7389_s22, 1  ;;  %v6413_v3 = vld [vmem:[%s11091_s4 + $0x2] ss:$0 sm:$0xff]  ;;  %v7471_v11 = vld [vmem:[%s11090_s3 + $0x18] sm:$0x3f]  ;;  %vm237_vm2 = vcmask 261120  }
  0x16   : > { %6770 = vmatprep.subr.msk.mxu1 %vm1490_vm0, %v1751_v1  ;;  %6820 = vmatprep.subr.msk.mxu0 %vm1490_vm0, %v6170_v2  ;;  %v6415_v16 = vld [vmem:[%s11091_s4 + $0x3] ss:$0 sm:$0xff]  ;;  %s7332_s9 = smov 24   ;;  %v6306_v40 = vld [vmem:[%s11090_s3 + $0x28] sm:$0x3f]  ;;  %v7333_v41 = vmov 0.0  }
  0x17   : > { %s6421_s14 = sshll.u32 %s7431_s11, 8  ;;  %5549 = vrot.lane.b32.xlu1 %v6413_v3, %s7331_s15  ;;  %v6272_v39 = vld [vmem:[%s11090_s3 + $0x20] sm:$0x3f]  ;;  %578 = vst.msk [vmem:[#allocation2 + $0xaa0] sm:$0xff] %vm237_vm2, %v7333_v41  ;;  %579 = vst.msk [vmem:[#allocation2 + $0xaa8] sm:$0xff] %vm237_vm2, %v7333_v41  ;;  %s7334_s25 = smov 8  }
  0x18   : > { %s7443_s23 = scalar_lea.vmem %s11087_s0, %s6421_s14  ;;  %580 = vst.msk [vmem:[#allocation2 + $0xab0] sm:$0xff] %vm237_vm2, %v7333_v41  ;;  %581 = vst.msk [vmem:[#allocation2 + $0xab8] sm:$0xff] %vm237_vm2, %v7333_v41  ;;  %v6411_v43 = vld [vmem:[%s11091_s4 + $0x1] ss:$0 sm:$0xff]  ;;  %v8161_v62 = vld [vmem:[%s11090_s3 + $0x30] sm:$0x3f]  ;;  %s236_s16 = scalar_lea.vmem %s11088_s1, %s7431_s11 }
  0x19   : > { %v7446_v4 = vld [vmem:[%s7443_s23] sm:$0xff]  ;;  %v7450_v6 = vld [vmem:[%s7443_s23 + $0x8] sm:$0xff]  ;;  %v7457_v8 = vld [vmem:[%s7443_s23 + $0x10] sm:$0xff]  ;;  %582 = vst.msk [vmem:[#allocation2 + $0xac0] sm:$0xff] %vm237_vm2, %v7333_v41  ;;  %5314 = vrot.lane.b32.xlu0 %v6411_v43, %s7334_s25  ;;  %vm4881_vm3 = vcmask 64512   ;;  %s226_s17 = sand.u32 1, %s7321_s19  }
  0x1a   : > { %v1376_v5 = vld [vmem:[%s7443_s23 + $0x80] sm:$0xff]  ;;  %6722 = vmatprep.mubr.msk.f32.mxu0 %vm1393_vm1, %v7446_v4  ;;  %v1377_v7 = vld [vmem:[%s7443_s23 + $0x88] sm:$0xff]  ;;  %v1378_v9 = vld [vmem:[%s7443_s23 + $0x90] sm:$0xff]  ;;  %711 = vst.msk [vmem:[#allocation2 + $0xec8] sm:$0xff] %vm237_vm2, %v7333_v41  ;;  %s6101_s26 = sshll.u32 %s226_s17, 8  ;;  %s7335_s30 = smov 104  }
  0x1b   : > { %6746 = vmatprep.mubr.msk.f32.mxu1 %vm1393_vm1, %v1376_v5  ;;  %6723 = vmatmul.mubr.msk.f32.vlgmr.msra.gmra.mxu0 %vm1393_vm1, %v7450_v6  ;;  %v7477_v12 = vld [vmem:[%s7443_s23 + $0x18] sm:$0xff]  ;;  %v7482_v14 = vld [vmem:[%s7443_s23 + $0x20] sm:$0xff]  ;;  %v7500_v17 = vld [vmem:[%s7443_s23 + $0x28] sm:$0xff]  ;;  %712 = vst.msk [vmem:[#allocation2 + $0xed0] sm:$0xff] %vm237_vm2, %v7333_v41  ;;  %s8433_s11 = scalar_lea.vmem [#allocation3], %s6101_s26  ;;  %vm5042_vm4 = vcmask 130112  }
  0x1c   : > { %6747 = vmatmul.mubr.msk.f32.vlgmr.msra.gmra.mxu1 %vm1393_vm1, %v1377_v7  ;;  %6725 = vmatprep.mubr.msk.f32.mxu0 %vm1393_vm1, %v7457_v8  ;;  %v1379_v13 = vld [vmem:[%s7443_s23 + $0x98] sm:$0xff]  ;;  %v1380_v15 = vld [vmem:[%s7443_s23 + $0xa0] sm:$0xff]  ;;  %v1381_v18 = vld [vmem:[%s7443_s23 + $0xa8] sm:$0xff]  ;;  %713 = vst.msk [vmem:[#allocation2 + $0xed8] sm:$0xff] %vm237_vm2, %v7333_v41  ;;  %vm5274_vm5 = vcmask 195712   ;;  %vm5509_vm6 = vcmask 261312  }
  0x1d   : > { %6771 = vmatpush3.msk.msra.mxu1 %vm1490_vm0, %v1751_v1  ;;  %6749 = vmatprep.mubr.msk.f32.mxu1 %vm1393_vm1, %v1378_v9  ;;  %v7504_v19 = vld [vmem:[%s7443_s23 + $0x30] sm:$0xff]  ;;  %v1367_v21 = vld [vmem:[%s7443_s23 + $0x38] sm:$0xff]  ;;  %v1368_v23 = vld [vmem:[%s7443_s23 + $0x40] sm:$0xff]  ;;  %577 = vst.msk [vmem:[#allocation2 + $0xa98] sm:$0xff] %vm237_vm2, %v7333_v41  ;;  %vm5744_vm7 = vcmask 326912   ;;  %vm5979_vm8 = vcmask 392512  }
  0x1e   : > { %6821 = vmatpush3.msk.msra.mxu0 %vm1490_vm0, %v6170_v2  ;;  %6870 = vmatprep.subr.msk.mxu1 %vm1490_vm0, %v7466_v10  ;;  %v1382_v20 = vld [vmem:[%s7443_s23 + $0xb0] sm:$0xff]  ;;  %v1383_v22 = vld [vmem:[%s7443_s23 + $0xb8] sm:$0xff]  ;;  %v1384_v24 = vld [vmem:[%s7443_s23 + $0xc0] sm:$0xff]  ;;  %589 = vst.msk [vmem:[#allocation2 + $0xaf8] sm:$0xff] %vm237_vm2, %v7333_v41  ;;  %s11046_s13 = scalar_lea.sflag [#allocation4], %s226_s17 }
  0x1f   : > { %6920 = vmatprep.subr.msk.mxu0 %vm1490_vm0, %v7471_v11  ;;  %6726 = vmatmul.mubr.msk.f32.gmra.mxu0 %vm1393_vm1, %v7477_v12  ;;  %v1369_v25 = vld [vmem:[%s7443_s23 + $0x48] sm:$0xff]  ;;  %v1370_v27 = vld [vmem:[%s7443_s23 + $0x50] sm:$0xff]  ;;  %v1371_v29 = vld [vmem:[%s7443_s23 + $0x58] sm:$0xff]  ;;  %590 = vst.msk [vmem:[#allocation2 + $0xb00] sm:$0xff] %vm237_vm2, %v7333_v41 }
  0x20   : > { %6750 = vmatmul.mubr.msk.f32.gmra.mxu1 %vm1393_vm1, %v1379_v13  ;;  %6728 = vmatprep.mubr.msk.f32.mxu0 %vm1393_vm1, %v7482_v14  ;;  %v1385_v26 = vld [vmem:[%s7443_s23 + $0xc8] sm:$0xff]  ;;  %v1386_v28 = vld [vmem:[%s7443_s23 + $0xd0] sm:$0xff]  ;;  %v1387_v30 = vld [vmem:[%s7443_s23 + $0xd8] sm:$0xff]  ;;  %591 = vst.msk [vmem:[#allocation2 + $0xb08] sm:$0xff] %vm237_vm2, %v7333_v41 }
  0x21   : > { %6752 = vmatprep.mubr.msk.f32.mxu1 %vm1393_vm1, %v1380_v15  ;;  %5784 = vrot.lane.b32.xlu1 %v6415_v16, %s7332_s9  ;;  %v1372_v31 = vld [vmem:[%s7443_s23 + $0x60] sm:$0xff]  ;;  %v1373_v33 = vld [vmem:[%s7443_s23 + $0x68] sm:$0xff]  ;;  %v1374_v35 = vld [vmem:[%s7443_s23 + $0x70] sm:$0xff]  ;;  %592 = vst.msk [vmem:[#allocation2 + $0xb10] sm:$0xff] %vm237_vm2, %v7333_v41  ;;  %s6026_s9 = sshll.u32 %s8433_s11, 4  ;;  %s11037_s9 = int_to_ptr.vmem [resolvable:$true] %s6026_s9 }
  0x22   : > { %v1388_v32 = vld [vmem:[%s7443_s23 + $0xe0] sm:$0xff]  ;;  %v1389_v34 = vld [vmem:[%s7443_s23 + $0xe8] sm:$0xff]  ;;  %v1390_v36 = vld [vmem:[%s7443_s23 + $0xf0] sm:$0xff]  ;;  %593 = vst.msk [vmem:[#allocation2 + $0xb18] sm:$0xff] %vm237_vm2, %v7333_v41  ;;  %s7269_s14 = scalar_lea.vmem %s11037_s9, 4096 }
  0x23   : > { %6729 = vmatmul.mubr.msk.f32.gmra.mxu0 %vm1393_vm1, %v7500_v17  ;;  %v1375_v37 = vld [vmem:[%s7443_s23 + $0x78] sm:$0xff]  ;;  %594 = vst.msk [vmem:[#allocation2 + $0xb20] sm:$0xff] %vm237_vm2, %v7333_v41  ;;  %601 = vst.msk [vmem:[#allocation2 + $0xb58] sm:$0xff] %vm237_vm2, %v7333_v41  ;;  %v8032_v44 = vld [vmem:[%s7443_s23 + $0x80] sm:$0xff]  ;;  %p7270_p11 = scmp.ne.s32.totalorder %s11037_s9, %s7269_s14 }
  0x24   : > { %6753 = vmatmul.mubr.msk.f32.gmra.mxu1 %vm1393_vm1, %v1381_v18  ;;  %6731 = vmatprep.mubr.msk.f32.mxu0 %vm1393_vm1, %v7504_v19  ;;  %v1391_v38 = vld [vmem:[%s7443_s23 + $0xf8] sm:$0xff]  ;;  %602 = vst.msk [vmem:[#allocation2 + $0xb60] sm:$0xff] %vm237_vm2, %v7333_v41  ;;  %603 = vst.msk [vmem:[#allocation2 + $0xb68] sm:$0xff] %vm237_vm2, %v7333_v41  ;;  %v8040_v45 = vld [vmem:[%s7443_s23 + $0x88] sm:$0xff] }
  0x25   : > { %6755 = vmatprep.mubr.msk.f32.mxu1 %vm1393_vm1, %v1382_v20  ;;  %604 = vst.msk [vmem:[#allocation2 + $0xb70] sm:$0xff] %vm237_vm2, %v7333_v41  ;;  %605 = vst.msk [vmem:[#allocation2 + $0xb78] sm:$0xff] %vm237_vm2, %v7333_v41  ;;  %v8022_v42 = vld [vmem:[%s7443_s23 + $0x78] sm:$0xff]  ;;  %v8047_v46 = vld [vmem:[%s7443_s23 + $0x90] sm:$0xff]  ;;  %p7271_p12 = pnand %p7270_p11, %p7406_p5 }
  0x26   : > { %606 = vst.msk [vmem:[#allocation2 + $0xb80] sm:$0xff] %vm237_vm2, %v7333_v41  ;;  %613 = vst.msk [vmem:[#allocation2 + $0xbb8] sm:$0xff] %vm237_vm2, %v7333_v41  ;;  %v8054_v47 = vld [vmem:[%s7443_s23 + $0x98] sm:$0xff]  ;;  %v8061_v48 = vld [vmem:[%s7443_s23 + $0xa0] sm:$0xff] }
  0x27   : > { %6732 = vmatmul.mubr.msk.f32.gmra.mxu0 %vm1393_vm1, %v1367_v21  ;;  %614 = vst.msk [vmem:[#allocation2 + $0xbc0] sm:$0xff] %vm237_vm2, %v7333_v41  ;;  %615 = vst.msk [vmem:[#allocation2 + $0xbc8] sm:$0xff] %vm237_vm2, %v7333_v41  ;;  %v8068_v49 = vld [vmem:[%s7443_s23 + $0xa8] sm:$0xff]  ;;  %v8075_v50 = vld [vmem:[%s7443_s23 + $0xb0] sm:$0xff]  ;;  %p7272_p13 = pneg %p7271_p12 }
  0x28   : > { %6756 = vmatmul.mubr.msk.f32.gmra.mxu1 %vm1393_vm1, %v1383_v22  ;;  %6734 = vmatprep.mubr.msk.f32.mxu0 %vm1393_vm1, %v1368_v23  ;;  %616 = vst.msk [vmem:[#allocation2 + $0xbd0] sm:$0xff] %vm237_vm2, %v7333_v41  ;;  %617 = vst.msk [vmem:[#allocation2 + $0xbd8] sm:$0xff] %vm237_vm2, %v7333_v41  ;;  %v8082_v51 = vld [vmem:[%s7443_s23 + $0xb8] sm:$0xff]  ;;  %v8089_v52 = vld [vmem:[%s7443_s23 + $0xc0] sm:$0xff] }
  0x29   : > { %6758 = vmatprep.mubr.msk.f32.mxu1 %vm1393_vm1, %v1384_v24  ;;  %618 = vst.msk [vmem:[#allocation2 + $0xbe0] sm:$0xff] %vm237_vm2, %v7333_v41  ;;  %625 = vst.msk [vmem:[#allocation2 + $0xc18] sm:$0xff] %vm237_vm2, %v7333_v41  ;;  %v8096_v53 = vld [vmem:[%s7443_s23 + $0xc8] sm:$0xff]  ;;  %v8103_v54 = vld [vmem:[%s7443_s23 + $0xd0] sm:$0xff] }
  0x2a   : > { %626 = vst.msk [vmem:[#allocation2 + $0xc20] sm:$0xff] %vm237_vm2, %v7333_v41  ;;  %627 = vst.msk [vmem:[#allocation2 + $0xc28] sm:$0xff] %vm237_vm2, %v7333_v41  ;;  %v8110_v55 = vld [vmem:[%s7443_s23 + $0xd8] sm:$0xff]  ;;  %v8117_v56 = vld [vmem:[%s7443_s23 + $0xe0] sm:$0xff] }
  0x2b   : > { %6735 = vmatmul.mubr.msk.f32.gmra.mxu0 %vm1393_vm1, %v1369_v25  ;;  %628 = vst.msk [vmem:[#allocation2 + $0xc30] sm:$0xff] %vm237_vm2, %v7333_v41  ;;  %629 = vst.msk [vmem:[#allocation2 + $0xc38] sm:$0xff] %vm237_vm2, %v7333_v41  ;;  %v8124_v57 = vld [vmem:[%s7443_s23 + $0xe8] sm:$0xff]  ;;  %v8131_v58 = vld [vmem:[%s7443_s23 + $0xf0] sm:$0xff] }
  0x2c   : > { %6759 = vmatmul.mubr.msk.f32.gmra.mxu1 %vm1393_vm1, %v1385_v26  ;;  %6737 = vmatprep.mubr.msk.f32.mxu0 %vm1393_vm1, %v1370_v27  ;;  %630 = vst.msk [vmem:[#allocation2 + $0xc40] sm:$0xff] %vm237_vm2, %v7333_v41  ;;  %637 = vst.msk [vmem:[#allocation2 + $0xc78] sm:$0xff] %vm237_vm2, %v7333_v41  ;;  %v8138_v59 = vld [vmem:[%s7443_s23 + $0xf8] sm:$0xff]  ;;  %v8145_v60 = vld [vmem:[%s7443_s23] sm:$0xff] }
  0x2d   : > { %6761 = vmatprep.mubr.msk.f32.mxu1 %vm1393_vm1, %v1386_v28  ;;  %638 = vst.msk [vmem:[#allocation2 + $0xc80] sm:$0xff] %vm237_vm2, %v7333_v41  ;;  %639 = vst.msk [vmem:[#allocation2 + $0xc88] sm:$0xff] %vm237_vm2, %v7333_v41  ;;  %v8152_v61 = vld [vmem:[%s7443_s23 + $0x8] sm:$0xff]  ;;  %v8166_v63 = vld [vmem:[%s11090_s3 + $0x38] sm:$0x3f] }
  0x2e   : > { %640 = vst.msk [vmem:[#allocation2 + $0xc90] sm:$0xff] %vm237_vm2, %v7333_v41  ;;  %641 = vst.msk [vmem:[#allocation2 + $0xc98] sm:$0xff] %vm237_vm2, %v7333_v41  ;;  %v7236_v0 = vld [vmem:[%s11090_s3 + $0x20] sm:$0x3f]  ;;  %v8173_v1 = vld [vmem:[%s7443_s23 + $0x10] sm:$0xff] }
  0x2f   : > { %6738 = vmatmul.mubr.msk.f32.gmra.mxu0 %vm1393_vm1, %v1371_v29  ;;  %642 = vst.msk [vmem:[#allocation2 + $0xca0] sm:$0xff] %vm237_vm2, %v7333_v41  ;;  %649 = vst.msk [vmem:[#allocation2 + $0xcd8] sm:$0xff] %vm237_vm2, %v7333_v41  ;;  %v7238_v2 = vld [vmem:[%s11090_s3 + $0x28] sm:$0x3f]  ;;  %v8188_v3 = vld [vmem:[%s7443_s23 + $0x18] sm:$0xff] }
  0x30   : > { %6762 = vmatmul.mubr.msk.f32.gmra.mxu1 %vm1393_vm1, %v1387_v30  ;;  %6740 = vmatprep.mubr.msk.f32.mxu0 %vm1393_vm1, %v1372_v31  ;;  %650 = vst.msk [vmem:[#allocation2 + $0xce0] sm:$0xff] %vm237_vm2, %v7333_v41  ;;  %651 = vst.msk [vmem:[#allocation2 + $0xce8] sm:$0xff] %vm237_vm2, %v7333_v41  ;;  %v8202_v5 = vld [vmem:[%s7443_s23 + $0x28] sm:$0xff]  ;;  %v8216_v7 = vld [vmem:[%s7443_s23 + $0x38] sm:$0xff] }
  0x31   : > { %6764 = vmatprep.mubr.msk.f32.mxu1 %vm1393_vm1, %v1388_v32  ;;  %652 = vst.msk [vmem:[#allocation2 + $0xcf0] sm:$0xff] %vm237_vm2, %v7333_v41  ;;  %653 = vst.msk [vmem:[#allocation2 + $0xcf8] sm:$0xff] %vm237_vm2, %v7333_v41  ;;  %v8230_v9 = vld [vmem:[%s7443_s23 + $0x48] sm:$0xff]  ;;  %v6408_v15 = vld [vmem:[%s236_s16] ss:$0 sm:$0xff]  ;;  %s7336_s16 = smov [#allocation3]  }
  0x32   : > { %654 = vst.msk [vmem:[#allocation2 + $0xd00] sm:$0xff] %vm237_vm2, %v7333_v41  ;;  %661 = vst.msk [vmem:[#allocation2 + $0xd38] sm:$0xff] %vm237_vm2, %v7333_v41  ;;  %v8258_v13 = vld [vmem:[%s7443_s23 + $0x68] sm:$0xff]  ;;  %s7273_s26 = sshll.u32 %s7336_s16, 4  ;;  %s7274_s26 = int_to_ptr.vmem [resolvable:$false] %s7273_s26 }
  0x33   : > { %6741 = vmatmul.mubr.msk.f32.gmra.mxu0 %vm1393_vm1, %v1373_v33  ;;  %662 = vst.msk [vmem:[#allocation2 + $0xd40] sm:$0xff] %vm237_vm2, %v7333_v41  ;;  %663 = vst.msk [vmem:[#allocation2 + $0xd48] sm:$0xff] %vm237_vm2, %v7333_v41  ;;  %p7276_p0 = scmp.lt.s32.totalorder %s11037_s9, %s7274_s26 }
  0x34   : > { %6765 = vmatmul.mubr.msk.f32.gmra.mxu1 %vm1393_vm1, %v1389_v34  ;;  %6743 = vmatprep.mubr.msk.f32.mxu0 %vm1393_vm1, %v1374_v35  ;;  %664 = vst.msk [vmem:[#allocation2 + $0xd50] sm:$0xff] %vm237_vm2, %v7333_v41  ;;  %665 = vst.msk [vmem:[#allocation2 + $0xd58] sm:$0xff] %vm237_vm2, %v7333_v41 }
  0x35   : > { %6767 = vmatprep.mubr.msk.f32.mxu1 %vm1393_vm1, %v1390_v36  ;;  %666 = vst.msk [vmem:[#allocation2 + $0xd60] sm:$0xff] %vm237_vm2, %v7333_v41  ;;  %673 = vst.msk [vmem:[#allocation2 + $0xd98] sm:$0xff] %vm237_vm2, %v7333_v41 }
  0x36   : > { %674 = vst.msk [vmem:[#allocation2 + $0xda0] sm:$0xff] %vm237_vm2, %v7333_v41  ;;  %675 = vst.msk [vmem:[#allocation2 + $0xda8] sm:$0xff] %vm237_vm2, %v7333_v41 }
  0x37   : > { %6744 = vmatmul.mubr.msk.f32.gmra.mxu0 %vm1393_vm1, %v1375_v37  ;;  %676 = vst.msk [vmem:[#allocation2 + $0xdb0] sm:$0xff] %vm237_vm2, %v7333_v41  ;;  %677 = vst.msk [vmem:[#allocation2 + $0xdb8] sm:$0xff] %vm237_vm2, %v7333_v41 }
  0x38   : > { %6768 = vmatmul.mubr.msk.f32.gmra.mxu1 %vm1393_vm1, %v1391_v38  ;;  %6822 = vmatprep.mubr.msk.f32.mxu0 %vm1393_vm1, %v7446_v4  ;;  %678 = vst.msk [vmem:[#allocation2 + $0xdc0] sm:$0xff] %vm237_vm2, %v7333_v41  ;;  %685 = vst.msk [vmem:[#allocation2 + $0xdf8] sm:$0xff] %vm237_vm2, %v7333_v41 }
  0x39   : > { %6772 = vmatprep.mubr.msk.f32.mxu1 %vm1393_vm1, %v7446_v4  ;;  %686 = vst.msk [vmem:[#allocation2 + $0xe00] sm:$0xff] %vm237_vm2, %v7333_v41  ;;  %687 = vst.msk [vmem:[#allocation2 + $0xe08] sm:$0xff] %vm237_vm2, %v7333_v41  ;;  %v8195_v4 = vld [vmem:[%s7443_s23 + $0x20] sm:$0xff] }
  0x3a   : > { %688 = vst.msk [vmem:[#allocation2 + $0xe10] sm:$0xff] %vm237_vm2, %v7333_v41  ;;  %689 = vst.msk [vmem:[#allocation2 + $0xe18] sm:$0xff] %vm237_vm2, %v7333_v41 }
  0x3b   : > { %6823 = vmatmul.mubr.msk.f32.vlgmr.msra.gmra.mxu0 %vm1393_vm1, %v7450_v6  ;;  %690 = vst.msk [vmem:[#allocation2 + $0xe20] sm:$0xff] %vm237_vm2, %v7333_v41  ;;  %697 = vst.msk [vmem:[#allocation2 + $0xe58] sm:$0xff] %vm237_vm2, %v7333_v41 }
  0x3c   : > { %6773 = vmatmul.mubr.msk.f32.vlgmr.msra.gmra.mxu1 %vm1393_vm1, %v7450_v6  ;;  %6825 = vmatprep.mubr.msk.f32.mxu0 %vm1393_vm1, %v7457_v8  ;;  %698 = vst.msk [vmem:[#allocation2 + $0xe60] sm:$0xff] %vm237_vm2, %v7333_v41  ;;  %699 = vst.msk [vmem:[#allocation2 + $0xe68] sm:$0xff] %vm237_vm2, %v7333_v41  ;;  %v8209_v6 = vld [vmem:[%s7443_s23 + $0x30] sm:$0xff] }
  0x3d   : > { %6871 = vmatpush3.msk.msra.mxu1 %vm1490_vm0, %v7466_v10  ;;  %6775 = vmatprep.mubr.msk.f32.mxu1 %vm1393_vm1, %v7457_v8  ;;  %700 = vst.msk [vmem:[#allocation2 + $0xe70] sm:$0xff] %vm237_vm2, %v7333_v41  ;;  %701 = vst.msk [vmem:[#allocation2 + $0xe78] sm:$0xff] %vm237_vm2, %v7333_v41  ;;  %v8223_v8 = vld [vmem:[%s7443_s23 + $0x40] sm:$0xff]  ;;  %v8237_v10 = vld [vmem:[%s7443_s23 + $0x50] sm:$0xff] }
  0x3e   : > { %6921 = vmatpush3.msk.msra.mxu0 %vm1490_vm0, %v7471_v11  ;;  %6970 = vmatprep.subr.msk.mxu1 %vm1490_vm0, %v6272_v39  ;;  %702 = vst.msk [vmem:[#allocation2 + $0xe80] sm:$0xff] %vm237_vm2, %v7333_v41  ;;  %709 = vst.msk [vmem:[#allocation2 + $0xeb8] sm:$0xff] %vm237_vm2, %v7333_v41  ;;  %v8244_v11 = vld [vmem:[%s7443_s23 + $0x58] sm:$0xff] }
  0x3f   : > { %7020 = vmatprep.subr.msk.mxu0 %vm1490_vm0, %v6306_v40  ;;  %6826 = vmatmul.mubr.msk.f32.gmra.mxu0 %vm1393_vm1, %v7477_v12  ;;  %710 = vst.msk [vmem:[#allocation2 + $0xec0] sm:$0xff] %vm237_vm2, %v7333_v41  ;;  %714 = vst.msk [vmem:[#allocation2 + $0xee0] sm:$0xff] %vm237_vm2, %v7333_v41  ;;  %v2082_v39 = vld [vmem:[#allocation2 + $0xb5c] sm:$0xff] }
  0x40   : > { %6776 = vmatmul.mubr.msk.f32.gmra.mxu1 %vm1393_vm1, %v7477_v12  ;;  %6828 = vmatprep.mubr.msk.f32.mxu0 %vm1393_vm1, %v7482_v14  ;;  %722 = vst.msk [vmem:[#allocation2 + $0x1518] sm:$0xff] %vm237_vm2, %v7333_v41  ;;  %723 = vst.msk [vmem:[#allocation2 + $0x1520] sm:$0xff] %vm237_vm2, %v7333_v41  ;;  %v8251_v12 = vld [vmem:[%s7443_s23 + $0x60] sm:$0xff] }
  0x41   : > { %6778 = vmatprep.mubr.msk.f32.mxu1 %vm1393_vm1, %v7482_v14  ;;  %724 = vst.msk [vmem:[#allocation2 + $0x1528] sm:$0xff] %vm237_vm2, %v7333_v41  ;;  %725 = vst.msk [vmem:[#allocation2 + $0x1530] sm:$0xff] %vm237_vm2, %v7333_v41  ;;  %v8265_v14 = vld [vmem:[%s7443_s23 + $0x70] sm:$0xff] }
  0x42   : > { %726 = vst.msk [vmem:[#allocation2 + $0x1538] sm:$0xff] %vm237_vm2, %v7333_v41  ;;  %727 = vst.msk [vmem:[#allocation2 + $0x1540] sm:$0xff] %vm237_vm2, %v7333_v41 }
  0x43   : > { %6829 = vmatmul.mubr.msk.f32.gmra.mxu0 %vm1393_vm1, %v7500_v17  ;;  %734 = vst.msk [vmem:[#allocation2 + $0x1578] sm:$0xff] %vm237_vm2, %v7333_v41  ;;  %735 = vst.msk [vmem:[#allocation2 + $0x1580] sm:$0xff] %vm237_vm2, %v7333_v41 }
  0x44   : > { %6779 = vmatmul.mubr.msk.f32.gmra.mxu1 %vm1393_vm1, %v7500_v17  ;;  %6831 = vmatprep.mubr.msk.f32.mxu0 %vm1393_vm1, %v7504_v19  ;;  %736 = vst.msk [vmem:[#allocation2 + $0x1588] sm:$0xff] %vm237_vm2, %v7333_v41  ;;  %737 = vst.msk [vmem:[#allocation2 + $0x1590] sm:$0xff] %vm237_vm2, %v7333_v41 }
  0x45   : > { %6781 = vmatprep.mubr.msk.f32.mxu1 %vm1393_vm1, %v7504_v19  ;;  %738 = vst.msk [vmem:[#allocation2 + $0x1598] sm:$0xff] %vm237_vm2, %v7333_v41  ;;  %739 = vst.msk [vmem:[#allocation2 + $0x15a0] sm:$0xff] %vm237_vm2, %v7333_v41  ;;  %v2078_v19 = vld [vmem:[#allocation2 + $0xa9c] sm:$0xff] }
  0x46   : > { %746 = vst.msk [vmem:[#allocation2 + $0x15d8] sm:$0xff] %vm237_vm2, %v7333_v41  ;;  %747 = vst.msk [vmem:[#allocation2 + $0x15e0] sm:$0xff] %vm237_vm2, %v7333_v41 }
  0x47   : > { %6832 = vmatmul.mubr.msk.f32.gmra.mxu0 %vm1393_vm1, %v1367_v21  ;;  %748 = vst.msk [vmem:[#allocation2 + $0x15e8] sm:$0xff] %vm237_vm2, %v7333_v41  ;;  %749 = vst.msk [vmem:[#allocation2 + $0x15f0] sm:$0xff] %vm237_vm2, %v7333_v41 }
  0x48   : > { %6782 = vmatmul.mubr.msk.f32.gmra.mxu1 %vm1393_vm1, %v1367_v21  ;;  %6834 = vmatprep.mubr.msk.f32.mxu0 %vm1393_vm1, %v1368_v23  ;;  %750 = vst.msk [vmem:[#allocation2 + $0x15f8] sm:$0xff] %vm237_vm2, %v7333_v41  ;;  %751 = vst.msk [vmem:[#allocation2 + $0x1600] sm:$0xff] %vm237_vm2, %v7333_v41 }
  0x49   : > { %6784 = vmatprep.mubr.msk.f32.mxu1 %vm1393_vm1, %v1368_v23  ;;  %758 = vst.msk [vmem:[#allocation2 + $0x1638] sm:$0xff] %vm237_vm2, %v7333_v41  ;;  %759 = vst.msk [vmem:[#allocation2 + $0x1640] sm:$0xff] %vm237_vm2, %v7333_v41 }
  0x4a   : > { %760 = vst.msk [vmem:[#allocation2 + $0x1648] sm:$0xff] %vm237_vm2, %v7333_v41  ;;  %761 = vst.msk [vmem:[#allocation2 + $0x1650] sm:$0xff] %vm237_vm2, %v7333_v41 }
  0x4b   : > { %6835 = vmatmul.mubr.msk.f32.gmra.mxu0 %vm1393_vm1, %v1369_v25  ;;  %762 = vst.msk [vmem:[#allocation2 + $0x1658] sm:$0xff] %vm237_vm2, %v7333_v41  ;;  %763 = vst.msk [vmem:[#allocation2 + $0x1660] sm:$0xff] %vm237_vm2, %v7333_v41 }
  0x4c   : > { %6785 = vmatmul.mubr.msk.f32.gmra.mxu1 %vm1393_vm1, %v1369_v25  ;;  %6837 = vmatprep.mubr.msk.f32.mxu0 %vm1393_vm1, %v1370_v27  ;;  %770 = vst.msk [vmem:[#allocation2 + $0x1698] sm:$0xff] %vm237_vm2, %v7333_v41  ;;  %771 = vst.msk [vmem:[#allocation2 + $0x16a0] sm:$0xff] %vm237_vm2, %v7333_v41  ;;  %v2468_v25 = vld [vmem:[#allocation2 + $0xaa8] sm:$0xff] }
  0x4d   : > { %6787 = vmatprep.mubr.msk.f32.mxu1 %vm1393_vm1, %v1370_v27  ;;  %772 = vst.msk [vmem:[#allocation2 + $0x16a8] sm:$0xff] %vm237_vm2, %v7333_v41  ;;  %773 = vst.msk [vmem:[#allocation2 + $0x16b0] sm:$0xff] %vm237_vm2, %v7333_v41 }
  0x4e   : > { %774 = vst.msk [vmem:[#allocation2 + $0x16b8] sm:$0xff] %vm237_vm2, %v7333_v41  ;;  %775 = vst.msk [vmem:[#allocation2 + $0x16c0] sm:$0xff] %vm237_vm2, %v7333_v41 }
  0x4f   : > { %6838 = vmatmul.mubr.msk.f32.gmra.mxu0 %vm1393_vm1, %v1371_v29  ;;  %782 = vst.msk [vmem:[#allocation2 + $0x16f8] sm:$0xff] %vm237_vm2, %v7333_v41  ;;  %783 = vst.msk [vmem:[#allocation2 + $0x1700] sm:$0xff] %vm237_vm2, %v7333_v41 }
  0x50   : > { %6788 = vmatmul.mubr.msk.f32.gmra.mxu1 %vm1393_vm1, %v1371_v29  ;;  %6840 = vmatprep.mubr.msk.f32.mxu0 %vm1393_vm1, %v1372_v31  ;;  %784 = vst.msk [vmem:[#allocation2 + $0x1708] sm:$0xff] %vm237_vm2, %v7333_v41  ;;  %785 = vst.msk [vmem:[#allocation2 + $0x1710] sm:$0xff] %vm237_vm2, %v7333_v41 }
  0x51   : > { %6790 = vmatprep.mubr.msk.f32.mxu1 %vm1393_vm1, %v1372_v31  ;;  %786 = vst.msk [vmem:[#allocation2 + $0x1718] sm:$0xff] %vm237_vm2, %v7333_v41  ;;  %787 = vst.msk [vmem:[#allocation2 + $0x1720] sm:$0xff] %vm237_vm2, %v7333_v41  ;;  %v2858_v31 = vld [vmem:[#allocation2 + $0xab4] sm:$0xff] }
  0x52   : > { %794 = vst.msk [vmem:[#allocation2 + $0x1758] sm:$0xff] %vm237_vm2, %v7333_v41  ;;  %795 = vst.msk [vmem:[#allocation2 + $0x1760] sm:$0xff] %vm237_vm2, %v7333_v41 }
  0x53   : > { %6841 = vmatmul.mubr.msk.f32.gmra.mxu0 %vm1393_vm1, %v1373_v33  ;;  %796 = vst.msk [vmem:[#allocation2 + $0x1768] sm:$0xff] %vm237_vm2, %v7333_v41  ;;  %797 = vst.msk [vmem:[#allocation2 + $0x1770] sm:$0xff] %vm237_vm2, %v7333_v41 }
  0x54   : > { %6791 = vmatmul.mubr.msk.f32.gmra.mxu1 %vm1393_vm1, %v1373_v33  ;;  %6843 = vmatprep.mubr.msk.f32.mxu0 %vm1393_vm1, %v1374_v35  ;;  %798 = vst.msk [vmem:[#allocation2 + $0x1778] sm:$0xff] %vm237_vm2, %v7333_v41  ;;  %799 = vst.msk [vmem:[#allocation2 + $0x1780] sm:$0xff] %vm237_vm2, %v7333_v41 }
  0x55   : > { %6793 = vmatprep.mubr.msk.f32.mxu1 %vm1393_vm1, %v1374_v35  ;;  %806 = vst.msk [vmem:[#allocation2 + $0x17b8] sm:$0xff] %vm237_vm2, %v7333_v41  ;;  %807 = vst.msk [vmem:[#allocation2 + $0x17c0] sm:$0xff] %vm237_vm2, %v7333_v41 }
  0x56   : > { %808 = vst.msk [vmem:[#allocation2 + $0x17c8] sm:$0xff] %vm237_vm2, %v7333_v41  ;;  %809 = vst.msk [vmem:[#allocation2 + $0x17d0] sm:$0xff] %vm237_vm2, %v7333_v41 }
  0x57   : > { %810 = vst.msk [vmem:[#allocation2 + $0x17d8] sm:$0xff] %vm237_vm2, %v7333_v41  ;;  %811 = vst.msk [vmem:[#allocation2 + $0x17e0] sm:$0xff] %vm237_vm2, %v7333_v41  ;;  %6844 = vmatmul.mubr.msk.f32.gmra.mxu0 %vm1393_vm1, %v8022_v42 }
  0x58   : > { %818 = vst.msk [vmem:[#allocation2 + $0x1818] sm:$0xff] %vm237_vm2, %v7333_v41  ;;  %819 = vst.msk [vmem:[#allocation2 + $0x1820] sm:$0xff] %vm237_vm2, %v7333_v41  ;;  %6794 = vmatmul.mubr.msk.f32.gmra.mxu1 %vm1393_vm1, %v8022_v42  ;;  %6846 = vmatprep.mubr.msk.f32.mxu0 %vm1393_vm1, %v8032_v44 }
  0x59   : > { %820 = vst.msk [vmem:[#allocation2 + $0x1828] sm:$0xff] %vm237_vm2, %v7333_v41  ;;  %821 = vst.msk [vmem:[#allocation2 + $0x1830] sm:$0xff] %vm237_vm2, %v7333_v41  ;;  %6796 = vmatprep.mubr.msk.f32.mxu1 %vm1393_vm1, %v8032_v44 }
  0x5a   : > { %822 = vst.msk [vmem:[#allocation2 + $0x1838] sm:$0xff] %vm237_vm2, %v7333_v41  ;;  %823 = vst.msk [vmem:[#allocation2 + $0x1840] sm:$0xff] %vm237_vm2, %v7333_v41 }
  0x5b   : > { %830 = vst.msk [vmem:[#allocation2 + $0x1878] sm:$0xff] %vm237_vm2, %v7333_v41  ;;  %831 = vst.msk [vmem:[#allocation2 + $0x1880] sm:$0xff] %vm237_vm2, %v7333_v41  ;;  %6847 = vmatmul.mubr.msk.f32.gmra.mxu0 %vm1393_vm1, %v8040_v45 }
  0x5c   : > { %832 = vst.msk [vmem:[#allocation2 + $0x1888] sm:$0xff] %vm237_vm2, %v7333_v41  ;;  %833 = vst.msk [vmem:[#allocation2 + $0x1890] sm:$0xff] %vm237_vm2, %v7333_v41  ;;  %6797 = vmatmul.mubr.msk.f32.gmra.mxu1 %vm1393_vm1, %v8040_v45  ;;  %6849 = vmatprep.mubr.msk.f32.mxu0 %vm1393_vm1, %v8047_v46 }
  0x5d   : > { %834 = vst.msk [vmem:[#allocation2 + $0x1898] sm:$0xff] %vm237_vm2, %v7333_v41  ;;  %835 = vst.msk [vmem:[#allocation2 + $0x18a0] sm:$0xff] %vm237_vm2, %v7333_v41  ;;  %6799 = vmatprep.mubr.msk.f32.mxu1 %vm1393_vm1, %v8047_v46 }
  0x5e   : > { %842 = vst.msk [vmem:[#allocation2 + $0x18d8] sm:$0xff] %vm237_vm2, %v7333_v41  ;;  %843 = vst.msk [vmem:[#allocation2 + $0x18e0] sm:$0xff] %vm237_vm2, %v7333_v41 }
  0x5f   : > { %844 = vst.msk [vmem:[#allocation2 + $0x18e8] sm:$0xff] %vm237_vm2, %v7333_v41  ;;  %845 = vst.msk [vmem:[#allocation2 + $0x18f0] sm:$0xff] %vm237_vm2, %v7333_v41  ;;  %6850 = vmatmul.mubr.msk.f32.gmra.mxu0 %vm1393_vm1, %v8054_v47 }
  0x60   : > { %846 = vst.msk [vmem:[#allocation2 + $0x18f8] sm:$0xff] %vm237_vm2, %v7333_v41  ;;  %847 = vst.msk [vmem:[#allocation2 + $0x1900] sm:$0xff] %vm237_vm2, %v7333_v41  ;;  %6800 = vmatmul.mubr.msk.f32.gmra.mxu1 %vm1393_vm1, %v8054_v47  ;;  %6852 = vmatprep.mubr.msk.f32.mxu0 %vm1393_vm1, %v8061_v48 }
  0x61   : > { %854 = vst.msk [vmem:[#allocation2 + $0x1938] sm:$0xff] %vm237_vm2, %v7333_v41  ;;  %855 = vst.msk [vmem:[#allocation2 + $0x1940] sm:$0xff] %vm237_vm2, %v7333_v41  ;;  %6802 = vmatprep.mubr.msk.f32.mxu1 %vm1393_vm1, %v8061_v48 }
  0x62   : > { %856 = vst.msk [vmem:[#allocation2 + $0x1948] sm:$0xff] %vm237_vm2, %v7333_v41  ;;  %857 = vst.msk [vmem:[#allocation2 + $0x1950] sm:$0xff] %vm237_vm2, %v7333_v41 }
  0x63   : > { %858 = vst.msk [vmem:[#allocation2 + $0x1958] sm:$0xff] %vm237_vm2, %v7333_v41  ;;  %859 = vst.msk [vmem:[#allocation2 + $0x1960] sm:$0xff] %vm237_vm2, %v7333_v41  ;;  %6853 = vmatmul.mubr.msk.f32.gmra.mxu0 %vm1393_vm1, %v8068_v49 }
  0x64   : > { %1203 = vst.msk [vmem:[#allocation2 + $0xf18] sm:$0xff] %vm237_vm2, %v7333_v41  ;;  %1204 = vst.msk [vmem:[#allocation2 + $0xf20] sm:$0xff] %vm237_vm2, %v7333_v41  ;;  %6803 = vmatmul.mubr.msk.f32.gmra.mxu1 %vm1393_vm1, %v8068_v49  ;;  %6855 = vmatprep.mubr.msk.f32.mxu0 %vm1393_vm1, %v8075_v50 }
  0x65   : > { %1208 = vst.msk [vmem:[#allocation2 + $0xf78] sm:$0xff] %vm237_vm2, %v7333_v41  ;;  %1209 = vst.msk [vmem:[#allocation2 + $0xf80] sm:$0xff] %vm237_vm2, %v7333_v41  ;;  %6805 = vmatprep.mubr.msk.f32.mxu1 %vm1393_vm1, %v8075_v50 }
  0x66   : > { %1213 = vst.msk [vmem:[#allocation2 + $0xfd8] sm:$0xff] %vm237_vm2, %v7333_v41  ;;  %1214 = vst.msk [vmem:[#allocation2 + $0xfe0] sm:$0xff] %vm237_vm2, %v7333_v41 }
  0x67   : > { %1218 = vst.msk [vmem:[#allocation2 + $0x1038] sm:$0xff] %vm237_vm2, %v7333_v41  ;;  %1219 = vst.msk [vmem:[#allocation2 + $0x1040] sm:$0xff] %vm237_vm2, %v7333_v41  ;;  %6856 = vmatmul.mubr.msk.f32.gmra.mxu0 %vm1393_vm1, %v8082_v51 }
  0x68   : > { %1223 = vst.msk [vmem:[#allocation2 + $0x1098] sm:$0xff] %vm237_vm2, %v7333_v41  ;;  %1224 = vst.msk [vmem:[#allocation2 + $0x10a0] sm:$0xff] %vm237_vm2, %v7333_v41  ;;  %6806 = vmatmul.mubr.msk.f32.gmra.mxu1 %vm1393_vm1, %v8082_v51  ;;  %6858 = vmatprep.mubr.msk.f32.mxu0 %vm1393_vm1, %v8089_v52 }
  0x69   : > { %1228 = vst.msk [vmem:[#allocation2 + $0x10f8] sm:$0xff] %vm237_vm2, %v7333_v41  ;;  %1229 = vst.msk [vmem:[#allocation2 + $0x1100] sm:$0xff] %vm237_vm2, %v7333_v41  ;;  %6808 = vmatprep.mubr.msk.f32.mxu1 %vm1393_vm1, %v8089_v52 }
  0x6a   : > { %1233 = vst.msk [vmem:[#allocation2 + $0x1158] sm:$0xff] %vm237_vm2, %v7333_v41  ;;  %1234 = vst.msk [vmem:[#allocation2 + $0x1160] sm:$0xff] %vm237_vm2, %v7333_v41 }
  0x6b   : > { %1238 = vst.msk [vmem:[#allocation2 + $0x11b8] sm:$0xff] %vm237_vm2, %v7333_v41  ;;  %1239 = vst.msk [vmem:[#allocation2 + $0x11c0] sm:$0xff] %vm237_vm2, %v7333_v41  ;;  %6859 = vmatmul.mubr.msk.f32.gmra.mxu0 %vm1393_vm1, %v8096_v53  ;;  %v3248_v35 = vld [vmem:[#allocation2 + $0xf1c] sm:$0xff] }
  0x6c   : > { %1243 = vst.msk [vmem:[#allocation2 + $0x1218] sm:$0xff] %vm237_vm2, %v7333_v41  ;;  %1244 = vst.msk [vmem:[#allocation2 + $0x1220] sm:$0xff] %vm237_vm2, %v7333_v41  ;;  %6809 = vmatmul.mubr.msk.f32.gmra.mxu1 %vm1393_vm1, %v8096_v53  ;;  %6861 = vmatprep.mubr.msk.f32.mxu0 %vm1393_vm1, %v8103_v54 }
  0x6d   : > { %1248 = vst.msk [vmem:[#allocation2 + $0x1278] sm:$0xff] %vm237_vm2, %v7333_v41  ;;  %1249 = vst.msk [vmem:[#allocation2 + $0x1280] sm:$0xff] %vm237_vm2, %v7333_v41  ;;  %6811 = vmatprep.mubr.msk.f32.mxu1 %vm1393_vm1, %v8103_v54 }
  0x6e   : > { %1253 = vst.msk [vmem:[#allocation2 + $0x12d8] sm:$0xff] %vm237_vm2, %v7333_v41  ;;  %1254 = vst.msk [vmem:[#allocation2 + $0x12e0] sm:$0xff] %vm237_vm2, %v7333_v41 }
  0x6f   : > { %1258 = vst.msk [vmem:[#allocation2 + $0x1338] sm:$0xff] %vm237_vm2, %v7333_v41  ;;  %1259 = vst.msk [vmem:[#allocation2 + $0x1340] sm:$0xff] %vm237_vm2, %v7333_v41  ;;  %6862 = vmatmul.mubr.msk.f32.gmra.mxu0 %vm1393_vm1, %v8110_v55 }
  0x70   : > { %1263 = vst.msk [vmem:[#allocation2 + $0x1398] sm:$0xff] %vm237_vm2, %v7333_v41  ;;  %1264 = vst.msk [vmem:[#allocation2 + $0x13a0] sm:$0xff] %vm237_vm2, %v7333_v41  ;;  %6812 = vmatmul.mubr.msk.f32.gmra.mxu1 %vm1393_vm1, %v8110_v55  ;;  %6864 = vmatprep.mubr.msk.f32.mxu0 %vm1393_vm1, %v8117_v56 }
  0x71   : > { %1268 = vst.msk [vmem:[#allocation2 + $0x13f8] sm:$0xff] %vm237_vm2, %v7333_v41  ;;  %1269 = vst.msk [vmem:[#allocation2 + $0x1400] sm:$0xff] %vm237_vm2, %v7333_v41  ;;  %6814 = vmatprep.mubr.msk.f32.mxu1 %vm1393_vm1, %v8117_v56 }
  0x72   : > { %1273 = vst.msk [vmem:[#allocation2 + $0x1458] sm:$0xff] %vm237_vm2, %v7333_v41  ;;  %1274 = vst.msk [vmem:[#allocation2 + $0x1460] sm:$0xff] %vm237_vm2, %v7333_v41 }
  0x73   : > { %1278 = vst.msk [vmem:[#allocation2 + $0x14b8] sm:$0xff] %vm237_vm2, %v7333_v41  ;;  %1279 = vst.msk [vmem:[#allocation2 + $0x14c0] sm:$0xff] %vm237_vm2, %v7333_v41  ;;  %6865 = vmatmul.mubr.msk.f32.gmra.mxu0 %vm1393_vm1, %v8124_v57 }
  0x74   : > { %1280 = vst.msk [vmem:[#allocation2 + $0xf38] sm:$0xff] %vm237_vm2, %v7333_v41  ;;  %1281 = vst.msk [vmem:[#allocation2 + $0xf40] sm:$0xff] %vm237_vm2, %v7333_v41  ;;  %6815 = vmatmul.mubr.msk.f32.gmra.mxu1 %vm1393_vm1, %v8124_v57  ;;  %6867 = vmatprep.mubr.msk.f32.mxu0 %vm1393_vm1, %v8131_v58 }
  0x75   : > { %1285 = vst.msk [vmem:[#allocation2 + $0xf98] sm:$0xff] %vm237_vm2, %v7333_v41  ;;  %1286 = vst.msk [vmem:[#allocation2 + $0xfa0] sm:$0xff] %vm237_vm2, %v7333_v41  ;;  %6817 = vmatprep.mubr.msk.f32.mxu1 %vm1393_vm1, %v8131_v58 }
  0x76   : > { %1290 = vst.msk [vmem:[#allocation2 + $0xff8] sm:$0xff] %vm237_vm2, %v7333_v41  ;;  %1291 = vst.msk [vmem:[#allocation2 + $0x1000] sm:$0xff] %vm237_vm2, %v7333_v41 }
  0x77   : > { %1295 = vst.msk [vmem:[#allocation2 + $0x1058] sm:$0xff] %vm237_vm2, %v7333_v41  ;;  %1296 = vst.msk [vmem:[#allocation2 + $0x1060] sm:$0xff] %vm237_vm2, %v7333_v41  ;;  %6868 = vmatmul.mubr.msk.f32.gmra.mxu0 %vm1393_vm1, %v8138_v59 }
  0x78   : > { %1300 = vst.msk [vmem:[#allocation2 + $0x10b8] sm:$0xff] %vm237_vm2, %v7333_v41  ;;  %1301 = vst.msk [vmem:[#allocation2 + $0x10c0] sm:$0xff] %vm237_vm2, %v7333_v41  ;;  %6818 = vmatmul.mubr.msk.f32.gmra.mxu1 %vm1393_vm1, %v8138_v59  ;;  %6922 = vmatprep.mubr.msk.f32.mxu0 %vm1393_vm1, %v8145_v60 }
  0x79   : > { %1305 = vst.msk [vmem:[#allocation2 + $0x1118] sm:$0xff] %vm237_vm2, %v7333_v41  ;;  %1306 = vst.msk [vmem:[#allocation2 + $0x1120] sm:$0xff] %vm237_vm2, %v7333_v41  ;;  %6872 = vmatprep.mubr.msk.f32.mxu1 %vm1393_vm1, %v8145_v60 }
  0x7a   : > { %1310 = vst.msk [vmem:[#allocation2 + $0x1178] sm:$0xff] %vm237_vm2, %v7333_v41  ;;  %1311 = vst.msk [vmem:[#allocation2 + $0x1180] sm:$0xff] %vm237_vm2, %v7333_v41 }
  0x7b   : > { %1315 = vst.msk [vmem:[#allocation2 + $0x11d8] sm:$0xff] %vm237_vm2, %v7333_v41  ;;  %1316 = vst.msk [vmem:[#allocation2 + $0x11e0] sm:$0xff] %vm237_vm2, %v7333_v41  ;;  %6923 = vmatmul.mubr.msk.f32.vlgmr.msra.gmra.mxu0 %vm1393_vm1, %v8152_v61 }
  0x7c   : > { %1320 = vst.msk [vmem:[#allocation2 + $0x1238] sm:$0xff] %vm237_vm2, %v7333_v41  ;;  %1321 = vst.msk [vmem:[#allocation2 + $0x1240] sm:$0xff] %vm237_vm2, %v7333_v41  ;;  %6873 = vmatmul.mubr.msk.f32.vlgmr.msra.gmra.mxu1 %vm1393_vm1, %v8152_v61  ;;  %6925 = vmatprep.mubr.msk.f32.mxu0 %vm1393_vm1, %v8173_v1 }
  0x7d   : > { %1325 = vst.msk [vmem:[#allocation2 + $0x1298] sm:$0xff] %vm237_vm2, %v7333_v41  ;;  %1326 = vst.msk [vmem:[#allocation2 + $0x12a0] sm:$0xff] %vm237_vm2, %v7333_v41  ;;  %6971 = vmatpush3.msk.msra.mxu1 %vm1490_vm0, %v7236_v0  ;;  %6875 = vmatprep.mubr.msk.f32.mxu1 %vm1393_vm1, %v8173_v1  ;;  %v2472_v0 = vld [vmem:[#allocation2 + $0xb68] sm:$0xff] }
  0x7e   : > { %1330 = vst.msk [vmem:[#allocation2 + $0x12f8] sm:$0xff] %vm237_vm2, %v7333_v41  ;;  %1331 = vst.msk [vmem:[#allocation2 + $0x1300] sm:$0xff] %vm237_vm2, %v7333_v41  ;;  %7021 = vmatpush3.msk.msra.mxu0 %vm1490_vm0, %v7238_v2  ;;  %7070 = vmatprep.subr.msk.mxu1 %vm1490_vm0, %v8161_v62 }
  0x7f   : > { %1335 = vst.msk [vmem:[#allocation2 + $0x1358] sm:$0xff] %vm237_vm2, %v7333_v41  ;;  %1336 = vst.msk [vmem:[#allocation2 + $0x1360] sm:$0xff] %vm237_vm2, %v7333_v41  ;;  %7120 = vmatprep.subr.msk.mxu0 %vm1490_vm0, %v8166_v63  ;;  %6926 = vmatmul.mubr.msk.f32.gmra.mxu0 %vm1393_vm1, %v8188_v3 }
  0x80   : > { %1340 = vst.msk [vmem:[#allocation2 + $0x13b8] sm:$0xff] %vm237_vm2, %v7333_v41  ;;  %1341 = vst.msk [vmem:[#allocation2 + $0x13c0] sm:$0xff] %vm237_vm2, %v7333_v41  ;;  %6876 = vmatmul.mubr.msk.f32.gmra.mxu1 %vm1393_vm1, %v8188_v3  ;;  %6928 = vmatprep.mubr.msk.f32.mxu0 %vm1393_vm1, %v8195_v4 }
  0x81   : > { %1345 = vst.msk [vmem:[#allocation2 + $0x1418] sm:$0xff] %vm237_vm2, %v7333_v41  ;;  %1346 = vst.msk [vmem:[#allocation2 + $0x1420] sm:$0xff] %vm237_vm2, %v7333_v41  ;;  %6878 = vmatprep.mubr.msk.f32.mxu1 %vm1393_vm1, %v8195_v4 }
  0x82   : > { %1350 = vst.msk [vmem:[#allocation2 + $0x1478] sm:$0xff] %vm237_vm2, %v7333_v41  ;;  %1351 = vst.msk [vmem:[#allocation2 + $0x1480] sm:$0xff] %vm237_vm2, %v7333_v41 }
  0x83   : > { %1355 = vst.msk [vmem:[#allocation2 + $0x14d8] sm:$0xff] %vm237_vm2, %v7333_v41  ;;  %1356 = vst.msk [vmem:[#allocation2 + $0x14e0] sm:$0xff] %vm237_vm2, %v7333_v41  ;;  %6929 = vmatmul.mubr.msk.f32.gmra.mxu0 %vm1393_vm1, %v8202_v5 }
  0x84   : > { %6879 = vmatmul.mubr.msk.f32.gmra.mxu1 %vm1393_vm1, %v8202_v5  ;;  %6931 = vmatprep.mubr.msk.f32.mxu0 %vm1393_vm1, %v8209_v6  ;;  %4899 = vst.msk [vmem:[%s8433_s11 + $0x88] sm:$0xff] %vm4881_vm3, %v6408_v15  ;;  %4882 = vst.msk [vmem:[%s8433_s11] sm:$0xff] %vm4881_vm3, %v6408_v15 }
  0x85   : > { %6881 = vmatprep.mubr.msk.f32.mxu1 %vm1393_vm1, %v8209_v6  ;;  %4883 = vst.msk [vmem:[%s8433_s11 + $0x8] sm:$0xff] %vm4881_vm3, %v6408_v15  ;;  %4884 = vst.msk [vmem:[%s8433_s11 + $0x10] sm:$0xff] %vm4881_vm3, %v6408_v15 }
  0x86   : > { %4885 = vst.msk [vmem:[%s8433_s11 + $0x18] sm:$0xff] %vm4881_vm3, %v6408_v15  ;;  %4886 = vst.msk [vmem:[%s8433_s11 + $0x20] sm:$0xff] %vm4881_vm3, %v6408_v15 }
  0x87   : > { %6932 = vmatmul.mubr.msk.f32.gmra.mxu0 %vm1393_vm1, %v8216_v7  ;;  %4887 = vst.msk [vmem:[%s8433_s11 + $0x28] sm:$0xff] %vm4881_vm3, %v6408_v15  ;;  %4888 = vst.msk [vmem:[%s8433_s11 + $0x30] sm:$0xff] %vm4881_vm3, %v6408_v15 }
  0x88   : > { %6882 = vmatmul.mubr.msk.f32.gmra.mxu1 %vm1393_vm1, %v8216_v7  ;;  %6934 = vmatprep.mubr.msk.f32.mxu0 %vm1393_vm1, %v8223_v8  ;;  %4889 = vst.msk [vmem:[%s8433_s11 + $0x38] sm:$0xff] %vm4881_vm3, %v6408_v15  ;;  %4890 = vst.msk [vmem:[%s8433_s11 + $0x40] sm:$0xff] %vm4881_vm3, %v6408_v15 }
  0x89   : > { %6884 = vmatprep.mubr.msk.f32.mxu1 %vm1393_vm1, %v8223_v8  ;;  %v8426_v18 = vpop.permute.xlu1 %5549  ;;  %4891 = vst.msk [vmem:[%s8433_s11 + $0x48] sm:$0xff] %vm4881_vm3, %v6408_v15  ;;  %4892 = vst.msk [vmem:[%s8433_s11 + $0x50] sm:$0xff] %vm4881_vm3, %v6408_v15 }
  0x8a   : > { %4893 = vst.msk [vmem:[%s8433_s11 + $0x58] sm:$0xff] %vm4881_vm3, %v6408_v15  ;;  %4894 = vst.msk [vmem:[%s8433_s11 + $0x60] sm:$0xff] %vm4881_vm3, %v6408_v15 }
  0x8b   : > { %6935 = vmatmul.mubr.msk.f32.gmra.mxu0 %vm1393_vm1, %v8230_v9  ;;  %4895 = vst.msk [vmem:[%s8433_s11 + $0x68] sm:$0xff] %vm4881_vm3, %v6408_v15  ;;  %4896 = vst.msk [vmem:[%s8433_s11 + $0x70] sm:$0xff] %vm4881_vm3, %v6408_v15 }
  0x8c   : > { %6885 = vmatmul.mubr.msk.f32.gmra.mxu1 %vm1393_vm1, %v8230_v9  ;;  %6937 = vmatprep.mubr.msk.f32.mxu0 %vm1393_vm1, %v8237_v10  ;;  %4897 = vst.msk [vmem:[%s8433_s11 + $0x78] sm:$0xff] %vm4881_vm3, %v6408_v15  ;;  %4898 = vst.msk [vmem:[%s8433_s11 + $0x80] sm:$0xff] %vm4881_vm3, %v6408_v15 }
  0x8d   : > { %6887 = vmatprep.mubr.msk.f32.mxu1 %vm1393_vm1, %v8237_v10  ;;  %4900 = vst.msk [vmem:[%s8433_s11 + $0x90] sm:$0xff] %vm4881_vm3, %v6408_v15  ;;  %4901 = vst.msk [vmem:[%s8433_s11 + $0x98] sm:$0xff] %vm4881_vm3, %v6408_v15 }
  0x8e   : > { %4902 = vst.msk [vmem:[%s8433_s11 + $0xa0] sm:$0xff] %vm4881_vm3, %v6408_v15  ;;  %4903 = vst.msk [vmem:[%s8433_s11 + $0xa8] sm:$0xff] %vm4881_vm3, %v6408_v15 }
  0x8f   : > { %6938 = vmatmul.mubr.msk.f32.gmra.mxu0 %vm1393_vm1, %v8244_v11  ;;  %4904 = vst.msk [vmem:[%s8433_s11 + $0xb0] sm:$0xff] %vm4881_vm3, %v6408_v15  ;;  %4905 = vst.msk [vmem:[%s8433_s11 + $0xb8] sm:$0xff] %vm4881_vm3, %v6408_v15 }
  0x90   : > { %6888 = vmatmul.mubr.msk.f32.gmra.mxu1 %vm1393_vm1, %v8244_v11  ;;  %6940 = vmatprep.mubr.msk.f32.mxu0 %vm1393_vm1, %v8251_v12  ;;  %4906 = vst.msk [vmem:[%s8433_s11 + $0xc0] sm:$0xff] %vm4881_vm3, %v6408_v15  ;;  %4907 = vst.msk [vmem:[%s8433_s11 + $0xc8] sm:$0xff] %vm4881_vm3, %v6408_v15 }
  0x91   : > { %6890 = vmatprep.mubr.msk.f32.mxu1 %vm1393_vm1, %v8251_v12  ;;  %4908 = vst.msk [vmem:[%s8433_s11 + $0xd0] sm:$0xff] %vm4881_vm3, %v6408_v15  ;;  %4909 = vst.msk [vmem:[%s8433_s11 + $0xd8] sm:$0xff] %vm4881_vm3, %v6408_v15 }
  0x92   : > { %4910 = vst.msk [vmem:[%s8433_s11 + $0xe0] sm:$0xff] %vm4881_vm3, %v6408_v15  ;;  %4911 = vst.msk [vmem:[%s8433_s11 + $0xe8] sm:$0xff] %vm4881_vm3, %v6408_v15 }
  0x93   : > { %6941 = vmatmul.mubr.msk.f32.gmra.mxu0 %vm1393_vm1, %v8258_v13  ;;  %4912 = vst.msk [vmem:[%s8433_s11 + $0xf0] sm:$0xff] %vm4881_vm3, %v6408_v15  ;;  %4913 = vst.msk [vmem:[%s8433_s11 + $0xf8] sm:$0xff] %vm4881_vm3, %v6408_v15 }
  0x94   : > { %6891 = vmatmul.mubr.msk.f32.gmra.mxu1 %vm1393_vm1, %v8258_v13  ;;  %6943 = vmatprep.mubr.msk.f32.mxu0 %vm1393_vm1, %v8265_v14 }
  0x95   : > { %6893 = vmatprep.mubr.msk.f32.mxu1 %vm1393_vm1, %v8265_v14 }
  0x97   : > { %6944 = vmatmul.mubr.msk.f32.gmra.mxu0 %vm1393_vm1, %v8022_v42 }
  0x98   : > { %6894 = vmatmul.mubr.msk.f32.gmra.mxu1 %vm1393_vm1, %v8022_v42  ;;  %6946 = vmatprep.mubr.msk.f32.mxu0 %vm1393_vm1, %v8032_v44 }
  0x99   : > { %6896 = vmatprep.mubr.msk.f32.mxu1 %vm1393_vm1, %v8032_v44 }
  0x9b   : > { %6947 = vmatmul.mubr.msk.f32.gmra.mxu0 %vm1393_vm1, %v8040_v45 }
  0x9c   : > { %6897 = vmatmul.mubr.msk.f32.gmra.mxu1 %vm1393_vm1, %v8040_v45  ;;  %6949 = vmatprep.mubr.msk.f32.mxu0 %vm1393_vm1, %v8047_v46 }
  0x9d   : > { %6899 = vmatprep.mubr.msk.f32.mxu1 %vm1393_vm1, %v8047_v46 }
  0x9f   : > { %6950 = vmatmul.mubr.msk.f32.gmra.mxu0 %vm1393_vm1, %v8054_v47 }
  0xa0   : > { %6900 = vmatmul.mubr.msk.f32.gmra.mxu1 %vm1393_vm1, %v8054_v47  ;;  %6952 = vmatprep.mubr.msk.f32.mxu0 %vm1393_vm1, %v8061_v48 }
  0xa1   : > { %6902 = vmatprep.mubr.msk.f32.mxu1 %vm1393_vm1, %v8061_v48 }
  0xa3   : > { %6953 = vmatmul.mubr.msk.f32.gmra.mxu0 %vm1393_vm1, %v8068_v49 }
  0xa4   : > { %6903 = vmatmul.mubr.msk.f32.gmra.mxu1 %vm1393_vm1, %v8068_v49  ;;  %6955 = vmatprep.mubr.msk.f32.mxu0 %vm1393_vm1, %v8075_v50 }
  0xa5   : > { %6905 = vmatprep.mubr.msk.f32.mxu1 %vm1393_vm1, %v8075_v50 }
  0xa7   : > { %6956 = vmatmul.mubr.msk.f32.gmra.mxu0 %vm1393_vm1, %v8082_v51 }
  0xa8   : > { %6906 = vmatmul.mubr.msk.f32.gmra.mxu1 %vm1393_vm1, %v8082_v51  ;;  %6958 = vmatprep.mubr.msk.f32.mxu0 %vm1393_vm1, %v8089_v52 }
  0xa9   : > { %6908 = vmatprep.mubr.msk.f32.mxu1 %vm1393_vm1, %v8089_v52 }
  0xab   : > { %6959 = vmatmul.mubr.msk.f32.gmra.mxu0 %vm1393_vm1, %v8096_v53 }
  0xac   : > { %6909 = vmatmul.mubr.msk.f32.gmra.mxu1 %vm1393_vm1, %v8096_v53  ;;  %6961 = vmatprep.mubr.msk.f32.mxu0 %vm1393_vm1, %v8103_v54 }
  0xad   : > { %6911 = vmatprep.mubr.msk.f32.mxu1 %vm1393_vm1, %v8103_v54 }
  0xaf   : > { %6962 = vmatmul.mubr.msk.f32.gmra.mxu0 %vm1393_vm1, %v8110_v55 }
  0xb0   : > { %6912 = vmatmul.mubr.msk.f32.gmra.mxu1 %vm1393_vm1, %v8110_v55  ;;  %6964 = vmatprep.mubr.msk.f32.mxu0 %vm1393_vm1, %v8117_v56 }
  0xb1   : > { %6914 = vmatprep.mubr.msk.f32.mxu1 %vm1393_vm1, %v8117_v56 }
  0xb3   : > { %6965 = vmatmul.mubr.msk.f32.gmra.mxu0 %vm1393_vm1, %v8124_v57 }
  0xb4   : > { %6915 = vmatmul.mubr.msk.f32.gmra.mxu1 %vm1393_vm1, %v8124_v57  ;;  %6967 = vmatprep.mubr.msk.f32.mxu0 %vm1393_vm1, %v8131_v58 }
  0xb5   : > { %6917 = vmatprep.mubr.msk.f32.mxu1 %vm1393_vm1, %v8131_v58 }
  0xb7   : > { %6968 = vmatmul.mubr.msk.f32.gmra.mxu0 %vm1393_vm1, %v8138_v59 }
  0xb8   : > { %6918 = vmatmul.mubr.msk.f32.gmra.mxu1 %vm1393_vm1, %v8138_v59  ;;  %7022 = vmatprep.mubr.msk.f32.mxu0 %vm1393_vm1, %v8145_v60 }
  0xb9   : > { %6972 = vmatprep.mubr.msk.f32.mxu1 %vm1393_vm1, %v8145_v60 }
  0xbb   : > { %7023 = vmatmul.mubr.msk.f32.vlgmr.msra.gmra.mxu0 %vm1393_vm1, %v8152_v61 }
  0xbc   : > { %6973 = vmatmul.mubr.msk.f32.vlgmr.msra.gmra.mxu1 %vm1393_vm1, %v8152_v61  ;;  %7121 = vmatpush3.msk.msra.mxu0 %vm1490_vm0, %v8166_v63 }
  0xbd   : > { %7071 = vmatpush3.msk.msra.mxu1 %vm1490_vm0, %v8161_v62  ;;  %6975 = vmatprep.mubr.msk.f32.mxu1 %vm1393_vm1, %v8173_v1 }
  0xbe   : > { %7025 = vmatprep.mubr.msk.f32.mxu0 %vm1393_vm1, %v8173_v1 }
  0xbf   : > { %7026 = vmatmul.mubr.msk.f32.gmra.mxu0 %vm1393_vm1, %v8188_v3 }
  0xc0   : > { %6976 = vmatmul.mubr.msk.f32.gmra.mxu1 %vm1393_vm1, %v8188_v3  ;;  %7028 = vmatprep.mubr.msk.f32.mxu0 %vm1393_vm1, %v8195_v4 }
  0xc1   : > { %6978 = vmatprep.mubr.msk.f32.mxu1 %vm1393_vm1, %v8195_v4 }
  0xc3   : > { %7029 = vmatmul.mubr.msk.f32.gmra.mxu0 %vm1393_vm1, %v8202_v5 }
  0xc4   : > { %6979 = vmatmul.mubr.msk.f32.gmra.mxu1 %vm1393_vm1, %v8202_v5  ;;  %7031 = vmatprep.mubr.msk.f32.mxu0 %vm1393_vm1, %v8209_v6 }
  0xc5   : > { %6981 = vmatprep.mubr.msk.f32.mxu1 %vm1393_vm1, %v8209_v6 }
  0xc7   : > { %7032 = vmatmul.mubr.msk.f32.gmra.mxu0 %vm1393_vm1, %v8216_v7 }
  0xc8   : > { %6982 = vmatmul.mubr.msk.f32.gmra.mxu1 %vm1393_vm1, %v8216_v7  ;;  %7034 = vmatprep.mubr.msk.f32.mxu0 %vm1393_vm1, %v8223_v8 }
  0xc9   : > { %6984 = vmatprep.mubr.msk.f32.mxu1 %vm1393_vm1, %v8223_v8 }
  0xcb   : > { %7035 = vmatmul.mubr.msk.f32.gmra.mxu0 %vm1393_vm1, %v8230_v9 }
  0xcc   : > { %6985 = vmatmul.mubr.msk.f32.gmra.mxu1 %vm1393_vm1, %v8230_v9  ;;  %7037 = vmatprep.mubr.msk.f32.mxu0 %vm1393_vm1, %v8237_v10 }
  0xcd   : > { %6987 = vmatprep.mubr.msk.f32.mxu1 %vm1393_vm1, %v8237_v10 }
  0xcf   : > { %7038 = vmatmul.mubr.msk.f32.gmra.mxu0 %vm1393_vm1, %v8244_v11 }
  0xd0   : > { %6988 = vmatmul.mubr.msk.f32.gmra.mxu1 %vm1393_vm1, %v8244_v11  ;;  %7040 = vmatprep.mubr.msk.f32.mxu0 %vm1393_vm1, %v8251_v12 }
  0xd1   : > { %6990 = vmatprep.mubr.msk.f32.mxu1 %vm1393_vm1, %v8251_v12 }
  0xd3   : > { %7041 = vmatmul.mubr.msk.f32.gmra.mxu0 %vm1393_vm1, %v8258_v13 }
  0xd4   : > { %6991 = vmatmul.mubr.msk.f32.gmra.mxu1 %vm1393_vm1, %v8258_v13  ;;  %7043 = vmatprep.mubr.msk.f32.mxu0 %vm1393_vm1, %v8265_v14 }
  0xd5   : > { %6993 = vmatprep.mubr.msk.f32.mxu1 %vm1393_vm1, %v8265_v14 }
  0xd7   : > { %7044 = vmatmul.mubr.msk.f32.gmra.mxu0 %vm1393_vm1, %v8022_v42 }
  0xd8   : > { %6994 = vmatmul.mubr.msk.f32.gmra.mxu1 %vm1393_vm1, %v8022_v42  ;;  %7046 = vmatprep.mubr.msk.f32.mxu0 %vm1393_vm1, %v8032_v44 }
  0xd9   : > { %6996 = vmatprep.mubr.msk.f32.mxu1 %vm1393_vm1, %v8032_v44 }
  0xdb   : > { %v8418_v16 = vpop.f32.mrf.mxu0  ;;  %7047 = vmatmul.mubr.msk.f32.gmra.mxu0 %vm1393_vm1, %v8040_v45 }
  0xdc   : > { %11120 = vst [vmem:[#allocation6_spill] sm:$0xff] %v8418_v16  ;;  %v8420_v17 = vpop.f32.mrf.mxu1  ;;  %6997 = vmatmul.mubr.msk.f32.gmra.mxu1 %vm1393_vm1, %v8040_v45  ;;  %7049 = vmatprep.mubr.msk.f32.mxu0 %vm1393_vm1, %v8047_v46  ;;  %v1720_v23 = vmax.f32 %v8418_v16, 0.0  ;;  %v5553_v24 = vadd.f32 %v8418_v16, %v8426_v18 }
  0xdd   : > { %11121 = vst [vmem:[#allocation7_spill] sm:$0xff] %v8420_v17  ;;  %v1736_v20 = vmax.f32 %v8420_v17, 0.0  ;;  %6999 = vmatprep.mubr.msk.f32.mxu1 %vm1393_vm1, %v8047_v46  ;;  %v8499_v21 = vpop.f32.mrf.mxu0  ;;  %v5569_v63 = vadd.f32 %v8420_v17, %v8426_v18 }
  0xde   : > { %v8501_v22 = vpop.f32.mrf.mxu1  ;;  %v2110_v26 = vadd.f32 %v2078_v19, %v8499_v21  ;;  %4948 = vrot.lane.b32.xlu0 %v1720_v23, %s7335_s30  ;;  %v5585_v29 = vmax.f32 %v5553_v24, 0.0  ;;  %v1719_v30 = vmax.f32 %v8499_v21, 0.0  ;;  %v2084_v23 = vld [vmem:[#allocation2 + $0xbbc] sm:$0xff]  ;;  %v8556_v24 = vpop.permute.xlu1 %5784 }
  0xdf   : > { %11122 = vst [vmem:[#allocation8_spill] sm:$0xff] %v8501_v22  ;;  %4980 = vrot.lane.b32.xlu1 %v1736_v20, %s7335_s30  ;;  %v8509_v27 = vpop.f32.mrf.mxu0  ;;  %7050 = vmatmul.mubr.msk.f32.gmra.mxu0 %vm1393_vm1, %v8054_v47  ;;  %v1735_v62 = vmax.f32 %v8501_v22, 0.0  ;;  %11133 = vst [vmem:[#allocation19_spill] sm:$0xff] %v8556_v24 }
  0xe0   : > { %11123 = vst [vmem:[#allocation9_spill] sm:$0xff] %v8509_v27  ;;  %v8511_v28 = vpop.f32.mrf.mxu1  ;;  %7000 = vmatmul.mubr.msk.f32.gmra.mxu1 %vm1393_vm1, %v8054_v47  ;;  %v2500_v32 = vadd.f32 %v2468_v25, %v2110_v26  ;;  %7052 = vmatprep.mubr.msk.f32.mxu0 %vm1393_vm1, %v8061_v48  ;;  %v1722_v15 = vmax.f32 %v8509_v27, 0.0  ;;  %v2862_v25 = vld [vmem:[#allocation2 + $0xb74] sm:$0xff] }
  0xe1   : > { %11124 = vst [vmem:[#allocation10_spill] sm:$0xff] %v8511_v28  ;;  %7002 = vmatprep.mubr.msk.f32.mxu1 %vm1393_vm1, %v8061_v48  ;;  %v8518_v33 = vpop.f32.mrf.mxu0 }
  0xe2   : > { %11125 = vst [vmem:[#allocation11_spill] sm:$0xff] %v8518_v33  ;;  %v8520_v34 = vpop.f32.mrf.mxu1  ;;  %v2890_v36 = vadd.f32 %v2858_v31, %v2500_v32  ;;  %4946 = vrot.lane.b32.xlu0 %v1719_v30, %s7335_s30  ;;  %v5601_v31 = vmax.f32 %v5569_v63, 0.0  ;;  %v5788_v32 = vadd.f32 %v8418_v16, %v8556_v24 }
  0xe3   : > { %11126 = vst [vmem:[#allocation12_spill] sm:$0xff] %v8520_v34  ;;  %5650 = vrot.lane.b32.xlu1 %v5585_v29, %s7331_s15  ;;  %v8528_v37 = vpop.f32.mrf.mxu0  ;;  %7053 = vmatmul.mubr.msk.f32.gmra.mxu0 %vm1393_vm1, %v8068_v49  ;;  %v2474_v29 = vld [vmem:[#allocation2 + $0xbc8] sm:$0xff] }
  0xe4   : > { %11127 = vst [vmem:[#allocation13_spill] sm:$0xff] %v8528_v37  ;;  %v8530_v38 = vpop.f32.mrf.mxu1  ;;  %7003 = vmatmul.mubr.msk.f32.gmra.mxu1 %vm1393_vm1, %v8068_v49  ;;  %v8534_v40 = vadd.f32 %v3248_v35, %v2890_v36  ;;  %7055 = vmatprep.mubr.msk.f32.mxu0 %vm1393_vm1, %v8075_v50  ;;  %v3252_v35 = vld [vmem:[#allocation2 + $0xfdc] sm:$0xff] }
  0xe5   : > { %11128 = vst [vmem:[#allocation14_spill] sm:$0xff] %v8530_v38  ;;  %v8536_v41 = vpop.f32.mrf.mxu0  ;;  %7005 = vmatprep.mubr.msk.f32.mxu1 %vm1393_vm1, %v8075_v50 }
  0xe6   : > { %11129 = vst [vmem:[#allocation15_spill] sm:$0xff] %v8534_v40  ;;  %v8538_v43 = vpop.f32.mrf.mxu1  ;;  %v2114_v2 = vadd.f32 %v2082_v39, %v8536_v41  ;;  %4978 = vrot.lane.b32.xlu0 %v1735_v62, %s7335_s30  ;;  %v2864_v39 = vld [vmem:[#allocation2 + $0xbd4] sm:$0xff]  ;;  %v1738_v62 = vmax.f32 %v8511_v28, 0.0 }
  0xe7   : > { %11130 = vst [vmem:[#allocation16_spill] sm:$0xff] %v8538_v43  ;;  %v8550_v19 = vpop.f32.mrf.mxu0  ;;  %4952 = vrot.lane.b32.xlu1 %v1722_v15, %s7335_s30  ;;  %7056 = vmatmul.mubr.msk.f32.gmra.mxu0 %vm1393_vm1, %v8082_v51  ;;  %v5568_v15 = vadd.f32 %v8426_v18, %v8501_v22 }
  0xe8   : > { %11131 = vst [vmem:[#allocation17_spill] sm:$0xff] %v8550_v19  ;;  %v8552_v20 = vpop.f32.mrf.mxu1  ;;  %7006 = vmatmul.mubr.msk.f32.gmra.mxu1 %vm1393_vm1, %v8082_v51  ;;  %v2504_v49 = vadd.f32 %v2472_v0, %v2114_v2  ;;  %v3254_v51 = vld [vmem:[#allocation2 + $0x103c] sm:$0xff]  ;;  %7058 = vmatprep.mubr.msk.f32.mxu0 %vm1393_vm1, %v8089_v52 }
  0xe9   : > { %11132 = vst [vmem:[#allocation18_spill] sm:$0xff] %v8552_v20  ;;  %v8561_v26 = vpop.f32.mrf.mxu0  ;;  %7008 = vmatprep.mubr.msk.f32.mxu1 %vm1393_vm1, %v8089_v52 }
  0xea   : > { %v8563_v30 = vpop.f32.mrf.mxu1  ;;  %v2116_v50 = vadd.f32 %v2084_v23, %v8561_v26  ;;  %v2894_v36 = vadd.f32 %v2862_v25, %v2504_v49  ;;  %5682 = vrot.lane.b32.xlu0 %v5601_v31, %s7331_s15  ;;  %v5820_v31 = vmax.f32 %v5788_v32, 0.0  ;;  %v5787_v32 = vadd.f32 %v8556_v24, %v8499_v21 }
  0xeb   : > { %11134 = vst [vmem:[#allocation20_spill] sm:$0xff] %v8563_v30  ;;  %v8574_v0 = vpop.f32.mrf.mxu0  ;;  %4984 = vrot.lane.b32.xlu1 %v1738_v62, %s7335_s30  ;;  %7059 = vmatmul.mubr.msk.f32.gmra.mxu0 %vm1393_vm1, %v8096_v53 }
  0xec   : > { %v8576_v63 = vpop.f32.mrf.mxu1  ;;  %v2506_v2 = vadd.f32 %v2474_v29, %v2116_v50  ;;  %7009 = vmatmul.mubr.msk.f32.gmra.mxu1 %vm1393_vm1, %v8096_v53  ;;  %v8582_v23 = vadd.f32 %v3252_v35, %v2894_v36  ;;  %v5600_v29 = vmax.f32 %v5568_v15, 0.0  ;;  %v5804_v35 = vadd.f32 %v8420_v17, %v8556_v24  ;;  %7061 = vmatprep.mubr.msk.f32.mxu0 %vm1393_vm1, %v8103_v54 }
  0xed   : > { %v8585_v25 = vpop.f32.mrf.mxu0  ;;  %7011 = vmatprep.mubr.msk.f32.mxu1 %vm1393_vm1, %v8103_v54  ;;  %v5803_v53 = vadd.f32 %v8556_v24, %v8501_v22 }
  0xee   : > { %11135 = vst [vmem:[#allocation21_spill] sm:$0xff] %v8582_v23  ;;  %v8587_v49 = vpop.f32.mrf.mxu1  ;;  %v2896_v40 = vadd.f32 %v2864_v39, %v2506_v2  ;;  %5885 = vrot.lane.b32.xlu0 %v5820_v31, %s7331_s15  ;;  %v5836_v52 = vmax.f32 %v5804_v35, 0.0  ;;  %v5552_v2 = vadd.f32 %v8426_v18, %v8499_v21 }
  0xef   : > { %v8592_v50 = vpop.f32.mrf.mxu0  ;;  %5680 = vrot.lane.b32.xlu1 %v5600_v29, %s7331_s15  ;;  %7062 = vmatmul.mubr.msk.f32.gmra.mxu0 %vm1393_vm1, %v8110_v55  ;;  %v5835_v35 = vmax.f32 %v5803_v53, 0.0  ;;  %v5571_v53 = vadd.f32 %v8511_v28, %v8426_v18 }
  0xf0   : > { %v8594_v16 = vpop.f32.mrf.mxu1  ;;  %v8602_v36 = vadd.f32 %v3254_v51, %v2896_v40  ;;  %7012 = vmatmul.mubr.msk.f32.gmra.mxu1 %vm1393_vm1, %v8110_v55  ;;  %v5819_v40 = vmax.f32 %v5787_v32, 0.0  ;;  %v5584_v54 = vmax.f32 %v5552_v2, 0.0  ;;  %7064 = vmatprep.mubr.msk.f32.mxu0 %vm1393_vm1, %v8117_v56 }
  0xf1   : > { %v8607_v39 = vpop.f32.mrf.mxu0  ;;  %7014 = vmatprep.mubr.msk.f32.mxu1 %vm1393_vm1, %v8117_v56  ;;  %v1721_v56 = vmax.f32 %v8518_v33, 0.0 }
  0xf2   : > { %11136 = vst [vmem:[#allocation22_spill] sm:$0xff] %v8602_v36  ;;  %v8609_v62 = vpop.f32.mrf.mxu1  ;;  %5917 = vrot.lane.b32.xlu0 %v5836_v52, %s7331_s15 }
  0xf3   : > { %v8620_v15 = vpop.f32.mrf.mxu0  ;;  %5883 = vrot.lane.b32.xlu1 %v5819_v40, %s7331_s15  ;;  %7065 = vmatmul.mubr.msk.f32.gmra.mxu0 %vm1393_vm1, %v8124_v57  ;;  %v1737_v40 = vmax.f32 %v8520_v34, 0.0 }
  0xf4   : > { %v8622_v51 = vpop.f32.mrf.mxu1  ;;  %7015 = vmatmul.mubr.msk.f32.gmra.mxu1 %vm1393_vm1, %v8124_v57  ;;  %7067 = vmatprep.mubr.msk.f32.mxu0 %vm1393_vm1, %v8131_v58  ;;  %v5555_v57 = vadd.f32 %v8509_v27, %v8426_v18 }
  0xf5   : > { %v8629_v31 = vpop.f32.mrf.mxu0  ;;  %7017 = vmatprep.mubr.msk.f32.mxu1 %vm1393_vm1, %v8131_v58 }
  0xf6   : > { %v8631_v29 = vpop.f32.mrf.mxu1  ;;  %5648 = vrot.lane.b32.xlu0 %v5584_v54, %s7331_s15  ;;  %v5587_v58 = vmax.f32 %v5555_v57, 0.0  ;;  %v1724_v57 = vmax.f32 %v8528_v37, 0.0 }
  0xf7   : > { %v8638_v32 = vpop.f32.mrf.mxu0  ;;  %5915 = vrot.lane.b32.xlu1 %v5835_v35, %s7331_s15  ;;  %7068 = vmatmul.mubr.msk.f32.gmra.mxu0 %vm1393_vm1, %v8138_v59 }
  0xf8   : > { %v8640_v52 = vpop.f32.mrf.mxu1  ;;  %7018 = vmatmul.mubr.msk.f32.gmra.mxu1 %vm1393_vm1, %v8138_v59  ;;  %7122 = vmatprep.mubr.msk.f32.mxu0 %vm1393_vm1, %v8145_v60 }
  0xf9   : > { %11137 = vst [vmem:[#allocation23_spill] sm:$0xff] %v8640_v52  ;;  %v8647_v55 = vpop.f32.mrf.mxu0  ;;  %7072 = vmatprep.mubr.msk.f32.mxu1 %vm1393_vm1, %v8145_v60  ;;  %v5806_v60 = vadd.f32 %v8511_v28, %v8556_v24  ;;  %v5554_v52 = vadd.f32 %v8426_v18, %v8518_v33 }
  0xfa   : > { %v8649_v2 = vpop.f32.mrf.mxu1  ;;  %4982 = vrot.lane.b32.xlu0 %v1737_v40, %s7335_s30  ;;  %v5603_v40 = vmax.f32 %v5571_v53, 0.0 }
  0xfb   : > { %11138 = vst [vmem:[#allocation24_spill] sm:$0xff] %v8649_v2  ;;  %v6824_v35 = vpop.f32.mrf.mxu0  ;;  %4950 = vrot.lane.b32.xlu1 %v1721_v56, %s7335_s30  ;;  %v5790_v2 = vadd.f32 %v8509_v27, %v8556_v24  ;;  %7123 = vmatmul.mubr.msk.f32.vlgmr.msra.gmra.mxu0 %vm1393_vm1, %v8152_v61 }
  0xfc   : > { %v6774_v54 = vpop.f32.mrf.mxu1  ;;  %7073 = vmatmul.mubr.msk.f32.vlgmr.msra.gmra.mxu1 %vm1393_vm1, %v8152_v61  ;;  %7125 = vmatprep.mubr.msk.f32.mxu0 %vm1393_vm1, %v8173_v1 }
  0xfd   : > { %1981 = vst.msk [vmem:[#allocation2 + $0xf30] sm:$0xff] %vm237_vm2, %v6774_v54  ;;  %v2213_v23 = vpop.f32.mrf.mxu0  ;;  %7075 = vmatprep.mubr.msk.f32.mxu1 %vm1393_vm1, %v8173_v1  ;;  %v5838_v1 = vmax.f32 %v5806_v60, 0.0 }
  0xfe   : > { %v1821_v36 = vpop.f32.mrf.mxu1  ;;  %5686 = vrot.lane.b32.xlu0 %v5603_v40, %s7331_s15 }
  0xff   : > { %1980 = vst.msk [vmem:[#allocation2 + $0xf28] sm:$0xff] %vm237_vm2, %v1821_v36  ;;  %v6827_v54 = vpop.f32.mrf.mxu0  ;;  %5654 = vrot.lane.b32.xlu1 %v5587_v58, %s7331_s15  ;;  %v5822_v36 = vmax.f32 %v5790_v2, 0.0  ;;  %7126 = vmatmul.mubr.msk.f32.gmra.mxu0 %vm1393_vm1, %v8188_v3 }
 0x100   : > { %v6777_v56 = vpop.f32.mrf.mxu1  ;;  %7076 = vmatmul.mubr.msk.f32.gmra.mxu1 %vm1393_vm1, %v8188_v3  ;;  %7128 = vmatprep.mubr.msk.f32.mxu0 %vm1393_vm1, %v8195_v4  ;;  %v1740_v3 = vmax.f32 %v8530_v38, 0.0 }
 0x101   : > { %1983 = vst.msk [vmem:[#allocation2 + $0xf90] sm:$0xff] %vm237_vm2, %v6777_v56  ;;  %v2223_v53 = vpop.f32.mrf.mxu0  ;;  %7078 = vmatprep.mubr.msk.f32.mxu1 %vm1393_vm1, %v8195_v4 }
 0x102   : > { %v1831_v59 = vpop.f32.mrf.mxu1  ;;  %5889 = vrot.lane.b32.xlu0 %v5822_v36, %s7331_s15 }
 0x103   : > { %1982 = vst.msk [vmem:[#allocation2 + $0xf88] sm:$0xff] %vm237_vm2, %v1831_v59  ;;  %v6830_v58 = vpop.f32.mrf.mxu0  ;;  %4956 = vrot.lane.b32.xlu1 %v1724_v57, %s7335_s30  ;;  %7129 = vmatmul.mubr.msk.f32.gmra.mxu0 %vm1393_vm1, %v8202_v5 }
 0x104   : > { %v6780_v40 = vpop.f32.mrf.mxu1  ;;  %7079 = vmatmul.mubr.msk.f32.gmra.mxu1 %vm1393_vm1, %v8202_v5  ;;  %7131 = vmatprep.mubr.msk.f32.mxu0 %vm1393_vm1, %v8209_v6  ;;  %v5789_v5 = vadd.f32 %v8556_v24, %v8518_v33 }
 0x105   : > { %1985 = vst.msk [vmem:[#allocation2 + $0xff0] sm:$0xff] %vm237_vm2, %v6780_v40  ;;  %v2233_v36 = vpop.f32.mrf.mxu0  ;;  %7081 = vmatprep.mubr.msk.f32.mxu1 %vm1393_vm1, %v8209_v6  ;;  %v5570_v40 = vadd.f32 %v8426_v18, %v8520_v34 }
 0x106   : > { %v2016_v61 = vld [vmem:[#allocation2 + $0xf2f] sm:$0xff]  ;;  %v8696_v2 = vld [vmem:[#allocation2 + $0xf27] sm:$0xff]  ;;  %v1841_v59 = vpop.f32.mrf.mxu1  ;;  %5921 = vrot.lane.b32.xlu0 %v5838_v1, %s7331_s15  ;;  %v5586_v1 = vmax.f32 %v5554_v52, 0.0 }
 0x107   : > { %11139 = vst [vmem:[#allocation25_spill] sm:$0xff] %v8696_v2  ;;  %v8698_v56 = vld [vmem:[#allocation2 + $0xf24] sm:$0xff]  ;;  %2373 = vst.msk [vmem:[#allocation2 + $0xf30] sm:$0xff] %vm237_vm2, %v6824_v35  ;;  %v6833_v57 = vpop.f32.mrf.mxu0  ;;  %4988 = vrot.lane.b32.xlu1 %v1740_v3, %s7335_s30  ;;  %v5602_v3 = vmax.f32 %v5570_v40, 0.0  ;;  %7132 = vmatmul.mubr.msk.f32.gmra.mxu0 %vm1393_vm1, %v8216_v7  ;;  %v1723_v40 = vmax.f32 %v8536_v41, 0.0 }
 0x108   : > { %2372 = vst.msk [vmem:[#allocation2 + $0xf28] sm:$0xff] %vm237_vm2, %v2213_v23  ;;  %1984 = vst.msk [vmem:[#allocation2 + $0xfe8] sm:$0xff] %vm237_vm2, %v1841_v59  ;;  %v6783_v60 = vpop.f32.mrf.mxu1  ;;  %7082 = vmatmul.mubr.msk.f32.gmra.mxu1 %vm1393_vm1, %v8216_v7  ;;  %7134 = vmatprep.mubr.msk.f32.mxu0 %vm1393_vm1, %v8223_v8  ;;  %v5821_v7 = vmax.f32 %v5789_v5, 0.0 }
 0x109   : > { %1987 = vst.msk [vmem:[#allocation2 + $0x1050] sm:$0xff] %vm237_vm2, %v6783_v60  ;;  %v2243_v2 = vpop.f32.mrf.mxu0  ;;  %7084 = vmatprep.mubr.msk.f32.mxu1 %vm1393_vm1, %v8223_v8 }
 0x10a   : > { %v2018_v23 = vld [vmem:[#allocation2 + $0xf8f] sm:$0xff]  ;;  %v8719_v35 = vld [vmem:[#allocation2 + $0xf87] sm:$0xff]  ;;  %v1851_v4 = vpop.f32.mrf.mxu1  ;;  %5652 = vrot.lane.b32.xlu0 %v5586_v1, %s7331_s15  ;;  %v2048_v1 = vadd.f32 %v8509_v27, %v2016_v61 }
 0x10b   : > { %v8721_v59 = vld [vmem:[#allocation2 + $0xf84] sm:$0xff]  ;;  %2375 = vst.msk [vmem:[#allocation2 + $0xf90] sm:$0xff] %vm237_vm2, %v6827_v54  ;;  %1986 = vst.msk [vmem:[#allocation2 + $0x1048] sm:$0xff] %vm237_vm2, %v1851_v4  ;;  %5684 = vrot.lane.b32.xlu1 %v5602_v3, %s7331_s15  ;;  %7135 = vmatmul.mubr.msk.f32.gmra.mxu0 %vm1393_vm1, %v8230_v9 }
 0x10c   : > { %11140 = vst [vmem:[#allocation26_spill] sm:$0xff] %v8721_v59  ;;  %2374 = vst.msk [vmem:[#allocation2 + $0xf88] sm:$0xff] %vm237_vm2, %v2223_v53  ;;  %v6786_v60 = vpop.f32.mrf.mxu1  ;;  %v6836_v59 = vpop.f32.mrf.mxu0  ;;  %7085 = vmatmul.mubr.msk.f32.gmra.mxu1 %vm1393_vm1, %v8230_v9  ;;  %7137 = vmatprep.mubr.msk.f32.mxu0 %vm1393_vm1, %v8237_v10 }
 0x10d   : > { %1989 = vst.msk [vmem:[#allocation2 + $0x10b0] sm:$0xff] %vm237_vm2, %v6786_v60  ;;  %7087 = vmatprep.mubr.msk.f32.mxu1 %vm1393_vm1, %v8237_v10 }
 0x10e   : > { %v1861_v6 = vpop.f32.mrf.mxu1  ;;  %v2253_v4 = vpop.f32.mrf.mxu0  ;;  %v8755_v3 = vld [vmem:[#allocation2 + $0xf30] sm:$0xff]  ;;  %4954 = vrot.lane.b32.xlu0 %v1723_v40, %s7335_s30  ;;  %v1739_v40 = vmax.f32 %v8538_v43, 0.0 }
 0x10f   : > { %v2020_v52 = vld [vmem:[#allocation2 + $0xfef] sm:$0xff]  ;;  %v8739_v54 = vld [vmem:[#allocation2 + $0xfe7] sm:$0xff]  ;;  %1988 = vst.msk [vmem:[#allocation2 + $0x10a8] sm:$0xff] %vm237_vm2, %v1861_v6  ;;  %v8761_v61 = vadd.f32 %v8755_v3, %v2048_v1  ;;  %5887 = vrot.lane.b32.xlu1 %v5821_v7, %s7331_s15  ;;  %7138 = vmatmul.mubr.msk.f32.gmra.mxu0 %vm1393_vm1, %v8244_v11 }
 0x110   : > { %v8741_v53 = vld [vmem:[#allocation2 + $0xfe4] sm:$0xff]  ;;  %2377 = vst.msk [vmem:[#allocation2 + $0xff0] sm:$0xff] %vm237_vm2, %v6830_v58  ;;  %v6789_v60 = vpop.f32.mrf.mxu1  ;;  %v5805_v58 = vadd.f32 %v8556_v24, %v8520_v34  ;;  %7088 = vmatmul.mubr.msk.f32.gmra.mxu1 %vm1393_vm1, %v8244_v11  ;;  %7140 = vmatprep.mubr.msk.f32.mxu0 %vm1393_vm1, %v8251_v12 }
 0x111   : > { %11141 = vst [vmem:[#allocation27_spill] sm:$0xff] %v8741_v53  ;;  %2376 = vst.msk [vmem:[#allocation2 + $0xfe8] sm:$0xff] %vm237_vm2, %v2233_v36  ;;  %v6839_v53 = vpop.f32.mrf.mxu0  ;;  %7090 = vmatprep.mubr.msk.f32.mxu1 %vm1393_vm1, %v8251_v12 }
 0x112   : > { %11142 = vst [vmem:[#allocation28_spill] sm:$0xff] %v8761_v61  ;;  %1991 = vst.msk [vmem:[#allocation2 + $0x1110] sm:$0xff] %vm237_vm2, %v6789_v60  ;;  %v2022_v36 = vld [vmem:[#allocation2 + $0x104f] sm:$0xff]  ;;  %v8766_v8 = vld [vmem:[#allocation2 + $0x1047] sm:$0xff]  ;;  %v1871_v5 = vpop.f32.mrf.mxu1  ;;  %v5557_v60 = vadd.f32 %v8528_v37, %v8426_v18  ;;  %v2050_v61 = vadd.f32 %v8528_v37, %v2018_v23  ;;  %v5837_v7 = vmax.f32 %v5805_v58, 0.0  ;;  %4986 = vrot.lane.b32.xlu0 %v1739_v40, %s7335_s30 }
 0x113   : > { %v8768_v6 = vld [vmem:[#allocation2 + $0x1044] sm:$0xff]  ;;  %v2263_v1 = vpop.f32.mrf.mxu0  ;;  %2379 = vst.msk [vmem:[#allocation2 + $0x1050] sm:$0xff] %vm237_vm2, %v6833_v57  ;;  %1990 = vst.msk [vmem:[#allocation2 + $0x1108] sm:$0xff] %vm237_vm2, %v1871_v5  ;;  %v8784_v9 = vld [vmem:[#allocation2 + $0xf90] sm:$0xff]  ;;  %7141 = vmatmul.mubr.msk.f32.gmra.mxu0 %vm1393_vm1, %v8258_v13 }
 0x114   : > { %11143 = vst [vmem:[#allocation29_spill] sm:$0xff] %v8768_v6  ;;  %2378 = vst.msk [vmem:[#allocation2 + $0x1048] sm:$0xff] %vm237_vm2, %v2243_v2  ;;  %v6792_v27 = vpop.f32.mrf.mxu1  ;;  %v8788_v23 = vadd.f32 %v8784_v9, %v2050_v61  ;;  %7091 = vmatmul.mubr.msk.f32.gmra.mxu1 %vm1393_vm1, %v8258_v13  ;;  %v2052_v2 = vadd.f32 %v8550_v19, %v2020_v52  ;;  %5919 = vrot.lane.b32.xlu1 %v5837_v7, %s7331_s15  ;;  %v5589_v58 = vmax.f32 %v5557_v60, 0.0 }
 0x115   : > { %v6842_v6 = vpop.f32.mrf.mxu0  ;;  %1993 = vst.msk [vmem:[#allocation2 + $0x1170] sm:$0xff] %vm237_vm2, %v6792_v27  ;;  %v5573_v61 = vadd.f32 %v8530_v38, %v8426_v18  ;;  %7093 = vmatprep.mubr.msk.f32.mxu1 %vm1393_vm1, %v8265_v14  ;;  %v1726_v27 = vmax.f32 %v8550_v19, 0.0  ;;  %7143 = vmatprep.mubr.msk.f32.mxu0 %vm1393_vm1, %v8265_v14 }
 0x116   : > { %11144 = vst [vmem:[#allocation30_spill] sm:$0xff] %v8788_v23  ;;  %v2024_v57 = vld [vmem:[#allocation2 + $0x10af] sm:$0xff]  ;;  %v2023_v5 = vld [vmem:[#allocation2 + $0x10a7] sm:$0xff]  ;;  %v1881_v10 = vpop.f32.mrf.mxu1  ;;  %5658 = vrot.lane.b32.xlu0 %v5589_v58, %s7331_s15  ;;  %v5792_v58 = vadd.f32 %v8528_v37, %v8556_v24 }
 0x117   : > { %v2273_v40 = vpop.f32.mrf.mxu0  ;;  %v8799_v23 = vld [vmem:[#allocation2 + $0xff0] sm:$0xff]  ;;  %2381 = vst.msk [vmem:[#allocation2 + $0x10b0] sm:$0xff] %vm237_vm2, %v6836_v59  ;;  %2380 = vst.msk [vmem:[#allocation2 + $0x10a8] sm:$0xff] %vm237_vm2, %v2253_v4  ;;  %v2054_v59 = vadd.f32 %v8574_v0, %v2022_v36  ;;  %v1742_v36 = vmax.f32 %v8552_v20, 0.0  ;;  %v2056_v14 = vadd.f32 %v8592_v50, %v2024_v57  ;;  %7144 = vmatmul.mubr.msk.f32.gmra.mxu0 %vm1393_vm1, %v8022_v42 }
 0x118   : > { %1992 = vst.msk [vmem:[#allocation2 + $0x1168] sm:$0xff] %vm237_vm2, %v1881_v10  ;;  %v8809_v11 = vadd.f32 %v8799_v23, %v2052_v2  ;;  %v6795_v52 = vpop.f32.mrf.mxu1  ;;  %7094 = vmatmul.mubr.msk.f32.gmra.mxu1 %vm1393_vm1, %v8022_v42  ;;  %4960 = vrot.lane.b32.xlu1 %v1726_v27, %s7335_s30  ;;  %v5605_v2 = vmax.f32 %v5573_v61, 0.0 }
 0x119   : > { %v8813_v60 = vpop.f32.mrf.mxu0  ;;  %1995 = vst.msk [vmem:[#allocation2 + $0x11d0] sm:$0xff] %vm237_vm2, %v6795_v52  ;;  %7096 = vmatprep.mubr.msk.f32.mxu1 %vm1393_vm1, %v8032_v44  ;;  %7146 = vmatprep.mubr.msk.f32.mxu0 %vm1393_vm1, %v8032_v44 }
 0x11a   : > { %11145 = vst [vmem:[#allocation31_spill] sm:$0xff] %v8809_v11  ;;  %v2026_v4 = vld [vmem:[#allocation2 + $0x110f] sm:$0xff]  ;;  %v2025_v7 = vld [vmem:[#allocation2 + $0x1107] sm:$0xff]  ;;  %v1891_v12 = vpop.f32.mrf.mxu1  ;;  %5690 = vrot.lane.b32.xlu0 %v5605_v2, %s7331_s15 }
 0x11b   : > { %v2283_v10 = vpop.f32.mrf.mxu0  ;;  %v8824_v11 = vld [vmem:[#allocation2 + $0x1050] sm:$0xff]  ;;  %2383 = vst.msk [vmem:[#allocation2 + $0x1110] sm:$0xff] %vm237_vm2, %v6839_v53  ;;  %2382 = vst.msk [vmem:[#allocation2 + $0x1108] sm:$0xff] %vm237_vm2, %v2263_v1  ;;  %v5572_v53 = vadd.f32 %v8426_v18, %v8538_v43  ;;  %v2058_v44 = vadd.f32 %v8620_v15, %v2026_v4  ;;  %7147 = vmatmul.mubr.msk.f32.gmra.mxu0 %vm1393_vm1, %v8040_v45 }
 0x11c   : > { %1994 = vst.msk [vmem:[#allocation2 + $0x11c8] sm:$0xff] %vm237_vm2, %v1891_v12  ;;  %v8834_v13 = vadd.f32 %v8824_v11, %v2054_v59  ;;  %v6798_v61 = vpop.f32.mrf.mxu1  ;;  %7097 = vmatmul.mubr.msk.f32.gmra.mxu1 %vm1393_vm1, %v8040_v45  ;;  %4992 = vrot.lane.b32.xlu1 %v1742_v36, %s7335_s30  ;;  %v5824_v12 = vmax.f32 %v5792_v58, 0.0 }
 0x11d   : > { %v8838_v27 = vpop.f32.mrf.mxu0  ;;  %1997 = vst.msk [vmem:[#allocation2 + $0x1230] sm:$0xff] %vm237_vm2, %v6798_v61  ;;  %v5808_v61 = vadd.f32 %v8530_v38, %v8556_v24  ;;  %7099 = vmatprep.mubr.msk.f32.mxu1 %vm1393_vm1, %v8047_v46  ;;  %v5604_v58 = vmax.f32 %v5572_v53, 0.0  ;;  %7149 = vmatprep.mubr.msk.f32.mxu0 %vm1393_vm1, %v8047_v46  ;;  %v8908_v46 = vld [vmem:[#allocation2 + $0xf88] sm:$0xff] }
 0x11e   : > { %11146 = vst [vmem:[#allocation32_spill] sm:$0xff] %v8834_v13  ;;  %v1901_v59 = vpop.f32.mrf.mxu1  ;;  %v2415_v37 = vld [vmem:[#allocation2 + $0x10b0] sm:$0xff]  ;;  %v2055_v13 = vadd.f32 %v2023_v5, %v8607_v39  ;;  %v2414_v57 = vld [vmem:[#allocation2 + $0x10a8] sm:$0xff]  ;;  %5893 = vrot.lane.b32.xlu0 %v5824_v12, %s7331_s15  ;;  %v5556_v12 = vadd.f32 %v8426_v18, %v8536_v41  ;;  %11153 = vst [vmem:[#allocation39_spill] sm:$0xff] %v8908_v46 }
 0x11f   : > { %v2028_v1 = vld [vmem:[#allocation2 + $0x116f] sm:$0xff]  ;;  %v8846_v52 = vld [vmem:[#allocation2 + $0x1167] sm:$0xff]  ;;  %v8851_v2 = vpop.f32.mrf.mxu0  ;;  %1996 = vst.msk [vmem:[#allocation2 + $0x1228] sm:$0xff] %vm237_vm2, %v1901_v59  ;;  %v8863_v42 = vadd.f32 %v2415_v37, %v2056_v14  ;;  %v5840_v59 = vmax.f32 %v5808_v61, 0.0 }
 0x120   : > { %2385 = vst.msk [vmem:[#allocation2 + $0x1170] sm:$0xff] %vm237_vm2, %v6842_v6  ;;  %2384 = vst.msk [vmem:[#allocation2 + $0x1168] sm:$0xff] %vm237_vm2, %v2273_v40  ;;  %v6801_v36 = vpop.f32.mrf.mxu1  ;;  %v5791_v6 = vadd.f32 %v8556_v24, %v8536_v41  ;;  %v8870_v40 = vadd.f32 %v2414_v57, %v2055_v13  ;;  %7100 = vmatmul.mubr.msk.f32.gmra.mxu1 %vm1393_vm1, %v8054_v47  ;;  %5688 = vrot.lane.b32.xlu1 %v5604_v58, %s7331_s15 }
 0x121   : > { %11147 = vst [vmem:[#allocation33_spill] sm:$0xff] %v8863_v42  ;;  %v8866_v5 = vpop.f32.mrf.mxu0  ;;  %1999 = vst.msk [vmem:[#allocation2 + $0x1290] sm:$0xff] %vm237_vm2, %v6801_v36  ;;  %v2057_v47 = vadd.f32 %v2025_v7, %v8629_v31  ;;  %7102 = vmatprep.mubr.msk.f32.mxu1 %vm1393_vm1, %v8061_v48  ;;  %v7251_v48 = vld [vmem:[%s7443_s23 + $0xa8] sm:$0xff] }
 0x122   : > { %11148 = vst [vmem:[#allocation34_spill] sm:$0xff] %v8870_v40  ;;  %v1911_v53 = vpop.f32.mrf.mxu1  ;;  %v2417_v57 = vld [vmem:[#allocation2 + $0x1110] sm:$0xff]  ;;  %v2416_v4 = vld [vmem:[#allocation2 + $0x1108] sm:$0xff]  ;;  %5925 = vrot.lane.b32.xlu0 %v5840_v59, %s7331_s15  ;;  %v5823_v61 = vmax.f32 %v5791_v6, 0.0  ;;  %v2060_v6 = vadd.f32 %v8638_v32, %v2028_v1  ;;  %v2049_v1 = vadd.f32 %v8719_v35, %v8536_v41  ;;  %v2051_v40 = vadd.f32 %v8739_v54, %v8561_v26 }
 0x123   : > { %v8876_v37 = vld [vmem:[#allocation2 + $0x11cf] sm:$0xff]  ;;  %v8878_v14 = vld [vmem:[#allocation2 + $0x11c7] sm:$0xff]  ;;  %v8883_v13 = vpop.f32.mrf.mxu0  ;;  %1998 = vst.msk [vmem:[#allocation2 + $0x1288] sm:$0xff] %vm237_vm2, %v1911_v53  ;;  %v8896_v45 = vadd.f32 %v2417_v57, %v2058_v44  ;;  %v2053_v35 = vadd.f32 %v8766_v8, %v8585_v25 }
 0x124   : > { %11149 = vst [vmem:[#allocation35_spill] sm:$0xff] %v8876_v37  ;;  %11150 = vst [vmem:[#allocation36_spill] sm:$0xff] %v8878_v14  ;;  %v6804_v7 = vpop.f32.mrf.mxu1  ;;  %7103 = vmatmul.mubr.msk.f32.gmra.mxu1 %vm1393_vm1, %v7251_v48  ;;  %v8910_v36 = vld [vmem:[#allocation2 + $0xfe8] sm:$0xff]  ;;  %5891 = vrot.lane.b32.xlu1 %v5823_v61, %s7331_s15  ;;  %v7254_v61 = vld [vmem:[%s7443_s23 + $0xa0] sm:$0xff] }
 0x125   : > { %2387 = vst.msk [vmem:[#allocation2 + $0x11d0] sm:$0xff] %vm237_vm2, %v8813_v60  ;;  %2386 = vst.msk [vmem:[#allocation2 + $0x11c8] sm:$0xff] %vm237_vm2, %v2283_v10  ;;  %v8899_v58 = vpop.f32.mrf.mxu0  ;;  %v5807_v60 = vadd.f32 %v8556_v24, %v8538_v43  ;;  %v8903_v10 = vadd.f32 %v2416_v4, %v2057_v47  ;;  %v8912_v44 = vld [vmem:[#allocation2 + $0x1048] sm:$0xff]  ;;  %v7252_v47 = vld [vmem:[%s7443_s23 + $0x98] sm:$0xff]  ;;  %v5588_v4 = vmax.f32 %v5556_v12, 0.0  ;;  %v8948_v42 = vadd.f32 %v8910_v36, %v2051_v40 }
 0x126   : > { %11151 = vst [vmem:[#allocation37_spill] sm:$0xff] %v8896_v45  ;;  %2001 = vst.msk [vmem:[#allocation2 + $0x12f0] sm:$0xff] %vm237_vm2, %v6804_v7  ;;  %v8915_v53 = vld [vmem:[#allocation2 + $0x122f] sm:$0xff]  ;;  %v8917_v59 = vld [vmem:[#allocation2 + $0x1227] sm:$0xff]  ;;  %v1921_v57 = vpop.f32.mrf.mxu1  ;;  %7150 = vmatmul.mubr.msk.f32.gmra.mxu0 %vm1393_vm1, %v7252_v47  ;;  %v2059_v45 = vadd.f32 %v8846_v52, %v8647_v55  ;;  %v8954_v8 = vadd.f32 %v8912_v44, %v2053_v35  ;;  %v1725_v40 = vmax.f32 %v8561_v26, 0.0 }
 0x127   : > { %11152 = vst [vmem:[#allocation38_spill] sm:$0xff] %v8903_v10  ;;  %11154 = vst [vmem:[#allocation40_spill] sm:$0xff] %v8910_v36  ;;  %v2313_v7 = vpop.f32.mrf.mxu0  ;;  %v2419_v10 = vld [vmem:[#allocation2 + $0x1170] sm:$0xff]  ;;  %7152 = vmatprep.mubr.msk.f32.mxu0 %vm1393_vm1, %v7254_v61  ;;  %v2418_v41 = vld [vmem:[#allocation2 + $0x1168] sm:$0xff]  ;;  %5656 = vrot.lane.b32.xlu0 %v5588_v4, %s7331_s15  ;;  %v5839_v54 = vmax.f32 %v5807_v60, 0.0 }
 0x128   : > { %11155 = vst [vmem:[#allocation41_spill] sm:$0xff] %v8912_v44  ;;  %11156 = vst [vmem:[#allocation42_spill] sm:$0xff] %v8915_v53  ;;  %v7253_v12 = vld [vmem:[%s7443_s23 + $0xb0] sm:$0xff]  ;;  %v8937_v52 = vadd.f32 %v2419_v10, %v2060_v6  ;;  %v8942_v47 = vadd.f32 %v2418_v41, %v2059_v45  ;;  %v7255_v10 = vld [vmem:[%s7443_s23 + $0xb8] sm:$0xff] }
 0x129   : > { %11157 = vst [vmem:[#allocation43_spill] sm:$0xff] %v8917_v59  ;;  %2389 = vst.msk [vmem:[#allocation2 + $0x1230] sm:$0xff] %vm237_vm2, %v8838_v27  ;;  %7105 = vmatprep.mubr.msk.f32.mxu1 %vm1393_vm1, %v7253_v12  ;;  %v6807_v27 = vpop.f32.mrf.mxu1  ;;  %5923 = vrot.lane.b32.xlu1 %v5839_v54, %s7331_s15  ;;  %v2875_v44 = vld [vmem:[#allocation2 + $0xdbc] sm:$0xff] }
 0x12a   : > { %2388 = vst.msk [vmem:[#allocation2 + $0x1228] sm:$0xff] %vm237_vm2, %v8851_v2  ;;  %2000 = vst.msk [vmem:[#allocation2 + $0x12e8] sm:$0xff] %vm237_vm2, %v1921_v57  ;;  %v6857_v2 = vpop.f32.mrf.mxu0  ;;  %v8945_v57 = vadd.f32 %v8908_v46, %v2049_v1  ;;  %7106 = vmatmul.mubr.msk.f32.gmra.mxu1 %vm1393_vm1, %v7255_v10  ;;  %v8956_v60 = vld [vmem:[#allocation2 + $0x128f] sm:$0xff]  ;;  %v8958_v6 = vld [vmem:[#allocation2 + $0x1287] sm:$0xff]  ;;  %7153 = vmatmul.mubr.msk.f32.gmra.mxu0 %vm1393_vm1, %v7251_v48  ;;  %v1728_v48 = vmax.f32 %v8574_v0, 0.0 }
 0x12b   : > { %11158 = vst [vmem:[#allocation44_spill] sm:$0xff] %v8937_v52  ;;  %11159 = vst [vmem:[#allocation45_spill] sm:$0xff] %v8942_v47  ;;  %v1931_v45 = vpop.f32.mrf.mxu1  ;;  %v7256_v1 = vld [vmem:[%s7443_s23 + $0xc0] sm:$0xff]  ;;  %7155 = vmatprep.mubr.msk.f32.mxu0 %vm1393_vm1, %v7253_v12  ;;  %4958 = vrot.lane.b32.xlu0 %v1725_v40, %s7335_s30  ;;  %v1741_v12 = vmax.f32 %v8563_v30, 0.0  ;;  %v5559_v40 = vadd.f32 %v8550_v19, %v8426_v18  ;;  %v5558_v52 = vadd.f32 %v8426_v18, %v8561_v26 }
 0x12c   : > { %11160 = vst [vmem:[#allocation46_spill] sm:$0xff] %v8945_v57  ;;  %11161 = vst [vmem:[#allocation47_spill] sm:$0xff] %v8948_v42  ;;  %v2323_v4 = vpop.f32.mrf.mxu0  ;;  %7108 = vmatprep.mubr.msk.f32.mxu1 %vm1393_vm1, %v7256_v1  ;;  %v3264_v36 = vld [vmem:[#allocation2 + $0x121c] sm:$0xff] }
 0x12d   : > { %2003 = vst.msk [vmem:[#allocation2 + $0x1350] sm:$0xff] %vm237_vm2, %v6807_v27  ;;  %11162 = vst [vmem:[#allocation48_spill] sm:$0xff] %v8954_v8  ;;  %v6810_v61 = vpop.f32.mrf.mxu1  ;;  %4964 = vrot.lane.b32.xlu1 %v1728_v48, %s7335_s30  ;;  %v7258_v27 = vld [vmem:[%s7443_s23 + $0xd0] sm:$0xff]  ;;  %v1744_v48 = vmax.f32 %v8576_v63, 0.0  ;;  %v5591_v8 = vmax.f32 %v5559_v40, 0.0  ;;  %v5574_v40 = vadd.f32 %v8426_v18, %v8563_v30  ;;  %v9319_v46 = vld [vmem:[#allocation2 + $0xf7c] sm:$0xff] }
 0x12e   : > { %11163 = vst [vmem:[#allocation49_spill] sm:$0xff] %v8956_v60  ;;  %11164 = vst [vmem:[#allocation50_spill] sm:$0xff] %v8958_v6  ;;  %v6860_v41 = vpop.f32.mrf.mxu0  ;;  %7156 = vmatmul.mubr.msk.f32.gmra.mxu0 %vm1393_vm1, %v7255_v10  ;;  %v2860_v6 = vld [vmem:[#allocation2 + $0xb14] sm:$0xff] }
 0x12f   : > { %2391 = vst.msk [vmem:[#allocation2 + $0x1290] sm:$0xff] %vm237_vm2, %v8866_v5  ;;  %2390 = vst.msk [vmem:[#allocation2 + $0x1288] sm:$0xff] %vm237_vm2, %v8883_v13  ;;  %v7257_v5 = vld [vmem:[%s7443_s23 + $0xc8] sm:$0xff]  ;;  %v1941_v54 = vpop.f32.mrf.mxu1  ;;  %4990 = vrot.lane.b32.xlu0 %v1741_v12, %s7335_s30  ;;  %7158 = vmatprep.mubr.msk.f32.mxu0 %vm1393_vm1, %v7256_v1  ;;  %v7260_v12 = vld [vmem:[%s7443_s23 + $0xe0] sm:$0xff]  ;;  %v5575_v1 = vadd.f32 %v8552_v20, %v8426_v18 }
 0x130   : > { %2002 = vst.msk [vmem:[#allocation2 + $0x1348] sm:$0xff] %vm237_vm2, %v1931_v45  ;;  %2005 = vst.msk [vmem:[#allocation2 + $0x13b0] sm:$0xff] %vm237_vm2, %v6810_v61  ;;  %7109 = vmatmul.mubr.msk.f32.gmra.mxu1 %vm1393_vm1, %v7257_v5  ;;  %v2333_v45 = vpop.f32.mrf.mxu0 }
 0x131   : > { %v8976_v13 = vld [vmem:[#allocation2 + $0x12ef] sm:$0xff]  ;;  %v8978_v35 = vld [vmem:[#allocation2 + $0x12e7] sm:$0xff]  ;;  %7111 = vmatprep.mubr.msk.f32.mxu1 %vm1393_vm1, %v7258_v27  ;;  %2004 = vst.msk [vmem:[#allocation2 + $0x13a8] sm:$0xff] %vm237_vm2, %v1941_v54  ;;  %v6813_v61 = vpop.f32.mrf.mxu1  ;;  %4996 = vrot.lane.b32.xlu1 %v1744_v48, %s7335_s30  ;;  %v5590_v48 = vmax.f32 %v5558_v52, 0.0 }
 0x132   : > { %11165 = vst [vmem:[#allocation51_spill] sm:$0xff] %v8976_v13  ;;  %11166 = vst [vmem:[#allocation52_spill] sm:$0xff] %v8978_v35  ;;  %v6863_v47 = vpop.f32.mrf.mxu0  ;;  %7159 = vmatmul.mubr.msk.f32.gmra.mxu0 %vm1393_vm1, %v7257_v5  ;;  %v7262_v52 = vld [vmem:[%s7443_s23 + $0xf0] sm:$0xff]  ;;  %v5607_v5 = vmax.f32 %v5575_v1, 0.0  ;;  %v5793_v1 = vadd.f32 %v8556_v24, %v8561_v26  ;;  %v5810_v26 = vadd.f32 %v8552_v20, %v8556_v24 }
 0x133   : > { %2393 = vst.msk [vmem:[#allocation2 + $0x12f0] sm:$0xff] %vm237_vm2, %v8899_v58  ;;  %2392 = vst.msk [vmem:[#allocation2 + $0x12e8] sm:$0xff] %vm237_vm2, %v2313_v7  ;;  %v7259_v58 = vld [vmem:[%s7443_s23 + $0xd8] sm:$0xff]  ;;  %v1951_v10 = vpop.f32.mrf.mxu1  ;;  %5662 = vrot.lane.b32.xlu0 %v5591_v8, %s7331_s15  ;;  %7161 = vmatprep.mubr.msk.f32.mxu0 %vm1393_vm1, %v7258_v27  ;;  %v5794_v27 = vadd.f32 %v8550_v19, %v8556_v24  ;;  %v9274_v13 = vld [vmem:[#allocation2 + $0xed0] sm:$0xff] }
 0x134   : > { %2007 = vst.msk [vmem:[#allocation2 + $0x1410] sm:$0xff] %vm237_vm2, %v6813_v61  ;;  %7112 = vmatmul.mubr.msk.f32.gmra.mxu1 %vm1393_vm1, %v7259_v58  ;;  %v2343_v42 = vpop.f32.mrf.mxu0  ;;  %2006 = vst.msk [vmem:[#allocation2 + $0x1408] sm:$0xff] %vm237_vm2, %v1951_v10  ;;  %v7263_v19 = vld [vmem:[%s7443_s23 + $0xf8] sm:$0xff] }
 0x135   : > { %7114 = vmatprep.mubr.msk.f32.mxu1 %vm1393_vm1, %v7260_v12  ;;  %v6816_v61 = vpop.f32.mrf.mxu1  ;;  %5660 = vrot.lane.b32.xlu1 %v5590_v48, %s7331_s15  ;;  %v5606_v48 = vmax.f32 %v5574_v40, 0.0  ;;  %v5826_v40 = vmax.f32 %v5794_v27, 0.0  ;;  %v5809_v27 = vadd.f32 %v8556_v24, %v8563_v30 }
 0x136   : > { %v6866_v57 = vpop.f32.mrf.mxu0  ;;  %2009 = vst.msk [vmem:[#allocation2 + $0x1470] sm:$0xff] %vm237_vm2, %v6816_v61  ;;  %7162 = vmatmul.mubr.msk.f32.gmra.mxu0 %vm1393_vm1, %v7259_v58 }
 0x137   : > { %v8999_v7 = vld [vmem:[#allocation2 + $0x134f] sm:$0xff]  ;;  %v9001_v54 = vld [vmem:[#allocation2 + $0x1347] sm:$0xff]  ;;  %v1961_v8 = vpop.f32.mrf.mxu1  ;;  %5694 = vrot.lane.b32.xlu0 %v5607_v5, %s7331_s15  ;;  %7164 = vmatprep.mubr.msk.f32.mxu0 %vm1393_vm1, %v7260_v12  ;;  %v5825_v12 = vmax.f32 %v5793_v1, 0.0 }
 0x138   : > { %11167 = vst [vmem:[#allocation53_spill] sm:$0xff] %v8999_v7  ;;  %11168 = vst [vmem:[#allocation54_spill] sm:$0xff] %v9001_v54  ;;  %v9021_v10 = vld [vmem:[#allocation2 + $0x13a7] sm:$0xff]  ;;  %v2353_v59 = vpop.f32.mrf.mxu0 }
 0x139   : > { %2395 = vst.msk [vmem:[#allocation2 + $0x1350] sm:$0xff] %vm237_vm2, %v6857_v2  ;;  %2394 = vst.msk [vmem:[#allocation2 + $0x1348] sm:$0xff] %vm237_vm2, %v2323_v4  ;;  %v7261_v2 = vld [vmem:[%s7443_s23 + $0xe8] sm:$0xff]  ;;  %v6819_v61 = vpop.f32.mrf.mxu1  ;;  %5692 = vrot.lane.b32.xlu1 %v5606_v48, %s7331_s15 }
 0x13a   : > { %7115 = vmatmul.mubr.msk.f32.gmra.mxu1 %vm1393_vm1, %v7261_v2  ;;  %v9019_v4 = vld [vmem:[#allocation2 + $0x13af] sm:$0xff]  ;;  %11170 = vst [vmem:[#allocation56_spill] sm:$0xff] %v9021_v10  ;;  %2008 = vst.msk [vmem:[#allocation2 + $0x1468] sm:$0xff] %vm237_vm2, %v1961_v8  ;;  %v6869_v53 = vpop.f32.mrf.mxu0  ;;  %7165 = vmatmul.mubr.msk.f32.gmra.mxu0 %vm1393_vm1, %v7261_v2  ;;  %v2080_v10 = vld [vmem:[#allocation2 + $0xafc] sm:$0xff] }
 0x13b   : > { %11169 = vst [vmem:[#allocation55_spill] sm:$0xff] %v9019_v4  ;;  %7117 = vmatprep.mubr.msk.f32.mxu1 %vm1393_vm1, %v7262_v52  ;;  %2397 = vst.msk [vmem:[#allocation2 + $0x13b0] sm:$0xff] %vm237_vm2, %v6860_v41  ;;  %v9039_v41 = vld [vmem:[#allocation2 + $0x140f] sm:$0xff]  ;;  %v1971_v58 = vpop.f32.mrf.mxu1  ;;  %5897 = vrot.lane.b32.xlu0 %v5826_v40, %s7331_s15 }
 0x13c   : > { %2396 = vst.msk [vmem:[#allocation2 + $0x13a8] sm:$0xff] %vm237_vm2, %v2333_v45  ;;  %2011 = vst.msk [vmem:[#allocation2 + $0x14d0] sm:$0xff] %vm237_vm2, %v6819_v61  ;;  %v9041_v45 = vld [vmem:[#allocation2 + $0x1407] sm:$0xff]  ;;  %v2363_v8 = vpop.f32.mrf.mxu0  ;;  %7167 = vmatprep.mubr.msk.f32.mxu0 %vm1393_vm1, %v7262_v52  ;;  %v5842_v61 = vmax.f32 %v5810_v26, 0.0  ;;  %v5841_v52 = vmax.f32 %v5809_v27, 0.0  ;;  %v1727_v26 = vmax.f32 %v8585_v25, 0.0 }
 0x13d   : > { %11171 = vst [vmem:[#allocation57_spill] sm:$0xff] %v9039_v41  ;;  %11172 = vst [vmem:[#allocation58_spill] sm:$0xff] %v9041_v45  ;;  %5895 = vrot.lane.b32.xlu1 %v5825_v12, %s7331_s15  ;;  %v9062_v2 = vld [vmem:[#allocation2 + $0xf28] sm:$0xff]  ;;  %v5798_v45 = vadd.f32 %v8592_v50, %v8556_v24 }
 0x13e   : > { %7118 = vmatmul.mubr.msk.f32.gmra.mxu1 %vm1393_vm1, %v7263_v19  ;;  %2403 = vst.msk [vmem:[#allocation2 + $0x14d0] sm:$0xff] %vm237_vm2, %v6869_v53  ;;  %2399 = vst.msk [vmem:[#allocation2 + $0x1410] sm:$0xff] %vm237_vm2, %v6863_v47  ;;  %v6874_v53 = vpop.f32.mrf.mxu1  ;;  %v6924_v5 = vpop.f32.mrf.mxu0  ;;  %7168 = vmatmul.mubr.msk.f32.gmra.mxu0 %vm1393_vm1, %v7263_v19  ;;  %v2014_v41 = vld [vmem:[#allocation2 + $0xecf] sm:$0xff] }
 0x13f   : > { %2398 = vst.msk [vmem:[#allocation2 + $0x1408] sm:$0xff] %vm237_vm2, %v2343_v42  ;;  %2010 = vst.msk [vmem:[#allocation2 + $0x14c8] sm:$0xff] %vm237_vm2, %v1971_v58  ;;  %5929 = vrot.lane.b32.xlu0 %v5842_v61, %s7331_s15  ;;  %v5830_v7 = vmax.f32 %v5798_v45, 0.0 }
 0x140   : > { %2402 = vst.msk [vmem:[#allocation2 + $0x14c8] sm:$0xff] %vm237_vm2, %v2363_v8  ;;  %2763 = vst.msk [vmem:[#allocation2 + $0xf30] sm:$0xff] %vm237_vm2, %v6874_v53  ;;  %v2603_v48 = vpop.f32.mrf.mxu1  ;;  %v2993_v1 = vpop.f32.mrf.mxu0 }
 0x141   : > { %v9057_v47 = vld [vmem:[#allocation2 + $0x146f] sm:$0xff]  ;;  %v9059_v42 = vld [vmem:[#allocation2 + $0x1467] sm:$0xff]  ;;  %11175 = vst [vmem:[#allocation61_spill] sm:$0xff] %v9062_v2  ;;  %2762 = vst.msk [vmem:[#allocation2 + $0xf28] sm:$0xff] %vm237_vm2, %v2603_v48  ;;  %5927 = vrot.lane.b32.xlu1 %v5841_v52, %s7331_s15  ;;  %v1743_v48 = vmax.f32 %v8587_v49, 0.0  ;;  %v5561_v52 = vadd.f32 %v8574_v0, %v8426_v18 }
 0x142   : > { %11173 = vst [vmem:[#allocation59_spill] sm:$0xff] %v9057_v47  ;;  %11174 = vst [vmem:[#allocation60_spill] sm:$0xff] %v9059_v42  ;;  %v6877_v58 = vpop.f32.mrf.mxu1  ;;  %v6927_v40 = vpop.f32.mrf.mxu0  ;;  %v5579_v42 = vadd.f32 %v8594_v16, %v8426_v18  ;;  %v3266_v2 = vld [vmem:[#allocation2 + $0x127c] sm:$0xff] }
 0x143   : > { %2401 = vst.msk [vmem:[#allocation2 + $0x1470] sm:$0xff] %vm237_vm2, %v6866_v57  ;;  %2400 = vst.msk [vmem:[#allocation2 + $0x1468] sm:$0xff] %vm237_vm2, %v2353_v59  ;;  %4962 = vrot.lane.b32.xlu0 %v1727_v26, %s7335_s30  ;;  %v1730_v59 = vmax.f32 %v8592_v50, 0.0  ;;  %v1746_v26 = vmax.f32 %v8594_v16, 0.0  ;;  %v5593_v37 = vmax.f32 %v5561_v52, 0.0 }
 0x144   : > { %2765 = vst.msk [vmem:[#allocation2 + $0xf90] sm:$0xff] %vm237_vm2, %v6877_v58  ;;  %v2613_v8 = vpop.f32.mrf.mxu1  ;;  %v3003_v12 = vpop.f32.mrf.mxu0  ;;  %v5611_v47 = vmax.f32 %v5579_v42, 0.0 }
 0x145   : > { %2764 = vst.msk [vmem:[#allocation2 + $0xf88] sm:$0xff] %vm237_vm2, %v2613_v8  ;;  %4968 = vrot.lane.b32.xlu1 %v1730_v59, %s7335_s30 }
 0x146   : > { %v6880_v19 = vpop.f32.mrf.mxu1  ;;  %v6930_v57 = vpop.f32.mrf.mxu0 }
 0x147   : > { %2767 = vst.msk [vmem:[#allocation2 + $0xff0] sm:$0xff] %vm237_vm2, %v6880_v19  ;;  %v9082_v58 = vld [vmem:[#allocation2 + $0xf31] sm:$0xff]  ;;  %4994 = vrot.lane.b32.xlu0 %v1743_v48, %s7335_s30 }
 0x148   : > { %v9076_v53 = vld [vmem:[#allocation2 + $0xf29] sm:$0xff]  ;;  %v2623_v27 = vpop.f32.mrf.mxu1  ;;  %v3013_v61 = vpop.f32.mrf.mxu0  ;;  %11177 = vst [vmem:[#allocation63_spill] sm:$0xff] %v9082_v58  ;;  %v9084_v8 = vld [vmem:[#allocation2 + $0xf34] sm:$0xff] }
 0x149   : > { %11176 = vst [vmem:[#allocation62_spill] sm:$0xff] %v9076_v53  ;;  %11178 = vst [vmem:[#allocation64_spill] sm:$0xff] %v9084_v8  ;;  %v5560_v53 = vadd.f32 %v8426_v18, %v8585_v25  ;;  %5000 = vrot.lane.b32.xlu1 %v1746_v26, %s7335_s30  ;;  %v9105_v8 = vpop.permute.xlu0 %5314 }
 0x14a   : > { %3152 = vst.msk [vmem:[#allocation2 + $0xf28] sm:$0xff] %vm237_vm2, %v2993_v1  ;;  %2766 = vst.msk [vmem:[#allocation2 + $0xfe8] sm:$0xff] %vm237_vm2, %v2623_v27  ;;  %v6883_v59 = vpop.f32.mrf.mxu1  ;;  %v6933_v19 = vpop.f32.mrf.mxu0 }
 0x14b   : > { %3153 = vst.msk [vmem:[#allocation2 + $0xf30] sm:$0xff] %vm237_vm2, %v6924_v5  ;;  %2769 = vst.msk [vmem:[#allocation2 + $0x1050] sm:$0xff] %vm237_vm2, %v6883_v59  ;;  %v5577_v5 = vadd.f32 %v8576_v63, %v8426_v18  ;;  %v9099_v48 = vld [vmem:[#allocation2 + $0xf91] sm:$0xff]  ;;  %5666 = vrot.lane.b32.xlu0 %v5593_v37, %s7331_s15  ;;  %v5592_v26 = vmax.f32 %v5560_v53, 0.0 }
 0x14c   : > { %v9094_v14 = vld [vmem:[#allocation2 + $0xf89] sm:$0xff]  ;;  %v2633_v1 = vpop.f32.mrf.mxu1  ;;  %v3023_v27 = vpop.f32.mrf.mxu0  ;;  %11180 = vst [vmem:[#allocation66_spill] sm:$0xff] %v9099_v48  ;;  %v9101_v58 = vld [vmem:[#allocation2 + $0xf94] sm:$0xff]  ;;  %11182 = vst [vmem:[#allocation68_spill] sm:$0xff] %v9105_v8 }
 0x14d   : > { %11179 = vst [vmem:[#allocation65_spill] sm:$0xff] %v9094_v14  ;;  %11181 = vst [vmem:[#allocation67_spill] sm:$0xff] %v9101_v58  ;;  %v5576_v14 = vadd.f32 %v8426_v18, %v8587_v49  ;;  %5664 = vrot.lane.b32.xlu1 %v5592_v26, %s7331_s15 }
 0x14e   : > { %3154 = vst.msk [vmem:[#allocation2 + $0xf88] sm:$0xff] %vm237_vm2, %v3003_v12  ;;  %2768 = vst.msk [vmem:[#allocation2 + $0x1048] sm:$0xff] %vm237_vm2, %v2633_v1  ;;  %v6886_v52 = vpop.f32.mrf.mxu1  ;;  %v6936_v59 = vpop.f32.mrf.mxu0  ;;  %v5609_v1 = vmax.f32 %v5577_v5, 0.0  ;;  %v9117_v37 = vld [vmem:[#allocation2 + $0xff1] sm:$0xff] }
 0x14f   : > { %3155 = vst.msk [vmem:[#allocation2 + $0xf90] sm:$0xff] %vm237_vm2, %v6927_v40  ;;  %2771 = vst.msk [vmem:[#allocation2 + $0x10b0] sm:$0xff] %vm237_vm2, %v6886_v52  ;;  %v5796_v40 = vadd.f32 %v8574_v0, %v8556_v24  ;;  %v9119_v53 = vld [vmem:[#allocation2 + $0xff4] sm:$0xff]  ;;  %v5608_v26 = vmax.f32 %v5576_v14, 0.0  ;;  %v5812_v14 = vadd.f32 %v8576_v63, %v8556_v24 }
 0x150   : > { %v2643_v12 = vpop.f32.mrf.mxu1  ;;  %v3033_v58 = vpop.f32.mrf.mxu0  ;;  %11184 = vst [vmem:[#allocation70_spill] sm:$0xff] %v9117_v37  ;;  %11185 = vst [vmem:[#allocation71_spill] sm:$0xff] %v9119_v53  ;;  %5698 = vrot.lane.b32.xlu0 %v5609_v1, %s7331_s15 }
 0x151   : > { %v9112_v48 = vld [vmem:[#allocation2 + $0xfe9] sm:$0xff]  ;;  %2770 = vst.msk [vmem:[#allocation2 + $0x10a8] sm:$0xff] %vm237_vm2, %v2643_v12  ;;  %v4981_v37 = vpop.permute.xlu1 %4980  ;;  %5696 = vrot.lane.b32.xlu1 %v5608_v26, %s7331_s15  ;;  %v5828_v12 = vmax.f32 %v5796_v40, 0.0  ;;  %v5811_v26 = vadd.f32 %v8556_v24, %v8587_v49 }
 0x152   : > { %11183 = vst [vmem:[#allocation69_spill] sm:$0xff] %v9112_v48  ;;  %3156 = vst.msk [vmem:[#allocation2 + $0xfe8] sm:$0xff] %vm237_vm2, %v3013_v61  ;;  %v6889_v5 = vpop.f32.mrf.mxu1  ;;  %v6939_v52 = vpop.f32.mrf.mxu0  ;;  %v5795_v48 = vadd.f32 %v8556_v24, %v8585_v25  ;;  %v9135_v1 = vld [vmem:[#allocation2 + $0x1051] sm:$0xff] }
 0x153   : > { %3157 = vst.msk [vmem:[#allocation2 + $0xff0] sm:$0xff] %vm237_vm2, %v6930_v57  ;;  %2773 = vst.msk [vmem:[#allocation2 + $0x1110] sm:$0xff] %vm237_vm2, %v6889_v5  ;;  %v4949_v61 = vpop.permute.xlu0 %4948  ;;  %v9137_v8 = vld [vmem:[#allocation2 + $0x1054] sm:$0xff] }
 0x154   : > { %5060 = vst.msk [vmem:[%s8433_s11 + $0x88] sm:$0xff] %vm5042_vm4, %v4981_v37  ;;  %v2653_v57 = vpop.f32.mrf.mxu1  ;;  %11187 = vst [vmem:[#allocation73_spill] sm:$0xff] %v9135_v1  ;;  %v3043_v5 = vpop.f32.mrf.mxu0  ;;  %5901 = vrot.lane.b32.xlu0 %v5828_v12, %s7331_s15  ;;  %v5827_v40 = vmax.f32 %v5795_v48, 0.0  ;;  %v5843_v12 = vmax.f32 %v5811_v26, 0.0 }
 0x155   : > { %v9128_v53 = vld [vmem:[#allocation2 + $0x1049] sm:$0xff]  ;;  %11188 = vst [vmem:[#allocation74_spill] sm:$0xff] %v9137_v8  ;;  %5044 = vst.msk [vmem:[%s8433_s11 + $0x8] sm:$0xff] %vm5042_vm4, %v4949_v61  ;;  %v5844_v8 = vmax.f32 %v5812_v14, 0.0 }
 0x156   : > { %11186 = vst [vmem:[#allocation72_spill] sm:$0xff] %v9128_v53  ;;  %3158 = vst.msk [vmem:[#allocation2 + $0x1048] sm:$0xff] %vm237_vm2, %v3023_v27  ;;  %v6892_v37 = vpop.f32.mrf.mxu1  ;;  %v9148_v53 = vpop.permute.xlu1 %5650  ;;  %v9150_v1 = vld [vmem:[#allocation2 + $0x10b1] sm:$0xff]  ;;  %5899 = vrot.lane.b32.xlu1 %v5827_v40, %s7331_s15 }
 0x157   : > { %2772 = vst.msk [vmem:[#allocation2 + $0x1108] sm:$0xff] %vm237_vm2, %v2653_v57  ;;  %3159 = vst.msk [vmem:[#allocation2 + $0x1050] sm:$0xff] %vm237_vm2, %v6933_v19  ;;  %v6942_v27 = vpop.f32.mrf.mxu0  ;;  %v4947_v19 = vpop.permute.xlu0 %4946 }
 0x158   : > { %2775 = vst.msk [vmem:[#allocation2 + $0x1170] sm:$0xff] %vm237_vm2, %v6892_v37  ;;  %11189 = vst [vmem:[#allocation75_spill] sm:$0xff] %v9148_v53  ;;  %v9152_v61 = vld [vmem:[#allocation2 + $0x10a9] sm:$0xff]  ;;  %v2663_v57 = vpop.f32.mrf.mxu1  ;;  %5933 = vrot.lane.b32.xlu0 %v5844_v8, %s7331_s15  ;;  %v1729_v8 = vmax.f32 %v8607_v39, 0.0 }
 0x159   : > { %11190 = vst [vmem:[#allocation76_spill] sm:$0xff] %v9150_v1  ;;  %11191 = vst [vmem:[#allocation77_spill] sm:$0xff] %v9152_v61  ;;  %v3053_v48 = vpop.f32.mrf.mxu0  ;;  %v9161_v37 = vld [vmem:[#allocation2 + $0x11d0] sm:$0xff]  ;;  %v1745_v1 = vmax.f32 %v8609_v62, 0.0 }
 0x15a   : > { %3160 = vst.msk [vmem:[#allocation2 + $0x10a8] sm:$0xff] %vm237_vm2, %v3033_v58  ;;  %3161 = vst.msk [vmem:[#allocation2 + $0x10b0] sm:$0xff] %vm237_vm2, %v6936_v59  ;;  %v6895_v53 = vpop.f32.mrf.mxu1  ;;  %v9164_v14 = vld [vmem:[#allocation2 + $0x1111] sm:$0xff]  ;;  %5931 = vrot.lane.b32.xlu1 %v5843_v12, %s7331_s15  ;;  %v4953_v26 = vpop.permute.xlu1 %4952  ;;  %v1732_v12 = vmax.f32 %v8620_v15, 0.0 }
 0x15b   : > { %5043 = vst.msk [vmem:[%s8433_s11] sm:$0xff] %vm5042_vm4, %v4947_v19  ;;  %11192 = vst [vmem:[#allocation78_spill] sm:$0xff] %v9161_v37  ;;  %v6945_v40 = vpop.f32.mrf.mxu0  ;;  %v4979_v59 = vpop.permute.xlu0 %4978  ;;  %v9169_v19 = vld [vmem:[#allocation2 + $0x11c8] sm:$0xff] }
 0x15c   : > { %2774 = vst.msk [vmem:[#allocation2 + $0x1168] sm:$0xff] %vm237_vm2, %v2663_v57  ;;  %2777 = vst.msk [vmem:[#allocation2 + $0x11d0] sm:$0xff] %vm237_vm2, %v6895_v53  ;;  %v2673_v57 = vpop.f32.mrf.mxu1  ;;  %4966 = vrot.lane.b32.xlu0 %v1729_v8, %s7335_s30 }
 0x15d   : > { %11193 = vst [vmem:[#allocation79_spill] sm:$0xff] %v9164_v14  ;;  %11195 = vst [vmem:[#allocation81_spill] sm:$0xff] %v9169_v19  ;;  %v3063_v53 = vpop.f32.mrf.mxu0 }
 0x15e   : > { %v9166_v58 = vld [vmem:[#allocation2 + $0x1109] sm:$0xff]  ;;  %5059 = vst.msk [vmem:[%s8433_s11 + $0x80] sm:$0xff] %vm5042_vm4, %v4979_v59  ;;  %v6898_v14 = vpop.f32.mrf.mxu1  ;;  %5046 = vst.msk [vmem:[%s8433_s11 + $0x18] sm:$0xff] %vm5042_vm4, %v4953_v26  ;;  %4972 = vrot.lane.b32.xlu1 %v1732_v12, %s7335_s30  ;;  %v5563_v26 = vadd.f32 %v8592_v50, %v8426_v18  ;;  %v1748_v12 = vmax.f32 %v8622_v51, 0.0 }
 0x15f   : > { %11194 = vst [vmem:[#allocation80_spill] sm:$0xff] %v9166_v58  ;;  %3162 = vst.msk [vmem:[#allocation2 + $0x1108] sm:$0xff] %vm237_vm2, %v3043_v5  ;;  %v9179_v58 = vld [vmem:[#allocation2 + $0x1230] sm:$0xff]  ;;  %v6948_v5 = vpop.f32.mrf.mxu0  ;;  %v9189_v59 = vpop.permute.xlu0 %5682 }
 0x160   : > { %3163 = vst.msk [vmem:[#allocation2 + $0x1110] sm:$0xff] %vm237_vm2, %v6939_v52  ;;  %2776 = vst.msk [vmem:[#allocation2 + $0x11c8] sm:$0xff] %vm237_vm2, %v2673_v57  ;;  %v9184_v61 = vld [vmem:[#allocation2 + $0x1171] sm:$0xff]  ;;  %v9191_v57 = vld [vmem:[#allocation2 + $0x1228] sm:$0xff]  ;;  %v2683_v8 = vpop.f32.mrf.mxu1  ;;  %4998 = vrot.lane.b32.xlu0 %v1745_v1, %s7335_s30  ;;  %v5595_v37 = vmax.f32 %v5563_v26, 0.0  ;;  %v5578_v26 = vadd.f32 %v8426_v18, %v8609_v62 }
 0x161   : > { %11196 = vst [vmem:[#allocation82_spill] sm:$0xff] %v9179_v58  ;;  %2779 = vst.msk [vmem:[#allocation2 + $0x1230] sm:$0xff] %vm237_vm2, %v6898_v14  ;;  %v3073_v14 = vpop.f32.mrf.mxu0  ;;  %v9217_v58 = vld [vmem:[#allocation2 + $0x1288] sm:$0xff] }
 0x162   : > { %11197 = vst [vmem:[#allocation83_spill] sm:$0xff] %v9184_v61  ;;  %11199 = vst [vmem:[#allocation85_spill] sm:$0xff] %v9189_v59  ;;  %v9201_v59 = vld [vmem:[#allocation2 + $0x1290] sm:$0xff]  ;;  %v6901_v61 = vpop.f32.mrf.mxu1  ;;  %5004 = vrot.lane.b32.xlu1 %v1748_v12, %s7335_s30  ;;  %v5610_v42 = vmax.f32 %v5578_v26, 0.0  ;;  %v9269_v26 = vld [vmem:[#allocation2 + $0x1348] sm:$0xff] }
 0x163   : > { %v9186_v52 = vld [vmem:[#allocation2 + $0x1169] sm:$0xff]  ;;  %11200 = vst [vmem:[#allocation86_spill] sm:$0xff] %v9191_v57  ;;  %2778 = vst.msk [vmem:[#allocation2 + $0x1228] sm:$0xff] %vm237_vm2, %v2683_v8  ;;  %v5562_v57 = vadd.f32 %v8426_v18, %v8607_v39  ;;  %v9215_v1 = vpop.permute.xlu0 %5885 }
 0x164   : > { %11198 = vst [vmem:[#allocation84_spill] sm:$0xff] %v9186_v52  ;;  %3164 = vst.msk [vmem:[#allocation2 + $0x1168] sm:$0xff] %vm237_vm2, %v3053_v48  ;;  %v4985_v52 = vpop.permute.xlu1 %4984  ;;  %v9208_v48 = vpop.f32.mrf.mxu0  ;;  %5670 = vrot.lane.b32.xlu0 %v5595_v37, %s7331_s15  ;;  %v9241_v37 = vld [vmem:[#allocation2 + $0x12e8] sm:$0xff] }
 0x165   : > { %3165 = vst.msk [vmem:[#allocation2 + $0x1170] sm:$0xff] %vm237_vm2, %v6942_v27  ;;  %11201 = vst [vmem:[#allocation87_spill] sm:$0xff] %v9201_v59  ;;  %v9210_v27 = vld [vmem:[#allocation2 + $0x11d1] sm:$0xff]  ;;  %v2693_v19 = vpop.f32.mrf.mxu1  ;;  %v5594_v12 = vmax.f32 %v5562_v57, 0.0 }
 0x166   : > { %5062 = vst.msk [vmem:[%s8433_s11 + $0x98] sm:$0xff] %vm5042_vm4, %v4985_v52  ;;  %11202 = vst [vmem:[#allocation88_spill] sm:$0xff] %v9210_v27  ;;  %v2094_v27 = vld [vmem:[#allocation2 + $0xd9c] sm:$0xff] }
 0x167   : > { %2781 = vst.msk [vmem:[#allocation2 + $0x1290] sm:$0xff] %vm237_vm2, %v6901_v61  ;;  %v9212_v8 = vld [vmem:[#allocation2 + $0x11c9] sm:$0xff]  ;;  %11204 = vst [vmem:[#allocation90_spill] sm:$0xff] %v9215_v1  ;;  %v3083_v61 = vpop.f32.mrf.mxu0  ;;  %5668 = vrot.lane.b32.xlu1 %v5594_v12, %s7331_s15 }
 0x168   : > { %11203 = vst [vmem:[#allocation89_spill] sm:$0xff] %v9212_v8  ;;  %11205 = vst [vmem:[#allocation91_spill] sm:$0xff] %v9217_v58  ;;  %v9224_v52 = vpop.permute.xlu1 %5680  ;;  %v9227_v1 = vld [vmem:[#allocation2 + $0x12f0] sm:$0xff]  ;;  %v6904_v8 = vpop.f32.mrf.mxu1  ;;  %v2095_v12 = vld [vmem:[#allocation2 + $0xda4] sm:$0xff]  ;;  %5702 = vrot.lane.b32.xlu0 %v5611_v47, %s7331_s15  ;;  %v5814_v58 = vadd.f32 %v8594_v16, %v8556_v24 }
 0x169   : > { %3166 = vst.msk [vmem:[#allocation2 + $0x11c8] sm:$0xff] %vm237_vm2, %v3063_v53  ;;  %3167 = vst.msk [vmem:[#allocation2 + $0x11d0] sm:$0xff] %vm237_vm2, %v6945_v40  ;;  %v9232_v53 = vpop.f32.mrf.mxu0  ;;  %v9234_v40 = vld [vmem:[#allocation2 + $0x1231] sm:$0xff] }
 0x16a   : > { %2780 = vst.msk [vmem:[#allocation2 + $0x1288] sm:$0xff] %vm237_vm2, %v2693_v19  ;;  %11206 = vst [vmem:[#allocation92_spill] sm:$0xff] %v9224_v52  ;;  %v9236_v19 = vld [vmem:[#allocation2 + $0x1229] sm:$0xff]  ;;  %v9239_v52 = vpop.permute.xlu0 %5917  ;;  %v2703_v57 = vpop.f32.mrf.mxu1 }
 0x16b   : > { %11207 = vst [vmem:[#allocation93_spill] sm:$0xff] %v9227_v1  ;;  %2783 = vst.msk [vmem:[#allocation2 + $0x12f0] sm:$0xff] %vm237_vm2, %v6904_v8  ;;  %v9248_v8 = vpop.f32.mrf.mxu0  ;;  %v2484_v1 = vld [vmem:[#allocation2 + $0xda8] sm:$0xff]  ;;  %5700 = vrot.lane.b32.xlu1 %v5610_v42, %s7331_s15 }
 0x16c   : > { %11208 = vst [vmem:[#allocation94_spill] sm:$0xff] %v9234_v40  ;;  %11209 = vst [vmem:[#allocation95_spill] sm:$0xff] %v9236_v19  ;;  %v2096_v19 = vld [vmem:[#allocation2 + $0xdfc] sm:$0xff]  ;;  %v9251_v40 = vpop.permute.xlu1 %5883  ;;  %v6907_v4 = vpop.f32.mrf.mxu1  ;;  %5905 = vrot.lane.b32.xlu0 %v5830_v7, %s7331_s15 }
 0x16d   : > { %11210 = vst [vmem:[#allocation96_spill] sm:$0xff] %v9239_v52  ;;  %11211 = vst [vmem:[#allocation97_spill] sm:$0xff] %v9241_v37  ;;  %v2126_v52 = vadd.f32 %v2094_v27, %v8501_v22  ;;  %v9254_v37 = vld [vmem:[#allocation2 + $0x1350] sm:$0xff]  ;;  %v9259_v54 = vpop.f32.mrf.mxu0  ;;  %v2112_v27 = vadd.f32 %v2080_v10, %v8518_v33  ;;  %v2127_v10 = vadd.f32 %v8420_v17, %v2095_v12 }
 0x16e   : > { %3168 = vst.msk [vmem:[#allocation2 + $0x1228] sm:$0xff] %vm237_vm2, %v3073_v14  ;;  %3169 = vst.msk [vmem:[#allocation2 + $0x1230] sm:$0xff] %vm237_vm2, %v6948_v5  ;;  %v5797_v14 = vadd.f32 %v8556_v24, %v8607_v39  ;;  %v2013_v5 = vld [vmem:[#allocation2 + $0xec7] sm:$0xff]  ;;  %v9262_v22 = vld [vmem:[#allocation2 + $0x1291] sm:$0xff]  ;;  %v9267_v47 = vpop.permute.xlu0 %5648 }
 0x16f   : > { %2782 = vst.msk [vmem:[#allocation2 + $0x12e8] sm:$0xff] %vm237_vm2, %v2703_v57  ;;  %11212 = vst [vmem:[#allocation98_spill] sm:$0xff] %v9251_v40  ;;  %v2097_v57 = vld [vmem:[#allocation2 + $0xe04] sm:$0xff]  ;;  %v2485_v33 = vld [vmem:[#allocation2 + $0xdb0] sm:$0xff]  ;;  %v9282_v45 = vpop.f32.mrf.mxu0  ;;  %v2045_v42 = vadd.f32 %v2013_v5, %v8499_v21 }
 0x170   : > { %11213 = vst [vmem:[#allocation99_spill] sm:$0xff] %v9254_v37  ;;  %2785 = vst.msk [vmem:[#allocation2 + $0x1350] sm:$0xff] %vm237_vm2, %v6907_v4  ;;  %v2713_v37 = vpop.f32.mrf.mxu1  ;;  %v11218_v4 = vld [vmem:[#allocation6_spill] sm:$0xff]  ;;  %v9287_v12 = vpop.permute.xlu1 %5915  ;;  %v2129_v17 = vadd.f32 %v8511_v28, %v2097_v57  ;;  %v5846_v57 = vmax.f32 %v5814_v58, 0.0  ;;  %v2517_v58 = vadd.f32 %v2485_v33, %v2127_v10  ;;  %v2488_v33 = vld [vmem:[#allocation2 + $0xe68] sm:$0xff] }
 0x171   : > { %11214 = vst [vmem:[#allocation100_spill] sm:$0xff] %v9262_v22  ;;  %v9264_v40 = vld [vmem:[#allocation2 + $0x1289] sm:$0xff]  ;;  %11216 = vst [vmem:[#allocation102_spill] sm:$0xff] %v9267_v47  ;;  %v2046_v35 = vadd.f32 %v11218_v4, %v2014_v41  ;;  %v2516_v47 = vadd.f32 %v2484_v1, %v2126_v52  ;;  %v2098_v21 = vld [vmem:[#allocation2 + $0xe5c] sm:$0xff]  ;;  %v9296_v1 = vpop.f32.mrf.mxu0 }
 0x172   : > { %11215 = vst [vmem:[#allocation101_spill] sm:$0xff] %v9264_v40  ;;  %11217 = vst [vmem:[#allocation103_spill] sm:$0xff] %v9269_v26  ;;  %v2470_v22 = vld [vmem:[#allocation2 + $0xb08] sm:$0xff]  ;;  %v2128_v40 = vadd.f32 %v2096_v19, %v8520_v34  ;;  %v5829_v19 = vmax.f32 %v5797_v14, 0.0  ;;  %v9290_v34 = vld [vmem:[#allocation2 + $0x13b0] sm:$0xff]  ;;  %v4983_v14 = vpop.permute.xlu0 %4982  ;;  %5937 = vrot.lane.b32.xlu0 %v5846_v57, %s7331_s15 }
 0x173   : > { %3170 = vst.msk [vmem:[#allocation2 + $0x1288] sm:$0xff] %vm237_vm2, %v3083_v61  ;;  %3171 = vst.msk [vmem:[#allocation2 + $0x1290] sm:$0xff] %vm237_vm2, %v9208_v48  ;;  %v9285_v41 = vld [vmem:[#allocation2 + $0xec8] sm:$0xff]  ;;  %v6910_v61 = vpop.f32.mrf.mxu1  ;;  %v5813_v48 = vadd.f32 %v8556_v24, %v8609_v62  ;;  %v2487_v26 = vld [vmem:[#allocation2 + $0xe10] sm:$0xff]  ;;  %v2502_v5 = vadd.f32 %v2470_v22, %v2112_v27  ;;  %v2437_v28 = vadd.f32 %v9274_v13, %v2046_v35  ;;  %v9313_v27 = vpop.f32.mrf.mxu0 }
 0x174   : > { %2784 = vst.msk [vmem:[#allocation2 + $0x1348] sm:$0xff] %vm237_vm2, %v2713_v37  ;;  %v2486_v4 = vld [vmem:[#allocation2 + $0xe08] sm:$0xff]  ;;  %11219 = vst [vmem:[#allocation104_spill] sm:$0xff] %v9287_v12  ;;  %v2874_v37 = vld [vmem:[#allocation2 + $0xdb4] sm:$0xff]  ;;  %5903 = vrot.lane.b32.xlu1 %v5829_v19, %s7331_s15  ;;  %v2436_v35 = vadd.f32 %v9285_v41, %v2045_v42 }
 0x175   : > { %11220 = vst [vmem:[#allocation105_spill] sm:$0xff] %v9290_v34  ;;  %2787 = vst.msk [vmem:[#allocation2 + $0x13b0] sm:$0xff] %vm237_vm2, %v6910_v61  ;;  %v2795_v52 = vld [vmem:[#allocation2 + $0xed1] sm:$0xff]  ;;  %v9303_v34 = vld [vmem:[#allocation2 + $0x13a8] sm:$0xff]  ;;  %v2723_v59 = vpop.f32.mrf.mxu1  ;;  %v2518_v60 = vadd.f32 %v2486_v4, %v2128_v40  ;;  %v2906_v19 = vadd.f32 %v2874_v37, %v2516_v47  ;;  %v9325_v47 = vpop.f32.mrf.mxu0  ;;  %v2892_v37 = vadd.f32 %v2860_v6, %v2502_v5 }
 0x176   : > { %v9298_v12 = vld [vmem:[#allocation2 + $0x12f1] sm:$0xff]  ;;  %v9300_v7 = vld [vmem:[#allocation2 + $0x12e9] sm:$0xff]  ;;  %11223 = vst [vmem:[#allocation108_spill] sm:$0xff] %v9303_v34  ;;  %5061 = vst.msk [vmem:[%s8433_s11 + $0x90] sm:$0xff] %vm5042_vm4, %v4983_v14  ;;  %v2519_v14 = vadd.f32 %v2487_v26, %v2129_v17  ;;  %v9333_v17 = vpop.permute.xlu0 %5686 }
 0x177   : > { %11221 = vst [vmem:[#allocation106_spill] sm:$0xff] %v9298_v12  ;;  %11222 = vst [vmem:[#allocation107_spill] sm:$0xff] %v9300_v7  ;;  %v2794_v61 = vld [vmem:[#allocation2 + $0xec9] sm:$0xff]  ;;  %v2877_v7 = vld [vmem:[#allocation2 + $0xe1c] sm:$0xff]  ;;  %v4951_v12 = vpop.permute.xlu1 %4950 }
 0x178   : > { %v2099_v22 = vld [vmem:[#allocation2 + $0xe64] sm:$0xff]  ;;  %3172 = vst.msk [vmem:[#allocation2 + $0x12e8] sm:$0xff] %vm237_vm2, %v9248_v8  ;;  %3173 = vst.msk [vmem:[#allocation2 + $0x12f0] sm:$0xff] %vm237_vm2, %v9232_v53  ;;  %v2876_v40 = vld [vmem:[#allocation2 + $0xe14] sm:$0xff]  ;;  %v5845_v8 = vmax.f32 %v5813_v48, 0.0  ;;  %v6913_v53 = vpop.f32.mrf.mxu1 }
 0x179   : > { %2786 = vst.msk [vmem:[#allocation2 + $0x13a8] sm:$0xff] %vm237_vm2, %v2723_v59  ;;  %v2100_v4 = vld [vmem:[#allocation2 + $0xebc] sm:$0xff]  ;;  %v9317_v34 = vld [vmem:[#allocation2 + $0x1410] sm:$0xff]  ;;  %v2130_v59 = vadd.f32 %v2098_v21, %v8538_v43  ;;  %v2101_v10 = vld [vmem:[#allocation2 + $0xec4] sm:$0xff]  ;;  %v2131_v48 = vadd.f32 %v8530_v38, %v2099_v22  ;;  %v9338_v43 = vadd.f32 %v2795_v52, %v2437_v28  ;;  %v9350_v28 = vadd.f32 %v2794_v61, %v2436_v35 }
 0x17a   : > { %11224 = vst [vmem:[#allocation109_spill] sm:$0xff] %v9317_v34  ;;  %v2088_v42 = vld [vmem:[#allocation2 + $0xc7c] sm:$0xff]  ;;  %5045 = vst.msk [vmem:[%s8433_s11 + $0x10] sm:$0xff] %vm5042_vm4, %v4951_v12  ;;  %v9328_v57 = vld [vmem:[#allocation2 + $0x1351] sm:$0xff]  ;;  %5935 = vrot.lane.b32.xlu1 %v5845_v8, %s7331_s15  ;;  %v2733_v21 = vpop.f32.mrf.mxu1  ;;  %v1731_v12 = vmax.f32 %v8629_v31, 0.0  ;;  %v2132_v5 = vadd.f32 %v2100_v4, %v8563_v30  ;;  %v9346_v8 = vpop.f32.mrf.mxu0  ;;  %v2133_v61 = vadd.f32 %v8552_v20, %v2101_v10 }
 0x17b   : > { %2789 = vst.msk [vmem:[#allocation2 + $0x1410] sm:$0xff] %vm237_vm2, %v6913_v53  ;;  %11225 = vst [vmem:[#allocation110_spill] sm:$0xff] %v9328_v57  ;;  %v9330_v34 = vld [vmem:[#allocation2 + $0x1349] sm:$0xff]  ;;  %v2908_v53 = vadd.f32 %v2876_v40, %v2518_v60  ;;  %v9352_v60 = vadd.f32 %v3264_v36, %v2906_v19  ;;  %v2878_v52 = vld [vmem:[#allocation2 + $0xe74] sm:$0xff]  ;;  %v9360_v57 = vadd.f32 %v2877_v7, %v2519_v14  ;;  %v9375_v14 = vpop.permute.xlu0 %5889 }
 0x17c   : > { %11226 = vst [vmem:[#allocation111_spill] sm:$0xff] %v9330_v34  ;;  %11227 = vst [vmem:[#allocation112_spill] sm:$0xff] %v9333_v17  ;;  %v9335_v26 = vld [vmem:[#allocation2 + $0x1408] sm:$0xff]  ;;  %v2489_v6 = vld [vmem:[#allocation2 + $0xe70] sm:$0xff]  ;;  %v9348_v17 = vadd.f32 %v2875_v44, %v2517_v58  ;;  %v9354_v34 = vpop.permute.xlu1 %5654  ;;  %4970 = vrot.lane.b32.xlu0 %v1731_v12, %s7335_s30  ;;  %v2520_v44 = vadd.f32 %v2488_v33, %v2130_v59  ;;  %v2120_v36 = vadd.f32 %v2088_v42, %v8607_v39 }
 0x17d   : > { %11228 = vst [vmem:[#allocation113_spill] sm:$0xff] %v9335_v26  ;;  %v2087_v22 = vld [vmem:[#allocation2 + $0xc24] sm:$0xff]  ;;  %3174 = vst.msk [vmem:[#allocation2 + $0x1348] sm:$0xff] %vm237_vm2, %v9282_v45  ;;  %v2086_v40 = vld [vmem:[#allocation2 + $0xc1c] sm:$0xff]  ;;  %v1734_v45 = vmax.f32 %v8638_v32, 0.0  ;;  %v9368_v12 = vadd.f32 %v9319_v46, %v2892_v37  ;;  %v1747_v33 = vmax.f32 %v8631_v29, 0.0  ;;  %v9382_v10 = vadd.f32 %v8620_v15, %v8426_v18 }
 0x17e   : > { %3175 = vst.msk [vmem:[#allocation2 + $0x1350] sm:$0xff] %vm237_vm2, %v9259_v54  ;;  %2788 = vst.msk [vmem:[#allocation2 + $0x1408] sm:$0xff] %vm237_vm2, %v2733_v21  ;;  %v2090_v4 = vld [vmem:[#allocation2 + $0xcdc] sm:$0xff]  ;;  %v9358_v54 = vld [vmem:[#allocation2 + $0x1470] sm:$0xff]  ;;  %v6916_v21 = vpop.f32.mrf.mxu1  ;;  %v9384_v42 = vadd.f32 %v3266_v2, %v2908_v53 }
 0x17f   : > { %11229 = vst [vmem:[#allocation114_spill] sm:$0xff] %v9348_v17  ;;  %11230 = vst [vmem:[#allocation115_spill] sm:$0xff] %v9352_v60  ;;  %v2089_v58 = vld [vmem:[#allocation2 + $0xc84] sm:$0xff]  ;;  %v2092_v19 = vld [vmem:[#allocation2 + $0xd3c] sm:$0xff]  ;;  %v2521_v60 = vadd.f32 %v2489_v6, %v2131_v48  ;;  %4976 = vrot.lane.b32.xlu1 %v1734_v45, %s7335_s30  ;;  %v2522_v48 = vadd.f32 %v9285_v41, %v2132_v5  ;;  %v2118_v41 = vadd.f32 %v2086_v40, %v8585_v25 }
 0x180   : > { %11231 = vst [vmem:[#allocation116_spill] sm:$0xff] %v9354_v34  ;;  %11232 = vst [vmem:[#allocation117_spill] sm:$0xff] %v9358_v54  ;;  %v2478_v35 = vld [vmem:[#allocation2 + $0xc88] sm:$0xff]  ;;  %v9365_v34 = vpop.f32.mrf.mxu0  ;;  %v9370_v54 = vld [vmem:[#allocation2 + $0x13b1] sm:$0xff]  ;;  %v2743_v39 = vpop.f32.mrf.mxu1  ;;  %5002 = vrot.lane.b32.xlu0 %v1747_v33, %s7335_s30  ;;  %v2121_v25 = vadd.f32 %v8592_v50, %v2089_v58 }
 0x181   : > { %11233 = vst [vmem:[#allocation118_spill] sm:$0xff] %v9360_v57  ;;  %2791 = vst.msk [vmem:[#allocation2 + $0x1470] sm:$0xff] %vm237_vm2, %v6916_v21  ;;  %v9372_v7 = vld [vmem:[#allocation2 + $0x13a9] sm:$0xff]  ;;  %v2879_v37 = vld [vmem:[#allocation2 + $0xe7c] sm:$0xff]  ;;  %v2119_v21 = vadd.f32 %v8574_v0, %v2087_v22  ;;  %v2124_v22 = vadd.f32 %v2092_v19, %v8647_v55  ;;  %v2910_v57 = vadd.f32 %v2878_v52, %v2520_v44  ;;  %v9415_v50 = vpop.permute.xlu0 %5921 }
 0x182   : > { %11234 = vst [vmem:[#allocation119_spill] sm:$0xff] %v9368_v12  ;;  %11235 = vst [vmem:[#allocation120_spill] sm:$0xff] %v9370_v54  ;;  %v9377_v59 = vld [vmem:[#allocation2 + $0x1468] sm:$0xff]  ;;  %v2880_v6 = vld [vmem:[#allocation2 + $0xed4] sm:$0xff]  ;;  %v2510_v17 = vadd.f32 %v2478_v35, %v2120_v36  ;;  %v9407_v33 = vadd.f32 %v2879_v37, %v2521_v60  ;;  %v5581_v60 = vadd.f32 %v8622_v51, %v8426_v18 }
 0x183   : > { %11236 = vst [vmem:[#allocation121_spill] sm:$0xff] %v9372_v7  ;;  %11237 = vst [vmem:[#allocation122_spill] sm:$0xff] %v9375_v14  ;;  %v2091_v45 = vld [vmem:[#allocation2 + $0xce4] sm:$0xff]  ;;  %v2122_v14 = vadd.f32 %v2090_v4, %v8629_v31  ;;  %v9394_v7 = vpop.f32.mrf.mxu0  ;;  %v3268_v2 = vld [vmem:[#allocation2 + $0x12dc] sm:$0xff]  ;;  %v4957_v4 = vpop.permute.xlu1 %4956  ;;  %v2912_v58 = vadd.f32 %v2880_v6, %v2522_v48 }
 0x184   : > { %11238 = vst [vmem:[#allocation123_spill] sm:$0xff] %v9377_v59  ;;  %11239 = vst [vmem:[#allocation124_spill] sm:$0xff] %v9384_v42  ;;  %v2881_v53 = vld [vmem:[#allocation2 + $0xedc] sm:$0xff]  ;;  %v2477_v42 = vld [vmem:[#allocation2 + $0xc30] sm:$0xff]  ;;  %v2523_v59 = vadd.f32 %v9274_v13, %v2133_v61  ;;  %v2123_v12 = vadd.f32 %v8620_v15, %v2091_v45  ;;  %v5597_v61 = vmax.f32 %v9382_v10, 0.0 }
 0x185   : > { %3176 = vst.msk [vmem:[#allocation2 + $0x13a8] sm:$0xff] %vm237_vm2, %v9313_v27  ;;  %3177 = vst.msk [vmem:[#allocation2 + $0x13b0] sm:$0xff] %vm237_vm2, %v9296_v1  ;;  %v2480_v0 = vld [vmem:[#allocation2 + $0xce8] sm:$0xff]  ;;  %v6919_v1 = vpop.f32.mrf.mxu1  ;;  %v2479_v40 = vld [vmem:[#allocation2 + $0xc90] sm:$0xff]  ;;  %v6969_v19 = vpop.f32.mrf.mxu0  ;;  %v2509_v36 = vadd.f32 %v2477_v42, %v2119_v21 }
 0x186   : > { %2790 = vst.msk [vmem:[#allocation2 + $0x1468] sm:$0xff] %vm237_vm2, %v2743_v39  ;;  %v2093_v5 = vld [vmem:[#allocation2 + $0xd44] sm:$0xff]  ;;  %v5564_v39 = vadd.f32 %v8426_v18, %v8629_v31  ;;  %2793 = vst.msk [vmem:[#allocation2 + $0x14d0] sm:$0xff] %vm237_vm2, %v6919_v1  ;;  %v3270_v20 = vld [vmem:[#allocation2 + $0x133c] sm:$0xff]  ;;  %5674 = vrot.lane.b32.xlu0 %v5597_v61, %s7331_s15 }
 0x187   : > { %v11240_v27 = vld [vmem:[#allocation23_spill] sm:$0xff]  ;;  %5048 = vst.msk [vmem:[%s8433_s11 + $0x28] sm:$0xff] %vm5042_vm4, %v4957_v4  ;;  %v2868_v38 = vld [vmem:[#allocation2 + $0xc94] sm:$0xff]  ;;  %11243 = vst [vmem:[#allocation127_spill] sm:$0xff] %v9415_v50  ;;  %v2753_v44 = vpop.f32.mrf.mxu1  ;;  %v2512_v4 = vadd.f32 %v2480_v0, %v2122_v14  ;;  %v2125_v1 = vadd.f32 %v8638_v32, %v2093_v5  ;;  %v4989_v6 = vpop.permute.xlu1 %4988  ;;  %v9433_v0 = vadd.f32 %v3268_v2, %v2910_v57 }
 0x188   : > { %v1750_v54 = vmax.f32 %v11240_v27, 0.0  ;;  %v2476_v26 = vld [vmem:[#allocation2 + $0xc28] sm:$0xff]  ;;  %v9410_v52 = vld [vmem:[#allocation2 + $0x1411] sm:$0xff]  ;;  %3183 = vst.msk [vmem:[#allocation2 + $0x14d0] sm:$0xff] %vm237_vm2, %v6969_v19  ;;  %v2867_v35 = vld [vmem:[#allocation2 + $0xc3c] sm:$0xff]  ;;  %v5596_v14 = vmax.f32 %v5564_v39, 0.0  ;;  %v2900_v5 = vadd.f32 %v2868_v38, %v2510_v17  ;;  %v9452_v38 = vpop.permute.xlu0 %5652 }
 0x189   : > { %v2482_v30 = vld [vmem:[#allocation2 + $0xd48] sm:$0xff]  ;;  %11241 = vst [vmem:[#allocation125_spill] sm:$0xff] %v9410_v52  ;;  %v2866_v37 = vld [vmem:[#allocation2 + $0xc34] sm:$0xff]  ;;  %2792 = vst.msk [vmem:[#allocation2 + $0x14c8] sm:$0xff] %vm237_vm2, %v2753_v44  ;;  %v2508_v10 = vadd.f32 %v2476_v26, %v2118_v41  ;;  %v9435_v26 = vadd.f32 %v2881_v53, %v2523_v59  ;;  %v2511_v41 = vadd.f32 %v2479_v40, %v2121_v25  ;;  %v5613_v53 = vmax.f32 %v5581_v60, 0.0 }
 0x18a   : > { %v9412_v13 = vld [vmem:[#allocation2 + $0x1409] sm:$0xff]  ;;  %5008 = vrot.lane.b32.xlu1 %v1750_v54, %s7335_s30  ;;  %v3143_v54 = vpop.f32.mrf.mxu0  ;;  %v2869_v19 = vld [vmem:[#allocation2 + $0xc9c] sm:$0xff]  ;;  %v2870_v50 = vld [vmem:[#allocation2 + $0xcf4] sm:$0xff]  ;;  %v2514_v42 = vadd.f32 %v2482_v30, %v2124_v22  ;;  %5064 = vst.msk [vmem:[%s8433_s11 + $0xa8] sm:$0xff] %vm5042_vm4, %v4989_v6  ;;  %v5800_v25 = vadd.f32 %v8620_v15, %v8556_v24  ;;  %v9458_v6 = vadd.f32 %v3270_v20, %v2912_v58 }
 0x18b   : > { %11242 = vst [vmem:[#allocation126_spill] sm:$0xff] %v9412_v13  ;;  %v2481_v45 = vld [vmem:[#allocation2 + $0xcf0] sm:$0xff]  ;;  %3178 = vst.msk [vmem:[#allocation2 + $0x1408] sm:$0xff] %vm237_vm2, %v9346_v8  ;;  %v6974_v8 = vpop.f32.mrf.mxu1  ;;  %v3258_v44 = vld [vmem:[#allocation2 + $0x10fc] sm:$0xff]  ;;  %v9467_v60 = vadd.f32 %v2866_v37, %v2508_v10  ;;  %v9469_v58 = vpop.permute.xlu1 %5684  ;;  %5706 = vrot.lane.b32.xlu0 %v5613_v53, %s7331_s15  ;;  %v9482_v37 = vadd.f32 %v9319_v46, %v8609_v62 }
 0x18c   : > { %3179 = vst.msk [vmem:[#allocation2 + $0x1410] sm:$0xff] %vm237_vm2, %v9325_v47  ;;  %v2483_v48 = vld [vmem:[#allocation2 + $0xd50] sm:$0xff]  ;;  %3182 = vst.msk [vmem:[#allocation2 + $0x14c8] sm:$0xff] %vm237_vm2, %v3143_v54  ;;  %v5580_v47 = vadd.f32 %v8426_v18, %v8631_v29  ;;  %v9437_v22 = vld [vmem:[#allocation2 + $0xf24] sm:$0xff]  ;;  %v9442_v39 = vpop.f32.mrf.mxu0  ;;  %v2513_v57 = vadd.f32 %v2481_v45, %v2123_v12  ;;  %v2902_v12 = vadd.f32 %v2870_v50, %v2512_v4  ;;  %v5832_v53 = vmax.f32 %v5800_v25, 0.0 }
 0x18d   : > { %v9429_v21 = vld [vmem:[#allocation2 + $0xf2f] sm:$0xff]  ;;  %11244 = vst [vmem:[#allocation128_spill] sm:$0xff] %v9437_v22  ;;  %v7264_v61 = vld [vmem:[#allocation2 + $0xf1c] sm:$0xff]  ;;  %11247 = vst [vmem:[#allocation131_spill] sm:$0xff] %v9452_v38  ;;  %v3383_v17 = vpop.f32.mrf.mxu1  ;;  %v2515_v45 = vadd.f32 %v2483_v48, %v2125_v1  ;;  %v9478_v4 = vadd.f32 %v3258_v44, %v2900_v5 }
 0x18e   : > { %v2872_v30 = vld [vmem:[#allocation2 + $0xd54] sm:$0xff]  ;;  %3543 = vst.msk [vmem:[#allocation2 + $0xf30] sm:$0xff] %vm237_vm2, %v6974_v8  ;;  %v9445_v54 = vadd.f32 %v7264_v61, %v8587_v49  ;;  %v9449_v59 = vld [vmem:[#allocation2 + $0x1469] sm:$0xff]  ;;  %5672 = vrot.lane.b32.xlu1 %v5596_v14, %s7331_s15  ;;  %v2899_v8 = vadd.f32 %v2867_v35, %v2509_v36  ;;  %v2871_v61 = vld [vmem:[#allocation2 + $0xcfc] sm:$0xff]  ;;  %v9464_v14 = vpop.f32.mrf.mxu0  ;;  %v5612_v50 = vmax.f32 %v5580_v47, 0.0  ;;  %v9476_v35 = vadd.f32 %v2869_v19, %v2511_v41 }
 0x18f   : > { %v9447_v2 = vld [vmem:[#allocation2 + $0x1471] sm:$0xff]  ;;  %11246 = vst [vmem:[#allocation130_spill] sm:$0xff] %v9449_v59  ;;  %v9456_v40 = vld [vmem:[#allocation2 + $0xf27] sm:$0xff]  ;;  %3180 = vst.msk [vmem:[#allocation2 + $0x1468] sm:$0xff] %vm237_vm2, %v9394_v7  ;;  %v2904_v20 = vadd.f32 %v2872_v30, %v2514_v42  ;;  %v6977_v7 = vpop.f32.mrf.mxu1  ;;  %v4955_v30 = vpop.permute.xlu0 %4954  ;;  %5909 = vrot.lane.b32.xlu0 %v5832_v53, %s7331_s15 }
 0x190   : > { %11245 = vst [vmem:[#allocation129_spill] sm:$0xff] %v9447_v2  ;;  %3181 = vst.msk [vmem:[#allocation2 + $0x1470] sm:$0xff] %vm237_vm2, %v9365_v34  ;;  %v3260_v15 = vld [vmem:[#allocation2 + $0x115c] sm:$0xff]  ;;  %v9472_v36 = vld [vmem:[#allocation2 + $0xf8f] sm:$0xff]  ;;  %v5799_v34 = vadd.f32 %v8556_v24, %v8629_v31  ;;  %v9488_v42 = vpop.f32.mrf.mxu0  ;;  %v9490_v31 = vadd.f32 %v2871_v61, %v2513_v57  ;;  %v2135_v61 = vadd.f32 %v8576_v63, %v8698_v56 }
 0x191   : > { %3542 = vst.msk [vmem:[#allocation2 + $0xf28] sm:$0xff] %vm237_vm2, %v3383_v17  ;;  %v2873_v38 = vld [vmem:[#allocation2 + $0xd5c] sm:$0xff]  ;;  %11248 = vst [vmem:[#allocation132_spill] sm:$0xff] %v9469_v58  ;;  %v3257_v47 = vld [vmem:[#allocation2 + $0x10a4] sm:$0xff]  ;;  %v3393_v17 = vpop.f32.mrf.mxu1  ;;  %v9517_v58 = vpop.permute.xlu1 %5887  ;;  %v5815_v56 = vadd.f32 %v8556_v24, %v8631_v29 }
 0x192   : > { %11249 = vst [vmem:[#allocation133_spill] sm:$0xff] %v9472_v36  ;;  %v7265_v1 = vld [vmem:[#allocation2 + $0xfdc] sm:$0xff]  ;;  %3545 = vst.msk [vmem:[#allocation2 + $0xf90] sm:$0xff] %vm237_vm2, %v6977_v7  ;;  %v11250_v41 = vld [vmem:[#allocation24_spill] sm:$0xff]  ;;  %5704 = vrot.lane.b32.xlu1 %v5612_v50, %s7331_s15  ;;  %v5816_v7 = vadd.f32 %v8622_v51, %v8556_v24  ;;  %v9504_v57 = vadd.f32 %v2873_v38, %v2515_v45  ;;  %v3217_v50 = vadd.f32 %v9429_v21, %v9338_v43 }
 0x193   : > { %v9485_v10 = vadd.f32 %v7265_v1, %v8631_v29  ;;  %v3262_v48 = vld [vmem:[#allocation2 + $0x11bc] sm:$0xff]  ;;  %v9495_v44 = vld [vmem:[#allocation2 + $0xf87] sm:$0xff]  ;;  %v9502_v1 = vadd.f32 %v3260_v15, %v2902_v12  ;;  %5047 = vst.msk [vmem:[%s8433_s11 + $0x20] sm:$0xff] %vm5042_vm4, %v4955_v30  ;;  %11253 = vst [vmem:[#allocation136_spill] sm:$0xff] %v9517_v58  ;;  %v5831_v38 = vmax.f32 %v5799_v34, 0.0  ;;  %v6980_v45 = vpop.f32.mrf.mxu1  ;;  %v3289_v15 = vadd.f32 %v3257_v47, %v2899_v8 }
 0x194   : > { %v7266_v19 = vld [vmem:[#allocation2 + $0x103c] sm:$0xff]  ;;  %11251 = vst [vmem:[#allocation134_spill] sm:$0xff] %v9495_v44  ;;  %v9497_v46 = vld [vmem:[#allocation2 + $0xf84] sm:$0xff]  ;;  %v9515_v25 = vadd.f32 %v3262_v48, %v2904_v20  ;;  %v9520_v12 = vld [vmem:[#allocation2 + $0xfef] sm:$0xff]  ;;  %v9576_v36 = vadd.f32 %v11240_v27, %v8426_v18 }
 0x195   : > { %v9493_v5 = vadd.f32 %v7266_v19, %v11250_v41  ;;  %11252 = vst [vmem:[#allocation135_spill] sm:$0xff] %v9497_v46  ;;  %3544 = vst.msk [vmem:[#allocation2 + $0xf88] sm:$0xff] %vm237_vm2, %v3393_v17  ;;  %v9511_v19 = vpop.f32.mrf.mxu0  ;;  %v3575_v30 = vld [vmem:[#allocation2 + $0xf31] sm:$0xff]  ;;  %v9525_v46 = vadd.f32 %v8755_v3, %v2135_v61  ;;  %v11255_v43 = vld [vmem:[#allocation26_spill] sm:$0xff]  ;;  %v4987_v3 = vpop.permute.xlu0 %4986 }
 0x196   : > { %11254 = vst [vmem:[#allocation137_spill] sm:$0xff] %v9520_v12  ;;  %v3638_v17 = vld [vmem:[#allocation2 + $0xf34] sm:$0xff]  ;;  %v2137_v21 = vadd.f32 %v8594_v16, %v11255_v43  ;;  %v11256_v20 = vld [vmem:[#allocation27_spill] sm:$0xff]  ;;  %3547 = vst.msk [vmem:[#allocation2 + $0xff0] sm:$0xff] %vm237_vm2, %v6980_v45  ;;  %v9534_v58 = vadd.f32 %v3575_v30, %v3217_v50  ;;  %5907 = vrot.lane.b32.xlu1 %v5831_v38, %s7331_s15  ;;  %v3403_v61 = vpop.f32.mrf.mxu1  ;;  %v5848_v43 = vmax.f32 %v5816_v7, 0.0 }
 0x197   : > { %v2139_v48 = vadd.f32 %v8622_v51, %v11256_v20  ;;  %v9532_v34 = vpop.f32.mrf.mxu0  ;;  %v3647_v53 = vld [vmem:[#allocation2 + $0x10bc] sm:$0xff]  ;;  %v9536_v8 = vld [vmem:[#allocation2 + $0xfe7] sm:$0xff]  ;;  %v9543_v20 = vadd.f32 %v8426_v18, %v8647_v55  ;;  %v3216_v45 = vadd.f32 %v9456_v40, %v9350_v28  ;;  %5063 = vst.msk [vmem:[%s8433_s11 + $0xa0] sm:$0xff] %vm5042_vm4, %v4987_v3  ;;  %v9559_v7 = vadd.f32 %v8426_v18, %v11250_v41  ;;  %v4435_v13 = vld [vmem:[#allocation2 + $0x1650] sm:$0xff] }
 0x198   : > { %11257 = vst [vmem:[#allocation26_spill] sm:$0xff] %v9534_v58  ;;  %11258 = vst [vmem:[#allocation27_spill] sm:$0xff] %v9536_v8  ;;  %v9538_v47 = vld [vmem:[#allocation2 + $0xfe4] sm:$0xff]  ;;  %v11262_v30 = vld [vmem:[#allocation29_spill] sm:$0xff]  ;;  %v9567_v28 = vadd.f32 %v8638_v32, %v8426_v18  ;;  %5941 = vrot.lane.b32.xlu0 %v5848_v43, %s7331_s15  ;;  %v6983_v44 = vpop.f32.mrf.mxu1  ;;  %v3679_v58 = vadd.f32 %v3647_v53, %v3289_v15  ;;  %v2527_v43 = vadd.f32 %v8784_v9, %v2137_v21 }
 0x199   : > { %11259 = vst [vmem:[#allocation138_spill] sm:$0xff] %v9538_v47  ;;  %v3259_v22 = vld [vmem:[#allocation2 + $0x1104] sm:$0xff]  ;;  %v2141_v8 = vadd.f32 %v11240_v27, %v11262_v30  ;;  %3546 = vst.msk [vmem:[#allocation2 + $0xfe8] sm:$0xff] %vm237_vm2, %v3403_v61  ;;  %v9555_v38 = vpop.f32.mrf.mxu0  ;;  %v9563_v47 = vadd.f32 %v8556_v24, %v8647_v55  ;;  %v3256_v40 = vld [vmem:[#allocation2 + $0x109c] sm:$0xff]  ;;  %v9569_v30 = vpop.permute.xlu1 %5919  ;;  %v5847_v61 = vmax.f32 %v5815_v56, 0.0  ;;  %v9586_v56 = vadd.f32 %v8799_v23, %v2139_v48 }
 0x19a   : > { %v11260_v12 = vld [vmem:[#allocation15_spill] sm:$0xff]  ;;  %v3640_v3 = vld [vmem:[#allocation2 + $0xf94] sm:$0xff]  ;;  %11263 = vst [vmem:[#allocation29_spill] sm:$0xff] %v9569_v30  ;;  %v2885_v59 = vld [vmem:[#allocation2 + $0xf9c] sm:$0xff]  ;;  %v1733_v18 = vmax.f32 %v8647_v55, 0.0  ;;  %v9603_v21 = vpop.permute.xlu0 %5658  ;;  %v5598_v55 = vmax.f32 %v9543_v20, 0.0  ;;  %v9608_v48 = vadd.f32 %v8638_v32, %v8556_v24  ;;  %v9629_v24 = vadd.f32 %v3256_v40, %v9467_v60 }
 0x19b   : > { %v9548_v50 = vadd.f32 %v3638_v17, %v11260_v12  ;;  %v2883_v12 = vld [vmem:[#allocation2 + $0xf3c] sm:$0xff]  ;;  %v3574_v17 = vld [vmem:[#allocation2 + $0xf29] sm:$0xff]  ;;  %v9592_v15 = vpop.f32.mrf.mxu0  ;;  %v9598_v9 = vld [vmem:[#allocation2 + $0xf91] sm:$0xff]  ;;  %5939 = vrot.lane.b32.xlu1 %v5847_v61, %s7331_s15  ;;  %11270 = vst [vmem:[#allocation145_spill] sm:$0xff] %v9603_v21  ;;  %v9645_v60 = vadd.f32 %v2885_v59, %v2527_v43 }
 0x19c   : > { %v9578_v2 = vadd.f32 %v3574_v17, %v3216_v45  ;;  %3932 = vst.msk [vmem:[#allocation2 + $0xf28] sm:$0xff] %vm237_vm2, %v9464_v14  ;;  %3933 = vst.msk [vmem:[#allocation2 + $0xf30] sm:$0xff] %vm237_vm2, %v9442_v39  ;;  %v9588_v30 = vld [vmem:[#allocation2 + $0x1047] sm:$0xff]  ;;  %v3291_v45 = vadd.f32 %v3259_v22, %v9476_v35  ;;  %v3649_v14 = vld [vmem:[#allocation2 + $0x111c] sm:$0xff]  ;;  %v2531_v17 = vadd.f32 %v8824_v11, %v2141_v8  ;;  %v1749_v8 = vmax.f32 %v11250_v41, 0.0 }
 0x19d   : > { %11261 = vst [vmem:[#allocation15_spill] sm:$0xff] %v9548_v50  ;;  %v9572_v50 = vld [vmem:[#allocation2 + $0x104f] sm:$0xff]  ;;  %11266 = vst [vmem:[#allocation141_spill] sm:$0xff] %v9588_v30  ;;  %v4039_v53 = vld [vmem:[#allocation2 + $0x1524] sm:$0xff]  ;;  %v9620_v20 = vpop.f32.mrf.mxu0  ;;  %v4961_v21 = vpop.permute.xlu1 %4960  ;;  %4974 = vrot.lane.b32.xlu0 %v1733_v18, %s7335_s30 }
 0x19e   : > { %11264 = vst [vmem:[#allocation139_spill] sm:$0xff] %v9572_v50  ;;  %11265 = vst [vmem:[#allocation140_spill] sm:$0xff] %v9578_v2  ;;  %v9596_v39 = vld [vmem:[#allocation2 + $0x1044] sm:$0xff]  ;;  %v4071_v11 = vadd.f32 %v4039_v53, %v3679_v58  ;;  %v2887_v32 = vld [vmem:[#allocation2 + $0xffc] sm:$0xff] }
 0x19f   : > { %3549 = vst.msk [vmem:[#allocation2 + $0x1050] sm:$0xff] %vm237_vm2, %v6983_v44  ;;  %11267 = vst [vmem:[#allocation142_spill] sm:$0xff] %v9596_v39  ;;  %v9600_v23 = vld [vmem:[#allocation2 + $0xf89] sm:$0xff]  ;;  %v3413_v44 = vpop.f32.mrf.mxu1  ;;  %v9632_v39 = vadd.f32 %v2883_v12, %v9525_v46  ;;  %v9639_v18 = vpop.f32.mrf.mxu0  ;;  %v11275_v58 = vld [vmem:[#allocation61_spill] sm:$0xff]  ;;  %5676 = vrot.lane.b32.xlu1 %v5598_v55, %s7331_s15 }
 0x1a0   : > { %11268 = vst [vmem:[#allocation143_spill] sm:$0xff] %v9598_v9  ;;  %11269 = vst [vmem:[#allocation144_spill] sm:$0xff] %v9600_v23  ;;  %v11271_v22 = vld [vmem:[#allocation119_spill] sm:$0xff]  ;;  %v9643_v53 = vadd.f32 %v11275_v58, %v9445_v54  ;;  %v11277_v12 = vld [vmem:[#allocation49_spill] sm:$0xff] }
 0x1a1   : > { %v9611_v35 = vadd.f32 %v3640_v3, %v11271_v22  ;;  %3935 = vst.msk [vmem:[#allocation2 + $0xf90] sm:$0xff] %vm237_vm2, %v9488_v42  ;;  %3934 = vst.msk [vmem:[#allocation2 + $0xf88] sm:$0xff] %vm237_vm2, %v9511_v19  ;;  %v3261_v61 = vld [vmem:[#allocation2 + $0x1164] sm:$0xff]  ;;  %v2889_v22 = vld [vmem:[#allocation2 + $0x105c] sm:$0xff]  ;;  %v6986_v19 = vpop.f32.mrf.mxu1  ;;  %v9673_v55 = vpop.f32.mrf.mxu0  ;;  %5006 = vrot.lane.b32.xlu0 %v1749_v8, %s7335_s30  ;;  %s7275_s30 = scalar_lea.vmem %s7274_s26, 8192 }
 0x1a2   : > { %3548 = vst.msk [vmem:[#allocation2 + $0x1048] sm:$0xff] %vm237_vm2, %v3413_v44  ;;  %v9625_v42 = vld [vmem:[#allocation2 + $0x10af] sm:$0xff]  ;;  %v9637_v3 = vld [vmem:[#allocation2 + $0x10a7] sm:$0xff]  ;;  %v3293_v43 = vadd.f32 %v3261_v61, %v9490_v31  ;;  %v3651_v59 = vld [vmem:[#allocation2 + $0x117c] sm:$0xff]  ;;  %v9680_v61 = vadd.f32 %v2887_v32, %v9586_v56  ;;  %v4993_v23 = vpop.permute.xlu1 %4992  ;;  %p7277_p1 = scmp.lt.s32.totalorder %s7275_s30, %s7269_s14 }
 0x1a3   : > { %11272 = vst [vmem:[#allocation119_spill] sm:$0xff] %v9611_v35  ;;  %11273 = vst [vmem:[#allocation146_spill] sm:$0xff] %v9625_v42  ;;  %v4429_v35 = vld [vmem:[#allocation2 + $0x1530] sm:$0xff]  ;;  %v3681_v42 = vadd.f32 %v3649_v14, %v3291_v45  ;;  %v4041_v30 = vld [vmem:[#allocation2 + $0x1584] sm:$0xff]  ;;  %v9660_v45 = vpop.permute.xlu0 %5690  ;;  %v3423_v54 = vpop.f32.mrf.mxu1 }
 0x1a4   : > { %5050 = vst.msk [vmem:[%s8433_s11 + $0x38] sm:$0xff] %vm5042_vm4, %v4961_v21  ;;  %11274 = vst [vmem:[#allocation147_spill] sm:$0xff] %v9637_v3  ;;  %v11276_v46 = vld [vmem:[#allocation39_spill] sm:$0xff]  ;;  %v11278_v21 = vld [vmem:[#allocation14_spill] sm:$0xff]  ;;  %v4461_v32 = vadd.f32 %v4429_v35, %v4071_v11  ;;  %v9708_v8 = vpop.f32.mrf.mxu0  ;;  %p7278_p2 = por %p7277_p1, %p7276_p0 }
 0x1a5   : > { %3551 = vst.msk [vmem:[#allocation2 + $0x10b0] sm:$0xff] %vm237_vm2, %v6986_v19  ;;  %v9649_v40 = vadd.f32 %v11276_v46, %v9482_v37  ;;  %v2066_v19 = vadd.f32 %v11278_v21, %v11277_v12  ;;  %v9653_v44 = vld [vmem:[#allocation2 + $0xff1] sm:$0xff]  ;;  %v9657_v50 = vld [vmem:[#allocation2 + $0xfe9] sm:$0xff]  ;;  %11282 = vst [vmem:[#allocation148_spill] sm:$0xff] %v9660_v45  ;;  %v9664_v37 = vadd.f32 %v2889_v22, %v2531_v17  ;;  %v6989_v56 = vpop.f32.mrf.mxu1 }
 0x1a6   : > { %11279 = vst [vmem:[#allocation39_spill] sm:$0xff] %v9653_v44  ;;  %v9655_v3 = vld [vmem:[#allocation2 + $0xff4] sm:$0xff]  ;;  %11281 = vst [vmem:[#allocation14_spill] sm:$0xff] %v9657_v50  ;;  %v11284_v46 = vld [vmem:[#allocation50_spill] sm:$0xff]  ;;  %p7279_p3 = pnand %p7278_p2, %p7272_p13 }
 0x1a7   : > { %11280 = vst [vmem:[#allocation49_spill] sm:$0xff] %v9655_v3  ;;  %v11283_v14 = vld [vmem:[#allocation16_spill] sm:$0xff]  ;;  %3937 = vst.msk [vmem:[#allocation2 + $0xff0] sm:$0xff] %vm237_vm2, %v9532_v34  ;;  %v3263_v21 = vld [vmem:[#allocation2 + $0x11c4] sm:$0xff] }
 0x1a8   : > { %v2065_v12 = vadd.f32 %v11284_v46, %v11283_v14  ;;  %3936 = vst.msk [vmem:[#allocation2 + $0xfe8] sm:$0xff] %vm237_vm2, %v9555_v38  ;;  %3550 = vst.msk [vmem:[#allocation2 + $0x10a8] sm:$0xff] %vm237_vm2, %v3423_v54  ;;  %v11285_v31 = vld [vmem:[#allocation40_spill] sm:$0xff]  ;;  %v11286_v22 = vld [vmem:[#allocation41_spill] sm:$0xff] }
 0x1a9   : > { %v9677_v17 = vadd.f32 %v11285_v31, %v9485_v10  ;;  %v9684_v34 = vadd.f32 %v11286_v22, %v9493_v5  ;;  %v11287_v14 = vld [vmem:[#allocation87_spill] sm:$0xff]  ;;  %v11289_v46 = vld [vmem:[#allocation18_spill] sm:$0xff]  ;;  %v11290_v3 = vld [vmem:[#allocation20_spill] sm:$0xff]  ;;  %5066 = vst.msk [vmem:[%s8433_s11 + $0xb8] sm:$0xff] %vm5042_vm4, %v4993_v23 }
 0x1aa   : > { %v9687_v38 = vadd.f32 %v11287_v14, %v2066_v19  ;;  %v11288_v54 = vld [vmem:[#allocation51_spill] sm:$0xff]  ;;  %v11291_v50 = vld [vmem:[#allocation52_spill] sm:$0xff]  ;;  %v11294_v5 = vld [vmem:[#allocation53_spill] sm:$0xff] }
 0x1ab   : > { %v2068_v45 = vadd.f32 %v11289_v46, %v11288_v54  ;;  %v2067_v44 = vadd.f32 %v11291_v50, %v11290_v3  ;;  %v9694_v10 = vld [vmem:[#allocation2 + $0x110f] sm:$0xff]  ;;  %v2070_v19 = vadd.f32 %v8576_v63, %v11294_v5  ;;  %v11295_v22 = vld [vmem:[#allocation54_spill] sm:$0xff]  ;;  %v4073_v54 = vadd.f32 %v4041_v30, %v3681_v42  ;;  %v11297_v11 = vld [vmem:[#allocation93_spill] sm:$0xff]  ;;  %v9724_v5 = vpop.permute.xlu0 %5893  ;;  %v3433_v30 = vpop.f32.mrf.mxu1 }
 0x1ac   : > { %11292 = vst [vmem:[#allocation16_spill] sm:$0xff] %v9694_v10  ;;  %v11293_v31 = vld [vmem:[#allocation91_spill] sm:$0xff]  ;;  %v2069_v14 = vadd.f32 %v11295_v22, %v8587_v49  ;;  %3553 = vst.msk [vmem:[#allocation2 + $0x1110] sm:$0xff] %vm237_vm2, %v6989_v56  ;;  %v4819_v3 = vld [vmem:[#allocation2 + $0x153c] sm:$0xff]  ;;  %v11302_v56 = vmax.f32 %v9559_v7, 0.0  ;;  %v3683_v42 = vadd.f32 %v3651_v59, %v3293_v43 }
 0x1ad   : > { %v9697_v9 = vadd.f32 %v11293_v31, %v2065_v12  ;;  %v9706_v50 = vld [vmem:[#allocation2 + $0x1107] sm:$0xff]  ;;  %v4431_v35 = vld [vmem:[#allocation2 + $0x1590] sm:$0xff]  ;;  %v9711_v12 = vadd.f32 %v11297_v11, %v2068_v45  ;;  %11303 = vst [vmem:[#allocation51_spill] sm:$0xff] %v9724_v5  ;;  %v3295_v45 = vadd.f32 %v3263_v21, %v9504_v57  ;;  %v11304_v22 = vld [vmem:[#allocation97_spill] sm:$0xff]  ;;  %v9742_v57 = vpop.f32.mrf.mxu0 }
 0x1ae   : > { %11296 = vst [vmem:[#allocation50_spill] sm:$0xff] %v9706_v50  ;;  %v11298_v46 = vld [vmem:[#allocation55_spill] sm:$0xff]  ;;  %v9715_v31 = vld [vmem:[#allocation2 + $0x1051] sm:$0xff]  ;;  %5708 = vrot.lane.b32.xlu1 %v11302_v56, %s7331_s15  ;;  %v9728_v11 = vadd.f32 %v11304_v22, %v2067_v44  ;;  %3552 = vst.msk [vmem:[#allocation2 + $0x1108] sm:$0xff] %vm237_vm2, %v3433_v30  ;;  %v6992_v56 = vpop.f32.mrf.mxu1  ;;  %v4851_v30 = vadd.f32 %v4819_v3, %v4461_v32 }
 0x1af   : > { %v2072_v63 = vadd.f32 %v8594_v16, %v11298_v46  ;;  %11299 = vst [vmem:[#allocation40_spill] sm:$0xff] %v9715_v31  ;;  %v9717_v49 = vld [vmem:[#allocation2 + $0x1054] sm:$0xff]  ;;  %v9719_v23 = vld [vmem:[#allocation2 + $0x1049] sm:$0xff]  ;;  %v3653_v59 = vld [vmem:[#allocation2 + $0x11dc] sm:$0xff] }
 0x1b0   : > { %11300 = vst [vmem:[#allocation41_spill] sm:$0xff] %v9717_v49  ;;  %11301 = vst [vmem:[#allocation87_spill] sm:$0xff] %v9719_v23  ;;  %v11305_v16 = vld [vmem:[#allocation99_spill] sm:$0xff]  ;;  %v11306_v49 = vld [vmem:[#allocation56_spill] sm:$0xff] }
 0x1b1   : > { %v9731_v46 = vadd.f32 %v11305_v16, %v2070_v19  ;;  %v2071_v50 = vadd.f32 %v11306_v49, %v8609_v62  ;;  %v11307_v10 = vld [vmem:[#allocation57_spill] sm:$0xff]  ;;  %3939 = vst.msk [vmem:[#allocation2 + $0x1050] sm:$0xff] %vm237_vm2, %v9592_v15  ;;  %3938 = vst.msk [vmem:[#allocation2 + $0x1048] sm:$0xff] %vm237_vm2, %v9620_v20  ;;  %v3265_v7 = vld [vmem:[#allocation2 + $0x1224] sm:$0xff]  ;;  %v9752_v15 = vpop.permute.xlu1 %5688  ;;  %v11312_v20 = vmax.f32 %v9567_v28, 0.0 }
 0x1b2   : > { %v2074_v23 = vadd.f32 %v8622_v51, %v11307_v10  ;;  %v4043_v44 = vld [vmem:[#allocation2 + $0x15e4] sm:$0xff]  ;;  %v11309_v62 = vld [vmem:[#allocation105_spill] sm:$0xff]  ;;  %11311 = vst [vmem:[#allocation18_spill] sm:$0xff] %v9752_v15  ;;  %v9757_v49 = vld [vmem:[#allocation2 + $0x116f] sm:$0xff] }
 0x1b3   : > { %v11308_v43 = vld [vmem:[#allocation103_spill] sm:$0xff]  ;;  %v9748_v19 = vadd.f32 %v11309_v62, %v2072_v63  ;;  %v11310_v51 = vld [vmem:[#allocation58_spill] sm:$0xff]  ;;  %5678 = vrot.lane.b32.xlu0 %v11312_v20, %s7331_s15  ;;  %11313 = vst [vmem:[#allocation20_spill] sm:$0xff] %v9757_v49  ;;  %v3646_v22 = vld [vmem:[#allocation2 + $0x10b4] sm:$0xff]  ;;  %v4463_v20 = vadd.f32 %v4431_v35, %v4073_v54  ;;  %v3685_v54 = vadd.f32 %v3653_v59, %v3295_v45 }
 0x1b4   : > { %v9745_v21 = vadd.f32 %v11308_v43, %v2069_v14  ;;  %v2073_v10 = vadd.f32 %v11310_v51, %v8631_v29  ;;  %v4038_v16 = vld [vmem:[#allocation2 + $0x151c] sm:$0xff]  ;;  %v11314_v43 = vld [vmem:[#allocation59_spill] sm:$0xff]  ;;  %v11315_v62 = vld [vmem:[#allocation60_spill] sm:$0xff]  ;;  %3555 = vst.msk [vmem:[#allocation2 + $0x1170] sm:$0xff] %vm237_vm2, %v6992_v56  ;;  %v9764_v29 = vpop.f32.mrf.mxu0  ;;  %v3678_v28 = vadd.f32 %v3646_v22, %v9629_v24  ;;  %v9779_v56 = vpop.permute.xlu0 %5925  ;;  %v4075_v22 = vadd.f32 %v4043_v44, %v3683_v42 }
 0x1b5   : > { %v4821_v14 = vld [vmem:[#allocation2 + $0x159c] sm:$0xff]  ;;  %v2076_v63 = vadd.f32 %v11240_v27, %v11314_v43  ;;  %v2075_v5 = vadd.f32 %v11315_v62, %v11250_v41  ;;  %v9767_v51 = vld [vmem:[#allocation2 + $0x1528] sm:$0xff]  ;;  %v4433_v15 = vld [vmem:[#allocation2 + $0x15f0] sm:$0xff]  ;;  %v11318_v43 = vmax.f32 %v9563_v47, 0.0  ;;  %11320 = vst [vmem:[#allocation53_spill] sm:$0xff] %v9779_v56  ;;  %v3443_v24 = vpop.f32.mrf.mxu1 }
 0x1b6   : > { %v4045_v32 = vld [vmem:[#allocation2 + $0x1644] sm:$0xff]  ;;  %v11316_v3 = vld [vmem:[#allocation108_spill] sm:$0xff]  ;;  %v3272_v2 = vld [vmem:[#allocation2 + $0x139c] sm:$0xff]  ;;  %v9790_v47 = vpop.f32.mrf.mxu0 }
 0x1b7   : > { %v9770_v49 = vadd.f32 %v11316_v3, %v2071_v50  ;;  %v9772_v31 = vld [vmem:[#allocation2 + $0x10b1] sm:$0xff]  ;;  %5911 = vrot.lane.b32.xlu1 %v11318_v43, %s7331_s15  ;;  %v9777_v62 = vld [vmem:[#allocation2 + $0x10a9] sm:$0xff]  ;;  %v11322_v35 = vld [vmem:[#allocation114_spill] sm:$0xff]  ;;  %v4070_v43 = vadd.f32 %v4038_v16, %v3678_v28  ;;  %v9804_v16 = vpop.permute.xlu1 %5891 }
 0x1b8   : > { %11317 = vst [vmem:[#allocation52_spill] sm:$0xff] %v9772_v31  ;;  %11319 = vst [vmem:[#allocation91_spill] sm:$0xff] %v9777_v62  ;;  %v9781_v27 = vld [vmem:[#allocation2 + $0x1167] sm:$0xff]  ;;  %v3297_v41 = vadd.f32 %v3265_v7, %v11322_v35  ;;  %v3274_v50 = vld [vmem:[#allocation2 + $0x13fc] sm:$0xff]  ;;  %v6995_v62 = vpop.f32.mrf.mxu1 }
 0x1b9   : > { %11321 = vst [vmem:[#allocation54_spill] sm:$0xff] %v9781_v27  ;;  %v11323_v3 = vld [vmem:[#allocation109_spill] sm:$0xff]  ;;  %3940 = vst.msk [vmem:[#allocation2 + $0x10a8] sm:$0xff] %vm237_vm2, %v9673_v55  ;;  %v3267_v42 = vld [vmem:[#allocation2 + $0x1284] sm:$0xff] }
 0x1ba   : > { %v9785_v58 = vadd.f32 %v11323_v3, %v2074_v23  ;;  %3554 = vst.msk [vmem:[#allocation2 + $0x1168] sm:$0xff] %vm237_vm2, %v3443_v24  ;;  %v4818_v56 = vld [vmem:[#allocation2 + $0x1534] sm:$0xff]  ;;  %3941 = vst.msk [vmem:[#allocation2 + $0x10b0] sm:$0xff] %vm237_vm2, %v9639_v18  ;;  %v3655_v45 = vld [vmem:[#allocation2 + $0x123c] sm:$0xff]  ;;  %v11331_v18 = vmax.f32 %v9576_v36, 0.0  ;;  %v4460_v36 = vadd.f32 %v9767_v51, %v4070_v43 }
 0x1bb   : > { %v11324_v7 = vld [vmem:[#allocation64_spill] sm:$0xff]  ;;  %v11325_v23 = vld [vmem:[#allocation67_spill] sm:$0xff]  ;;  %v3276_v35 = vld [vmem:[#allocation2 + $0x145c] sm:$0xff]  ;;  %11330 = vst [vmem:[#allocation97_spill] sm:$0xff] %v9804_v16  ;;  %v3687_v43 = vadd.f32 %v3655_v45, %v3297_v41 }
 0x1bc   : > { %v2914_v44 = vadd.f32 %v11324_v7, %v9643_v53  ;;  %v2916_v59 = vadd.f32 %v11325_v23, %v9649_v40  ;;  %v11326_v3 = vld [vmem:[#allocation113_spill] sm:$0xff]  ;;  %5710 = vrot.lane.b32.xlu0 %v11331_v18, %s7331_s15  ;;  %v9809_v28 = vld [vmem:[#allocation2 + $0x11cf] sm:$0xff]  ;;  %v4853_v18 = vadd.f32 %v4821_v14, %v4463_v20  ;;  %v11341_v14 = vld [vmem:[#allocation118_spill] sm:$0xff] }
 0x1bd   : > { %v9799_v55 = vadd.f32 %v11326_v3, %v2073_v10  ;;  %v11328_v24 = vld [vmem:[#allocation117_spill] sm:$0xff]  ;;  %11332 = vst [vmem:[#allocation99_spill] sm:$0xff] %v9809_v28  ;;  %v11333_v53 = vld [vmem:[#allocation68_spill] sm:$0xff]  ;;  %v11334_v10 = vld [vmem:[#allocation71_spill] sm:$0xff]  ;;  %v3299_v20 = vadd.f32 %v3267_v42, %v11341_v14 }
 0x1be   : > { %v9802_v27 = vadd.f32 %v11328_v24, %v2076_v63  ;;  %v9812_v7 = vadd.f32 %v11333_v53, %v4851_v30  ;;  %v3648_v40 = vld [vmem:[#allocation2 + $0x1114] sm:$0xff]  ;;  %v4040_v23 = vld [vmem:[#allocation2 + $0x157c] sm:$0xff]  ;;  %v2918_v3 = vadd.f32 %v11334_v10, %v9677_v17  ;;  %v11335_v31 = vld [vmem:[#allocation123_spill] sm:$0xff]  ;;  %3557 = vst.msk [vmem:[#allocation2 + $0x11d0] sm:$0xff] %vm237_vm2, %v6995_v62  ;;  %v9820_v24 = vpop.f32.mrf.mxu0  ;;  %v3453_v62 = vpop.f32.mrf.mxu1  ;;  %v4465_v10 = vadd.f32 %v4433_v15, %v4075_v22 }
 0x1bf   : > { %11327 = vst [vmem:[#allocation93_spill] sm:$0xff] %v9799_v55  ;;  %v9817_v63 = vadd.f32 %v11335_v31, %v2075_v5  ;;  %v3680_v16 = vadd.f32 %v3648_v40, %v9478_v4  ;;  %v4430_v28 = vld [vmem:[#allocation2 + $0x1588] sm:$0xff]  ;;  %v9824_v52 = vld [vmem:[#allocation2 + $0x1111] sm:$0xff]  ;;  %v9828_v31 = vpop.permute.xlu0 %5656  ;;  %v4850_v40 = vadd.f32 %v4818_v56, %v4460_v36  ;;  %v9840_v15 = vadd.f32 %v3272_v2, %v2914_v44  ;;  %v11344_v2 = vld [vmem:[#allocation74_spill] sm:$0xff] }
 0x1c0   : > { %11329 = vst [vmem:[#allocation55_spill] sm:$0xff] %v9802_v27  ;;  %v3269_v30 = vld [vmem:[#allocation2 + $0x12e4] sm:$0xff]  ;;  %v4823_v27 = vld [vmem:[#allocation2 + $0x15fc] sm:$0xff]  ;;  %11337 = vst [vmem:[#allocation57_spill] sm:$0xff] %v9824_v52  ;;  %v9836_v4 = vpop.f32.mrf.mxu0  ;;  %v9842_v41 = vadd.f32 %v3274_v50, %v2916_v59  ;;  %v6998_v56 = vpop.f32.mrf.mxu1  ;;  %v9857_v50 = vadd.f32 %v11344_v2, %v9684_v34  ;;  %v9864_v59 = vadd.f32 %v11333_v53, %v4853_v18 }
 0x1c1   : > { %11336 = vst [vmem:[#allocation56_spill] sm:$0xff] %v9817_v63  ;;  %v4047_v55 = vld [vmem:[#allocation2 + $0x16a4] sm:$0xff]  ;;  %11339 = vst [vmem:[#allocation105_spill] sm:$0xff] %v9828_v31  ;;  %v4077_v63 = vadd.f32 %v4045_v32, %v3685_v54  ;;  %v4072_v52 = vadd.f32 %v4040_v23, %v3680_v16  ;;  %v4042_v31 = vld [vmem:[#allocation2 + $0x15dc] sm:$0xff]  ;;  %v9844_v32 = vpop.permute.xlu1 %5923  ;;  %v5358_v54 = vmax.f32 %v9812_v7, 0.0  ;;  %v9853_v16 = vadd.f32 %v3276_v35, %v2918_v3 }
 0x1c2   : > { %v9826_v17 = vld [vmem:[#allocation2 + $0x1109] sm:$0xff]  ;;  %11342 = vst [vmem:[#allocation59_spill] sm:$0xff] %v9844_v32  ;;  %v3650_v42 = vld [vmem:[#allocation2 + $0x1174] sm:$0xff]  ;;  %v9861_v44 = vpop.f32.mrf.mxu0  ;;  %v4825_v35 = vld [vmem:[#allocation2 + $0x165c] sm:$0xff]  ;;  %v4079_v18 = vadd.f32 %v4047_v55, %v3687_v43 }
 0x1c3   : > { %11338 = vst [vmem:[#allocation103_spill] sm:$0xff] %v9826_v17  ;;  %v9830_v5 = vld [vmem:[#allocation2 + $0x11c7] sm:$0xff]  ;;  %3942 = vst.msk [vmem:[#allocation2 + $0x1108] sm:$0xff] %vm237_vm2, %v9742_v57  ;;  %v4820_v17 = vld [vmem:[#allocation2 + $0x1594] sm:$0xff]  ;;  %v11343_v57 = vmax.f32 %v9608_v48, 0.0  ;;  %v5325_v48 = vadd.f32 %v11333_v53, %v4850_v40  ;;  %v4462_v7 = vadd.f32 %v4430_v28, %v4072_v52  ;;  %v3682_v23 = vadd.f32 %v3650_v42, %v9502_v1  ;;  %v3463_v40 = vpop.f32.mrf.mxu1 }
 0x1c4   : > { %11340 = vst [vmem:[#allocation58_spill] sm:$0xff] %v9830_v5  ;;  %3556 = vst.msk [vmem:[#allocation2 + $0x11c8] sm:$0xff] %vm237_vm2, %v3453_v62  ;;  %v3657_v5 = vld [vmem:[#allocation2 + $0x129c] sm:$0xff]  ;;  %v9849_v22 = vld [vmem:[#allocation2 + $0x122f] sm:$0xff]  ;;  %v4959_v62 = vpop.permute.xlu0 %4958  ;;  %v9878_v1 = vpop.f32.mrf.mxu0 }
 0x1c5   : > { %3943 = vst.msk [vmem:[#allocation2 + $0x1110] sm:$0xff] %vm237_vm2, %v9708_v8  ;;  %5913 = vrot.lane.b32.xlu0 %v11343_v57, %s7331_s15  ;;  %v3271_v45 = vld [vmem:[#allocation2 + $0x1344] sm:$0xff]  ;;  %v3301_v8 = vadd.f32 %v3269_v30, %v9407_v33  ;;  %3559 = vst.msk [vmem:[#allocation2 + $0x1230] sm:$0xff] %vm237_vm2, %v6998_v56  ;;  %v4437_v3 = vld [vmem:[#allocation2 + $0x16b0] sm:$0xff]  ;;  %v4855_v57 = vadd.f32 %v4823_v27, %v4465_v10  ;;  %v4467_v56 = vadd.f32 %v4435_v13, %v4077_v63  ;;  %v4965_v43 = vpop.permute.xlu1 %4964 }
 0x1c6   : > { %v4432_v33 = vld [vmem:[#allocation2 + $0x15e8] sm:$0xff]  ;;  %v3659_v36 = vld [vmem:[#allocation2 + $0x12fc] sm:$0xff]  ;;  %v9867_v30 = vld [vmem:[#allocation2 + $0x1171] sm:$0xff]  ;;  %v3689_v2 = vadd.f32 %v3657_v5, %v3299_v20  ;;  %5049 = vst.msk [vmem:[%s8433_s11 + $0x30] sm:$0xff] %vm5042_vm4, %v4959_v62  ;;  %v5357_v52 = vmax.f32 %v5325_v48, 0.0  ;;  %v4852_v28 = vadd.f32 %v4820_v17, %v4462_v7  ;;  %v4074_v42 = vadd.f32 %v4042_v31, %v3682_v23  ;;  %v7001_v31 = vpop.f32.mrf.mxu1 }
 0x1c7   : > { %v9869_v34 = vld [vmem:[#allocation2 + $0x1169] sm:$0xff]  ;;  %v4822_v32 = vld [vmem:[#allocation2 + $0x15f4] sm:$0xff]  ;;  %v3303_v13 = vadd.f32 %v3271_v45, %v9435_v26  ;;  %v3661_v55 = vld [vmem:[#allocation2 + $0x135c] sm:$0xff]  ;;  %v3691_v48 = vadd.f32 %v3659_v36, %v3301_v8  ;;  %5052 = vst.msk [vmem:[%s8433_s11 + $0x48] sm:$0xff] %vm5042_vm4, %v4965_v43  ;;  %v4857_v43 = vadd.f32 %v4825_v35, %v4467_v56 }
 0x1c8   : > { %v9871_v14 = vld [vmem:[#allocation2 + $0x1227] sm:$0xff]  ;;  %3944 = vst.msk [vmem:[#allocation2 + $0x1168] sm:$0xff] %vm237_vm2, %v9790_v47  ;;  %3945 = vst.msk [vmem:[#allocation2 + $0x1170] sm:$0xff] %vm237_vm2, %v9764_v29  ;;  %v11346_v47 = vld [vmem:[#allocation100_spill] sm:$0xff]  ;;  %5429 = vrot.lane.b32.xlu1 %v5357_v52, %s7331_s15  ;;  %v3473_v52 = vpop.f32.mrf.mxu1 }
 0x1c9   : > { %11345 = vst [vmem:[#allocation60_spill] sm:$0xff] %v9871_v14  ;;  %3558 = vst.msk [vmem:[#allocation2 + $0x1228] sm:$0xff] %vm237_vm2, %v3463_v40  ;;  %v4049_v27 = vld [vmem:[#allocation2 + $0x1704] sm:$0xff]  ;;  %v9885_v63 = vadd.f32 %v11346_v47, %v9687_v38  ;;  %5431 = vrot.lane.b32.xlu0 %v5358_v54, %s7331_s15  ;;  %v9892_v17 = vld [vmem:[#allocation2 + $0x128f] sm:$0xff]  ;;  %v5360_v38 = vmax.f32 %v9864_v59, 0.0  ;;  %v4464_v54 = vadd.f32 %v4432_v33, %v4074_v42  ;;  %v4991_v47 = vpop.permute.xlu0 %4990  ;;  %v9917_v42 = vpop.f32.mrf.mxu0 }
 0x1ca   : > { %v11347_v5 = vld [vmem:[#allocation106_spill] sm:$0xff]  ;;  %11348 = vst [vmem:[#allocation108_spill] sm:$0xff] %v9892_v17  ;;  %v3652_v20 = vld [vmem:[#allocation2 + $0x11d4] sm:$0xff]  ;;  %3561 = vst.msk [vmem:[#allocation2 + $0x1290] sm:$0xff] %vm237_vm2, %v7001_v31  ;;  %v5330_v59 = vadd.f32 %v11333_v53, %v4855_v57  ;;  %v4081_v33 = vadd.f32 %v4049_v27, %v3689_v2  ;;  %v4997_v2 = vpop.permute.xlu1 %4996 }
 0x1cb   : > { %v9889_v10 = vadd.f32 %v11347_v5, %v9711_v12  ;;  %v4044_v29 = vld [vmem:[#allocation2 + $0x163c] sm:$0xff]  ;;  %v5327_v12 = vadd.f32 %v11333_v53, %v4852_v28  ;;  %v3684_v7 = vadd.f32 %v3652_v20, %v9515_v25  ;;  %v4434_v23 = vld [vmem:[#allocation2 + $0x1648] sm:$0xff]  ;;  %v4469_v28 = vadd.f32 %v4437_v3, %v4079_v18  ;;  %5065 = vst.msk [vmem:[%s8433_s11 + $0xb0] sm:$0xff] %vm5042_vm4, %v4991_v47  ;;  %v4439_v57 = vld [vmem:[#allocation2 + $0x1710] sm:$0xff] }
 0x1cc   : > { %v11349_v26 = vld [vmem:[#allocation101_spill] sm:$0xff]  ;;  %v3273_v8 = vld [vmem:[#allocation2 + $0x13a4] sm:$0xff]  ;;  %v4854_v31 = vadd.f32 %v4822_v32, %v4464_v54  ;;  %v4441_v35 = vld [vmem:[#allocation2 + $0x1770] sm:$0xff]  ;;  %v3693_v3 = vadd.f32 %v3661_v55, %v3303_v13  ;;  %5068 = vst.msk [vmem:[%s8433_s11 + $0xc8] sm:$0xff] %vm5042_vm4, %v4997_v2  ;;  %v7004_v55 = vpop.f32.mrf.mxu1 }
 0x1cd   : > { %v9896_v45 = vadd.f32 %v11349_v26, %v9697_v9  ;;  %v4827_v36 = vld [vmem:[#allocation2 + $0x16bc] sm:$0xff]  ;;  %v4051_v62 = vld [vmem:[#allocation2 + $0x1764] sm:$0xff]  ;;  %v9905_v9 = vld [vmem:[#allocation2 + $0x11d1] sm:$0xff]  ;;  %v5359_v25 = vmax.f32 %v5327_v12, 0.0  ;;  %v4076_v20 = vadd.f32 %v4044_v29, %v3684_v7  ;;  %5435 = vrot.lane.b32.xlu0 %v5360_v38, %s7331_s15  ;;  %v3305_v54 = vadd.f32 %v3273_v8, %v9632_v39 }
 0x1ce   : > { %v9907_v40 = vld [vmem:[#allocation2 + $0x11c9] sm:$0xff]  ;;  %v11351_v18 = vld [vmem:[#allocation110_spill] sm:$0xff]  ;;  %v4824_v27 = vld [vmem:[#allocation2 + $0x1654] sm:$0xff]  ;;  %v4083_v32 = vadd.f32 %v4051_v62, %v3691_v48  ;;  %v5329_v7 = vadd.f32 %v11333_v53, %v4854_v31  ;;  %v4859_v31 = vadd.f32 %v4827_v36, %v4469_v28 }
 0x1cf   : > { %v9909_v5 = vld [vmem:[#allocation2 + $0x1287] sm:$0xff]  ;;  %3946 = vst.msk [vmem:[#allocation2 + $0x11c8] sm:$0xff] %vm237_vm2, %v9836_v4  ;;  %3947 = vst.msk [vmem:[#allocation2 + $0x11d0] sm:$0xff] %vm237_vm2, %v9820_v24  ;;  %v9923_v4 = vadd.f32 %v11351_v18, %v9731_v46  ;;  %v3654_v26 = vld [vmem:[#allocation2 + $0x1234] sm:$0xff]  ;;  %5433 = vrot.lane.b32.xlu1 %v5359_v25, %s7331_s15  ;;  %v3863_v46 = vpop.f32.mrf.mxu0  ;;  %v4466_v38 = vadd.f32 %v4434_v23, %v4076_v20  ;;  %v9945_v25 = vpop.permute.xlu0 %5662  ;;  %v5332_v23 = vadd.f32 %v11333_v53, %v4857_v43 }
 0x1d0   : > { %11350 = vst [vmem:[#allocation114_spill] sm:$0xff] %v9909_v5  ;;  %3560 = vst.msk [vmem:[#allocation2 + $0x1288] sm:$0xff] %vm237_vm2, %v3473_v52  ;;  %v4053_v56 = vld [vmem:[#allocation2 + $0x17c4] sm:$0xff]  ;;  %v4046_v12 = vld [vmem:[#allocation2 + $0x169c] sm:$0xff] }
 0x1d1   : > { %v11352_v24 = vld [vmem:[#allocation107_spill] sm:$0xff]  ;;  %v4829_v48 = vld [vmem:[#allocation2 + $0x171c] sm:$0xff]  ;;  %11357 = vst [vmem:[#allocation67_spill] sm:$0xff] %v9945_v25  ;;  %v9950_v5 = vpop.f32.mrf.mxu0  ;;  %v4856_v17 = vadd.f32 %v4824_v27, %v4466_v38  ;;  %v11358_v36 = vld [vmem:[#allocation120_spill] sm:$0xff] }
 0x1d2   : > { %v9929_v29 = vadd.f32 %v11352_v24, %v9728_v11  ;;  %v3205_v13 = vld [vmem:[#allocation2 + $0x12ef] sm:$0xff]  ;;  %v3663_v62 = vld [vmem:[#allocation2 + $0x13bc] sm:$0xff]  ;;  %v5362_v24 = vmax.f32 %v5330_v59, 0.0  ;;  %v3275_v20 = vld [vmem:[#allocation2 + $0x1404] sm:$0xff]  ;;  %v4085_v59 = vadd.f32 %v4053_v56, %v3693_v3  ;;  %v9956_v28 = vadd.f32 %v11358_v36, %v9748_v19 }
 0x1d3   : > { %v11353_v47 = vld [vmem:[#allocation115_spill] sm:$0xff]  ;;  %v9940_v11 = vld [vmem:[#allocation2 + $0x1231] sm:$0xff]  ;;  %3563 = vst.msk [vmem:[#allocation2 + $0x12f0] sm:$0xff] %vm237_vm2, %v7004_v55  ;;  %v4831_v25 = vld [vmem:[#allocation2 + $0x177c] sm:$0xff]  ;;  %v9964_v38 = vpop.f32.mrf.mxu0  ;;  %v5331_v19 = vadd.f32 %v11333_v53, %v4856_v17 }
 0x1d4   : > { %v3686_v52 = vadd.f32 %v3654_v26, %v11353_v47  ;;  %v4436_v18 = vld [vmem:[#allocation2 + $0x16a8] sm:$0xff]  ;;  %11355 = vst [vmem:[#allocation109_spill] sm:$0xff] %v9940_v11  ;;  %v4471_v26 = vadd.f32 %v4439_v57, %v4081_v33  ;;  %v9958_v33 = vpop.permute.xlu1 %5660  ;;  %5439 = vrot.lane.b32.xlu0 %v5362_v24, %s7331_s15  ;;  %v3656_v57 = vld [vmem:[#allocation2 + $0x1294] sm:$0xff]  ;;  %v4048_v27 = vld [vmem:[#allocation2 + $0x16fc] sm:$0xff]  ;;  %v3307_v24 = vadd.f32 %v3275_v20, %v9645_v60 }
 0x1d5   : > { %v11354_v39 = vld [vmem:[#allocation111_spill] sm:$0xff]  ;;  %11359 = vst [vmem:[#allocation113_spill] sm:$0xff] %v9958_v33  ;;  %v11360_v36 = vld [vmem:[#allocation124_spill] sm:$0xff]  ;;  %v3665_v14 = vld [vmem:[#allocation2 + $0x141c] sm:$0xff]  ;;  %v5363_v20 = vmax.f32 %v5331_v19, 0.0 }
 0x1d6   : > { %v9938_v8 = vadd.f32 %v11354_v39, %v9745_v21  ;;  %v9943_v2 = vld [vmem:[#allocation2 + $0x1229] sm:$0xff]  ;;  %v3483_v21 = vpop.f32.mrf.mxu1  ;;  %v5361_v39 = vmax.f32 %v5329_v7, 0.0  ;;  %v4078_v55 = vadd.f32 %v4046_v12, %v3686_v52  ;;  %v4473_v7 = vadd.f32 %v4441_v35, %v4083_v32  ;;  %v9969_v11 = vld [vmem:[#allocation2 + $0x1291] sm:$0xff]  ;;  %v9974_v35 = vpop.permute.xlu0 %5694 }
 0x1d7   : > { %11356 = vst [vmem:[#allocation64_spill] sm:$0xff] %v9943_v2  ;;  %3948 = vst.msk [vmem:[#allocation2 + $0x1228] sm:$0xff] %vm237_vm2, %v9878_v1  ;;  %v3204_v47 = vld [vmem:[#allocation2 + $0x12e7] sm:$0xff]  ;;  %v4443_v2 = vld [vmem:[#allocation2 + $0x17d0] sm:$0xff]  ;;  %v3237_v12 = vadd.f32 %v3205_v13, %v9885_v63  ;;  %v5364_v32 = vmax.f32 %v5332_v23, 0.0  ;;  %v4861_v13 = vadd.f32 %v4829_v48, %v4471_v26 }
 0x1d8   : > { %3949 = vst.msk [vmem:[#allocation2 + $0x1230] sm:$0xff] %vm237_vm2, %v9861_v44  ;;  %v4055_v43 = vld [vmem:[#allocation2 + $0x1824] sm:$0xff]  ;;  %3562 = vst.msk [vmem:[#allocation2 + $0x12e8] sm:$0xff] %vm237_vm2, %v3483_v21  ;;  %v4826_v1 = vld [vmem:[#allocation2 + $0x16b4] sm:$0xff]  ;;  %v3695_v44 = vadd.f32 %v3663_v62, %v3305_v54  ;;  %v7007_v56 = vpop.f32.mrf.mxu1  ;;  %5437 = vrot.lane.b32.xlu1 %v5361_v39, %s7331_s15  ;;  %v4468_v52 = vadd.f32 %v4436_v18, %v4078_v55  ;;  %v3688_v21 = vadd.f32 %v3656_v57, %v11360_v36  ;;  %v9979_v39 = vpop.f32.mrf.mxu0 }
 0x1d9   : > { %v3207_v3 = vld [vmem:[#allocation2 + $0x134f] sm:$0xff]  ;;  %11361 = vst [vmem:[#allocation117_spill] sm:$0xff] %v9974_v35  ;;  %v5334_v54 = vadd.f32 %v11333_v53, %v4859_v31  ;;  %v3279_v17 = vld [vmem:[#allocation2 + $0x14c4] sm:$0xff]  ;;  %v3236_v18 = vadd.f32 %v3204_v47, %v9896_v45  ;;  %v4833_v23 = vld [vmem:[#allocation2 + $0x17dc] sm:$0xff]  ;;  %v9983_v36 = vpop.permute.xlu1 %5692  ;;  %5443 = vrot.lane.b32.xlu0 %v5364_v32, %s7331_s15 }
 0x1da   : > { %v4438_v33 = vld [vmem:[#allocation2 + $0x1708] sm:$0xff]  ;;  %3565 = vst.msk [vmem:[#allocation2 + $0x1350] sm:$0xff] %vm237_vm2, %v7007_v56  ;;  %v3493_v60 = vpop.f32.mrf.mxu1  ;;  %v4858_v55 = vadd.f32 %v4826_v1, %v4468_v52  ;;  %v4080_v57 = vadd.f32 %v4048_v27, %v3688_v21  ;;  %v4475_v56 = vadd.f32 %v4443_v2, %v4085_v59  ;;  %11362 = vst [vmem:[#allocation68_spill] sm:$0xff] %v9983_v36  ;;  %v4828_v45 = vld [vmem:[#allocation2 + $0x1714] sm:$0xff] }
 0x1db   : > { %v9972_v63 = vld [vmem:[#allocation2 + $0x1289] sm:$0xff]  ;;  %v4050_v48 = vld [vmem:[#allocation2 + $0x175c] sm:$0xff]  ;;  %v4087_v31 = vadd.f32 %v4055_v43, %v3695_v44  ;;  %v3239_v47 = vadd.f32 %v3207_v3, %v9889_v10  ;;  %v3658_v21 = vld [vmem:[#allocation2 + $0x12f4] sm:$0xff]  ;;  %v3311_v43 = vadd.f32 %v3279_v17, %v9664_v37  ;;  %v9998_v10 = vpop.permute.xlu0 %5897  ;;  %v5336_v44 = vadd.f32 %v11333_v53, %v4861_v13 }
 0x1dc   : > { %3950 = vst.msk [vmem:[#allocation2 + $0x1288] sm:$0xff] %vm237_vm2, %v3863_v46  ;;  %v3206_v62 = vld [vmem:[#allocation2 + $0x1347] sm:$0xff]  ;;  %3951 = vst.msk [vmem:[#allocation2 + $0x1290] sm:$0xff] %vm237_vm2, %v9917_v42  ;;  %v4863_v46 = vadd.f32 %v4831_v25, %v4473_v7  ;;  %v4445_v26 = vld [vmem:[#allocation2 + $0x1830] sm:$0xff]  ;;  %v7010_v59 = vpop.f32.mrf.mxu1  ;;  %5441 = vrot.lane.b32.xlu1 %v5363_v20, %s7331_s15  ;;  %v5333_v27 = vadd.f32 %v11333_v53, %v4858_v55  ;;  %v4470_v52 = vadd.f32 %v4438_v33, %v4080_v57 }
 0x1dd   : > { %3564 = vst.msk [vmem:[#allocation2 + $0x1348] sm:$0xff] %vm237_vm2, %v3493_v60  ;;  %v11363_v1 = vld [vmem:[#allocation121_spill] sm:$0xff]  ;;  %v9992_v2 = vld [vmem:[#allocation2 + $0x13af] sm:$0xff]  ;;  %v3697_v25 = vadd.f32 %v3665_v14, %v3307_v24  ;;  %11364 = vst [vmem:[#allocation71_spill] sm:$0xff] %v9998_v10  ;;  %v5366_v7 = vmax.f32 %v5334_v54, 0.0  ;;  %v3690_v32 = vadd.f32 %v3658_v21, %v9433_v0  ;;  %v4865_v57 = vadd.f32 %v4833_v23, %v4475_v56  ;;  %v10009_v13 = vpop.permute.xlu1 %5895 }
 0x1de   : > { %v9990_v19 = vadd.f32 %v11363_v1, %v9770_v49  ;;  %v3595_v42 = vld [vmem:[#allocation2 + $0x12f1] sm:$0xff]  ;;  %3567 = vst.msk [vmem:[#allocation2 + $0x13b0] sm:$0xff] %vm237_vm2, %v7010_v59  ;;  %v3883_v49 = vpop.f32.mrf.mxu0  ;;  %v3277_v3 = vld [vmem:[#allocation2 + $0x1464] sm:$0xff]  ;;  %v3669_v20 = vld [vmem:[#allocation2 + $0x14dc] sm:$0xff]  ;;  %v3503_v14 = vpop.f32.mrf.mxu1  ;;  %v5365_v37 = vmax.f32 %v5333_v27, 0.0  ;;  %v4860_v24 = vadd.f32 %v4828_v45, %v4470_v52  ;;  %v3238_v54 = vadd.f32 %v3206_v62, %v9929_v29 }
 0x1df   : > { %v4057_v60 = vld [vmem:[#allocation2 + $0x1884] sm:$0xff]  ;;  %v10002_v1 = vadd.f32 %v3595_v42, %v3237_v12  ;;  %11365 = vst [vmem:[#allocation123_spill] sm:$0xff] %v10009_v13  ;;  %5447 = vrot.lane.b32.xlu0 %v5366_v7, %s7331_s15  ;;  %v10014_v0 = vadd.f32 %v11333_v53, %v4863_v46  ;;  %v4082_v12 = vadd.f32 %v4050_v48, %v3690_v32  ;;  %v4830_v45 = vld [vmem:[#allocation2 + $0x1774] sm:$0xff]  ;;  %v4052_v56 = vld [vmem:[#allocation2 + $0x17bc] sm:$0xff]  ;;  %v10026_v48 = vpop.permute.xlu0 %5929 }
 0x1e0   : > { %v3594_v33 = vld [vmem:[#allocation2 + $0x12e9] sm:$0xff]  ;;  %v4477_v23 = vadd.f32 %v4445_v26, %v4087_v31  ;;  %v4835_v29 = vld [vmem:[#allocation2 + $0x183c] sm:$0xff]  ;;  %v7013_v59 = vpop.f32.mrf.mxu1  ;;  %5445 = vrot.lane.b32.xlu1 %v5365_v37, %s7331_s15  ;;  %v5335_v27 = vadd.f32 %v11333_v53, %v4860_v24  ;;  %v4089_v52 = vadd.f32 %v4057_v60, %v3697_v25  ;;  %v3701_v21 = vadd.f32 %v3669_v20, %v3311_v43  ;;  %v10028_v31 = vpop.f32.mrf.mxu0 }
 0x1e1   : > { %v10004_v55 = vld [vmem:[#allocation2 + $0x13a7] sm:$0xff]  ;;  %3952 = vst.msk [vmem:[#allocation2 + $0x12e8] sm:$0xff] %vm237_vm2, %v9964_v38  ;;  %3953 = vst.msk [vmem:[#allocation2 + $0x12f0] sm:$0xff] %vm237_vm2, %v9950_v5  ;;  %v10018_v62 = vadd.f32 %v3594_v33, %v3236_v18  ;;  %v3597_v38 = vld [vmem:[#allocation2 + $0x1351] sm:$0xff]  ;;  %v3309_v5 = vadd.f32 %v3277_v3, %v9680_v61  ;;  %v5368_v18 = vmax.f32 %v5336_v44, 0.0  ;;  %v10040_v24 = vadd.f32 %v11333_v53, %v4865_v57 }
 0x1e2   : > { %v4440_v17 = vld [vmem:[#allocation2 + $0x1768] sm:$0xff]  ;;  %3566 = vst.msk [vmem:[#allocation2 + $0x13a8] sm:$0xff] %vm237_vm2, %v3503_v14  ;;  %v3660_v46 = vld [vmem:[#allocation2 + $0x1354] sm:$0xff]  ;;  %11366 = vst [vmem:[#allocation118_spill] sm:$0xff] %v10026_v48  ;;  %v10031_v37 = vadd.f32 %v3597_v38, %v3239_v47  ;;  %v3513_v60 = vpop.f32.mrf.mxu1  ;;  %v5367_v20 = vmax.f32 %v5335_v27, 0.0  ;;  %v10045_v47 = vpop.permute.xlu1 %5927  ;;  %v4867_v38 = vadd.f32 %v4835_v29, %v4477_v23 }
 0x1e3   : > { %v10020_v42 = vld [vmem:[#allocation2 + $0x140f] sm:$0xff]  ;;  %v4472_v26 = vadd.f32 %v4440_v17, %v4082_v12  ;;  %v3692_v7 = vadd.f32 %v3660_v46, %v9458_v6  ;;  %v4061_v33 = vld [vmem:[#allocation2 + $0x1944] sm:$0xff]  ;;  %v3667_v14 = vld [vmem:[#allocation2 + $0x147c] sm:$0xff]  ;;  %v3241_v6 = vadd.f32 %v9992_v2, %v9923_v4  ;;  %11368 = vst [vmem:[#allocation74_spill] sm:$0xff] %v10045_v47  ;;  %5451 = vrot.lane.b32.xlu0 %v5368_v18, %s7331_s15  ;;  %v5370_v46 = vmax.f32 %v10014_v0, 0.0 }
 0x1e4   : > { %3569 = vst.msk [vmem:[#allocation2 + $0x1410] sm:$0xff] %vm237_vm2, %v7013_v59  ;;  %v4447_v32 = vld [vmem:[#allocation2 + $0x1890] sm:$0xff]  ;;  %v11367_v25 = vld [vmem:[#allocation125_spill] sm:$0xff]  ;;  %v10037_v3 = vld [vmem:[#allocation2 + $0x1407] sm:$0xff]  ;;  %5449 = vrot.lane.b32.xlu1 %v5367_v20, %s7331_s15 }
 0x1e5   : > { %v10035_v43 = vadd.f32 %v11367_v25, %v9785_v58  ;;  %v3596_v61 = vld [vmem:[#allocation2 + $0x1349] sm:$0xff]  ;;  %3568 = vst.msk [vmem:[#allocation2 + $0x1408] sm:$0xff] %vm237_vm2, %v3513_v60  ;;  %v3893_v58 = vpop.f32.mrf.mxu0  ;;  %v4862_v17 = vadd.f32 %v4830_v45, %v4472_v26  ;;  %v4084_v12 = vadd.f32 %v4052_v56, %v3692_v7  ;;  %v4832_v57 = vld [vmem:[#allocation2 + $0x17d4] sm:$0xff]  ;;  %v4054_v59 = vld [vmem:[#allocation2 + $0x181c] sm:$0xff]  ;;  %v4479_v45 = vadd.f32 %v4447_v32, %v4089_v52 }
 0x1e6   : > { %v4442_v44 = vld [vmem:[#allocation2 + $0x17c8] sm:$0xff]  ;;  %3954 = vst.msk [vmem:[#allocation2 + $0x1348] sm:$0xff] %vm237_vm2, %v3883_v49  ;;  %3955 = vst.msk [vmem:[#allocation2 + $0x1350] sm:$0xff] %vm237_vm2, %v9979_v39  ;;  %v10051_v27 = vadd.f32 %v3596_v61, %v3238_v54  ;;  %v3599_v4 = vld [vmem:[#allocation2 + $0x13b1] sm:$0xff]  ;;  %v7016_v49 = vpop.f32.mrf.mxu1  ;;  %v4093_v26 = vadd.f32 %v4061_v33, %v3701_v21  ;;  %v3699_v25 = vadd.f32 %v3667_v14, %v3309_v5  ;;  %v4963_v39 = vpop.permute.xlu0 %4962  ;;  %v5372_v5 = vmax.f32 %v10040_v24, 0.0 }
 0x1e7   : > { %v10053_v2 = vld [vmem:[#allocation2 + $0x146f] sm:$0xff]  ;;  %v10058_v56 = vpop.f32.mrf.mxu0  ;;  %v5337_v54 = vadd.f32 %v11333_v53, %v4862_v17  ;;  %v4474_v23 = vadd.f32 %v4442_v44, %v4084_v12  ;;  %v4837_v7 = vld [vmem:[#allocation2 + $0x189c] sm:$0xff]  ;;  %v4059_v60 = vld [vmem:[#allocation2 + $0x18e4] sm:$0xff]  ;;  %v10062_v20 = vadd.f32 %v3599_v4, %v3241_v6  ;;  %5051 = vst.msk [vmem:[%s8433_s11 + $0x40] sm:$0xff] %vm5042_vm4, %v4963_v39  ;;  %v3243_v33 = vadd.f32 %v10020_v42, %v9956_v28  ;;  %v4969_v17 = vpop.permute.xlu1 %4968 }
 0x1e8   : > { %v3662_v18 = vld [vmem:[#allocation2 + $0x13b4] sm:$0xff]  ;;  %3571 = vst.msk [vmem:[#allocation2 + $0x1470] sm:$0xff] %vm237_vm2, %v7016_v49  ;;  %v10066_v52 = vld [vmem:[#allocation2 + $0x1467] sm:$0xff]  ;;  %v3523_v21 = vpop.f32.mrf.mxu1  ;;  %5455 = vrot.lane.b32.xlu0 %v5370_v46, %s7331_s15  ;;  %v10081_v28 = vadd.f32 %v11333_v53, %v4867_v38  ;;  %v4056_v42 = vld [vmem:[#allocation2 + $0x187c] sm:$0xff]  ;;  %v4869_v39 = vadd.f32 %v4837_v7, %v4479_v45 }
 0x1e9   : > { %v3694_v29 = vadd.f32 %v3662_v18, %v9840_v15  ;;  %v4451_v61 = vld [vmem:[#allocation2 + $0x1950] sm:$0xff]  ;;  %v4444_v32 = vld [vmem:[#allocation2 + $0x1828] sm:$0xff]  ;;  %v3240_v15 = vadd.f32 %v10004_v55, %v9938_v8  ;;  %v11369_v14 = vld [vmem:[#allocation93_spill] sm:$0xff]  ;;  %3570 = vst.msk [vmem:[#allocation2 + $0x1468] sm:$0xff] %vm237_vm2, %v3523_v21  ;;  %v3903_v24 = vpop.f32.mrf.mxu0  ;;  %v5369_v12 = vmax.f32 %v5337_v54, 0.0  ;;  %v4864_v4 = vadd.f32 %v4832_v57, %v4474_v23 }
 0x1ea   : > { %v3598_v0 = vld [vmem:[#allocation2 + $0x13a9] sm:$0xff]  ;;  %v11370_v44 = vld [vmem:[#allocation126_spill] sm:$0xff]  ;;  %v4834_v55 = vld [vmem:[#allocation2 + $0x1834] sm:$0xff]  ;;  %5054 = vst.msk [vmem:[%s8433_s11 + $0x58] sm:$0xff] %vm5042_vm4, %v4969_v17  ;;  %v7019_v18 = vpop.f32.mrf.mxu1  ;;  %v4483_v46 = vadd.f32 %v4451_v61, %v4093_v26  ;;  %v4091_v54 = vadd.f32 %v4059_v60, %v3699_v25  ;;  %v4995_v38 = vpop.permute.xlu0 %4994 }
 0x1eb   : > { %v10075_v6 = vadd.f32 %v11370_v44, %v11369_v14  ;;  %3956 = vst.msk [vmem:[#allocation2 + $0x13a8] sm:$0xff] %vm237_vm2, %v3893_v58  ;;  %3957 = vst.msk [vmem:[#allocation2 + $0x13b0] sm:$0xff] %vm237_vm2, %v10028_v31  ;;  %v4086_v8 = vadd.f32 %v4054_v59, %v3694_v29  ;;  %v3601_v49 = vld [vmem:[#allocation2 + $0x1411] sm:$0xff]  ;;  %v10087_v57 = vadd.f32 %v3598_v0, %v3240_v15  ;;  %5453 = vrot.lane.b32.xlu1 %v5369_v12, %s7331_s15  ;;  %v7066_v31 = vpop.f32.mrf.mxu0  ;;  %v4841_v14 = vld [vmem:[#allocation2 + $0x195c] sm:$0xff] }
 0x1ec   : > { %v3215_v58 = vld [vmem:[#allocation2 + $0x14cf] sm:$0xff]  ;;  %v5339_v59 = vadd.f32 %v11333_v53, %v4864_v4  ;;  %v10093_v45 = vadd.f32 %v3601_v49, %v3243_v33  ;;  %v11372_v26 = vld [vmem:[#allocation129_spill] sm:$0xff]  ;;  %5067 = vst.msk [vmem:[%s8433_s11 + $0xc0] sm:$0xff] %vm5042_vm4, %v4995_v38  ;;  %v3214_v60 = vld [vmem:[#allocation2 + $0x14c7] sm:$0xff]  ;;  %v3533_v0 = vpop.f32.mrf.mxu1  ;;  %v5001_v33 = vpop.permute.xlu1 %5000  ;;  %5459 = vrot.lane.b32.xlu0 %v5372_v5, %s7331_s15  ;;  %v5374_v49 = vmax.f32 %v10081_v28, 0.0 }
 0x1ed   : > { %v3664_v21 = vld [vmem:[#allocation2 + $0x1414] sm:$0xff]  ;;  %3573 = vst.msk [vmem:[#allocation2 + $0x14d0] sm:$0xff] %vm237_vm2, %v7019_v18  ;;  %v4476_v23 = vadd.f32 %v4444_v32, %v4086_v8  ;;  %v11371_v7 = vld [vmem:[#allocation55_spill] sm:$0xff]  ;;  %v11374_v12 = vld [vmem:[#allocation130_spill] sm:$0xff]  ;;  %v3242_v32 = vadd.f32 %v10037_v3, %v9990_v19  ;;  %v3913_v4 = vpop.f32.mrf.mxu0  ;;  %v5344_v3 = vadd.f32 %v11333_v53, %v4869_v39 }
 0x1ee   : > { %v3696_v29 = vadd.f32 %v3664_v21, %v9842_v41  ;;  %v4449_v44 = vld [vmem:[#allocation2 + $0x18f0] sm:$0xff]  ;;  %v2857_v25 = vadd.f32 %v11372_v26, %v11371_v7  ;;  %v4446_v15 = vld [vmem:[#allocation2 + $0x1888] sm:$0xff]  ;;  %v3245_v41 = vadd.f32 %v10053_v2, %v10035_v43  ;;  %3572 = vst.msk [vmem:[#allocation2 + $0x14c8] sm:$0xff] %vm237_vm2, %v3533_v0  ;;  %v5371_v8 = vmax.f32 %v5339_v59, 0.0  ;;  %v3278_v2 = vld [vmem:[#allocation2 + $0x14bc] sm:$0xff]  ;;  %v7074_v19 = vpop.f32.mrf.mxu1  ;;  %v10116_v28 = vpop.permute.xlu0 %5666 }
 0x1ef   : > { %v3600_v61 = vld [vmem:[#allocation2 + $0x1409] sm:$0xff]  ;;  %v4866_v21 = vadd.f32 %v4834_v55, %v4476_v23  ;;  %v4836_v43 = vld [vmem:[#allocation2 + $0x1894] sm:$0xff]  ;;  %5070 = vst.msk [vmem:[%s8433_s11 + $0xd8] sm:$0xff] %vm5042_vm4, %v5001_v33  ;;  %v4058_v5 = vld [vmem:[#allocation2 + $0x18dc] sm:$0xff]  ;;  %v4481_v0 = vadd.f32 %v4449_v44, %v4091_v54 }
 0x1f0   : > { %v11373_v17 = vld [vmem:[#allocation56_spill] sm:$0xff]  ;;  %3958 = vst.msk [vmem:[#allocation2 + $0x1408] sm:$0xff] %vm237_vm2, %v3903_v24  ;;  %3959 = vst.msk [vmem:[#allocation2 + $0x1410] sm:$0xff] %vm237_vm2, %v10058_v56  ;;  %v4088_v38 = vadd.f32 %v4056_v42, %v3696_v29  ;;  %v4873_v24 = vadd.f32 %v4841_v14, %v4483_v46  ;;  %v10114_v59 = vadd.f32 %v3600_v61, %v3242_v32  ;;  %5457 = vrot.lane.b32.xlu1 %v5371_v8, %s7331_s15  ;;  %v7069_v56 = vpop.f32.mrf.mxu0  ;;  %v4839_v29 = vld [vmem:[#allocation2 + $0x18fc] sm:$0xff]  ;;  %v4165_v14 = vpop.f32.mrf.mxu1 }
 0x1f1   : > { %v2856_v18 = vadd.f32 %v11374_v12, %v11373_v17  ;;  %v3603_v7 = vld [vmem:[#allocation2 + $0x1471] sm:$0xff]  ;;  %v5341_v55 = vadd.f32 %v11333_v53, %v4866_v21  ;;  %4325 = vst.msk [vmem:[#allocation2 + $0xf30] sm:$0xff] %vm237_vm2, %v7074_v19  ;;  %v3602_v46 = vld [vmem:[#allocation2 + $0x1469] sm:$0xff]  ;;  %v3247_v44 = vadd.f32 %v3215_v58, %v2857_v25  ;;  %v3310_v61 = vadd.f32 %v3278_v2, %v9857_v50  ;;  %v11394_v13 = vld [vmem:[#allocation10_spill] sm:$0xff] }
 0x1f2   : > { %v3666_v26 = vld [vmem:[#allocation2 + $0x1474] sm:$0xff]  ;;  %v4478_v42 = vadd.f32 %v4446_v15, %v4088_v38  ;;  %v10122_v39 = vadd.f32 %v3603_v7, %v3245_v41  ;;  %v4448_v54 = vld [vmem:[#allocation2 + $0x18e8] sm:$0xff]  ;;  %v3244_v17 = vadd.f32 %v10066_v52, %v10075_v6  ;;  %3960 = vst.msk [vmem:[#allocation2 + $0x1468] sm:$0xff] %vm237_vm2, %v3913_v4  ;;  %v10128_v15 = vpop.permute.xlu1 %5664  ;;  %5463 = vrot.lane.b32.xlu0 %v5374_v49, %s7331_s15  ;;  %4324 = vst.msk [vmem:[#allocation2 + $0xf28] sm:$0xff] %vm237_vm2, %v4165_v14  ;;  %v7077_v6 = vpop.f32.mrf.mxu1 }
 0x1f3   : > { %v3698_v23 = vadd.f32 %v3666_v26, %v9853_v16  ;;  %v2079_v12 = vld [vmem:[#allocation2 + $0xaa4] sm:$0xff]  ;;  %11375 = vst [vmem:[#allocation100_spill] sm:$0xff] %v10128_v15  ;;  %v3923_v16 = vpop.f32.mrf.mxu0  ;;  %v5373_v32 = vmax.f32 %v5341_v55, 0.0  ;;  %3961 = vst.msk [vmem:[#allocation2 + $0x1470] sm:$0xff] %vm237_vm2, %v7066_v31  ;;  %v4838_v8 = vld [vmem:[#allocation2 + $0x18f4] sm:$0xff]  ;;  %v3246_v25 = vadd.f32 %v3214_v60, %v2856_v18  ;;  %v5376_v21 = vmax.f32 %v5344_v3, 0.0 }
 0x1f4   : > { %v4868_v41 = vadd.f32 %v4836_v43, %v4478_v42  ;;  %v3996_v58 = vld [vmem:[#allocation2 + $0x152f] sm:$0xff]  ;;  %v5348_v4 = vadd.f32 %v11333_v53, %v4873_v24  ;;  %v4871_v38 = vadd.f32 %v4839_v29, %v4481_v0  ;;  %v10136_v49 = vadd.f32 %v3602_v46, %v3244_v17  ;;  %v10138_v43 = vpop.permute.xlu0 %5698  ;;  %v4060_v26 = vld [vmem:[#allocation2 + $0x193c] sm:$0xff]  ;;  %v4175_v0 = vpop.f32.mrf.mxu1  ;;  %v3995_v55 = vld [vmem:[#allocation2 + $0x1527] sm:$0xff] }
 0x1f5   : > { %v4090_v33 = vadd.f32 %v4058_v5, %v3698_v23  ;;  %v3605_v50 = vld [vmem:[#allocation2 + $0x14d1] sm:$0xff]  ;;  %11376 = vst [vmem:[#allocation106_spill] sm:$0xff] %v10138_v43  ;;  %5461 = vrot.lane.b32.xlu1 %v5373_v32, %s7331_s15  ;;  %v7124_v31 = vpop.f32.mrf.mxu0  ;;  %v11377_v3 = vld [vmem:[#allocation6_spill] sm:$0xff]  ;;  %v3604_v5 = vld [vmem:[#allocation2 + $0x14c9] sm:$0xff] }
 0x1f6   : > { %v3668_v52 = vld [vmem:[#allocation2 + $0x14d4] sm:$0xff]  ;;  %v5343_v60 = vadd.f32 %v11333_v53, %v4868_v41  ;;  %v3637_v7 = vadd.f32 %v3605_v50, %v3247_v44  ;;  %v2111_v24 = vadd.f32 %v11377_v3, %v2079_v12  ;;  %v10144_v42 = vld [vmem:[#allocation2 + $0xf87] sm:$0xff]  ;;  %4715 = vst.msk [vmem:[#allocation2 + $0xf30] sm:$0xff] %vm237_vm2, %v7124_v31  ;;  %3962 = vst.msk [vmem:[#allocation2 + $0x14c8] sm:$0xff] %vm237_vm2, %v3923_v16  ;;  %v10149_v46 = vpop.permute.xlu1 %5696  ;;  %5467 = vrot.lane.b32.xlu0 %v5376_v21, %s7331_s15  ;;  %v7080_v32 = vpop.f32.mrf.mxu1 }
 0x1f7   : > { %v10134_v2 = vld [vmem:[#allocation2 + $0xf8f] sm:$0xff]  ;;  %v4480_v18 = vadd.f32 %v4448_v54, %v4090_v33  ;;  %v3700_v19 = vadd.f32 %v3668_v52, %v3310_v61  ;;  %v2081_v29 = vld [vmem:[#allocation2 + $0xb04] sm:$0xff]  ;;  %3963 = vst.msk [vmem:[#allocation2 + $0x14d0] sm:$0xff] %vm237_vm2, %v7069_v56  ;;  %11378 = vst [vmem:[#allocation101_spill] sm:$0xff] %v10149_v46  ;;  %v4555_v14 = vpop.f32.mrf.mxu0  ;;  %v3636_v17 = vadd.f32 %v3604_v5, %v3246_v25  ;;  %v5380_v41 = vmax.f32 %v5348_v4, 0.0 }
 0x1f8   : > { %4327 = vst.msk [vmem:[#allocation2 + $0xf90] sm:$0xff] %vm237_vm2, %v7077_v6  ;;  %v2469_v23 = vld [vmem:[#allocation2 + $0xab0] sm:$0xff]  ;;  %v5375_v54 = vmax.f32 %v5343_v60, 0.0  ;;  %v4028_v61 = vadd.f32 %v3996_v58, %v3637_v7  ;;  %v4450_v12 = vld [vmem:[#allocation2 + $0x1948] sm:$0xff]  ;;  %4326 = vst.msk [vmem:[#allocation2 + $0xf88] sm:$0xff] %vm237_vm2, %v4175_v0  ;;  %v10156_v16 = vpop.permute.xlu0 %5901  ;;  %v5346_v58 = vadd.f32 %v11333_v53, %v4871_v38  ;;  %v4185_v7 = vpop.f32.mrf.mxu1 }
 0x1f9   : > { %v4870_v44 = vadd.f32 %v4838_v8, %v4480_v18  ;;  %v4777_v33 = vld [vmem:[#allocation2 + $0x1531] sm:$0xff]  ;;  %v4092_v50 = vadd.f32 %v4060_v26, %v3700_v19  ;;  %4714 = vst.msk [vmem:[#allocation2 + $0xf28] sm:$0xff] %vm237_vm2, %v4555_v14  ;;  %11379 = vst [vmem:[#allocation110_spill] sm:$0xff] %v10156_v16  ;;  %v7127_v52 = vpop.f32.mrf.mxu0  ;;  %v4027_v21 = vadd.f32 %v3995_v55, %v3636_v17  ;;  %v10166_v19 = vld [vmem:[%s11091_s4] ss:$0 sm:$0xff] }
 0x1fa   : > { %v10154_v56 = vld [vmem:[#allocation2 + $0xfef] sm:$0xff]  ;;  %5465 = vrot.lane.b32.xlu1 %v5375_v54, %s7331_s15  ;;  %v2501_v4 = vadd.f32 %v2469_v23, %v2111_v24  ;;  %v11380_v60 = vld [vmem:[#allocation9_spill] sm:$0xff]  ;;  %v10168_v5 = vld [vmem:[#allocation2 + $0xfe7] sm:$0xff]  ;;  %v10170_v14 = vpop.permute.xlu1 %5899  ;;  %5475 = vrot.lane.b32.xlu0 %v5380_v41, %s7331_s15  ;;  %v7083_v54 = vpop.f32.mrf.mxu1 }
 0x1fb   : > { %v5345_v8 = vadd.f32 %v11333_v53, %v4870_v44  ;;  %v7267_v25 = vld [vmem:[#allocation2 + $0x1530] sm:$0xff]  ;;  %4329 = vst.msk [vmem:[#allocation2 + $0xff0] sm:$0xff] %vm237_vm2, %v7080_v32  ;;  %v2113_v18 = vadd.f32 %v11380_v60, %v2081_v29  ;;  %v4482_v3 = vadd.f32 %v4450_v12, %v4092_v50  ;;  %v2859_v38 = vld [vmem:[#allocation2 + $0xabc] sm:$0xff]  ;;  %11381 = vst [vmem:[#allocation107_spill] sm:$0xff] %v10170_v14  ;;  %v4565_v55 = vpop.f32.mrf.mxu0  ;;  %v5378_v60 = vmax.f32 %v5346_v58, 0.0 }
 0x1fc   : > { %v4419_v6 = vadd.f32 %v7267_v25, %v4028_v61  ;;  %v4840_v31 = vld [vmem:[#allocation2 + $0x1954] sm:$0xff]  ;;  %v4776_v26 = vld [vmem:[#allocation2 + $0x1529] sm:$0xff]  ;;  %v4418_v29 = vadd.f32 %v9767_v51, %v4027_v21  ;;  %4328 = vst.msk [vmem:[#allocation2 + $0xfe8] sm:$0xff] %vm237_vm2, %v4185_v7  ;;  %v10179_v25 = vpop.permute.xlu0 %5933  ;;  %v10185_v51 = vadd.f32 %v2859_v38, %v2501_v4  ;;  %v4195_v21 = vpop.f32.mrf.mxu1  ;;  %v11398_v47 = vld [vmem:[#allocation26_spill] sm:$0xff] }
 0x1fd   : > { %v2471_v0 = vld [vmem:[#allocation2 + $0xb10] sm:$0xff]  ;;  %v5377_v24 = vmax.f32 %v5345_v8, 0.0  ;;  %v4872_v44 = vadd.f32 %v4840_v31, %v4482_v3  ;;  %v11382_v17 = vld [vmem:[#allocation11_spill] sm:$0xff]  ;;  %v11383_v12 = vld [vmem:[#allocation25_spill] sm:$0xff]  ;;  %11384 = vst [vmem:[#allocation115_spill] sm:$0xff] %v10179_v25  ;;  %v7130_v41 = vpop.f32.mrf.mxu0 }
 0x1fe   : > { %v4809_v23 = vadd.f32 %v4777_v33, %v4419_v6  ;;  %v2047_v32 = vadd.f32 %v11383_v12, %v11382_v17  ;;  %v10177_v50 = vld [vmem:[#allocation2 + $0x104f] sm:$0xff]  ;;  %v4808_v8 = vadd.f32 %v4776_v26, %v4418_v29  ;;  %v10187_v6 = vadd.f32 %v2471_v0, %v2113_v18  ;;  %v11385_v7 = vld [vmem:[#allocation61_spill] sm:$0xff]  ;;  %v10190_v17 = vld [vmem:[#allocation2 + $0x1047] sm:$0xff]  ;;  %5471 = vrot.lane.b32.xlu0 %v5378_v60, %s7331_s15 }
 0x1ff   : > { %v4357_v61 = vld [vmem:[#allocation2 + $0xf90] sm:$0xff]  ;;  %5469 = vrot.lane.b32.xlu1 %v5377_v24, %s7331_s15  ;;  %4331 = vst.msk [vmem:[#allocation2 + $0x1050] sm:$0xff] %vm237_vm2, %v7083_v54  ;;  %v4356_v31 = vld [vmem:[#allocation2 + $0xf88] sm:$0xff]  ;;  %v10192_v24 = vpop.permute.xlu1 %5931  ;;  %v4575_v58 = vpop.f32.mrf.mxu0  ;;  %4330 = vst.msk [vmem:[#allocation2 + $0x1048] sm:$0xff] %vm237_vm2, %v4195_v21 }
 0x200   : > { %v5113_v33 = vadd.f32 %v10166_v19, %v4809_v23  ;;  %4717 = vst.msk [vmem:[#allocation2 + $0xf90] sm:$0xff] %vm237_vm2, %v7127_v52  ;;  %v2438_v3 = vadd.f32 %v11385_v7, %v2047_v32  ;;  %11386 = vst [vmem:[#allocation111_spill] sm:$0xff] %v10192_v24  ;;  %v5112_v52 = vadd.f32 %v10166_v19, %v4808_v8  ;;  %v11387_v4 = vld [vmem:[#allocation28_spill] sm:$0xff]  ;;  %v11388_v18 = vld [vmem:[#allocation63_spill] sm:$0xff]  ;;  %v7086_v8 = vpop.f32.mrf.mxu1  ;;  %v4967_v21 = vpop.permute.xlu0 %4966 }
 0x201   : > { %v5347_v23 = vadd.f32 %v11333_v53, %v4872_v44  ;;  %4716 = vst.msk [vmem:[#allocation2 + $0xf88] sm:$0xff] %vm237_vm2, %v4565_v55  ;;  %v2829_v38 = vadd.f32 %v11388_v18, %v11387_v4  ;;  %v11389_v0 = vld [vmem:[#allocation35_spill] sm:$0xff]  ;;  %v11391_v12 = vld [vmem:[#allocation8_spill] sm:$0xff]  ;;  %v11393_v60 = vld [vmem:[#allocation42_spill] sm:$0xff] }
 0x202   : > { %v5145_v26 = vmax.f32 %v5113_v33, 0.0  ;;  %v11390_v29 = vld [vmem:[#allocation7_spill] sm:$0xff]  ;;  %v11392_v32 = vld [vmem:[#allocation36_spill] sm:$0xff]  ;;  %v2064_v33 = vadd.f32 %v11394_v13, %v11393_v60  ;;  %v11395_v44 = vld [vmem:[#allocation62_spill] sm:$0xff]  ;;  %5053 = vst.msk [vmem:[%s8433_s11 + $0x50] sm:$0xff] %vm5042_vm4, %v4967_v21 }
 0x203   : > { %v2062_v54 = vadd.f32 %v11390_v29, %v11389_v0  ;;  %v2061_v7 = vadd.f32 %v11392_v32, %v11391_v12  ;;  %v4359_v10 = vld [vmem:[#allocation2 + $0xff0] sm:$0xff]  ;;  %v2828_v24 = vadd.f32 %v11395_v44, %v2438_v3  ;;  %v11397_v4 = vld [vmem:[#allocation43_spill] sm:$0xff]  ;;  %v7133_v0 = vpop.f32.mrf.mxu0  ;;  %v5144_v29 = vmax.f32 %v5112_v52, 0.0  ;;  %v11399_v32 = vld [vmem:[#allocation133_spill] sm:$0xff] }
 0x204   : > { %v10208_v55 = vld [vmem:[#allocation2 + $0x10af] sm:$0xff]  ;;  %5240 = vrot.lane.b32.xlu1 %v5145_v26, %s7331_s15  ;;  %v3998_v12 = vadd.f32 %v10134_v2, %v11398_v47  ;;  %v3219_v13 = vadd.f32 %v11399_v32, %v2829_v38  ;;  %4719 = vst.msk [vmem:[#allocation2 + $0xff0] sm:$0xff] %vm237_vm2, %v7130_v41  ;;  %v11400_v3 = vld [vmem:[#allocation78_spill] sm:$0xff]  ;;  %v11401_v44 = vld [vmem:[#allocation81_spill] sm:$0xff]  ;;  %v4973_v41 = vpop.permute.xlu1 %4972 }
 0x205   : > { %v11396_v46 = vld [vmem:[#allocation12_spill] sm:$0xff]  ;;  %4333 = vst.msk [vmem:[#allocation2 + $0x10b0] sm:$0xff] %vm237_vm2, %v7086_v8  ;;  %v10219_v60 = vadd.f32 %v11400_v3, %v2062_v54  ;;  %v10222_v36 = vadd.f32 %v11401_v44, %v2061_v7  ;;  %v11402_v26 = vld [vmem:[#allocation134_spill] sm:$0xff]  ;;  %5238 = vrot.lane.b32.xlu0 %v5144_v29, %s7331_s15  ;;  %v4585_v54 = vpop.f32.mrf.mxu0  ;;  %v5379_v8 = vmax.f32 %v5347_v23, 0.0  ;;  %v11406_v21 = vld [vmem:[#allocation143_spill] sm:$0xff] }
 0x206   : > { %v2063_v18 = vadd.f32 %v11397_v4, %v11396_v46  ;;  %v4205_v46 = vpop.f32.mrf.mxu1  ;;  %v3218_v52 = vadd.f32 %v11402_v26, %v2828_v24  ;;  %v4358_v4 = vld [vmem:[#allocation2 + $0xfe8] sm:$0xff]  ;;  %v11403_v47 = vld [vmem:[#allocation30_spill] sm:$0xff]  ;;  %v4389_v3 = vadd.f32 %v4357_v61, %v3998_v12  ;;  %v11405_v7 = vld [vmem:[#allocation140_spill] sm:$0xff]  ;;  %v3609_v25 = vadd.f32 %v11406_v21, %v3219_v13  ;;  %5056 = vst.msk [vmem:[%s8433_s11 + $0x68] sm:$0xff] %vm5042_vm4, %v4973_v41 }
 0x207   : > { %v11404_v2 = vld [vmem:[#allocation66_spill] sm:$0xff]  ;;  %v3997_v44 = vadd.f32 %v10144_v42, %v11405_v7  ;;  %4718 = vst.msk [vmem:[#allocation2 + $0xfe8] sm:$0xff] %vm237_vm2, %v4575_v58  ;;  %v4747_v61 = vld [vmem:[#allocation2 + $0xf91] sm:$0xff]  ;;  %v11414_v48 = vld [vmem:[#allocation27_spill] sm:$0xff] }
 0x208   : > { %v2831_v38 = vadd.f32 %v11404_v2, %v11403_v47  ;;  %v10229_v32 = vld [vmem:[#allocation2 + $0x10a7] sm:$0xff]  ;;  %v7089_v23 = vpop.f32.mrf.mxu1  ;;  %v11409_v29 = vld [vmem:[#allocation137_spill] sm:$0xff]  ;;  %v4361_v42 = vld [vmem:[#allocation2 + $0x1050] sm:$0xff]  ;;  %5473 = vrot.lane.b32.xlu1 %v5379_v8, %s7331_s15 }
 0x209   : > { %4332 = vst.msk [vmem:[#allocation2 + $0x10a8] sm:$0xff] %vm237_vm2, %v4205_v46  ;;  %v11407_v24 = vld [vmem:[#allocation82_spill] sm:$0xff]  ;;  %v11411_v13 = vld [vmem:[#allocation65_spill] sm:$0xff]  ;;  %v10248_v58 = vld [vmem:[#allocation2 + $0x110f] sm:$0xff]  ;;  %v4999_v46 = vpop.permute.xlu0 %4998 }
 0x20a   : > { %v10238_v26 = vadd.f32 %v11407_v24, %v2064_v33  ;;  %v11408_v47 = vld [vmem:[#allocation86_spill] sm:$0xff]  ;;  %v3221_v12 = vadd.f32 %v11409_v29, %v2831_v38  ;;  %v7136_v33 = vpop.f32.mrf.mxu0  ;;  %v4779_v24 = vadd.f32 %v4747_v61, %v4389_v3  ;;  %v11412_v41 = vld [vmem:[#allocation144_spill] sm:$0xff]  ;;  %4721 = vst.msk [vmem:[#allocation2 + $0x1050] sm:$0xff] %vm237_vm2, %v7133_v0  ;;  %4335 = vst.msk [vmem:[#allocation2 + $0x1110] sm:$0xff] %vm237_vm2, %v7089_v23  ;;  %v4215_v38 = vpop.f32.mrf.mxu1 }
 0x20b   : > { %v10241_v2 = vadd.f32 %v11408_v47, %v2063_v18  ;;  %v11410_v7 = vld [vmem:[#allocation46_spill] sm:$0xff]  ;;  %v4388_v18 = vadd.f32 %v4356_v31, %v3997_v44  ;;  %v4000_v47 = vadd.f32 %v10154_v56, %v3609_v25  ;;  %v3608_v43 = vadd.f32 %v11412_v41, %v3218_v52  ;;  %5069 = vst.msk [vmem:[%s8433_s11 + $0xd0] sm:$0xff] %vm5042_vm4, %v4999_v46  ;;  %v4746_v29 = vld [vmem:[#allocation2 + $0xf89] sm:$0xff]  ;;  %v11418_v25 = vld [vmem:[#allocation69_spill] sm:$0xff]  ;;  %v5005_v0 = vpop.permute.xlu1 %5004 }
 0x20c   : > { %v2830_v21 = vadd.f32 %v11411_v13, %v11410_v7  ;;  %v11413_v7 = vld [vmem:[#allocation39_spill] sm:$0xff]  ;;  %v11416_v31 = vld [vmem:[#allocation70_spill] sm:$0xff]  ;;  %v4595_v23 = vpop.f32.mrf.mxu0  ;;  %v5083_v46 = vadd.f32 %v10166_v19, %v4779_v24  ;;  %5072 = vst.msk [vmem:[%s8433_s11 + $0xe8] sm:$0xff] %vm5042_vm4, %v5005_v0 }
 0x20d   : > { %v3611_v13 = vadd.f32 %v11413_v7, %v3221_v12  ;;  %v4360_v35 = vld [vmem:[#allocation2 + $0x1048] sm:$0xff]  ;;  %v4778_v41 = vadd.f32 %v4746_v29, %v4388_v18  ;;  %v4391_v14 = vadd.f32 %v4359_v10, %v4000_v47  ;;  %v3999_v15 = vadd.f32 %v10168_v5, %v3608_v43  ;;  %v4749_v12 = vld [vmem:[#allocation2 + $0xff1] sm:$0xff]  ;;  %v11419_v7 = vld [vmem:[#allocation14_spill] sm:$0xff]  ;;  %v10280_v5 = vpop.permute.xlu0 %5670 }
 0x20e   : > { %v3220_v8 = vadd.f32 %v11414_v48, %v2830_v21  ;;  %v11415_v3 = vld [vmem:[#allocation31_spill] sm:$0xff]  ;;  %4720 = vst.msk [vmem:[#allocation2 + $0x1048] sm:$0xff] %vm237_vm2, %v4585_v54  ;;  %v7092_v48 = vpop.f32.mrf.mxu1  ;;  %v11421_v10 = vld [vmem:[#allocation128_spill] sm:$0xff]  ;;  %11422 = vst [vmem:[#allocation120_spill] sm:$0xff] %v10280_v5  ;;  %v7139_v54 = vpop.f32.mrf.mxu0  ;;  %v5115_v18 = vmax.f32 %v5083_v46, 0.0 }
 0x20f   : > { %v2833_v44 = vadd.f32 %v11416_v31, %v11415_v3  ;;  %v11417_v56 = vld [vmem:[#allocation47_spill] sm:$0xff]  ;;  %v4002_v21 = vadd.f32 %v10177_v50, %v3611_v13  ;;  %v10278_v43 = vadd.f32 %v11421_v10, %v10185_v51  ;;  %v5082_v47 = vadd.f32 %v10166_v19, %v4778_v41  ;;  %v11424_v51 = vld [vmem:[#allocation141_spill] sm:$0xff]  ;;  %v11425_v10 = vld [vmem:[#allocation32_spill] sm:$0xff] }
 0x210   : > { %v2832_v52 = vadd.f32 %v11418_v25, %v11417_v56  ;;  %v10263_v61 = vld [vmem:[#allocation2 + $0x1107] sm:$0xff]  ;;  %v3610_v3 = vadd.f32 %v11419_v7, %v3220_v8  ;;  %v4363_v25 = vld [vmem:[#allocation2 + $0x10b0] sm:$0xff]  ;;  %v4390_v29 = vadd.f32 %v4358_v4, %v3999_v15  ;;  %v4225_v50 = vpop.f32.mrf.mxu1  ;;  %v11426_v5 = vld [vmem:[#allocation73_spill] sm:$0xff]  ;;  %5180 = vrot.lane.b32.xlu1 %v5115_v18, %s7331_s15  ;;  %v4605_v15 = vpop.f32.mrf.mxu0 }
 0x211   : > { %4334 = vst.msk [vmem:[#allocation2 + $0x1108] sm:$0xff] %vm237_vm2, %v4215_v38  ;;  %v11420_v31 = vld [vmem:[#allocation139_spill] sm:$0xff]  ;;  %v4781_v38 = vadd.f32 %v4749_v12, %v4391_v14  ;;  %4723 = vst.msk [vmem:[#allocation2 + $0x10b0] sm:$0xff] %vm237_vm2, %v7136_v33  ;;  %v2835_v46 = vadd.f32 %v11426_v5, %v11425_v10  ;;  %v10292_v14 = vpop.permute.xlu1 %5668  ;;  %v5114_v4 = vmax.f32 %v5082_v47, 0.0  ;;  %v11429_v5 = vld [vmem:[#allocation146_spill] sm:$0xff] }
 0x212   : > { %v3223_v56 = vadd.f32 %v11420_v31, %v2833_v44  ;;  %v10274_v24 = vld [vmem:[#allocation2 + $0x116f] sm:$0xff]  ;;  %v4001_v8 = vadd.f32 %v10190_v17, %v3610_v3  ;;  %v3222_v7 = vadd.f32 %v11424_v51, %v2832_v52  ;;  %v10290_v16 = vld [vmem:[#allocation2 + $0x1167] sm:$0xff]  ;;  %11427 = vst [vmem:[#allocation124_spill] sm:$0xff] %v10292_v14  ;;  %v4393_v17 = vadd.f32 %v4361_v42, %v4002_v21  ;;  %v7095_v52 = vpop.f32.mrf.mxu1  ;;  %v7142_v42 = vpop.f32.mrf.mxu0 }
 0x213   : > { %4337 = vst.msk [vmem:[#allocation2 + $0x1170] sm:$0xff] %vm237_vm2, %v7092_v48  ;;  %v4748_v13 = vld [vmem:[#allocation2 + $0xfe9] sm:$0xff]  ;;  %v5085_v33 = vadd.f32 %v10166_v19, %v4781_v38  ;;  %4336 = vst.msk [vmem:[#allocation2 + $0x1168] sm:$0xff] %vm237_vm2, %v4225_v50  ;;  %v4751_v48 = vld [vmem:[#allocation2 + $0x1051] sm:$0xff]  ;;  %v10305_v38 = vpop.permute.xlu0 %5702  ;;  %5178 = vrot.lane.b32.xlu0 %v5114_v4, %s7331_s15 }
 0x214   : > { %v11423_v44 = vld [vmem:[#allocation40_spill] sm:$0xff]  ;;  %v4362_v31 = vld [vmem:[#allocation2 + $0x10a8] sm:$0xff]  ;;  %v4780_v41 = vadd.f32 %v4748_v13, %v4390_v29  ;;  %11432 = vst [vmem:[#allocation121_spill] sm:$0xff] %v10305_v38  ;;  %v4783_v29 = vadd.f32 %v4751_v48, %v4393_v17  ;;  %v11433_v50 = vld [vmem:[#allocation33_spill] sm:$0xff] }
 0x215   : > { %v3613_v0 = vadd.f32 %v11423_v44, %v3223_v56  ;;  %4722 = vst.msk [vmem:[#allocation2 + $0x10a8] sm:$0xff] %vm237_vm2, %v4595_v23  ;;  %v11428_v3 = vld [vmem:[#allocation87_spill] sm:$0xff]  ;;  %v3225_v44 = vadd.f32 %v11429_v5, %v2835_v46  ;;  %v4365_v51 = vld [vmem:[#allocation2 + $0x1110] sm:$0xff]  ;;  %v5117_v23 = vmax.f32 %v5085_v33, 0.0 }
 0x216   : > { %v3612_v56 = vadd.f32 %v11428_v3, %v3222_v7  ;;  %v11430_v18 = vld [vmem:[#allocation48_spill] sm:$0xff]  ;;  %v5084_v21 = vadd.f32 %v10166_v19, %v4780_v41  ;;  %4725 = vst.msk [vmem:[#allocation2 + $0x1110] sm:$0xff] %vm237_vm2, %v7139_v54  ;;  %v4235_v7 = vpop.f32.mrf.mxu1  ;;  %v11436_v4 = vld [vmem:[#allocation147_spill] sm:$0xff]  ;;  %v10318_v41 = vpop.permute.xlu1 %5700 }
 0x217   : > { %v4004_v12 = vadd.f32 %v10208_v55, %v3613_v0  ;;  %v11431_v10 = vld [vmem:[#allocation72_spill] sm:$0xff]  ;;  %v4392_v55 = vadd.f32 %v4360_v35, %v4001_v8  ;;  %v10316_v38 = vld [vmem:[#allocation2 + $0x11c7] sm:$0xff]  ;;  %11437 = vst [vmem:[#allocation125_spill] sm:$0xff] %v10318_v41  ;;  %5184 = vrot.lane.b32.xlu1 %v5117_v23, %s7331_s15  ;;  %v4615_v35 = vpop.f32.mrf.mxu0  ;;  %v5087_v8 = vadd.f32 %v10166_v19, %v4783_v29  ;;  %v10331_v29 = vpop.permute.xlu0 %5905 }
 0x218   : > { %v2834_v47 = vadd.f32 %v11431_v10, %v11430_v18  ;;  %v10303_v14 = vld [vmem:[#allocation2 + $0x11cf] sm:$0xff]  ;;  %v4003_v3 = vadd.f32 %v10229_v32, %v3612_v56  ;;  %v5116_v54 = vmax.f32 %v5084_v21, 0.0  ;;  %v7098_v32 = vpop.f32.mrf.mxu1  ;;  %v11440_v23 = vld [vmem:[#allocation34_spill] sm:$0xff]  ;;  %11442 = vst [vmem:[#allocation93_spill] sm:$0xff] %v10331_v29 }
 0x219   : > { %4339 = vst.msk [vmem:[#allocation2 + $0x11d0] sm:$0xff] %vm237_vm2, %v7095_v52  ;;  %v11434_v13 = vld [vmem:[#allocation76_spill] sm:$0xff]  ;;  %v4364_v33 = vld [vmem:[#allocation2 + $0x1108] sm:$0xff]  ;;  %v4395_v52 = vadd.f32 %v4363_v25, %v4004_v12  ;;  %4338 = vst.msk [vmem:[#allocation2 + $0x11c8] sm:$0xff] %vm237_vm2, %v4235_v7  ;;  %v7145_v25 = vpop.f32.mrf.mxu0 }
 0x21a   : > { %v2837_v0 = vadd.f32 %v11434_v13, %v11433_v50  ;;  %v4750_v46 = vld [vmem:[#allocation2 + $0x1049] sm:$0xff]  ;;  %v3224_v10 = vadd.f32 %v11436_v4, %v2834_v47  ;;  %4724 = vst.msk [vmem:[#allocation2 + $0x1108] sm:$0xff] %vm237_vm2, %v4605_v15  ;;  %v4753_v48 = vld [vmem:[#allocation2 + $0x10b1] sm:$0xff]  ;;  %5182 = vrot.lane.b32.xlu0 %v5116_v54, %s7331_s15  ;;  %v5119_v15 = vmax.f32 %v5087_v8, 0.0  ;;  %v11446_v54 = vld [vmem:[#allocation50_spill] sm:$0xff] }
 0x21b   : > { %v11435_v5 = vld [vmem:[#allocation52_spill] sm:$0xff]  ;;  %v4782_v17 = vadd.f32 %v4750_v46, %v4392_v55  ;;  %v11441_v4 = vld [vmem:[#allocation77_spill] sm:$0xff]  ;;  %v4785_v55 = vadd.f32 %v4753_v48, %v4395_v52  ;;  %v11444_v7 = vld [vmem:[#allocation79_spill] sm:$0xff] }
 0x21c   : > { %v3615_v18 = vadd.f32 %v11435_v5, %v3225_v44  ;;  %v11438_v44 = vld [vmem:[#allocation91_spill] sm:$0xff]  ;;  %v11439_v50 = vld [vmem:[#allocation16_spill] sm:$0xff]  ;;  %v2836_v21 = vadd.f32 %v11441_v4, %v11440_v23  ;;  %5188 = vrot.lane.b32.xlu1 %v5119_v15, %s7331_s15  ;;  %v11450_v15 = vld [vmem:[#allocation38_spill] sm:$0xff] }
 0x21d   : > { %v3614_v47 = vadd.f32 %v11438_v44, %v3224_v10  ;;  %v3227_v13 = vadd.f32 %v11439_v50, %v2837_v0  ;;  %v4367_v5 = vld [vmem:[#allocation2 + $0x1170] sm:$0xff]  ;;  %v5086_v12 = vadd.f32 %v10166_v19, %v4782_v17  ;;  %v11443_v0 = vld [vmem:[#allocation37_spill] sm:$0xff]  ;;  %v4366_v8 = vld [vmem:[#allocation2 + $0x1168] sm:$0xff]  ;;  %v10344_v17 = vpop.permute.xlu1 %5903 }
 0x21e   : > { %v4006_v56 = vadd.f32 %v10248_v58, %v3615_v18  ;;  %v10329_v41 = vld [vmem:[#allocation2 + $0x122f] sm:$0xff]  ;;  %v4394_v58 = vadd.f32 %v4362_v31, %v4003_v3  ;;  %4727 = vst.msk [vmem:[#allocation2 + $0x1170] sm:$0xff] %vm237_vm2, %v7142_v42  ;;  %v2839_v46 = vadd.f32 %v11444_v7, %v11443_v0  ;;  %v4245_v18 = vpop.f32.mrf.mxu1  ;;  %v11445_v50 = vld [vmem:[#allocation57_spill] sm:$0xff]  ;;  %v3226_v4 = vadd.f32 %v11446_v54, %v2836_v21  ;;  %v10342_v29 = vld [vmem:[#allocation2 + $0x1227] sm:$0xff]  ;;  %v4625_v31 = vpop.f32.mrf.mxu0 }
 0x21f   : > { %4341 = vst.msk [vmem:[#allocation2 + $0x1230] sm:$0xff] %vm237_vm2, %v7098_v32  ;;  %v4752_v10 = vld [vmem:[#allocation2 + $0x10a9] sm:$0xff]  ;;  %v4005_v44 = vadd.f32 %v10263_v61, %v3614_v47  ;;  %v3617_v23 = vadd.f32 %v11445_v50, %v3227_v13  ;;  %11447 = vst [vmem:[#allocation126_spill] sm:$0xff] %v10344_v17  ;;  %v5118_v42 = vmax.f32 %v5086_v12, 0.0  ;;  %v5089_v3 = vadd.f32 %v10166_v19, %v4785_v55  ;;  %v4755_v48 = vld [vmem:[#allocation2 + $0x1111] sm:$0xff]  ;;  %v10357_v55 = vpop.permute.xlu0 %5937 }
 0x220   : > { %v4784_v52 = vadd.f32 %v4752_v10, %v4394_v58  ;;  %v4397_v32 = vadd.f32 %v4365_v51, %v4006_v56  ;;  %4726 = vst.msk [vmem:[#allocation2 + $0x1168] sm:$0xff] %vm237_vm2, %v4615_v35  ;;  %4340 = vst.msk [vmem:[#allocation2 + $0x1228] sm:$0xff] %vm237_vm2, %v4245_v18  ;;  %v7101_v61 = vpop.f32.mrf.mxu1  ;;  %v11448_v13 = vld [vmem:[#allocation103_spill] sm:$0xff]  ;;  %v11449_v0 = vld [vmem:[#allocation20_spill] sm:$0xff]  ;;  %v7148_v51 = vpop.f32.mrf.mxu0 }
 0x221   : > { %v4008_v47 = vadd.f32 %v10274_v24, %v3617_v23  ;;  %v3616_v21 = vadd.f32 %v11448_v13, %v3226_v4  ;;  %v3229_v7 = vadd.f32 %v11449_v0, %v2839_v46  ;;  %v4369_v50 = vld [vmem:[#allocation2 + $0x11d0] sm:$0xff]  ;;  %5186 = vrot.lane.b32.xlu0 %v5118_v42, %s7331_s15  ;;  %v5121_v35 = vmax.f32 %v5089_v3, 0.0  ;;  %v11453_v18 = vld [vmem:[#allocation83_spill] sm:$0xff]  ;;  %v11454_v42 = vld [vmem:[#allocation54_spill] sm:$0xff] }
 0x222   : > { %v11451_v54 = vld [vmem:[#allocation80_spill] sm:$0xff]  ;;  %v5088_v56 = vadd.f32 %v10166_v19, %v4784_v52  ;;  %v4787_v58 = vadd.f32 %v4755_v48, %v4397_v32  ;;  %v4396_v24 = vadd.f32 %v4364_v33, %v4005_v44  ;;  %4729 = vst.msk [vmem:[#allocation2 + $0x11d0] sm:$0xff] %vm237_vm2, %v7145_v25  ;;  %v4255_v23 = vpop.f32.mrf.mxu1  ;;  %v4368_v3 = vld [vmem:[#allocation2 + $0x11c8] sm:$0xff]  ;;  %v10370_v52 = vpop.permute.xlu1 %5935 }
 0x223   : > { %v2838_v12 = vadd.f32 %v11451_v54, %v11450_v15  ;;  %v10355_v17 = vld [vmem:[#allocation2 + $0x128f] sm:$0xff]  ;;  %v4007_v13 = vadd.f32 %v10290_v16, %v3616_v21  ;;  %v3619_v0 = vadd.f32 %v9867_v30, %v3229_v7  ;;  %v10368_v54 = vld [vmem:[#allocation2 + $0x1287] sm:$0xff]  ;;  %5192 = vrot.lane.b32.xlu1 %v5121_v35, %s7331_s15  ;;  %v4635_v33 = vpop.f32.mrf.mxu0  ;;  %4728 = vst.msk [vmem:[#allocation2 + $0x11c8] sm:$0xff] %vm237_vm2, %v4625_v31 }
 0x224   : > { %4343 = vst.msk [vmem:[#allocation2 + $0x1290] sm:$0xff] %vm237_vm2, %v7101_v61  ;;  %v11452_v46 = vld [vmem:[#allocation44_spill] sm:$0xff]  ;;  %v5120_v25 = vmax.f32 %v5088_v56, 0.0  ;;  %v5091_v44 = vadd.f32 %v10166_v19, %v4787_v58  ;;  %v4399_v61 = vadd.f32 %v4367_v5, %v4008_v47  ;;  %4342 = vst.msk [vmem:[#allocation2 + $0x1288] sm:$0xff] %vm237_vm2, %v4255_v23  ;;  %v7104_v30 = vpop.f32.mrf.mxu1  ;;  %v11455_v7 = vld [vmem:[#allocation99_spill] sm:$0xff]  ;;  %v4971_v5 = vpop.permute.xlu0 %4970 }
 0x225   : > { %v2841_v10 = vadd.f32 %v11453_v18, %v11452_v46  ;;  %v4754_v4 = vld [vmem:[#allocation2 + $0x1109] sm:$0xff]  ;;  %v3228_v15 = vadd.f32 %v11454_v42, %v2838_v12  ;;  %v4757_v16 = vld [vmem:[#allocation2 + $0x1171] sm:$0xff]  ;;  %v4010_v48 = vadd.f32 %v10303_v14, %v3619_v0  ;;  %v7151_v31 = vpop.f32.mrf.mxu0  ;;  %v4398_v23 = vadd.f32 %v4366_v8, %v4007_v13  ;;  %5055 = vst.msk [vmem:[%s8433_s11 + $0x60] sm:$0xff] %vm5042_vm4, %v4971_v5 }
 0x226   : > { %v4786_v32 = vadd.f32 %v4754_v4, %v4396_v24  ;;  %v10379_v35 = vld [vmem:[#allocation2 + $0x1230] sm:$0xff]  ;;  %v11456_v56 = vld [vmem:[#allocation45_spill] sm:$0xff]  ;;  %5190 = vrot.lane.b32.xlu0 %v5120_v25, %s7331_s15  ;;  %v5123_v47 = vmax.f32 %v5091_v44, 0.0  ;;  %v4789_v14 = vadd.f32 %v4757_v16, %v4399_v61  ;;  %v4265_v4 = vpop.f32.mrf.mxu1  ;;  %v11459_v25 = vld [vmem:[#allocation58_spill] sm:$0xff] }
 0x227   : > { %v3618_v21 = vadd.f32 %v9869_v34, %v3228_v15  ;;  %v3231_v12 = vadd.f32 %v11455_v7, %v2841_v10  ;;  %v11457_v46 = vld [vmem:[#allocation84_spill] sm:$0xff]  ;;  %4731 = vst.msk [vmem:[#allocation2 + $0x1230] sm:$0xff] %vm237_vm2, %v7148_v51  ;;  %v10398_v8 = vld [vmem:[#allocation2 + $0x12e7] sm:$0xff]  ;;  %v4977_v51 = vpop.permute.xlu1 %4976  ;;  %v4645_v13 = vpop.f32.mrf.mxu0  ;;  %v4401_v16 = vadd.f32 %v4369_v50, %v4010_v48 }
 0x228   : > { %v2840_v58 = vadd.f32 %v11457_v46, %v11456_v56  ;;  %v10383_v24 = vld [vmem:[#allocation2 + $0x12ef] sm:$0xff]  ;;  %v5090_v18 = vadd.f32 %v10166_v19, %v4786_v32  ;;  %5196 = vrot.lane.b32.xlu1 %v5123_v47, %s7331_s15  ;;  %v5093_v61 = vadd.f32 %v10166_v19, %v4789_v14  ;;  %5058 = vst.msk [vmem:[%s8433_s11 + $0x78] sm:$0xff] %vm5042_vm4, %v4977_v51  ;;  %v11460_v46 = vld [vmem:[#allocation89_spill] sm:$0xff] }
 0x229   : > { %4345 = vst.msk [vmem:[#allocation2 + $0x12f0] sm:$0xff] %vm237_vm2, %v7104_v30  ;;  %v11458_v34 = vld [vmem:[#allocation88_spill] sm:$0xff]  ;;  %v4009_v42 = vadd.f32 %v10316_v38, %v3618_v21  ;;  %v3621_v15 = vadd.f32 %v9905_v9, %v3231_v12  ;;  %v10396_v32 = vld [vmem:[#allocation2 + $0x1228] sm:$0xff]  ;;  %4344 = vst.msk [vmem:[#allocation2 + $0x12e8] sm:$0xff] %vm237_vm2, %v4265_v4  ;;  %v7107_v9 = vpop.f32.mrf.mxu1  ;;  %v2842_v50 = vadd.f32 %v11460_v46, %v10222_v36 }
 0x22a   : > { %v2843_v10 = vadd.f32 %v11458_v34, %v10219_v60  ;;  %v4756_v0 = vld [vmem:[#allocation2 + $0x1169] sm:$0xff]  ;;  %v3230_v44 = vadd.f32 %v11459_v25, %v2840_v58  ;;  %v5122_v60 = vmax.f32 %v5090_v18, 0.0  ;;  %4730 = vst.msk [vmem:[#allocation2 + $0x1228] sm:$0xff] %vm237_vm2, %v4635_v33  ;;  %v4759_v38 = vld [vmem:[#allocation2 + $0x11d1] sm:$0xff]  ;;  %v5003_v33 = vpop.permute.xlu0 %5002  ;;  %v7154_v58 = vpop.f32.mrf.mxu0  ;;  %v5125_v5 = vmax.f32 %v5093_v61, 0.0 }
 0x22b   : > { %v4788_v30 = vadd.f32 %v4756_v0, %v4398_v23  ;;  %v4012_v21 = vadd.f32 %v10329_v41, %v3621_v15  ;;  %v10409_v56 = vld [vmem:[#allocation2 + $0x1290] sm:$0xff]  ;;  %v4791_v41 = vadd.f32 %v4759_v38, %v4401_v16  ;;  %v4400_v18 = vadd.f32 %v4368_v3, %v4009_v42  ;;  %5071 = vst.msk [vmem:[%s8433_s11 + $0xe0] sm:$0xff] %vm5042_vm4, %v5003_v33  ;;  %v4275_v36 = vpop.f32.mrf.mxu1  ;;  %v11462_v34 = vld [vmem:[#allocation109_spill] sm:$0xff]  ;;  %v10426_v15 = vld [vmem:[#allocation2 + $0x1288] sm:$0xff]  ;;  %v5009_v42 = vpop.permute.xlu1 %5008 }
 0x22c   : > { %v3620_v7 = vadd.f32 %v9907_v40, %v3230_v44  ;;  %v3233_v12 = vadd.f32 %v9849_v22, %v2843_v10  ;;  %v10413_v48 = vld [vmem:[#allocation2 + $0x134f] sm:$0xff]  ;;  %5194 = vrot.lane.b32.xlu0 %v5122_v60, %s7331_s15  ;;  %4733 = vst.msk [vmem:[#allocation2 + $0x1290] sm:$0xff] %vm237_vm2, %v7151_v31  ;;  %v11461_v22 = vld [vmem:[#allocation94_spill] sm:$0xff]  ;;  %5200 = vrot.lane.b32.xlu1 %v5125_v5, %s7331_s15  ;;  %4732 = vst.msk [vmem:[#allocation2 + $0x1288] sm:$0xff] %vm237_vm2, %v4645_v13  ;;  %v4655_v61 = vpop.f32.mrf.mxu0 }
 0x22d   : > { %v5092_v47 = vadd.f32 %v10166_v19, %v4788_v30  ;;  %4347 = vst.msk [vmem:[#allocation2 + $0x1350] sm:$0xff] %vm237_vm2, %v7107_v9  ;;  %v2845_v40 = vadd.f32 %v11461_v22, %v10238_v26  ;;  %v4758_v14 = vld [vmem:[#allocation2 + $0x11c9] sm:$0xff]  ;;  %v5095_v25 = vadd.f32 %v10166_v19, %v4791_v41  ;;  %v4403_v51 = vadd.f32 %v10379_v35, %v4012_v21  ;;  %v7110_v60 = vpop.f32.mrf.mxu1  ;;  %v2861_v21 = vld [vmem:[#allocation2 + $0xb1c] sm:$0xff] }
 0x22e   : > { %v4011_v23 = vadd.f32 %v10342_v29, %v3620_v7  ;;  %v3623_v10 = vadd.f32 %v11462_v34, %v3233_v12  ;;  %v11463_v4 = vld [vmem:[#allocation60_spill] sm:$0xff]  ;;  %v10428_v3 = vld [vmem:[#allocation2 + $0x1347] sm:$0xff]  ;;  %v4790_v44 = vadd.f32 %v4758_v14, %v4400_v18  ;;  %5074 = vst.msk [vmem:[%s8433_s11 + $0xf8] sm:$0xff] %vm5042_vm4, %v5009_v42  ;;  %v10449_v33 = vpop.permute.xlu0 %5674  ;;  %v3639_v18 = vld [vmem:[#allocation2 + $0xf3c] sm:$0xff] }
 0x22f   : > { %v3232_v0 = vadd.f32 %v11463_v4, %v2842_v50  ;;  %v2083_v31 = vld [vmem:[#allocation2 + $0xb64] sm:$0xff]  ;;  %v5124_v26 = vmax.f32 %v5092_v47, 0.0  ;;  %4346 = vst.msk [vmem:[#allocation2 + $0x1348] sm:$0xff] %vm237_vm2, %v4275_v36  ;;  %v10437_v29 = vld [vmem:[#allocation2 + $0x13af] sm:$0xff]  ;;  %v5127_v5 = vmax.f32 %v5095_v25, 0.0  ;;  %v11467_v22 = vld [vmem:[#allocation13_spill] sm:$0xff]  ;;  %v7157_v36 = vpop.f32.mrf.mxu0 }
 0x230   : > { %v4761_v30 = vld [vmem:[#allocation2 + $0x1231] sm:$0xff]  ;;  %v4014_v16 = vadd.f32 %v10355_v17, %v3623_v10  ;;  %v11466_v35 = vld [vmem:[#allocation95_spill] sm:$0xff]  ;;  %4349 = vst.msk [vmem:[#allocation2 + $0x13b0] sm:$0xff] %vm237_vm2, %v7110_v60  ;;  %v5094_v17 = vadd.f32 %v10166_v19, %v4790_v44  ;;  %v4402_v41 = vadd.f32 %v10396_v32, %v4011_v23  ;;  %v11468_v4 = vld [vmem:[#allocation114_spill] sm:$0xff]  ;;  %v10459_v44 = vpop.permute.xlu1 %5672 }
 0x231   : > { %v11464_v9 = vld [vmem:[#allocation64_spill] sm:$0xff]  ;;  %v2844_v13 = vadd.f32 %v11466_v35, %v10241_v2  ;;  %v10446_v50 = vld [vmem:[#allocation2 + $0x13a7] sm:$0xff]  ;;  %5198 = vrot.lane.b32.xlu0 %v5124_v26, %s7331_s15  ;;  %v4793_v47 = vadd.f32 %v4761_v30, %v4403_v51  ;;  %v2115_v2 = vadd.f32 %v11467_v22, %v2083_v31  ;;  %5204 = vrot.lane.b32.xlu1 %v5127_v5, %s7331_s15  ;;  %v4665_v60 = vpop.f32.mrf.mxu0 }
 0x232   : > { %v3622_v38 = vadd.f32 %v11464_v9, %v3232_v0  ;;  %v11465_v7 = vld [vmem:[#allocation108_spill] sm:$0xff]  ;;  %v4374_v42 = vld [vmem:[#allocation2 + $0x12e8] sm:$0xff]  ;;  %v5126_v32 = vmax.f32 %v5094_v17, 0.0  ;;  %v4405_v31 = vadd.f32 %v10409_v56, %v4014_v16  ;;  %v10475_v56 = vpop.permute.xlu0 %5706 }
 0x233   : > { %v3235_v12 = vadd.f32 %v11465_v7, %v2845_v40  ;;  %v10442_v46 = vld [vmem:[#allocation2 + $0x12f0] sm:$0xff]  ;;  %v4285_v40 = vpop.f32.mrf.mxu1  ;;  %v3234_v0 = vadd.f32 %v11468_v4, %v2844_v13  ;;  %v4031_v26 = vld [vmem:[#allocation2 + $0x13a4] sm:$0xff]  ;;  %4734 = vst.msk [vmem:[#allocation2 + $0x12e8] sm:$0xff] %vm237_vm2, %v4655_v61 }
 0x234   : > { %4735 = vst.msk [vmem:[#allocation2 + $0x12f0] sm:$0xff] %vm237_vm2, %v7154_v58  ;;  %v4760_v14 = vld [vmem:[#allocation2 + $0x1229] sm:$0xff]  ;;  %v4013_v34 = vadd.f32 %v10368_v54, %v3622_v38  ;;  %v5097_v58 = vadd.f32 %v10166_v19, %v4793_v47  ;;  %4348 = vst.msk [vmem:[#allocation2 + $0x13a8] sm:$0xff] %vm237_vm2, %v4285_v40  ;;  %v4763_v30 = vld [vmem:[#allocation2 + $0x1291] sm:$0xff] }
 0x235   : > { %v3625_v10 = vadd.f32 %v9969_v11, %v3235_v12  ;;  %v2473_v25 = vld [vmem:[#allocation2 + $0xb70] sm:$0xff]  ;;  %v4792_v23 = vadd.f32 %v4760_v14, %v4402_v41  ;;  %v2893_v11 = vadd.f32 %v2861_v21, %v10187_v6  ;;  %v7113_v51 = vpop.f32.mrf.mxu1  ;;  %v3624_v38 = vadd.f32 %v9972_v63, %v3234_v0  ;;  %v10472_v35 = vld [vmem:[#allocation2 + $0x1407] sm:$0xff]  ;;  %5202 = vrot.lane.b32.xlu0 %v5126_v32, %s7331_s15  ;;  %v7160_v21 = vpop.f32.mrf.mxu0  ;;  %v2863_v40 = vld [vmem:[#allocation2 + $0xb7c] sm:$0xff] }
 0x236   : > { %v10467_v54 = vld [vmem:[#allocation2 + $0x140f] sm:$0xff]  ;;  %v3671_v12 = vadd.f32 %v3639_v18, %v10278_v43  ;;  %v5129_v6 = vmax.f32 %v5097_v58, 0.0  ;;  %v4795_v16 = vadd.f32 %v4763_v30, %v4405_v31  ;;  %v4404_v13 = vadd.f32 %v10426_v15, %v4013_v34  ;;  %v4033_v22 = vld [vmem:[#allocation2 + $0x1404] sm:$0xff]  ;;  %v10485_v14 = vpop.permute.xlu1 %5704 }
 0x237   : > { %v4016_v9 = vadd.f32 %v10383_v24, %v3625_v10  ;;  %v4377_v7 = vld [vmem:[#allocation2 + $0x1350] sm:$0xff]  ;;  %4351 = vst.msk [vmem:[#allocation2 + $0x1410] sm:$0xff] %vm237_vm2, %v7113_v51  ;;  %v5096_v61 = vadd.f32 %v10166_v19, %v4792_v23  ;;  %v2505_v63 = vadd.f32 %v2473_v25, %v2115_v2  ;;  %v4295_v24 = vpop.f32.mrf.mxu1  ;;  %v4015_v5 = vadd.f32 %v10398_v8, %v3624_v38  ;;  %v10482_v47 = vld [vmem:[#allocation2 + $0x1348] sm:$0xff]  ;;  %v4811_v10 = vld [vmem:[#allocation2 + $0x13bc] sm:$0xff] }
 0x238   : > { %4737 = vst.msk [vmem:[#allocation2 + $0x1350] sm:$0xff] %vm237_vm2, %v7157_v36  ;;  %v4762_v43 = vld [vmem:[#allocation2 + $0x1289] sm:$0xff]  ;;  %v4063_v17 = vadd.f32 %v4031_v26, %v3671_v12  ;;  %5208 = vrot.lane.b32.xlu1 %v5129_v6, %s7331_s15  ;;  %v5099_v36 = vadd.f32 %v10166_v19, %v4795_v16  ;;  %4736 = vst.msk [vmem:[#allocation2 + $0x1348] sm:$0xff] %vm237_vm2, %v4665_v60  ;;  %v3641_v8 = vld [vmem:[#allocation2 + $0xf9c] sm:$0xff]  ;;  %v4675_v26 = vpop.f32.mrf.mxu0  ;;  %v4018_v58 = vadd.f32 %v10413_v48, %v10002_v1 }
 0x239   : > { %v11469_v41 = vld [vmem:[#allocation135_spill] sm:$0xff]  ;;  %v5128_v15 = vmax.f32 %v5096_v61, 0.0  ;;  %v4794_v2 = vadd.f32 %v4762_v43, %v4404_v13  ;;  %v4407_v34 = vadd.f32 %v10442_v46, %v4016_v9  ;;  %4350 = vst.msk [vmem:[#allocation2 + $0x1408] sm:$0xff] %vm237_vm2, %v4295_v24  ;;  %v7116_v0 = vpop.f32.mrf.mxu1  ;;  %v4406_v32 = vadd.f32 %v4374_v42, %v4015_v5  ;;  %v4421_v23 = vld [vmem:[#allocation2 + $0x13b0] sm:$0xff]  ;;  %v10499_v46 = vpop.permute.xlu0 %5909  ;;  %v4030_v42 = vld [vmem:[#allocation2 + $0x139c] sm:$0xff] }
 0x23a   : > { %v3283_v18 = vadd.f32 %v11469_v41, %v2893_v11  ;;  %v10492_v4 = vld [vmem:[#allocation2 + $0x146f] sm:$0xff]  ;;  %v2085_v31 = vld [vmem:[#allocation2 + $0xbc4] sm:$0xff]  ;;  %v5131_v51 = vmax.f32 %v5099_v36, 0.0  ;;  %v4453_v9 = vadd.f32 %v4421_v23, %v4063_v17  ;;  %4739 = vst.msk [vmem:[#allocation2 + $0x13b0] sm:$0xff] %vm237_vm2, %v7160_v21  ;;  %v2895_v38 = vadd.f32 %v2863_v40, %v2505_v63  ;;  %v7163_v48 = vpop.f32.mrf.mxu0  ;;  %v10510_v43 = vpop.permute.xlu1 %5907 }
 0x23b   : > { %v4765_v25 = vld [vmem:[#allocation2 + $0x12f1] sm:$0xff]  ;;  %v10496_v11 = vld [vmem:[#allocation2 + $0x1467] sm:$0xff]  ;;  %4353 = vst.msk [vmem:[#allocation2 + $0x1470] sm:$0xff] %vm237_vm2, %v7116_v0  ;;  %5206 = vrot.lane.b32.xlu0 %v5128_v15, %s7331_s15  ;;  %v5098_v60 = vadd.f32 %v10166_v19, %v4794_v2  ;;  %v4305_v1 = vpop.f32.mrf.mxu1  ;;  %v4409_v6 = vadd.f32 %v4377_v7, %v4018_v58  ;;  %v4017_v61 = vadd.f32 %v10428_v3, %v10018_v62 }
 0x23c   : > { %v4797_v30 = vadd.f32 %v4765_v25, %v4407_v34  ;;  %v4764_v12 = vld [vmem:[#allocation2 + $0x12e9] sm:$0xff]  ;;  %v3673_v13 = vadd.f32 %v3641_v8, %v3283_v18  ;;  %5212 = vrot.lane.b32.xlu1 %v5131_v51, %s7331_s15  ;;  %v4843_v17 = vadd.f32 %v4811_v10, %v4453_v9  ;;  %v11470_v7 = vld [vmem:[#allocation17_spill] sm:$0xff]  ;;  %v4685_v18 = vpop.f32.mrf.mxu0  ;;  %v4020_v15 = vadd.f32 %v10437_v29, %v10031_v37 }
 0x23d   : > { %v10506_v16 = vld [vmem:[#allocation2 + $0x13a8] sm:$0xff]  ;;  %v5130_v5 = vmax.f32 %v5098_v60, 0.0  ;;  %v4796_v63 = vadd.f32 %v4764_v12, %v4406_v32  ;;  %v2117_v62 = vadd.f32 %v11470_v7, %v2085_v31  ;;  %v7119_v41 = vpop.f32.mrf.mxu1  ;;  %v2475_v0 = vld [vmem:[#allocation2 + $0xbd0] sm:$0xff]  ;;  %v4408_v31 = vadd.f32 %v10482_v47, %v4017_v61 }
 0x23e   : > { %v10508_v24 = vld [vmem:[#allocation2 + $0x1464] sm:$0xff]  ;;  %v5101_v21 = vadd.f32 %v10166_v19, %v4797_v30  ;;  %4738 = vst.msk [vmem:[#allocation2 + $0x13a8] sm:$0xff] %vm237_vm2, %v4675_v26  ;;  %v10517_v3 = vld [vmem:[#allocation2 + $0x14cf] sm:$0xff]  ;;  %v4065_v34 = vadd.f32 %v4033_v22, %v3673_v13  ;;  %v10525_v26 = vpop.permute.xlu0 %5941  ;;  %v7166_v29 = vpop.f32.mrf.mxu0  ;;  %v5318_v22 = vadd.f32 %v11333_v53, %v4843_v17  ;;  %v4411_v51 = vadd.f32 %v4421_v23, %v4020_v15  ;;  %v4813_v13 = vld [vmem:[#allocation2 + $0x141c] sm:$0xff] }
 0x23f   : > { %4352 = vst.msk [vmem:[#allocation2 + $0x1468] sm:$0xff] %vm237_vm2, %v4305_v1  ;;  %v4767_v40 = vld [vmem:[#allocation2 + $0x1351] sm:$0xff]  ;;  %v11471_v36 = vld [vmem:[#allocation15_spill] sm:$0xff]  ;;  %4355 = vst.msk [vmem:[#allocation2 + $0x14d0] sm:$0xff] %vm237_vm2, %v7119_v41  ;;  %5210 = vrot.lane.b32.xlu0 %v5130_v5, %s7331_s15  ;;  %v5100_v32 = vadd.f32 %v10166_v19, %v4796_v63  ;;  %v4315_v37 = vpop.f32.mrf.mxu1  ;;  %v2507_v23 = vadd.f32 %v2475_v0, %v2117_v62  ;;  %v4022_v7 = vadd.f32 %v10467_v54, %v10062_v20 }
 0x240   : > { %v4062_v2 = vadd.f32 %v4030_v42, %v11471_v36  ;;  %v4423_v8 = vld [vmem:[#allocation2 + $0x1410] sm:$0xff]  ;;  %v10522_v10 = vld [vmem:[#allocation2 + $0x14c7] sm:$0xff]  ;;  %v5133_v25 = vmax.f32 %v5101_v21, 0.0  ;;  %v4799_v58 = vadd.f32 %v4767_v40, %v4409_v6  ;;  %v3643_v5 = vld [vmem:[#allocation2 + $0xffc] sm:$0xff]  ;;  %v10542_v21 = vpop.permute.xlu1 %5939 }
 0x241   : > { %4741 = vst.msk [vmem:[#allocation2 + $0x1410] sm:$0xff] %vm237_vm2, %v7163_v48  ;;  %v4766_v60 = vld [vmem:[#allocation2 + $0x1349] sm:$0xff]  ;;  %v11472_v42 = vld [vmem:[#allocation138_spill] sm:$0xff]  ;;  %v5132_v6 = vmax.f32 %v5100_v32, 0.0  ;;  %v4455_v61 = vadd.f32 %v4423_v8, %v4065_v34  ;;  %v4769_v63 = vld [vmem:[#allocation2 + $0x13b1] sm:$0xff]  ;;  %v4413_v0 = vadd.f32 %v4423_v8, %v4022_v7  ;;  %v5350_v32 = vmax.f32 %v5318_v22, 0.0 }
 0x242   : > { %v4452_v30 = vadd.f32 %v10506_v16, %v4062_v2  ;;  %v10533_v9 = vld [vmem:[#allocation2 + $0x1408] sm:$0xff]  ;;  %v3285_v1 = vadd.f32 %v11472_v42, %v2895_v38  ;;  %5216 = vrot.lane.b32.xlu1 %v5133_v25, %s7331_s15  ;;  %v5103_v47 = vadd.f32 %v10166_v19, %v4799_v58  ;;  %v4798_v48 = vadd.f32 %v4766_v60, %v4408_v31  ;;  %v4695_v38 = vpop.f32.mrf.mxu0  ;;  %v4810_v17 = vld [vmem:[#allocation2 + $0x13b4] sm:$0xff]  ;;  %v2865_v40 = vld [vmem:[#allocation2 + $0xbdc] sm:$0xff]  ;;  %v4975_v15 = vpop.permute.xlu0 %4974 }
 0x243   : > { %v10536_v12 = vld [vmem:[#allocation2 + $0x14c4] sm:$0xff]  ;;  %4740 = vst.msk [vmem:[#allocation2 + $0x1408] sm:$0xff] %vm237_vm2, %v4685_v18  ;;  %v10546_v41 = vld [vmem:[#allocation2 + $0x1470] sm:$0xff]  ;;  %5214 = vrot.lane.b32.xlu0 %v5132_v6, %s7331_s15  ;;  %v4801_v18 = vadd.f32 %v4769_v63, %v4411_v51  ;;  %v4032_v34 = vld [vmem:[#allocation2 + $0x13fc] sm:$0xff]  ;;  %v4019_v25 = vadd.f32 %v10446_v50, %v10051_v27 }
 0x244   : > { %4354 = vst.msk [vmem:[#allocation2 + $0x14c8] sm:$0xff] %vm237_vm2, %v4315_v37  ;;  %v5135_v36 = vmax.f32 %v5103_v47, 0.0  ;;  %v4842_v2 = vadd.f32 %v4810_v17, %v4452_v30  ;;  %4743 = vst.msk [vmem:[#allocation2 + $0x1470] sm:$0xff] %vm237_vm2, %v7166_v29  ;;  %v7169_v62 = vpop.f32.mrf.mxu0  ;;  %v3675_v20 = vadd.f32 %v3643_v5, %v3285_v1  ;;  %v5102_v31 = vadd.f32 %v10166_v19, %v4798_v48  ;;  %v11473_v30 = vld [vmem:[#allocation119_spill] sm:$0xff]  ;;  %v10568_v48 = vpop.permute.xlu1 %5676  ;;  %v3645_v7 = vld [vmem:[#allocation2 + $0x105c] sm:$0xff] }
 0x245   : > { %5057 = vst.msk [vmem:[%s8433_s11 + $0x70] sm:$0xff] %vm5042_vm4, %v4975_v15  ;;  %v5105_v58 = vadd.f32 %v10166_v19, %v4801_v18  ;;  %v4845_v37 = vadd.f32 %v4813_v13, %v4455_v61  ;;  %v2897_v29 = vadd.f32 %v2865_v40, %v2507_v23  ;;  %v4768_v60 = vld [vmem:[#allocation2 + $0x13a9] sm:$0xff]  ;;  %v4064_v27 = vadd.f32 %v4032_v34, %v11473_v30  ;;  %v11474_v13 = vld [vmem:[#allocation142_spill] sm:$0xff]  ;;  %v11475_v15 = vld [vmem:[#allocation21_spill] sm:$0xff] }
 0x246   : > { %v10554_v54 = vld [vmem:[#allocation2 + $0x1468] sm:$0xff]  ;;  %5220 = vrot.lane.b32.xlu1 %v5135_v36, %s7331_s15  ;;  %v4705_v51 = vpop.f32.mrf.mxu0  ;;  %v4067_v50 = vadd.f32 %v10508_v24, %v3675_v20  ;;  %v10562_v42 = vld [vmem:[#allocation2 + $0x14d0] sm:$0xff]  ;;  %v5007_v22 = vpop.permute.xlu0 %5006  ;;  %v5317_v19 = vadd.f32 %v11333_v53, %v4842_v2  ;;  %v4410_v47 = vadd.f32 %v10506_v16, %v4019_v25  ;;  %v4815_v40 = vld [vmem:[#allocation2 + $0x147c] sm:$0xff]  ;;  %v4024_v20 = vadd.f32 %v10492_v4, %v10093_v45 }
 0x247   : > { %4742 = vst.msk [vmem:[#allocation2 + $0x1468] sm:$0xff] %vm237_vm2, %v4695_v38  ;;  %5415 = vrot.lane.b32.xlu0 %v5350_v32, %s7331_s15  ;;  %v5137_v1 = vmax.f32 %v5105_v58, 0.0  ;;  %4745 = vst.msk [vmem:[#allocation2 + $0x14d0] sm:$0xff] %vm237_vm2, %v7169_v62  ;;  %v4454_v61 = vadd.f32 %v10533_v9, %v4064_v27  ;;  %v3287_v5 = vadd.f32 %v11474_v13, %v2897_v29  ;;  %v5134_v38 = vmax.f32 %v5102_v31, 0.0  ;;  %v11476_v36 = vld [vmem:[#allocation49_spill] sm:$0xff]  ;;  %v11477_v13 = vld [vmem:[#allocation22_spill] sm:$0xff] }
 0x248   : > { %v4771_v8 = vld [vmem:[#allocation2 + $0x1411] sm:$0xff]  ;;  %5073 = vst.msk [vmem:[%s8433_s11 + $0xf0] sm:$0xff] %vm5042_vm4, %v5007_v22  ;;  %v5320_v63 = vadd.f32 %v11333_v53, %v4845_v37  ;;  %v4800_v17 = vadd.f32 %v4768_v60, %v4410_v47  ;;  %v4457_v16 = vadd.f32 %v10546_v41, %v4067_v50  ;;  %v3674_v18 = vadd.f32 %v11476_v36, %v11475_v15  ;;  %v10588_v62 = vld [vmem:[%s11091_s4] ss:$0 sm:$0xff]  ;;  %v10598_v30 = vpop.permute.xlu1 %5708 }
 0x249   : > { %v4803_v6 = vadd.f32 %v4771_v8, %v4413_v0  ;;  %v4812_v24 = vld [vmem:[#allocation2 + $0x1414] sm:$0xff]  ;;  %v5349_v34 = vmax.f32 %v5317_v19, 0.0  ;;  %v4034_v32 = vld [vmem:[#allocation2 + $0x145c] sm:$0xff]  ;;  %v4021_v31 = vadd.f32 %v10472_v35, %v10087_v57  ;;  %v3677_v37 = vadd.f32 %v3645_v7, %v3287_v5 }
 0x24a   : > { %5224 = vrot.lane.b32.xlu1 %v5137_v1, %s7331_s15  ;;  %v10583_v2 = vpop.permute.xlu0 %5678  ;;  %v4844_v25 = vadd.f32 %v4812_v24, %v4454_v61  ;;  %v5352_v29 = vmax.f32 %v5320_v63, 0.0  ;;  %v4847_v8 = vadd.f32 %v4815_v40, %v4457_v16  ;;  %v4415_v60 = vadd.f32 %v10546_v41, %v4024_v20  ;;  %v4770_v27 = vld [vmem:[#allocation2 + $0x1409] sm:$0xff]  ;;  %v4817_v24 = vld [vmem:[#allocation2 + $0x14dc] sm:$0xff] }
 0x24b   : > { %v10574_v23 = vld [vmem:[#allocation2 + $0x14c8] sm:$0xff]  ;;  %5218 = vrot.lane.b32.xlu0 %v5134_v38, %s7331_s15  ;;  %v5107_v0 = vadd.f32 %v10588_v62, %v4803_v6  ;;  %v4773_v58 = vld [vmem:[#allocation2 + $0x1471] sm:$0xff]  ;;  %v4066_v50 = vadd.f32 %v4034_v32, %v3674_v18  ;;  %v4069_v45 = vadd.f32 %v10536_v12, %v3677_v37  ;;  %v4412_v1 = vadd.f32 %v10533_v9, %v4021_v31  ;;  %v4036_v40 = vld [vmem:[#allocation2 + $0x14bc] sm:$0xff] }
 0x24c   : > { %4744 = vst.msk [vmem:[#allocation2 + $0x14c8] sm:$0xff] %vm237_vm2, %v4705_v51  ;;  %v5104_v51 = vadd.f32 %v10588_v62, %v4800_v17  ;;  %v5319_v35 = vadd.f32 %v11333_v53, %v4844_v25  ;;  %v4805_v22 = vadd.f32 %v4773_v58, %v4415_v60  ;;  %v4814_v6 = vld [vmem:[#allocation2 + $0x1474] sm:$0xff]  ;;  %v5322_v47 = vadd.f32 %v11333_v53, %v4847_v8  ;;  %v10618_v15 = vpop.permute.xlu1 %5911 }
 0x24d   : > { %v5139_v57 = vmax.f32 %v5107_v0, 0.0  ;;  %v4456_v19 = vadd.f32 %v10554_v54, %v4066_v50  ;;  %v4802_v61 = vadd.f32 %v4770_v27, %v4412_v1  ;;  %v4459_v12 = vadd.f32 %v10562_v42, %v4069_v45  ;;  %v11478_v5 = vld [vmem:[#allocation41_spill] sm:$0xff] }
 0x24e   : > { %5413 = vrot.lane.b32.xlu1 %v5349_v34, %s7331_s15  ;;  %v10602_v4 = vpop.permute.xlu0 %5710  ;;  %v5136_v41 = vmax.f32 %v5104_v51, 0.0  ;;  %v3676_v38 = vadd.f32 %v11478_v5, %v11477_v13  ;;  %v5351_v9 = vmax.f32 %v5319_v35, 0.0  ;;  %v5109_v17 = vadd.f32 %v10588_v62, %v4805_v22  ;;  %v4775_v36 = vld [vmem:[#allocation2 + $0x14d1] sm:$0xff]  ;;  %v4772_v32 = vld [vmem:[#allocation2 + $0x1469] sm:$0xff] }
 0x24f   : > { %5419 = vrot.lane.b32.xlu0 %v5352_v29, %s7331_s15  ;;  %v4846_v16 = vadd.f32 %v4814_v6, %v4456_v19  ;;  %v4026_v7 = vadd.f32 %v10517_v3, %v10122_v39  ;;  %v4023_v18 = vadd.f32 %v10496_v11, %v10114_v59  ;;  %v5354_v34 = vmax.f32 %v5322_v47, 0.0  ;;  %v4816_v29 = vld [vmem:[#allocation2 + $0x14d4] sm:$0xff] }
 0x250   : > { %v5106_v0 = vadd.f32 %v10588_v62, %v4802_v61  ;;  %v4849_v25 = vadd.f32 %v4817_v24, %v4459_v12  ;;  %v4068_v58 = vadd.f32 %v4036_v40, %v3676_v38  ;;  %v5141_v3 = vmax.f32 %v5109_v17, 0.0  ;;  %v10630_v11 = vpop.permute.xlu1 %5429  ;;  %v11479_v5 = vld [vmem:[#allocation24_spill] sm:$0xff]  ;;  %v11480_v38 = vld [vmem:[#allocation19_spill] sm:$0xff] }
 0x251   : > { %v4417_v20 = vadd.f32 %v10562_v42, %v4026_v7  ;;  %v5321_v31 = vadd.f32 %v11333_v53, %v4846_v16  ;;  %v4414_v59 = vadd.f32 %v10554_v54, %v4023_v18  ;;  %v4025_v51 = vadd.f32 %v10522_v10, %v10136_v49  ;;  %v11481_v16 = vld [vmem:[#allocation23_spill] sm:$0xff] }
 0x252   : > { %5228 = vrot.lane.b32.xlu1 %v5139_v57, %s7331_s15  ;;  %v10613_v63 = vpop.permute.xlu0 %5913  ;;  %v5138_v42 = vmax.f32 %v5106_v0, 0.0  ;;  %v5324_v8 = vadd.f32 %v11333_v53, %v4849_v25  ;;  %v4458_v27 = vadd.f32 %v10574_v23, %v4068_v58  ;;  %v5818_v7 = vadd.f32 %v11481_v16, %v11480_v38 }
 0x253   : > { %5222 = vrot.lane.b32.xlu0 %v5136_v41, %s7331_s15  ;;  %v4807_v37 = vadd.f32 %v4775_v36, %v4417_v20  ;;  %v4804_v60 = vadd.f32 %v4772_v32, %v4414_v59  ;;  %v4774_v50 = vld [vmem:[#allocation2 + $0x14c9] sm:$0xff]  ;;  %v5353_v54 = vmax.f32 %v5321_v31, 0.0  ;;  %v4416_v22 = vadd.f32 %v10574_v23, %v4025_v51 }
 0x254   : > { %v4848_v35 = vadd.f32 %v4816_v29, %v4458_v27  ;;  %v10642_v49 = vpop.permute.xlu1 %5433  ;;  %v5356_v10 = vmax.f32 %v5324_v8, 0.0  ;;  %v5850_v18 = vmax.f32 %v5818_v7, 0.0  ;;  %v11497_v7 = vld [vmem:[#allocation148_spill] sm:$0xff] }
 0x255   : > { %v5111_v57 = vadd.f32 %v10588_v62, %v4807_v37  ;;  %v5108_v1 = vadd.f32 %v10588_v62, %v4804_v60  ;;  %v4806_v19 = vadd.f32 %v4774_v50, %v4416_v22 }
 0x256   : > { %5417 = vrot.lane.b32.xlu1 %v5351_v9, %s7331_s15  ;;  %v10626_v39 = vpop.permute.xlu0 %5431  ;;  %v5323_v47 = vadd.f32 %v11333_v53, %v4848_v35  ;;  %v5817_v9 = vadd.f32 %v11480_v38, %v11479_v5  ;;  %v11487_v5 = vld [vmem:[#allocation124_spill] sm:$0xff] }
 0x257   : > { %5423 = vrot.lane.b32.xlu0 %v5354_v34, %s7331_s15  ;;  %v5143_v41 = vmax.f32 %v5111_v57, 0.0  ;;  %v5140_v23 = vmax.f32 %v5108_v1, 0.0  ;;  %v5110_v12 = vadd.f32 %v10588_v62, %v4806_v19 }
 0x258   : > { %v10650_v61 = vpop.permute.xlu1 %5437  ;;  %v5355_v13 = vmax.f32 %v5323_v47, 0.0  ;;  %v5849_v62 = vmax.f32 %v5817_v9, 0.0 }
 0x259   : > { %v5142_v53 = vmax.f32 %v5110_v12, 0.0  ;;  %v11485_v12 = vld [vmem:[#allocation120_spill] sm:$0xff] }
 0x25a   : > { %5232 = vrot.lane.b32.xlu1 %v5141_v3, %s7331_s15  ;;  %v10638_v45 = vpop.permute.xlu0 %5435 }
 0x25b   : > { %5226 = vrot.lane.b32.xlu0 %v5138_v42, %s7331_s15 }
 0x25c   : > { %v10659_v17 = vpop.permute.xlu1 %5441 }
 0x25e   : > { %5421 = vrot.lane.b32.xlu1 %v5353_v54, %s7331_s15  ;;  %v10647_v6 = vpop.permute.xlu0 %5439 }
 0x25f   : > { %5427 = vrot.lane.b32.xlu0 %v5356_v10, %s7331_s15 }
 0x260   : > { %v10667_v36 = vpop.permute.xlu1 %5445 }
 0x262   : > { %5236 = vrot.lane.b32.xlu1 %v5143_v41, %s7331_s15  ;;  %v10655_v24 = vpop.permute.xlu0 %5443  ;;  %v11482_v41 = vld [vmem:[#allocation110_spill] sm:$0xff] }
 0x263   : > { %5230 = vrot.lane.b32.xlu0 %v5140_v23, %s7331_s15  ;;  %v11483_v23 = vld [vmem:[#allocation100_spill] sm:$0xff] }
 0x264   : > { %v10673_v0 = vpop.permute.xlu1 %5449 }
 0x266   : > { %5425 = vrot.lane.b32.xlu1 %v5355_v13, %s7331_s15  ;;  %v10665_v40 = vpop.permute.xlu0 %5447 }
 0x267   : > { %5234 = vrot.lane.b32.xlu0 %v5142_v53, %s7331_s15  ;;  %v11496_v53 = vld [vmem:[#allocation29_spill] sm:$0xff] }
 0x268   : > { %v10677_v20 = vpop.permute.xlu1 %5453 }
 0x26a   : > { %5943 = vrot.lane.b32.xlu1 %v5849_v62, %s7331_s15  ;;  %v10671_v34 = vpop.permute.xlu0 %5451  ;;  %v11499_v62 = vld [vmem:[#allocation75_spill] sm:$0xff] }
 0x26b   : > { %5945 = vrot.lane.b32.xlu0 %v5850_v18, %s7331_s15  ;;  %v11500_v18 = vld [vmem:[#allocation90_spill] sm:$0xff]  ;;  %s6422_s15 = sshll.u32 %s7389_s22, 12 }
 0x26c   : > { %v10681_v58 = vpop.permute.xlu1 %5457  ;;  %s11030_s12 = scalar_lea.hbm %s11092_s5, %s6422_s15 }
 0x26e   : > { %v10675_v25 = vpop.permute.xlu0 %5455 }
 0x270   : > { %v10685_v31 = vpop.permute.xlu1 %5461 }
 0x272   : > { %v10679_v32 = vpop.permute.xlu0 %5459 }
 0x274   : > { %v10689_v59 = vpop.permute.xlu1 %5465 }
 0x276   : > { %v10683_v3 = vpop.permute.xlu0 %5463 }
 0x278   : > { %v10691_v51 = vpop.permute.xlu1 %5469 }
 0x27a   : > { %v10687_v37 = vpop.permute.xlu0 %5467 }
 0x27c   : > { %v5241_v8 = vpop.permute.xlu1 %5240 }
 0x27d   : > { %5306 = vst.msk [vmem:[%s8433_s11 + $0xf8] sm:$0xff] %vm5274_vm5, %v5241_v8  ;;  %v11503_v8 = vld [vmem:[#allocation18_spill] sm:$0xff] }
 0x27e   : > { %v5476_v29 = vpop.permute.xlu0 %5475 }
 0x27f   : > { %5541 = vst.msk [vmem:[%s8433_s11 + $0xf8] sm:$0xff] %vm5509_vm6, %v5476_v29 }
 0x280   : > { %5776 = vst.msk [vmem:[%s8433_s11 + $0xf8] sm:$0xff] %vm5744_vm7, %v10602_v4  ;;  %v5474_v27 = vpop.permute.xlu1 %5473 }
 0x282   : > { %v10693_v42 = vpop.permute.xlu0 %5471 }
 0x284   : > { %v5181_v50 = vpop.permute.xlu1 %5180 }
 0x285   : > { %5276 = vst.msk [vmem:[%s8433_s11 + $0x8] sm:$0xff] %vm5274_vm5, %v5181_v50  ;;  %v11506_v50 = vld [vmem:[#allocation98_spill] sm:$0xff] }
 0x286   : > { %v5239_v60 = vpop.permute.xlu0 %5238 }
 0x287   : > { %5305 = vst.msk [vmem:[%s8433_s11 + $0xf0] sm:$0xff] %vm5274_vm5, %v5239_v60  ;;  %v11505_v60 = vld [vmem:[#allocation102_spill] sm:$0xff] }
 0x288   : > { %5540 = vst.msk [vmem:[%s8433_s11 + $0xf0] sm:$0xff] %vm5509_vm6, %v5474_v27 }
 0x289   : > { %5775 = vst.msk [vmem:[%s8433_s11 + $0xf0] sm:$0xff] %vm5744_vm7, %v10598_v30  ;;  %v5185_v57 = vpop.permute.xlu1 %5184 }
 0x28a   : > { %v5179_v54 = vpop.permute.xlu0 %5178  ;;  %5278 = vst.msk [vmem:[%s8433_s11 + $0x18] sm:$0xff] %vm5274_vm5, %v5185_v57  ;;  %v11508_v57 = vld [vmem:[#allocation122_spill] sm:$0xff] }
 0x28b   : > { %5275 = vst.msk [vmem:[%s8433_s11] sm:$0xff] %vm5274_vm5, %v5179_v54 }
 0x28e   : > { %v5183_v4 = vpop.permute.xlu0 %5182  ;;  %v5189_v35 = vpop.permute.xlu1 %5188 }
 0x28f   : > { %5277 = vst.msk [vmem:[%s8433_s11 + $0x10] sm:$0xff] %vm5274_vm5, %v5183_v4  ;;  %5280 = vst.msk [vmem:[%s8433_s11 + $0x28] sm:$0xff] %vm5274_vm5, %v5189_v35  ;;  %v11509_v35 = vld [vmem:[#allocation106_spill] sm:$0xff] }
 0x293   : > { %v5187_v30 = vpop.permute.xlu0 %5186 }
 0x294   : > { %5279 = vst.msk [vmem:[%s8433_s11 + $0x20] sm:$0xff] %vm5274_vm5, %v5187_v30  ;;  %v11510_v30 = vld [vmem:[#allocation115_spill] sm:$0xff] }
 0x295   : > { %v5193_v22 = vpop.permute.xlu1 %5192 }
 0x296   : > { %5282 = vst.msk [vmem:[%s8433_s11 + $0x38] sm:$0xff] %vm5274_vm5, %v5193_v22 }
 0x298   : > { %v5191_v10 = vpop.permute.xlu0 %5190 }
 0x299   : > { %5281 = vst.msk [vmem:[%s8433_s11 + $0x30] sm:$0xff] %vm5274_vm5, %v5191_v10  ;;  %v11511_v10 = vld [vmem:[#allocation68_spill] sm:$0xff] }
 0x29a   : > { %v5197_v1 = vpop.permute.xlu1 %5196 }
 0x29b   : > { %5284 = vst.msk [vmem:[%s8433_s11 + $0x48] sm:$0xff] %vm5274_vm5, %v5197_v1  ;;  %v11513_v1 = vld [vmem:[#allocation131_spill] sm:$0xff] }
 0x29c   : > { %5519 = vst.msk [vmem:[%s8433_s11 + $0x48] sm:$0xff] %vm5509_vm6, %v10626_v39 }
 0x29d   : > { %5754 = vst.msk [vmem:[%s8433_s11 + $0x48] sm:$0xff] %vm5744_vm7, %v10116_v28  ;;  %v11484_v28 = vld [vmem:[#allocation107_spill] sm:$0xff] }
 0x29e   : > { %v5195_v19 = vpop.permute.xlu0 %5194  ;;  %5989 = vst.msk [vmem:[%s8433_s11 + $0x48] sm:$0xff] %vm5979_vm8, %v11482_v41  ;;  %v5201_v47 = vpop.permute.xlu1 %5200  ;;  %v11514_v41 = vld [vmem:[#allocation136_spill] sm:$0xff] }
 0x29f   : > { %5283 = vst.msk [vmem:[%s8433_s11 + $0x40] sm:$0xff] %vm5274_vm5, %v5195_v19  ;;  %5286 = vst.msk [vmem:[%s8433_s11 + $0x58] sm:$0xff] %vm5274_vm5, %v5201_v47 }
 0x2a0   : > { %5518 = vst.msk [vmem:[%s8433_s11 + $0x40] sm:$0xff] %vm5509_vm6, %v10630_v11  ;;  %5521 = vst.msk [vmem:[%s8433_s11 + $0x58] sm:$0xff] %vm5509_vm6, %v10638_v45  ;;  %v11486_v11 = vld [vmem:[#allocation93_spill] sm:$0xff]  ;;  %v11488_v45 = vld [vmem:[#allocation126_spill] sm:$0xff] }
 0x2a1   : > { %5753 = vst.msk [vmem:[%s8433_s11 + $0x40] sm:$0xff] %vm5744_vm7, %v11483_v23  ;;  %5756 = vst.msk [vmem:[%s8433_s11 + $0x58] sm:$0xff] %vm5744_vm7, %v11485_v12  ;;  %v11516_v23 = vld [vmem:[#allocation51_spill] sm:$0xff] }
 0x2a2   : > { %5988 = vst.msk [vmem:[%s8433_s11 + $0x40] sm:$0xff] %vm5979_vm8, %v11484_v28  ;;  %5991 = vst.msk [vmem:[%s8433_s11 + $0x58] sm:$0xff] %vm5979_vm8, %v11486_v11  ;;  %v11518_v11 = vld [vmem:[#allocation101_spill] sm:$0xff] }
 0x2a3   : > { %v5199_v39 = vpop.permute.xlu0 %5198  ;;  %v5205_v13 = vpop.permute.xlu1 %5204 }
 0x2a4   : > { %5285 = vst.msk [vmem:[%s8433_s11 + $0x50] sm:$0xff] %vm5274_vm5, %v5199_v39  ;;  %5288 = vst.msk [vmem:[%s8433_s11 + $0x68] sm:$0xff] %vm5274_vm5, %v5205_v13  ;;  %v11517_v39 = vld [vmem:[#allocation121_spill] sm:$0xff] }
 0x2a5   : > { %5520 = vst.msk [vmem:[%s8433_s11 + $0x50] sm:$0xff] %vm5509_vm6, %v10642_v49  ;;  %5523 = vst.msk [vmem:[%s8433_s11 + $0x68] sm:$0xff] %vm5509_vm6, %v10647_v6  ;;  %v11520_v13 = vld [vmem:[#allocation105_spill] sm:$0xff] }
 0x2a6   : > { %5755 = vst.msk [vmem:[%s8433_s11 + $0x50] sm:$0xff] %vm5744_vm7, %v11487_v5  ;;  %5758 = vst.msk [vmem:[%s8433_s11 + $0x68] sm:$0xff] %vm5744_vm7, %v10449_v33  ;;  %v11521_v5 = vld [vmem:[#allocation97_spill] sm:$0xff] }
 0x2a7   : > { %5990 = vst.msk [vmem:[%s8433_s11 + $0x50] sm:$0xff] %vm5979_vm8, %v11488_v45  ;;  %v5203_v38 = vpop.permute.xlu0 %5202  ;;  %5993 = vst.msk [vmem:[%s8433_s11 + $0x68] sm:$0xff] %vm5979_vm8, %v10499_v46 }
 0x2a8   : > { %5287 = vst.msk [vmem:[%s8433_s11 + $0x60] sm:$0xff] %vm5274_vm5, %v5203_v38  ;;  %v11523_v38 = vld [vmem:[#allocation71_spill] sm:$0xff] }
 0x2a9   : > { %5522 = vst.msk [vmem:[%s8433_s11 + $0x60] sm:$0xff] %vm5509_vm6, %v10650_v61  ;;  %v11493_v61 = vld [vmem:[#allocation112_spill] sm:$0xff] }
 0x2aa   : > { %v5209_v49 = vpop.permute.xlu1 %5208  ;;  %5757 = vst.msk [vmem:[%s8433_s11 + $0x60] sm:$0xff] %vm5744_vm7, %v10459_v44 }
 0x2ab   : > { %5290 = vst.msk [vmem:[%s8433_s11 + $0x78] sm:$0xff] %vm5274_vm5, %v5209_v49 }
 0x2ac   : > { %5992 = vst.msk [vmem:[%s8433_s11 + $0x60] sm:$0xff] %vm5979_vm8, %v10510_v43  ;;  %v11489_v43 = vld [vmem:[#allocation85_spill] sm:$0xff] }
 0x2ad   : > { %5525 = vst.msk [vmem:[%s8433_s11 + $0x78] sm:$0xff] %vm5509_vm6, %v10655_v24  ;;  %v5207_v33 = vpop.permute.xlu0 %5206  ;;  %v11494_v24 = vld [vmem:[#allocation127_spill] sm:$0xff] }
 0x2ae   : > { %5760 = vst.msk [vmem:[%s8433_s11 + $0x78] sm:$0xff] %vm5744_vm7, %v10583_v2  ;;  %v5213_v44 = vpop.permute.xlu1 %5212 }
 0x2af   : > { %5289 = vst.msk [vmem:[%s8433_s11 + $0x70] sm:$0xff] %vm5274_vm5, %v5207_v33  ;;  %5292 = vst.msk [vmem:[%s8433_s11 + $0x88] sm:$0xff] %vm5274_vm5, %v5213_v44  ;;  %v11524_v44 = vld [vmem:[#allocation125_spill] sm:$0xff] }
 0x2b0   : > { %5995 = vst.msk [vmem:[%s8433_s11 + $0x78] sm:$0xff] %vm5979_vm8, %v10613_v63  ;;  %v11491_v63 = vld [vmem:[#allocation92_spill] sm:$0xff] }
 0x2b1   : > { %5524 = vst.msk [vmem:[%s8433_s11 + $0x70] sm:$0xff] %vm5509_vm6, %v10659_v17  ;;  %5527 = vst.msk [vmem:[%s8433_s11 + $0x88] sm:$0xff] %vm5509_vm6, %v10665_v40  ;;  %v5211_v46 = vpop.permute.xlu0 %5210  ;;  %v11495_v17 = vld [vmem:[#allocation132_spill] sm:$0xff]  ;;  %v11498_v40 = vld [vmem:[#allocation53_spill] sm:$0xff] }
 0x2b2   : > { %5759 = vst.msk [vmem:[%s8433_s11 + $0x70] sm:$0xff] %vm5744_vm7, %v10568_v48  ;;  %5762 = vst.msk [vmem:[%s8433_s11 + $0x88] sm:$0xff] %vm5744_vm7, %v11489_v43  ;;  %v11490_v48 = vld [vmem:[#allocation96_spill] sm:$0xff] }
 0x2b3   : > { %5994 = vst.msk [vmem:[%s8433_s11 + $0x70] sm:$0xff] %vm5979_vm8, %v10618_v15  ;;  %5997 = vst.msk [vmem:[%s8433_s11 + $0x88] sm:$0xff] %vm5979_vm8, %v11490_v48  ;;  %v11492_v15 = vld [vmem:[#allocation104_spill] sm:$0xff] }
 0x2b4   : > { %5291 = vst.msk [vmem:[%s8433_s11 + $0x80] sm:$0xff] %vm5274_vm5, %v5211_v46  ;;  %v5217_v2 = vpop.permute.xlu1 %5216 }
 0x2b5   : > { %5526 = vst.msk [vmem:[%s8433_s11 + $0x80] sm:$0xff] %vm5509_vm6, %v10667_v36  ;;  %v5215_v6 = vpop.permute.xlu0 %5214 }
 0x2b6   : > { %5761 = vst.msk [vmem:[%s8433_s11 + $0x80] sm:$0xff] %vm5744_vm7, %v11491_v63 }
 0x2b7   : > { %5294 = vst.msk [vmem:[%s8433_s11 + $0x98] sm:$0xff] %vm5274_vm5, %v5217_v2  ;;  %5293 = vst.msk [vmem:[%s8433_s11 + $0x90] sm:$0xff] %vm5274_vm5, %v5215_v6 }
 0x2b8   : > { %5996 = vst.msk [vmem:[%s8433_s11 + $0x80] sm:$0xff] %vm5979_vm8, %v11492_v15  ;;  %v5221_v9 = vpop.permute.xlu1 %5220 }
 0x2b9   : > { %5529 = vst.msk [vmem:[%s8433_s11 + $0x98] sm:$0xff] %vm5509_vm6, %v10671_v34  ;;  %5528 = vst.msk [vmem:[%s8433_s11 + $0x90] sm:$0xff] %vm5509_vm6, %v10673_v0  ;;  %v5416_v16 = vpop.permute.xlu0 %5415  ;;  %v11501_v0 = vld [vmem:[#allocation117_spill] sm:$0xff] }
 0x2ba   : > { %5764 = vst.msk [vmem:[%s8433_s11 + $0x98] sm:$0xff] %vm5744_vm7, %v11493_v61  ;;  %5763 = vst.msk [vmem:[%s8433_s11 + $0x90] sm:$0xff] %vm5744_vm7, %v11495_v17 }
 0x2bb   : > { %5999 = vst.msk [vmem:[%s8433_s11 + $0x98] sm:$0xff] %vm5979_vm8, %v11494_v24  ;;  %5998 = vst.msk [vmem:[%s8433_s11 + $0x90] sm:$0xff] %vm5979_vm8, %v11496_v53 }
 0x2bc   : > { %5296 = vst.msk [vmem:[%s8433_s11 + $0xa8] sm:$0xff] %vm5274_vm5, %v5221_v9  ;;  %v5225_v36 = vpop.permute.xlu1 %5224 }
 0x2bd   : > { %5531 = vst.msk [vmem:[%s8433_s11 + $0xa8] sm:$0xff] %vm5509_vm6, %v10675_v25  ;;  %5511 = vst.msk [vmem:[%s8433_s11 + $0x8] sm:$0xff] %vm5509_vm6, %v5416_v16  ;;  %v5219_v34 = vpop.permute.xlu0 %5218  ;;  %v11502_v25 = vld [vmem:[#allocation118_spill] sm:$0xff] }
 0x2be   : > { %5766 = vst.msk [vmem:[%s8433_s11 + $0xa8] sm:$0xff] %vm5744_vm7, %v11497_v7  ;;  %5746 = vst.msk [vmem:[%s8433_s11 + $0x8] sm:$0xff] %vm5744_vm7, %v11499_v62 }
 0x2bf   : > { %6001 = vst.msk [vmem:[%s8433_s11 + $0xa8] sm:$0xff] %vm5979_vm8, %v11498_v40  ;;  %5981 = vst.msk [vmem:[%s8433_s11 + $0x8] sm:$0xff] %vm5979_vm8, %v11500_v18 }
 0x2c0   : > { %5298 = vst.msk [vmem:[%s8433_s11 + $0xb8] sm:$0xff] %vm5274_vm5, %v5225_v36  ;;  %5295 = vst.msk [vmem:[%s8433_s11 + $0xa0] sm:$0xff] %vm5274_vm5, %v5219_v34  ;;  %v5414_v29 = vpop.permute.xlu1 %5413 }
 0x2c1   : > { %5533 = vst.msk [vmem:[%s8433_s11 + $0xb8] sm:$0xff] %vm5509_vm6, %v10679_v32  ;;  %5530 = vst.msk [vmem:[%s8433_s11 + $0xa0] sm:$0xff] %vm5509_vm6, %v10677_v20  ;;  %v11504_v32 = vld [vmem:[#allocation59_spill] sm:$0xff]  ;;  %v5420_v27 = vpop.permute.xlu0 %5419  ;;  %v11507_v20 = vld [vmem:[#allocation116_spill] sm:$0xff] }
 0x2c2   : > { %5768 = vst.msk [vmem:[%s8433_s11 + $0xb8] sm:$0xff] %vm5744_vm7, %v11501_v0  ;;  %5765 = vst.msk [vmem:[%s8433_s11 + $0xa0] sm:$0xff] %vm5744_vm7, %v11503_v8 }
 0x2c3   : > { %6003 = vst.msk [vmem:[%s8433_s11 + $0xb8] sm:$0xff] %vm5979_vm8, %v11502_v25  ;;  %6000 = vst.msk [vmem:[%s8433_s11 + $0xa0] sm:$0xff] %vm5979_vm8, %v11504_v32 }
 0x2c4   : > { %5510 = vst.msk [vmem:[%s8433_s11] sm:$0xff] %vm5509_vm6, %v5414_v29  ;;  %5513 = vst.msk [vmem:[%s8433_s11 + $0x18] sm:$0xff] %vm5509_vm6, %v5420_v27  ;;  %v5229_v54 = vpop.permute.xlu1 %5228 }
 0x2c5   : > { %5745 = vst.msk [vmem:[%s8433_s11] sm:$0xff] %vm5744_vm7, %v11505_v60  ;;  %5748 = vst.msk [vmem:[%s8433_s11 + $0x18] sm:$0xff] %vm5744_vm7, %v11507_v20  ;;  %v5223_v4 = vpop.permute.xlu0 %5222 }
 0x2c6   : > { %5980 = vst.msk [vmem:[%s8433_s11] sm:$0xff] %vm5979_vm8, %v11506_v50  ;;  %5983 = vst.msk [vmem:[%s8433_s11 + $0x18] sm:$0xff] %vm5979_vm8, %v11508_v57 }
 0x2c7   : > { %5300 = vst.msk [vmem:[%s8433_s11 + $0xc8] sm:$0xff] %vm5274_vm5, %v5229_v54  ;;  %5297 = vst.msk [vmem:[%s8433_s11 + $0xb0] sm:$0xff] %vm5274_vm5, %v5223_v4 }
 0x2c8   : > { %5535 = vst.msk [vmem:[%s8433_s11 + $0xc8] sm:$0xff] %vm5509_vm6, %v10683_v3  ;;  %5532 = vst.msk [vmem:[%s8433_s11 + $0xb0] sm:$0xff] %vm5509_vm6, %v10681_v58  ;;  %v5418_v22 = vpop.permute.xlu1 %5417  ;;  %v11512_v3 = vld [vmem:[#allocation74_spill] sm:$0xff]  ;;  %v11515_v58 = vld [vmem:[#allocation145_spill] sm:$0xff] }
 0x2c9   : > { %5770 = vst.msk [vmem:[%s8433_s11 + $0xc8] sm:$0xff] %vm5744_vm7, %v11509_v35  ;;  %5767 = vst.msk [vmem:[%s8433_s11 + $0xb0] sm:$0xff] %vm5744_vm7, %v11511_v10  ;;  %v5424_v19 = vpop.permute.xlu0 %5423 }
 0x2ca   : > { %6005 = vst.msk [vmem:[%s8433_s11 + $0xc8] sm:$0xff] %vm5979_vm8, %v11510_v30  ;;  %6002 = vst.msk [vmem:[%s8433_s11 + $0xb0] sm:$0xff] %vm5979_vm8, %v11512_v3 }
 0x2cb   : > { %5512 = vst.msk [vmem:[%s8433_s11 + $0x10] sm:$0xff] %vm5509_vm6, %v5418_v22  ;;  %5515 = vst.msk [vmem:[%s8433_s11 + $0x28] sm:$0xff] %vm5509_vm6, %v5424_v19 }
 0x2cc   : > { %5747 = vst.msk [vmem:[%s8433_s11 + $0x10] sm:$0xff] %vm5744_vm7, %v11513_v1  ;;  %5750 = vst.msk [vmem:[%s8433_s11 + $0x28] sm:$0xff] %vm5744_vm7, %v11515_v58  ;;  %v5233_v47 = vpop.permute.xlu1 %5232 }
 0x2cd   : > { %5982 = vst.msk [vmem:[%s8433_s11 + $0x10] sm:$0xff] %vm5979_vm8, %v11514_v41  ;;  %5985 = vst.msk [vmem:[%s8433_s11 + $0x28] sm:$0xff] %vm5979_vm8, %v11516_v23  ;;  %v5227_v28 = vpop.permute.xlu0 %5226 }
 0x2ce   : > { %5302 = vst.msk [vmem:[%s8433_s11 + $0xd8] sm:$0xff] %vm5274_vm5, %v5233_v47  ;;  %5299 = vst.msk [vmem:[%s8433_s11 + $0xc0] sm:$0xff] %vm5274_vm5, %v5227_v28 }
 0x2cf   : > { %5537 = vst.msk [vmem:[%s8433_s11 + $0xd8] sm:$0xff] %vm5509_vm6, %v10687_v37  ;;  %5534 = vst.msk [vmem:[%s8433_s11 + $0xc0] sm:$0xff] %vm5509_vm6, %v10685_v31  ;;  %v11519_v37 = vld [vmem:[#allocation111_spill] sm:$0xff] }
 0x2d0   : > { %5772 = vst.msk [vmem:[%s8433_s11 + $0xd8] sm:$0xff] %vm5744_vm7, %v11517_v39  ;;  %v5422_v12 = vpop.permute.xlu1 %5421  ;;  %5769 = vst.msk [vmem:[%s8433_s11 + $0xc0] sm:$0xff] %vm5744_vm7, %v11518_v11  ;;  %v11522_v31 = vld [vmem:[#allocation67_spill] sm:$0xff] }
 0x2d1   : > { %6007 = vst.msk [vmem:[%s8433_s11 + $0xd8] sm:$0xff] %vm5979_vm8, %v10357_v55  ;;  %6004 = vst.msk [vmem:[%s8433_s11 + $0xc0] sm:$0xff] %vm5979_vm8, %v11519_v37  ;;  %v5428_v55 = vpop.permute.xlu0 %5427 }
 0x2d2   : > { %5514 = vst.msk [vmem:[%s8433_s11 + $0x20] sm:$0xff] %vm5509_vm6, %v5422_v12  ;;  %5517 = vst.msk [vmem:[%s8433_s11 + $0x38] sm:$0xff] %vm5509_vm6, %v5428_v55 }
 0x2d3   : > { %5749 = vst.msk [vmem:[%s8433_s11 + $0x20] sm:$0xff] %vm5744_vm7, %v11520_v13  ;;  %5752 = vst.msk [vmem:[%s8433_s11 + $0x38] sm:$0xff] %vm5744_vm7, %v11522_v31 }
 0x2d4   : > { %5984 = vst.msk [vmem:[%s8433_s11 + $0x20] sm:$0xff] %vm5979_vm8, %v11521_v5  ;;  %v5237_v45 = vpop.permute.xlu1 %5236  ;;  %5987 = vst.msk [vmem:[%s8433_s11 + $0x38] sm:$0xff] %vm5979_vm8, %v11523_v38 }
 0x2d5   : > { %5304 = vst.msk [vmem:[%s8433_s11 + $0xe8] sm:$0xff] %vm5274_vm5, %v5237_v45  ;;  %v5231_v49 = vpop.permute.xlu0 %5230 }
 0x2d6   : > { %5539 = vst.msk [vmem:[%s8433_s11 + $0xe8] sm:$0xff] %vm5509_vm6, %v10693_v42 }
 0x2d7   : > { %5774 = vst.msk [vmem:[%s8433_s11 + $0xe8] sm:$0xff] %vm5744_vm7, %v10475_v56  ;;  %v11525_v56 = vld [vmem:[#allocation113_spill] sm:$0xff] }
 0x2d8   : > { %5301 = vst.msk [vmem:[%s8433_s11 + $0xd0] sm:$0xff] %vm5274_vm5, %v5231_v49  ;;  %v5426_v33 = vpop.permute.xlu1 %5425 }
 0x2d9   : > { %6009 = vst.msk [vmem:[%s8433_s11 + $0xe8] sm:$0xff] %vm5979_vm8, %v10525_v26  ;;  %v5235_v26 = vpop.permute.xlu0 %5234 }
 0x2da   : > { %5536 = vst.msk [vmem:[%s8433_s11 + $0xd0] sm:$0xff] %vm5509_vm6, %v10689_v59  ;;  %5516 = vst.msk [vmem:[%s8433_s11 + $0x30] sm:$0xff] %vm5509_vm6, %v5426_v33  ;;  %v11526_v59 = vld [vmem:[#allocation123_spill] sm:$0xff] }
 0x2db   : > { %5771 = vst.msk [vmem:[%s8433_s11 + $0xd0] sm:$0xff] %vm5744_vm7, %v11524_v44  ;;  %5751 = vst.msk [vmem:[%s8433_s11 + $0x30] sm:$0xff] %vm5744_vm7, %v11525_v56 }
 0x2dc   : > { %6006 = vst.msk [vmem:[%s8433_s11 + $0xd0] sm:$0xff] %vm5979_vm8, %v10370_v52  ;;  %5986 = vst.msk [vmem:[%s8433_s11 + $0x30] sm:$0xff] %vm5979_vm8, %v11526_v59  ;;  %v5944_v42 = vpop.permute.xlu1 %5943 }
 0x2dd   : > { %5303 = vst.msk [vmem:[%s8433_s11 + $0xe0] sm:$0xff] %vm5274_vm5, %v5235_v26  ;;  %v5946_v52 = vpop.permute.xlu0 %5945 }
 0x2de   : > { %5538 = vst.msk [vmem:[%s8433_s11 + $0xe0] sm:$0xff] %vm5509_vm6, %v10691_v51 }
 0x2df   : > { %5773 = vst.msk [vmem:[%s8433_s11 + $0xe0] sm:$0xff] %vm5744_vm7, %v10485_v14 }
 0x2e0   : > { %6010 = vst.msk [vmem:[%s8433_s11 + $0xf0] sm:$0xff] %vm5979_vm8, %v5944_v42  ;;  %6008 = vst.msk [vmem:[%s8433_s11 + $0xe0] sm:$0xff] %vm5979_vm8, %v10542_v21 }
 0x2e1   : > { %6011 = vst.msk [vmem:[%s8433_s11 + $0xf8] sm:$0xff] %vm5979_vm8, %v5946_v52 }
 0x2e2   : > { %7282 = shalt.err (!%p7279_p3)
}
 0x2e3   : > { %s7283_s17 = scalar_lea.hbm %s11030_s12, 4096  ;;  %s7287_s6 = scalar_lea.hbm %s11092_s5, 8192 }
 0x2e4   : > { %p7284_p4 = scmp.ne.s32.totalorder %s11030_s12, %s7283_s17  ;;  %p7288_p9 = scmp.lt.s32.totalorder %s11030_s12, %s11092_s5 }
 0x2e5   : > { %p7289_p10 = scmp.lt.s32.totalorder %s7287_s6, %s7283_s17 }
 0x2e6   : > { %p7285_p7 = pnand %p7284_p4, %p7406_p5 }
 0x2e7   : > { %p7290_p11 = por %p7289_p10, %p7288_p9 }
 0x2e8   : > { %p7286_p8 = pneg %p7285_p7 }
 0x2ea   : > { %p7291_p12 = pnand %p7290_p11, %p7286_p8 }
 0x2ec   : > { %7294 = shalt.err (!%p7291_p12)
}
 0x2ed   : > { %s7337_s15 = smov 128  }
 0x2ee   : > { %7172 = dma.vmem_to_hbm [thread:$0]  (%p7406_p5), %s11037_s9, 4096, %s11030_s12, %s11046_s13, %s7337_s15, %s7337_s15, %s7334_s25  }
 0x2ef PF: > { %p7178_p13 = scmp.ge.s32.totalorder %s7329_s21, 2  ;;  %s6041_s22 = sand.u32 1, %s7317_s18  }
 0x2f0   : > { %s6042_s10 = scalar_lea.sflag [#allocation4], %s6041_s22 }
 0x2f1   : > { %p7175_p0 = pnand %p7178_p13, %p7410_p6 }
 0x2f3   : > { %p7176_p1 = pneg %p7175_p0 }
 0x2f5   : > { %7312 = dma.done.wait (%p7176_p1), %s6042_s10, 4096  }
 0x2f6   : > { %7314 = vsyncadd (%p7176_p1), %s6042_s10, 4294963200  ;;  %p15_p2 = scmp.ge.s32.totalorder %s7393_s24, 4   ;;  %s11527_s18 = smov %s7321_s19 }
 0x2f7   : > { %s11528_s19 = smov %s7325_s20  ;;  %s11529_s20 = smov %s7404_s27 }
 0x2f8   : > { %s11530_s21 = smov %s7393_s24  ;;  %17 = sbr.rel (!%p15_p2) target bundleno = 3 (0x3), region = 94 }
 0x2fd   :  { %6047 = vsyncpa [#allocation4], 1 }
 0x2fe   :  { %6049 = vsyncpa [#allocation4 + $0x1], 1 }

</bundles_post_ra>
